<compile_context>
chip_gen: v5e
topology: v5e:2x2
jax: 0.10.0
libtpu: 0.0.40
codegen_flags: <defaults>
</compile_context>

<pallas_src>
import functools

import jax
import jax.numpy as jnp
import numpy as np
from jax.experimental import pallas as pl
from jax.experimental.pallas import tpu as pltpu


# --------------------------------------------------------------------------- #
# Kernel
# --------------------------------------------------------------------------- #
def _power_iteration_kernel(x_ref, u_ref, o_ref, *, n_iters, eps):
    # x_ref: (TB, M, N)   u_ref: (TB, M, 1)   o_ref: (TB, M, N)
    x = x_ref[...].astype(jnp.float32)
    u = u_ref[...].astype(jnp.float32)                 # initial u (column form)

    def l2n(t, axis):
        # x / (||x|| + 1e-8) up to ~1e-8; rsqrt runs on the EUP slot and the
        # tiny additive guard keeps zero-padded batch rows exactly zero.
        ssq = jnp.sum(t * t, axis=axis, keepdims=True)
        return t * jax.lax.rsqrt(ssq + 1e-16)

    u = l2n(u, 1)                                       # read of self.u
    xv = None
    for _ in range(n_iters):
        # self.v = X^T @ u  -> row form (TB, 1, N); assignment normalizes.
        v = l2n(jnp.sum(x * u, axis=1, keepdims=True), 2)
        # self.u = X @ v    -> column form (TB, M, 1); assignment normalizes.
        xv = jnp.sum(x * v, axis=2, keepdims=True)
        u = l2n(xv, 1)

    # s = u^T @ X @ v; reuse xv = X @ v from the last iteration.
    s = jnp.sum(u * xv, axis=1, keepdims=True)          # (TB, 1, 1)
    o_ref[...] = (x * (1.0 / (s + eps))).astype(o_ref.dtype)


# --------------------------------------------------------------------------- #
# Hardware-aware sizing helpers
# --------------------------------------------------------------------------- #
def _round_up(a, k):
    return ((a + k - 1) // k) * k


def _vmem_budget_and_limit():
    """(block budget bytes, vmem_limit_bytes) derived from physical VMEM."""
    cap = None
    try:
        info = pltpu.get_tpu_info()
        for name in ("vmem_capacity_bytes", "vmem_bytes", "vmem_size_bytes"):
            val = getattr(info, name, None)
            if val:
                cap = int(val)
                break
    except Exception:
        cap = None
    if cap is None:
        # Conservative fallback that still fits v7x's 64 MiB physical VMEM.
        return 28 * 1024 * 1024, 44 * 1024 * 1024
    # ~half of physical for the pipelined blocks + temporaries
    # (v5e/v6e: ~64 MiB, v7x: ~32 MiB), scoped limit with extra headroom.
    return cap // 2, int(cap * 0.70)


def _num_tensorcores():
    try:
        info = pltpu.get_tpu_info()
        for name in ("num_cores", "core_count", "num_tensorcores",
                     "tensorcore_count"):
            val = getattr(info, name, None)
            if val:
                return int(val)
    except Exception:
        pass
    try:
        return int(getattr(jax.devices()[0], "num_cores", 1) or 1)
    except Exception:
        return 1


def _per_matrix_vmem_bytes(m, n, x_itemsize, u_itemsize):
    """Estimated VMEM bytes per matrix in a block (pipeline buffers + temps)."""
    n_pad = _round_up(n, 128)
    sub_nat = max(8, 32 // x_itemsize)                  # sublane multiple, native dtype
    slab_nat = _round_up(m, sub_nat) * n_pad * x_itemsize
    slab_f32 = _round_up(m, 8) * n_pad * 4
    sub_u = max(8, 32 // u_itemsize)
    u_tile = _round_up(m, sub_u) * 128 * u_itemsize
    # 2x double-buffered native input + 2x double-buffered native output
    # + 1 f32 cast copy + ~2 f32 slab temporaries (x*u / x*v products)
    # + 2x double-buffered u block + small per-matrix vector temporaries.
    return (4 * slab_nat + 3 * slab_f32 + 2 * u_tile
            + _round_up(m, 8) * 128 * 4 + 8 * n_pad * 4)


# --------------------------------------------------------------------------- #
# Wrapper
# --------------------------------------------------------------------------- #
def batched_power_iteration(x, u, v=None, n_iters=3, eps=1e-12,
                            max_block_batch=512):
    """Forward pass equivalent to BatchedPowerIteration.forward(X).

    `v` is accepted for API parity with the module but is unused: the module
    assigns self.v before reading it, so the initial v never affects the output
    (requires n_iters >= 1).
    """
    assert n_iters >= 1, "n_iters must be >= 1 (module default is 3)"
    *batch_dims, m, n = x.shape
    assert tuple(u.shape) == (*batch_dims, m, 1)
    if v is not None:
        assert tuple(v.shape) == (*batch_dims, n, 1)
    b = int(np.prod(batch_dims)) if batch_dims else 1

    xb = x.reshape(b, m, n)          # native dtype; no wrapper-side upcast
    ub = u.reshape(b, m, 1)

    # ---- choose how many matrices to process per grid step ------------------
    budget, vmem_limit = _vmem_budget_and_limit()
    per_mat = _per_matrix_vmem_bytes(m, n, jnp.dtype(x.dtype).itemsize,
                                     jnp.dtype(u.dtype).itemsize)
    tb = max(1, budget // per_mat)
    tb = min(tb, max_block_batch, b)
    cores = _num_tensorcores()
    if cores > 1 and b >= cores:
        # Only multi-TensorCore chips (v7x) benefit from forcing grid >= cores.
        tb = min(tb, pl.cdiv(b, cores))

    grid_len = pl.cdiv(b, tb)
    tb = pl.cdiv(b, grid_len)        # rebalance to minimize batch padding
    b_pad = grid_len * tb
    if b_pad != b:                   # pad batch only (cheap, zero-safe)
        xb = jnp.pad(xb, ((0, b_pad - b), (0, 0), (0, 0)))
        ub = jnp.pad(ub, ((0, b_pad - b), (0, 0), (0, 0)))

    out = pl.pallas_call(
        functools.partial(_power_iteration_kernel, n_iters=n_iters, eps=eps),
        out_shape=jax.ShapeDtypeStruct((b_pad, m, n), x.dtype),
        grid=(grid_len,),
        in_specs=[
            pl.BlockSpec((tb, m, n), lambda i: (i, 0, 0)),
            pl.BlockSpec((tb, m, 1), lambda i: (i, 0, 0)),
        ],
        out_specs=pl.BlockSpec((tb, m, n), lambda i: (i, 0, 0)),
        compiler_params=pltpu.CompilerParams(
            dimension_semantics=("parallel",),
            vmem_limit_bytes=int(vmem_limit)),
    )(xb, ub)

    return out[:b].reshape(*batch_dims, m, n)


# --------------------------------------------------------------------------- #
# Pure-JAX reference (faithful to the PyTorch parametrized read/assign path)
# --------------------------------------------------------------------------- #
def _reference(x, u0, v0, n_iters=3, eps=1e-12):
    hi = jax.lax.Precision.HIGHEST
    xf = x.astype(jnp.float32)                      # (*batch, M, N)
    xt = jnp.swapaxes(xf, -1, -2)                   # (*batch, N, M)
    u_s = u0.astype(jnp.float32)                    # (*batch, M, 1)
    v_s = v0.astype(jnp.float32)                    # (*batch, N, 1)

    def l2n(t):
        return t / (jnp.sqrt(jnp.sum(t * t, axis=-2, keepdims=True)) + 1e-8)

    for _ in range(n_iters):
        u_r = l2n(u_s)
        v_s = l2n(jnp.einsum('...nm,...mk->...nk', xt, u_r, precision=hi))
        v_r = l2n(v_s)
        u_s = l2n(jnp.einsum('...mn,...nk->...mk', xf, v_r, precision=hi))
    u = l2n(u_s)
    v = l2n(v_s)
    s = jnp.einsum('...mo,...mn,...np->...op', u, xf, v, precision=hi)
    return (xf / (s + eps)).astype(x.dtype)


if __name__ == "__main__":
    key = jax.random.PRNGKey(0)
    test_shapes = [
        (2, 8, 32, 24),   # batch dims (2, 8), M=32, N=24
        (5, 20, 36),      # B=5 (exercises batch padding when cores > 1)
        (48, 32),         # no batch dims, single matrix
    ]
    for weight_shape in test_shapes:
        *batch_dims, m, n = weight_shape
        key, kx, ku, kv = jax.random.split(key, 4)
        x = jax.random.normal(kx, weight_shape, dtype=jnp.float32)
        u = jax.random.normal(ku, (*batch_dims, m, 1), dtype=jnp.float32)
        v = jax.random.normal(kv, (*batch_dims, n, 1), dtype=jnp.float32)

        out = jax.block_until_ready(
            batched_power_iteration(x, u, v, n_iters=3, eps=1e-12))
        ref = jax.block_until_ready(
            _reference(x, u, v, n_iters=3, eps=1e-12))

        np.testing.assert_allclose(np.asarray(out), np.asarray(ref),
                                   rtol=1e-5, atol=1e-5)
        assert out.shape == tuple(weight_shape)

    print("KERNEL_OK")
</pallas_src>

<mosaic_0001>
module attributes {stable_mosaic.version = 11 : i64} {
  func.func @_power_iteration_kernel(%arg0: i32, %arg1: memref<16x32x24xf32, #tpu.memory_space<vmem>>, %arg2: memref<16x32x1xf32, #tpu.memory_space<vmem>>, %arg3: memref<16x32x24xf32, #tpu.memory_space<vmem>>) attributes {dimension_semantics = [#tpu.dimension_semantics<parallel>], iteration_bounds = array<i64: 1>, scalar_prefetch = 0 : i64, scratch_operands = 0 : i64, tpu.core_type = #tpu.core_type<tc>, window_params = [{transform_indices = @transform_0, window_bounds = array<i64: 16, 32, 24>}, {transform_indices = @transform_1, window_bounds = array<i64: 16, 32, 1>}, {transform_indices = @transform_2, window_bounds = array<i64: 16, 32, 24>}]} {
    %c0 = arith.constant 0 : index
    %c0_0 = arith.constant 0 : index
    %c0_1 = arith.constant 0 : index
    %0 = vector.load %arg1[%c0, %c0_0, %c0_1] : memref<16x32x24xf32, #tpu.memory_space<vmem>>, vector<16x32x24xf32>
    %c0_2 = arith.constant 0 : index
    %c0_3 = arith.constant 0 : index
    %c0_4 = arith.constant 0 : index
    %1 = vector.load %arg2[%c0_2, %c0_3, %c0_4] : memref<16x32x1xf32, #tpu.memory_space<vmem>>, vector<16x32x1xf32>
    %2 = arith.mulf %1, %1 : vector<16x32x1xf32>
    %cst = arith.constant dense<0.000000e+00> : vector<16x1xf32>
    %3 = vector.multi_reduction <add>, %2, %cst [1] : vector<16x32x1xf32> to vector<16x1xf32>
    %4 = vector.shape_cast %3 : vector<16x1xf32> to vector<16x1x1xf32>
    %cst_5 = arith.constant 1.000000e-16 : f32
    %5 = vector.broadcast %cst_5 : f32 to vector<16x1x1xf32>
    %6 = arith.addf %4, %5 : vector<16x1x1xf32>
    %7 = math.rsqrt %6 : vector<16x1x1xf32>
    %8 = vector.broadcast %7 : vector<16x1x1xf32> to vector<16x32x1xf32>
    %9 = arith.mulf %1, %8 : vector<16x32x1xf32>
    %10 = vector.broadcast %9 : vector<16x32x1xf32> to vector<16x32x24xf32>
    %11 = arith.mulf %0, %10 : vector<16x32x24xf32>
    %cst_6 = arith.constant dense<0.000000e+00> : vector<16x24xf32>
    %12 = vector.multi_reduction <add>, %11, %cst_6 [1] : vector<16x32x24xf32> to vector<16x24xf32>
    %13 = vector.shape_cast %12 : vector<16x24xf32> to vector<16x1x24xf32>
    %14 = arith.mulf %13, %13 : vector<16x1x24xf32>
    %cst_7 = arith.constant dense<0.000000e+00> : vector<16x1xf32>
    %15 = vector.multi_reduction <add>, %14, %cst_7 [2] : vector<16x1x24xf32> to vector<16x1xf32>
    %16 = vector.shape_cast %15 : vector<16x1xf32> to vector<16x1x1xf32>
    %cst_8 = arith.constant 1.000000e-16 : f32
    %17 = vector.broadcast %cst_8 : f32 to vector<16x1x1xf32>
    %18 = arith.addf %16, %17 : vector<16x1x1xf32>
    %19 = math.rsqrt %18 : vector<16x1x1xf32>
    %20 = vector.broadcast %19 : vector<16x1x1xf32> to vector<16x1x24xf32>
    %21 = arith.mulf %13, %20 : vector<16x1x24xf32>
    %22 = vector.broadcast %21 : vector<16x1x24xf32> to vector<16x32x24xf32>
    %23 = arith.mulf %0, %22 : vector<16x32x24xf32>
    %cst_9 = arith.constant dense<0.000000e+00> : vector<16x32xf32>
    %24 = vector.multi_reduction <add>, %23, %cst_9 [2] : vector<16x32x24xf32> to vector<16x32xf32>
    %25 = vector.shape_cast %24 : vector<16x32xf32> to vector<16x32x1xf32>
    %26 = arith.mulf %25, %25 : vector<16x32x1xf32>
    %cst_10 = arith.constant dense<0.000000e+00> : vector<16x1xf32>
    %27 = vector.multi_reduction <add>, %26, %cst_10 [1] : vector<16x32x1xf32> to vector<16x1xf32>
    %28 = vector.shape_cast %27 : vector<16x1xf32> to vector<16x1x1xf32>
    %cst_11 = arith.constant 1.000000e-16 : f32
    %29 = vector.broadcast %cst_11 : f32 to vector<16x1x1xf32>
    %30 = arith.addf %28, %29 : vector<16x1x1xf32>
    %31 = math.rsqrt %30 : vector<16x1x1xf32>
    %32 = vector.broadcast %31 : vector<16x1x1xf32> to vector<16x32x1xf32>
    %33 = arith.mulf %25, %32 : vector<16x32x1xf32>
    %34 = vector.broadcast %33 : vector<16x32x1xf32> to vector<16x32x24xf32>
    %35 = arith.mulf %0, %34 : vector<16x32x24xf32>
    %cst_12 = arith.constant dense<0.000000e+00> : vector<16x24xf32>
    %36 = vector.multi_reduction <add>, %35, %cst_12 [1] : vector<16x32x24xf32> to vector<16x24xf32>
    %37 = vector.shape_cast %36 : vector<16x24xf32> to vector<16x1x24xf32>
    %38 = arith.mulf %37, %37 : vector<16x1x24xf32>
    %cst_13 = arith.constant dense<0.000000e+00> : vector<16x1xf32>
    %39 = vector.multi_reduction <add>, %38, %cst_13 [2] : vector<16x1x24xf32> to vector<16x1xf32>
    %40 = vector.shape_cast %39 : vector<16x1xf32> to vector<16x1x1xf32>
    %cst_14 = arith.constant 1.000000e-16 : f32
    %41 = vector.broadcast %cst_14 : f32 to vector<16x1x1xf32>
    %42 = arith.addf %40, %41 : vector<16x1x1xf32>
    %43 = math.rsqrt %42 : vector<16x1x1xf32>
    %44 = vector.broadcast %43 : vector<16x1x1xf32> to vector<16x1x24xf32>
    %45 = arith.mulf %37, %44 : vector<16x1x24xf32>
    %46 = vector.broadcast %45 : vector<16x1x24xf32> to vector<16x32x24xf32>
    %47 = arith.mulf %0, %46 : vector<16x32x24xf32>
    %cst_15 = arith.constant dense<0.000000e+00> : vector<16x32xf32>
    %48 = vector.multi_reduction <add>, %47, %cst_15 [2] : vector<16x32x24xf32> to vector<16x32xf32>
    %49 = vector.shape_cast %48 : vector<16x32xf32> to vector<16x32x1xf32>
    %50 = arith.mulf %49, %49 : vector<16x32x1xf32>
    %cst_16 = arith.constant dense<0.000000e+00> : vector<16x1xf32>
    %51 = vector.multi_reduction <add>, %50, %cst_16 [1] : vector<16x32x1xf32> to vector<16x1xf32>
    %52 = vector.shape_cast %51 : vector<16x1xf32> to vector<16x1x1xf32>
    %cst_17 = arith.constant 1.000000e-16 : f32
    %53 = vector.broadcast %cst_17 : f32 to vector<16x1x1xf32>
    %54 = arith.addf %52, %53 : vector<16x1x1xf32>
    %55 = math.rsqrt %54 : vector<16x1x1xf32>
    %56 = vector.broadcast %55 : vector<16x1x1xf32> to vector<16x32x1xf32>
    %57 = arith.mulf %49, %56 : vector<16x32x1xf32>
    %58 = vector.broadcast %57 : vector<16x32x1xf32> to vector<16x32x24xf32>
    %59 = arith.mulf %0, %58 : vector<16x32x24xf32>
    %cst_18 = arith.constant dense<0.000000e+00> : vector<16x24xf32>
    %60 = vector.multi_reduction <add>, %59, %cst_18 [1] : vector<16x32x24xf32> to vector<16x24xf32>
    %61 = vector.shape_cast %60 : vector<16x24xf32> to vector<16x1x24xf32>
    %62 = arith.mulf %61, %61 : vector<16x1x24xf32>
    %cst_19 = arith.constant dense<0.000000e+00> : vector<16x1xf32>
    %63 = vector.multi_reduction <add>, %62, %cst_19 [2] : vector<16x1x24xf32> to vector<16x1xf32>
    %64 = vector.shape_cast %63 : vector<16x1xf32> to vector<16x1x1xf32>
    %cst_20 = arith.constant 1.000000e-16 : f32
    %65 = vector.broadcast %cst_20 : f32 to vector<16x1x1xf32>
    %66 = arith.addf %64, %65 : vector<16x1x1xf32>
    %67 = math.rsqrt %66 : vector<16x1x1xf32>
    %68 = vector.broadcast %67 : vector<16x1x1xf32> to vector<16x1x24xf32>
    %69 = arith.mulf %61, %68 : vector<16x1x24xf32>
    %70 = vector.broadcast %69 : vector<16x1x24xf32> to vector<16x32x24xf32>
    %71 = arith.mulf %0, %70 : vector<16x32x24xf32>
    %cst_21 = arith.constant dense<0.000000e+00> : vector<16x32xf32>
    %72 = vector.multi_reduction <add>, %71, %cst_21 [2] : vector<16x32x24xf32> to vector<16x32xf32>
    %73 = vector.shape_cast %72 : vector<16x32xf32> to vector<16x32x1xf32>
    %74 = arith.mulf %73, %73 : vector<16x32x1xf32>
    %cst_22 = arith.constant dense<0.000000e+00> : vector<16x1xf32>
    %75 = vector.multi_reduction <add>, %74, %cst_22 [1] : vector<16x32x1xf32> to vector<16x1xf32>
    %76 = vector.shape_cast %75 : vector<16x1xf32> to vector<16x1x1xf32>
    %cst_23 = arith.constant 1.000000e-16 : f32
    %77 = vector.broadcast %cst_23 : f32 to vector<16x1x1xf32>
    %78 = arith.addf %76, %77 : vector<16x1x1xf32>
    %79 = math.rsqrt %78 : vector<16x1x1xf32>
    %80 = vector.broadcast %79 : vector<16x1x1xf32> to vector<16x32x1xf32>
    %81 = arith.mulf %73, %80 : vector<16x32x1xf32>
    %82 = arith.mulf %81, %73 : vector<16x32x1xf32>
    %cst_24 = arith.constant dense<0.000000e+00> : vector<16x1xf32>
    %83 = vector.multi_reduction <add>, %82, %cst_24 [1] : vector<16x32x1xf32> to vector<16x1xf32>
    %84 = vector.shape_cast %83 : vector<16x1xf32> to vector<16x1x1xf32>
    %cst_25 = arith.constant 9.99999996E-13 : f32
    %85 = vector.broadcast %cst_25 : f32 to vector<16x1x1xf32>
    %86 = arith.addf %84, %85 : vector<16x1x1xf32>
    %cst_26 = arith.constant 1.000000e+00 : f32
    %87 = vector.broadcast %cst_26 : f32 to vector<16x1x1xf32>
    %88 = arith.divf %87, %86 : vector<16x1x1xf32>
    %89 = vector.broadcast %88 : vector<16x1x1xf32> to vector<16x32x24xf32>
    %90 = arith.mulf %0, %89 : vector<16x32x24xf32>
    %c0_27 = arith.constant 0 : index
    %c0_28 = arith.constant 0 : index
    %c0_29 = arith.constant 0 : index
    %91 = vector.load %arg3[%c0_27, %c0_28, %c0_29] : memref<16x32x24xf32, #tpu.memory_space<vmem>>, vector<16x32x24xf32>
    tpu.vector_store %arg3[%c0_27, %c0_28, %c0_29], %90 {strides = array<i32>} : memref<16x32x24xf32, #tpu.memory_space<vmem>>, vector<16x32x24xf32>,
    return
  }
  func.func @transform_0(%arg0: i32) -> (i32, i32, i32) {
    %c0_i32 = arith.constant 0 : i32
    %c0_i32_0 = arith.constant 0 : i32
    %c0_i32_1 = arith.constant 0 : i32
    return %arg0, %c0_i32, %c0_i32_0 : i32, i32, i32
  }
  func.func @transform_1(%arg0: i32) -> (i32, i32, i32) {
    %c0_i32 = arith.constant 0 : i32
    %c0_i32_0 = arith.constant 0 : i32
    %c0_i32_1 = arith.constant 0 : i32
    return %arg0, %c0_i32, %c0_i32_0 : i32, i32, i32
  }
  func.func @transform_2(%arg0: i32) -> (i32, i32, i32) {
    %c0_i32 = arith.constant 0 : i32
    %c0_i32_0 = arith.constant 0 : i32
    %c0_i32_1 = arith.constant 0 : i32
    return %arg0, %c0_i32, %c0_i32_0 : i32, i32, i32
  }
}

</mosaic_0001>

<bundles_post_ra>
// kernel: tpu_custom_call.1
= control target key start
LH: loop header
LB: loop body
LE: loop exit
PB: predicated region body
PF: predicated region fallthrough
CT: control target
= control target key end

     0   :  { %v5833_v0 = vmov 0   ;;  %vm203_vm0 = vcmask 7168   ;;  %s10955_s1 = inlined_call_operand.vmem [shape: f32[16,32,1], index: 1, kind: input, shape index: {}]   ;;  %s10956_s0 = inlined_call_operand.vmem [shape: f32[16,32,24], index: 0, kind: input, shape index: {}]   ;;  %s10957_s2 = inlined_call_operand.vmem [shape: f32[16,32,24], index: 2, kind: output, shape index: {}]  }
   0x1   :  { %5268 = vset.pattern.permute.xlu2 %v5833_v0  ;;  %5267 = vset.pattern.permute.xlu1 %v5833_v0  ;;  %v5852_v1 = vld [vmem:[%s10955_s1 + $0x20] sm:$0xff]  ;;  %v5857_v2 = vld [vmem:[%s10955_s1 + $0x28] sm:$0xff]  ;;  %v5862_v3 = vld [vmem:[%s10955_s1 + $0x30] sm:$0xff] }
   0x2   :  { %5266 = vset.pattern.permute.xlu0 %v5833_v0  ;;  %v5867_v4 = vld [vmem:[%s10955_s1 + $0x38] sm:$0xff]  ;;  %v143_v5 = vmul.f32 %v5852_v1, %v5852_v1  ;;  %v144_v6 = vmul.f32 %v5857_v2, %v5857_v2  ;;  %v145_v7 = vmul.f32 %v5862_v3, %v5862_v3  ;;  %v5878_v8 = vld [vmem:[%s10955_s1] sm:$0xff]  ;;  %v5883_v9 = vld [vmem:[%s10955_s1 + $0x8] sm:$0xff] }
   0x3   :  { %v146_v10 = vmul.f32 %v5867_v4, %v5867_v4  ;;  %v5890_v11 = vld [vmem:[%s10955_s1 + $0x10] sm:$0xff]  ;;  %v5895_v12 = vld [vmem:[%s10955_s1 + $0x18] sm:$0xff]  ;;  %v139_v13 = vmul.f32 %v5878_v8, %v5878_v8  ;;  %v140_v14 = vmul.f32 %v5883_v9, %v5883_v9  ;;  %v5904_v15 = vld [vmem:[%s10955_s1 + $0x40] sm:$0xff] }
   0x4   :  { %v217_v16 = vsel %vm203_vm0, %v143_v5, 0.0  ;;  %v218_v17 = vsel %vm203_vm0, %v144_v6, 0.0  ;;  %v220_v18 = vsel %vm203_vm0, %v145_v7, 0.0  ;;  %v141_v19 = vmul.f32 %v5890_v11, %v5890_v11  ;;  %v5914_v20 = vld [vmem:[%s10955_s1 + $0x48] sm:$0xff]  ;;  %v5919_v21 = vld [vmem:[%s10955_s1 + $0x50] sm:$0xff]  ;;  %v5928_v26 = vld [vmem:[%s10955_s1 + $0x58] sm:$0xff] }
   0x5   :  { %v219_v22 = vadd.f32 %v218_v17, %v217_v16  ;;  %v222_v23 = vsel %vm203_vm0, %v146_v10, 0.0  ;;  %v142_v24 = vmul.f32 %v5895_v12, %v5895_v12  ;;  %v204_v25 = vsel %vm203_vm0, %v139_v13, 0.0  ;;  %v5933_v27 = vld [vmem:[%s10955_s1 + $0x60] sm:$0xff]  ;;  %v5947_v36 = vld [vmem:[%s10955_s1 + $0x68] sm:$0xff]  ;;  %v5952_v37 = vld [vmem:[%s10955_s1 + $0x70] sm:$0xff] }
   0x6   :  { %v205_v28 = vsel %vm203_vm0, %v140_v14, 0.0  ;;  %v207_v29 = vsel %vm203_vm0, %v141_v19, 0.0  ;;  %v147_v30 = vmul.f32 %v5904_v15, %v5904_v15  ;;  %v148_v31 = vmul.f32 %v5914_v20, %v5914_v20  ;;  %v5957_v38 = vld [vmem:[%s10955_s1 + $0x78] sm:$0xff]  ;;  %v5977_v55 = vld [vmem:[%s10955_s1 + $0x80] sm:$0xff]  ;;  %v5982_v56 = vld [vmem:[%s10955_s1 + $0x88] sm:$0xff] }
   0x7   :  { %v221_v32 = vadd.f32 %v220_v18, %v219_v22  ;;  %v206_v33 = vadd.f32 %v205_v28, %v204_v25  ;;  %v209_v34 = vsel %vm203_vm0, %v142_v24, 0.0  ;;  %v149_v35 = vmul.f32 %v5919_v21, %v5919_v21  ;;  %v5991_v0 = vld [vmem:[%s10955_s1 + $0x90] sm:$0xff]  ;;  %v6002_v18 = vld [vmem:[%s10955_s1 + $0x98] sm:$0xff] }
   0x8   :  { %v150_v39 = vmul.f32 %v5928_v26, %v5928_v26  ;;  %v230_v40 = vsel %vm203_vm0, %v147_v30, 0.0  ;;  %v231_v41 = vsel %vm203_vm0, %v148_v31, 0.0  ;;  %v151_v42 = vmul.f32 %v5933_v27, %v5933_v27 }
   0x9   :  { %v223_v43 = vadd.f32 %v222_v23, %v221_v32  ;;  %v208_v44 = vadd.f32 %v207_v29, %v206_v33  ;;  %v232_v45 = vadd.f32 %v231_v41, %v230_v40  ;;  %v233_v46 = vsel %vm203_vm0, %v149_v35, 0.0  ;;  %v6017_v40 = vld [vmem:[%s10955_s1 + $0xa8] sm:$0xff] }
   0xa   :  { %v235_v47 = vsel %vm203_vm0, %v150_v39, 0.0  ;;  %v152_v48 = vmul.f32 %v5947_v36, %v5947_v36  ;;  %v153_v49 = vmul.f32 %v5952_v37, %v5952_v37  ;;  %v154_v50 = vmul.f32 %v5957_v38, %v5957_v38  ;;  %v6012_v39 = vld [vmem:[%s10955_s1 + $0xa0] sm:$0xff] }
   0xb   :  { %v224_v51 = vrot.slane %v223_v43, 4  ;;  %v210_v52 = vadd.f32 %v209_v34, %v208_v44  ;;  %v234_v53 = vadd.f32 %v233_v46, %v232_v45  ;;  %v243_v54 = vsel %vm203_vm0, %v151_v42, 0.0 }
   0xc   :  { %v244_v57 = vsel %vm203_vm0, %v152_v48, 0.0  ;;  %v246_v58 = vsel %vm203_vm0, %v153_v49, 0.0  ;;  %v155_v59 = vmul.f32 %v5977_v55, %v5977_v55  ;;  %v248_v5 = vsel %vm203_vm0, %v154_v50, 0.0  ;;  %v6026_v48 = vld [vmem:[%s10955_s1 + $0xb0] sm:$0xff] }
   0xd   :  { %v225_v60 = vadd.f32 %v224_v51, %v223_v43  ;;  %v211_v61 = vrot.slane %v210_v52, 4  ;;  %v236_v62 = vadd.f32 %v235_v47, %v234_v53  ;;  %v245_v63 = vadd.f32 %v244_v57, %v243_v54 }
   0xe   :  { %v156_v6 = vmul.f32 %v5982_v56, %v5982_v56  ;;  %v157_v7 = vmul.f32 %v5991_v0, %v5991_v0  ;;  %v256_v10 = vsel %vm203_vm0, %v155_v59, 0.0  ;;  %v158_v19 = vmul.f32 %v6002_v18, %v6002_v18  ;;  %v6035_v59 = vld [vmem:[%s10955_s1 + $0xb8] sm:$0xff] }
   0xf   :  { %v226_v13 = vrot.slane %v225_v60, 2  ;;  %v212_v14 = vadd.f32 %v211_v61, %v210_v52  ;;  %v237_v16 = vrot.slane %v236_v62, 4  ;;  %v247_v17 = vadd.f32 %v246_v58, %v245_v63 }
  0x10   :  { %v257_v22 = vsel %vm203_vm0, %v156_v6, 0.0  ;;  %v259_v23 = vsel %vm203_vm0, %v157_v7, 0.0  ;;  %v261_v31 = vsel %vm203_vm0, %v158_v19, 0.0  ;;  %v159_v42 = vmul.f32 %v6012_v39, %v6012_v39 }
  0x11   :  { %v227_v24 = vadd.f32 %v226_v13, %v225_v60  ;;  %v213_v25 = vrot.slane %v212_v14, 2  ;;  %v238_v28 = vadd.f32 %v237_v16, %v236_v62  ;;  %v249_v29 = vadd.f32 %v248_v5, %v247_v17 }
  0x12   :  { %v258_v30 = vadd.f32 %v257_v22, %v256_v10  ;;  %v160_v43 = vmul.f32 %v6017_v40, %v6017_v40  ;;  %v161_v50 = vmul.f32 %v6026_v48, %v6026_v48  ;;  %v269_v51 = vsel %vm203_vm0, %v159_v42, 0.0 }
  0x13   :  { %v228_v32 = vrot.slane %v227_v24, 1  ;;  %v214_v33 = vadd.f32 %v213_v25, %v212_v14  ;;  %v239_v34 = vrot.slane %v238_v28, 2  ;;  %v250_v35 = vrot.slane %v249_v29, 4 }
  0x14   :  { %v260_v41 = vadd.f32 %v259_v23, %v258_v30  ;;  %v270_v52 = vsel %vm203_vm0, %v160_v43, 0.0  ;;  %v162_v61 = vmul.f32 %v6035_v59, %v6035_v59  ;;  %v272_v63 = vsel %vm203_vm0, %v161_v50, 0.0 }
  0x15   :  { %v229_v44 = vadd.f32 %v228_v32, %v227_v24  ;;  %v215_v45 = vrot.slane %v214_v33, 1  ;;  %v240_v46 = vadd.f32 %v239_v34, %v238_v28  ;;  %v251_v47 = vadd.f32 %v250_v35, %v249_v29 }
  0x16   :  { %v262_v49 = vadd.f32 %v261_v31, %v260_v41  ;;  %v271_v62 = vadd.f32 %v270_v52, %v269_v51  ;;  %v274_v14 = vsel %vm203_vm0, %v162_v61, 0.0 }
  0x17   :  { %v413_v53 = vadd.f32 1e-16, %v229_v44  ;;  %v216_v54 = vadd.f32 %v215_v45, %v214_v33  ;;  %v241_v57 = vrot.slane %v240_v46, 1  ;;  %v252_v58 = vrot.slane %v251_v47, 2 }
  0x18   :  { %v263_v60 = vrot.slane %v262_v49, 4  ;;  %v273_v13 = vadd.f32 %v272_v63, %v271_v62 }
  0x19   :  { %5269 = vrsqrt.f32 %v413_v53  ;;  %v412_v5 = vadd.f32 1e-16, %v216_v54  ;;  %v242_v6 = vadd.f32 %v241_v57, %v240_v46  ;;  %v253_v7 = vadd.f32 %v252_v58, %v251_v47  ;;  %v6053_v46 = vld [vmem:[%s10955_s1 + $0xc0] sm:$0xff]  ;;  %v6058_v47 = vld [vmem:[%s10955_s1 + $0xc8] sm:$0xff] }
  0x1a   :  { %v264_v10 = vadd.f32 %v263_v60, %v262_v49  ;;  %v275_v22 = vadd.f32 %v274_v14, %v273_v13  ;;  %vm444_vm1 = vweird.f32 %v413_v53  ;;  %v163_v54 = vmul.f32 %v6053_v46, %v6053_v46 }
  0x1b   :  { %5271 = vrsqrt.f32 %v412_v5  ;;  %v6041_v16 = vadd.f32 1e-16, %v242_v6  ;;  %v254_v17 = vrot.slane %v253_v7, 1  ;;  %vm434_vm3 = vweird.f32 %v412_v5  ;;  %v6077_v6 = vld [vmem:[%s10955_s1 + $0xd8] sm:$0xff] }
  0x1c   :  { %v265_v19 = vrot.slane %v264_v10, 2  ;;  %v276_v24 = vrot.slane %v275_v22, 4  ;;  %v164_v57 = vmul.f32 %v6058_v47, %v6058_v47  ;;  %v282_v14 = vsel %vm203_vm0, %v163_v54, 0.0 }
  0x1d   :  { %5273 = vrsqrt.f32 %v6041_v16  ;;  %v255_v23 = vadd.f32 %v254_v17, %v253_v7  ;;  %vm454_vm7 = vweird.f32 %v6041_v16 }
  0x1e   :  { %v266_v28 = vadd.f32 %v265_v19, %v264_v10  ;;  %v277_v32 = vadd.f32 %v276_v24, %v275_v22  ;;  %v283_v17 = vsel %vm203_vm0, %v164_v57, 0.0 }
  0x1f   :  { %v5270_v25 = vpop.eup %5269  ;;  %v6044_v31 = vadd.f32 1e-16, %v255_v23 }
  0x20   :  { %v439_v29 = vmul.f32 %v5270_v25, %v413_v53  ;;  %vm445_vm2 = vweird.f32 %v5270_v25  ;;  %v267_v41 = vrot.slane %v266_v28, 1  ;;  %v278_v45 = vrot.slane %v277_v32, 2  ;;  %v6072_v53 = vld [vmem:[%s10955_s1 + $0xd0] sm:$0xff] }
  0x21   :  { %v5272_v30 = vpop.eup %5271  ;;  %5275 = vrsqrt.f32 %v6044_v31  ;;  %vm446_vm5 = vmor %vm444_vm1, %vm445_vm2  ;;  %vm464_vm10 = vweird.f32 %v6044_v31 }
  0x22   :  { %v440_v33 = vmul.f32 %v5270_v25, %v439_v29  ;;  %v429_v34 = vmul.f32 %v5272_v30, %v412_v5  ;;  %vm435_vm4 = vweird.f32 %v5272_v30  ;;  %v268_v52 = vadd.f32 %v267_v41, %v266_v28 }
  0x23   :  { %v6046_v35 = vpop.eup %5273  ;;  %v279_v62 = vadd.f32 %v278_v45, %v277_v32  ;;  %vm436_vm6 = vmor %vm434_vm3, %vm435_vm4  ;;  %v165_v28 = vmul.f32 %v6072_v53, %v6072_v53  ;;  %v284_v32 = vadd.f32 %v283_v17, %v282_v14  ;;  %v6152_v17 = vld [vmem:[%s10955_s1 + $0x108] sm:$0xff] }
  0x24   :  { %v441_v42 = vmul.f32 0.5, %v440_v33  ;;  %v430_v43 = vmul.f32 %v5272_v30, %v429_v34  ;;  %v449_v44 = vmul.f32 %v6046_v35, %v6041_v16  ;;  %v6083_v13 = vadd.f32 1e-16, %v268_v52 }
  0x25   :  { %v280_v23 = vrot.slane %v279_v62, 1  ;;  %vm455_vm8 = vweird.f32 %v6046_v35 }
  0x26   :  { %v442_v49 = vsub.f32 1.5, %v441_v42  ;;  %v431_v50 = vmul.f32 0.5, %v430_v43  ;;  %v450_v51 = vmul.f32 %v6046_v35, %v449_v44  ;;  %5277 = vrsqrt.f32 %v6083_v13  ;;  %v6119_v42 = vld [vmem:[%s10955_s1 + $0xf8] sm:$0xff]  ;;  %vm456_vm9 = vmor %vm454_vm7, %vm455_vm8 }
  0x27   :  { %v6079_v7 = vpop.eup %5275  ;;  %v281_v41 = vadd.f32 %v280_v23, %v279_v62  ;;  %v285_v43 = vsel %vm203_vm0, %v165_v28, 0.0  ;;  %v170_v57 = vmul.f32 %v6119_v42, %v6119_v42  ;;  %vm474_vm13 = vweird.f32 %v6083_v13 }
  0x28   :  { %v443_v58 = vmul.f32 %v5270_v25, %v442_v49  ;;  %v432_v60 = vsub.f32 1.5, %v431_v50  ;;  %v451_v61 = vmul.f32 0.5, %v450_v51  ;;  %v459_v29 = vmul.f32 %v6079_v7, %v6044_v31 }
  0x29   :  { %v286_v51 = vadd.f32 %v285_v43, %v284_v32  ;;  %v300_v23 = vsel %vm203_vm0, %v170_v57, 0.0  ;;  %vm465_vm11 = vweird.f32 %v6079_v7 }
  0x2a   :  { %v6067_v63 = vsel %vm446_vm5, %v5270_v25, %v443_v58  ;;  %v433_v5 = vmul.f32 %v5272_v30, %v432_v60  ;;  %v452_v22 = vsub.f32 1.5, %v451_v61  ;;  %v460_v50 = vmul.f32 %v6079_v7, %v459_v29  ;;  %vm466_vm12 = vmor %vm464_vm10, %vm465_vm11 }
  0x2b   :  { %v592_v10 = vmul.f32 %v6067_v63, %v5852_v1  ;;  %v166_v1 = vmul.f32 %v6077_v6, %v6077_v6  ;;  %v593_v33 = vmul.f32 %v6067_v63, %v5857_v2  ;;  %v6138_v61 = vadd.f32 1e-16, %v281_v41 }
  0x2c   :  { %v437_v19 = vsel %vm436_vm6, %v5272_v30, %v433_v5  ;;  %v6098_v30 = vld [vmem:[%s10955_s1 + $0xe0] sm:$0xff]  ;;  %v453_v34 = vmul.f32 %v6046_v35, %v452_v22  ;;  %v6140_v5 = vpop.eup %5277  ;;  %v595_v32 = vmul.f32 %v6067_v63, %v5867_v4  ;;  %v594_v41 = vmul.f32 %v6067_v63, %v5862_v3 }
  0x2d   :  { %674 = vperm.xlu2 %5268, %v592_v10   ;;  %v590_v24 = vmul.f32 %v437_v19, %v5890_v11  ;;  %v588_v25 = vmul.f32 %v437_v19, %v5878_v8  ;;  %v6103_v11 = vld [vmem:[%s10955_s1 + $0xe8] sm:$0xff]  ;;  %v6110_v8 = vld [vmem:[%s10955_s1 + $0xf0] sm:$0xff]  ;;  %v287_v44 = vsel %vm203_vm0, %v166_v1, 0.0  ;;  %v167_v45 = vmul.f32 %v6098_v30, %v6098_v30 }
  0x2e   :  { %v168_v2 = vmul.f32 %v6103_v11, %v6103_v11  ;;  %v591_v49 = vmul.f32 %v437_v19, %v5895_v12  ;;  %v169_v52 = vmul.f32 %v6110_v8, %v6110_v8  ;;  %v589_v54 = vmul.f32 %v437_v19, %v5883_v9  ;;  %v6145_v9 = vld [vmem:[%s10955_s1 + $0x100] sm:$0xff] }
  0x2f   :  { %664 = vperm.xlu1 %5267, %v590_v24   ;;  %654 = vperm.xlu0 %5266, %v588_v25   ;;  %v295_v58 = vsel %vm203_vm0, %v167_v45, 0.0  ;;  %v288_v12 = vadd.f32 %v287_v44, %v286_v51  ;;  %v457_v16 = vsel %vm456_vm9, %v6046_v35, %v453_v34  ;;  %v461_v19 = vmul.f32 0.5, %v460_v50  ;;  %v6158_v24 = vld [vmem:[%s10955_s1 + $0x110] sm:$0xff]  ;;  %v6163_v35 = vld [vmem:[%s10955_s1 + $0x118] sm:$0xff] }
  0x30   :  { %v296_v60 = vsel %vm203_vm0, %v168_v2, 0.0  ;;  %v298_v14 = vsel %vm203_vm0, %v169_v52, 0.0  ;;  %v469_v25 = vmul.f32 %v6140_v5, %v6083_v13  ;;  %5279 = vrsqrt.f32 %v6138_v61 }
  0x31   :  { %v297_v62 = vadd.f32 %v296_v60, %v295_v58  ;;  %v289_v10 = vrot.slane %v288_v12, 4  ;;  %v171_v1 = vmul.f32 %v6145_v9, %v6145_v9  ;;  %v596_v29 = vmul.f32 %v457_v16, %v5904_v15 }
  0x32   :  { %v172_v34 = vmul.f32 %v6152_v17, %v6152_v17  ;;  %v173_v44 = vmul.f32 %v6158_v24, %v6158_v24  ;;  %v174_v45 = vmul.f32 %v6163_v35, %v6163_v35  ;;  %v462_v2 = vsub.f32 1.5, %v461_v19 }
  0x33   :  { %v299_v22 = vadd.f32 %v298_v14, %v297_v62  ;;  %v290_v28 = vadd.f32 %v289_v10, %v288_v12  ;;  %v308_v15 = vsel %vm203_vm0, %v171_v1, 0.0  ;;  %v470_v50 = vmul.f32 %v6140_v5, %v469_v25 }
  0x34   :  { %v309_v4 = vsel %vm203_vm0, %v172_v34, 0.0  ;;  %v313_v63 = vsel %vm203_vm0, %v174_v45, 0.0  ;;  %v463_v12 = vmul.f32 %v6079_v7, %v462_v2  ;;  %v599_v19 = vmul.f32 %v457_v16, %v5928_v26  ;;  %v6207_v26 = vld [vmem:[%s10955_s1 + $0x128] sm:$0xff] }
  0x35   :  { %679 = vperm.xlu2 %5268, %v593_v33   ;;  %v301_v33 = vadd.f32 %v300_v23, %v299_v22  ;;  %v291_v43 = vrot.slane %v290_v28, 2  ;;  %v310_v52 = vadd.f32 %v309_v4, %v308_v15  ;;  %v471_v10 = vmul.f32 0.5, %v470_v50  ;;  %v6232_v50 = vld [vmem:[%s10955_s1 + $0x138] sm:$0xff] }
  0x36   :  { %v6188_v57 = vpop.eup %5279  ;;  %v597_v1 = vmul.f32 %v457_v16, %v5914_v20  ;;  %v176_v20 = vmul.f32 %v6207_v26, %v6207_v26  ;;  %vm475_vm14 = vweird.f32 %v6140_v5  ;;  %vm484_vm1 = vweird.f32 %v6138_v61 }
  0x37   :  { %669 = vperm.xlu1 %5267, %v591_v49   ;;  %659 = vperm.xlu0 %5266, %v589_v54   ;;  %v302_v49 = vrot.slane %v301_v33, 4  ;;  %v292_v51 = vadd.f32 %v291_v43, %v290_v28  ;;  %v311_v54 = vsel %vm203_vm0, %v173_v44, 0.0  ;;  %v479_v31 = vmul.f32 %v6188_v57, %v6138_v61  ;;  %v6219_v44 = vld [vmem:[%s10955_s1 + $0x130] sm:$0xff]  ;;  %vm476_vm15 = vmor %vm474_vm13, %vm475_vm14 }
  0x38   :  { %v312_v60 = vadd.f32 %v311_v54, %v310_v52  ;;  %v598_v28 = vmul.f32 %v457_v16, %v5919_v21  ;;  %v472_v34 = vsub.f32 1.5, %v471_v10  ;;  %v177_v2 = vmul.f32 %v6219_v44, %v6219_v44 }
  0x39   :  { %v303_v3 = vadd.f32 %v302_v49, %v301_v33  ;;  %v293_v58 = vrot.slane %v292_v51, 1  ;;  %v6202_v33 = vld [vmem:[%s10955_s1 + $0x120] sm:$0xff]  ;;  %v322_v15 = vsel %vm203_vm0, %v176_v20, 0.0  ;;  %v6276_v20 = vld [vmem:[%s10955_s1 + $0x158] sm:$0xff]  ;;  %vm485_vm2 = vweird.f32 %v6188_v57 }
  0x3a   :  { %v314_v14 = vadd.f32 %v313_v63, %v312_v60  ;;  %v175_v21 = vmul.f32 %v6202_v33, %v6202_v33  ;;  %v473_v52 = vmul.f32 %v6140_v5, %v472_v34  ;;  %v324_v63 = vsel %vm203_vm0, %v177_v2, 0.0  ;;  %vm486_vm3 = vmor %vm484_vm1, %vm485_vm2 }
  0x3b   :  { %v304_v62 = vrot.slane %v303_v3, 2  ;;  %v294_v22 = vadd.f32 %v293_v58, %v292_v51 }
  0x3c   :  { %v315_v25 = vrot.slane %v314_v14, 4  ;;  %v321_v49 = vsel %vm203_vm0, %v175_v21, 0.0 }
  0x3d   :  { %694 = vperm.xlu2 %5268, %v596_v29   ;;  %v305_v23 = vadd.f32 %v304_v62, %v303_v3  ;;  %v6197_v29 = vsel %vm466_vm12, %v6079_v7, %v463_v12  ;;  %v480_v7 = vmul.f32 %v6188_v57, %v479_v31  ;;  %v6214_v16 = vadd.f32 1e-16, %v294_v22  ;;  %v6254_v31 = vld [vmem:[%s10955_s1 + $0x148] sm:$0xff] }
  0x3e   :  { %v602_v4 = vmul.f32 %v6197_v29, %v5952_v37  ;;  %v323_v51 = vadd.f32 %v322_v15, %v321_v49  ;;  %v178_v3 = vmul.f32 %v6232_v50, %v6232_v50  ;;  %v601_v62 = vmul.f32 %v6197_v29, %v5947_v36 }
  0x3f   :  { %689 = vperm.xlu1 %5267, %v595_v32   ;;  %684 = vperm.xlu0 %5266, %v594_v41   ;;  %v306_v32 = vrot.slane %v305_v23, 1  ;;  %v316_v41 = vadd.f32 %v315_v25, %v314_v14  ;;  %v481_v58 = vmul.f32 0.5, %v480_v7  ;;  %5281 = vrsqrt.f32 %v6214_v16 }
  0x40   :  { %v325_v13 = vadd.f32 %v324_v63, %v323_v51  ;;  %v326_v12 = vsel %vm203_vm0, %v178_v3, 0.0  ;;  %v600_v10 = vmul.f32 %v6197_v29, %v5933_v27  ;;  %v180_v36 = vmul.f32 %v6254_v31, %v6254_v31  ;;  %v6298_v63 = vld [vmem:[%s10955_s1 + $0x160] sm:$0xff] }
  0x41   :  { %v307_v43 = vadd.f32 %v306_v32, %v305_v23  ;;  %v317_v45 = vrot.slane %v316_v41, 2  ;;  %v477_v27 = vsel %vm476_vm15, %v6140_v5, %v473_v52  ;;  %v482_v23 = vsub.f32 1.5, %v481_v58  ;;  %v6303_v58 = vld [vmem:[%s10955_s1 + $0x168] sm:$0xff] }
  0x42   :  { %v327_v14 = vadd.f32 %v326_v12, %v325_v13  ;;  %v603_v3 = vmul.f32 %v6197_v29, %v5957_v38  ;;  %v183_v38 = vmul.f32 %v6298_v63, %v6298_v63  ;;  %v184_v29 = vmul.f32 %v6303_v58, %v6303_v58 }
  0x43   :  { %v318_v54 = vadd.f32 %v317_v45, %v316_v41  ;;  %v6239_v37 = vadd.f32 1e-16, %v307_v43  ;;  %v335_v41 = vsel %vm203_vm0, %v180_v36, 0.0  ;;  %v182_v43 = vmul.f32 %v6276_v20, %v6276_v20 }
  0x44   :  { %v328_v25 = vrot.slane %v327_v14, 4  ;;  %v605_v45 = vmul.f32 %v477_v27, %v5982_v56  ;;  %v483_v2 = vmul.f32 %v6188_v57, %v482_v23  ;;  %vm494_vm4 = vweird.f32 %v6214_v16 }
  0x45   :  { %709 = vperm.xlu2 %5268, %v599_v19   ;;  %v319_v60 = vrot.slane %v318_v54, 1  ;;  %v6249_v19 = vld [vmem:[%s10955_s1 + $0x140] sm:$0xff]  ;;  %5283 = vrsqrt.f32 %v6239_v37  ;;  %v6271_v21 = vpop.eup %5281  ;;  %v339_v52 = vsel %vm203_vm0, %v182_v43, 0.0  ;;  %vm504_vm7 = vweird.f32 %v6239_v37 }
  0x46   :  { %v179_v22 = vmul.f32 %v6249_v19, %v6249_v19  ;;  %v329_v5 = vadd.f32 %v328_v25, %v327_v14  ;;  %v489_v15 = vmul.f32 %v6271_v21, %v6214_v16  ;;  %v6322_v14 = vld [vmem:[%s10955_s1 + $0x178] sm:$0xff]  ;;  %v347_v25 = vsel %vm203_vm0, %v183_v38, 0.0  ;;  %v6352_v16 = vld [vmem:[%s10955_s1 + $0x180] sm:$0xff] }
  0x47   :  { %704 = vperm.xlu1 %5267, %v598_v28   ;;  %699 = vperm.xlu0 %5266, %v597_v1   ;;  %v6265_v28 = vld [vmem:[%s10955_s1 + $0x150] sm:$0xff]  ;;  %v320_v1 = vadd.f32 %v319_v60, %v318_v54  ;;  %v604_v54 = vmul.f32 %v477_v27, %v5977_v55  ;;  %v487_v60 = vsel %vm486_vm3, %v6188_v57, %v483_v2  ;;  %vm495_vm5 = vweird.f32 %v6271_v21 }
  0x48   :  { %v181_v32 = vmul.f32 %v6265_v28, %v6265_v28  ;;  %v334_v34 = vsel %vm203_vm0, %v179_v22, 0.0  ;;  %v330_v56 = vrot.slane %v329_v5, 2  ;;  %v6308_v55 = vld [vmem:[%s10955_s1 + $0x170] sm:$0xff]  ;;  %v490_v12 = vmul.f32 %v6271_v21, %v489_v15  ;;  %vm496_vm6 = vmor %vm494_vm4, %vm495_vm5 }
  0x49   :  { %v336_v7 = vadd.f32 %v335_v41, %v334_v34  ;;  %v185_v36 = vmul.f32 %v6308_v55, %v6308_v55  ;;  %v608_v57 = vmul.f32 %v487_v60, %v6012_v39  ;;  %v186_v23 = vmul.f32 %v6322_v14, %v6322_v14 }
  0x4a   :  { %v337_v49 = vsel %vm203_vm0, %v181_v32, 0.0  ;;  %v607_v32 = vmul.f32 %v477_v27, %v6002_v18  ;;  %v491_v34 = vmul.f32 0.5, %v490_v12  ;;  %v610_v38 = vmul.f32 %v487_v60, %v6026_v48  ;;  %v6357_v48 = vld [vmem:[%s10955_s1 + $0x188] sm:$0xff] }
  0x4b   :  { %v338_v51 = vadd.f32 %v337_v49, %v336_v7  ;;  %v6290_v61 = vpop.eup %5283  ;;  %v606_v7 = vmul.f32 %v477_v27, %v5991_v0  ;;  %v350_v2 = vsel %vm203_vm0, %v185_v36, 0.0 }
  0x4c   :  { %vm505_vm8 = vweird.f32 %v6290_v61 }
  0x4d   :  { %724 = vperm.xlu2 %5268, %v602_v4   ;;  %v6287_v4 = vadd.f32 1e-16, %v320_v1  ;;  %v340_v13 = vadd.f32 %v339_v52, %v338_v51  ;;  %v348_v1 = vsel %vm203_vm0, %v184_v29, 0.0  ;;  %v352_v51 = vsel %vm203_vm0, %v186_v23, 0.0  ;;  %v6368_v23 = vld [vmem:[%s10955_s1 + $0x190] sm:$0xff]  ;;  %vm506_vm9 = vmor %vm504_vm7, %vm505_vm8 }
  0x4e   :  { %v492_v52 = vsub.f32 1.5, %v491_v34 }
  0x4f   :  { %719 = vperm.xlu1 %5267, %v601_v62   ;;  %714 = vperm.xlu0 %5266, %v600_v10   ;;  %5285 = vrsqrt.f32 %v6287_v4  ;;  %v499_v62 = vmul.f32 %v6290_v61, %v6239_v37  ;;  %v331_v10 = vadd.f32 %v330_v56, %v329_v5  ;;  %v341_v22 = vrot.slane %v340_v13, 4 }
  0x50   :  { %v349_v5 = vadd.f32 %v348_v1, %v347_v25  ;;  %v493_v29 = vmul.f32 %v6271_v21, %v492_v52  ;;  %v189_v1 = vmul.f32 %v6368_v23, %v6368_v23  ;;  %vm514_vm10 = vweird.f32 %v6287_v4 }
  0x51   :  { %v342_v41 = vadd.f32 %v341_v22, %v340_v13  ;;  %v500_v43 = vmul.f32 %v6290_v61, %v499_v62  ;;  %v611_v13 = vmul.f32 %v487_v60, %v6035_v59  ;;  %v609_v62 = vmul.f32 %v487_v60, %v6017_v40 }
  0x52   :  { %v351_v15 = vadd.f32 %v350_v2, %v349_v5  ;;  %v187_v40 = vmul.f32 %v6352_v16, %v6352_v16  ;;  %v188_v60 = vmul.f32 %v6357_v48, %v6357_v48  ;;  %v497_v25 = vsel %vm496_vm6, %v6271_v21, %v493_v29 }
  0x53   :  { %v343_v49 = vrot.slane %v342_v41, 2  ;;  %v501_v18 = vmul.f32 0.5, %v500_v43  ;;  %v614_v2 = vmul.f32 %v497_v25, %v6072_v53  ;;  %v612_v52 = vmul.f32 %v497_v25, %v6053_v46  ;;  %v6400_v53 = vld [vmem:[%s10955_s1 + $0x1a8] sm:$0xff] }
  0x54   :  { %v361_v5 = vsel %vm203_vm0, %v188_v60, 0.0 }
  0x55   :  { %739 = vperm.xlu2 %5268, %v605_v45   ;;  %v332_v45 = vrot.slane %v331_v10, 1  ;;  %v6335_v39 = vpop.eup %5285  ;;  %v502_v22 = vsub.f32 1.5, %v501_v18 }
  0x56   :  { %v509_v0 = vmul.f32 %v6335_v39, %v6287_v4  ;;  %vm515_vm11 = vweird.f32 %v6335_v39 }
  0x57   :  { %734 = vperm.xlu1 %5267, %v604_v54   ;;  %729 = vperm.xlu0 %5266, %v603_v3   ;;  %v353_v54 = vadd.f32 %v352_v51, %v351_v15  ;;  %v333_v27 = vadd.f32 %v332_v45, %v331_v10  ;;  %v344_v3 = vadd.f32 %v343_v49, %v342_v41  ;;  %v6379_v41 = vld [vmem:[%s10955_s1 + $0x198] sm:$0xff]  ;;  %v363_v45 = vsel %vm203_vm0, %v189_v1, 0.0  ;;  %vm516_vm12 = vmor %vm514_vm10, %vm515_vm11 }
  0x58   :  { %v510_v36 = vmul.f32 %v6335_v39, %v509_v0  ;;  %v503_v34 = vmul.f32 %v6290_v61, %v502_v22  ;;  %v613_v15 = vmul.f32 %v497_v25, %v6058_v47  ;;  %v6423_v22 = vld [vmem:[%s10955_s1 + $0x1b8] sm:$0xff] }
  0x59   :  { %v354_v56 = vrot.slane %v353_v54, 4  ;;  %v6347_v10 = vadd.f32 1e-16, %v333_v27  ;;  %v345_v59 = vrot.slane %v344_v3, 1  ;;  %v6395_v27 = vld [vmem:[%s10955_s1 + $0x1a0] sm:$0xff] }
  0x5a   :  { %v511_v37 = vmul.f32 0.5, %v510_v36  ;;  %v191_v46 = vmul.f32 %v6395_v27, %v6395_v27 }
  0x5b   :  { %v355_v12 = vadd.f32 %v354_v56, %v353_v54  ;;  %5287 = vrsqrt.f32 %v6347_v10  ;;  %v346_v21 = vadd.f32 %v345_v59, %v344_v3  ;;  %v6389_v54 = vsel %vm506_vm9, %v6290_v61, %v503_v34 }
  0x5c   :  { %v512_v18 = vsub.f32 1.5, %v511_v37  ;;  %v192_v61 = vmul.f32 %v6400_v53, %v6400_v53  ;;  %v617_v29 = vmul.f32 %v6389_v54, %v6103_v11  ;;  %v373_v59 = vsel %vm203_vm0, %v191_v46, 0.0 }
  0x5d   :  { %754 = vperm.xlu2 %5268, %v608_v57   ;;  %v356_v57 = vrot.slane %v355_v12, 2  ;;  %v6402_v47 = vadd.f32 1e-16, %v346_v21  ;;  %v616_v37 = vmul.f32 %v6389_v54, %v6098_v30  ;;  %vm524_vm13 = vweird.f32 %v6347_v10 }
  0x5e   :  { %v374_v60 = vsel %vm203_vm0, %v192_v61, 0.0 }
  0x5f   :  { %749 = vperm.xlu1 %5267, %v607_v32   ;;  %744 = vperm.xlu0 %5266, %v606_v7   ;;  %v360_v32 = vsel %vm203_vm0, %v187_v40, 0.0  ;;  %v190_v7 = vmul.f32 %v6379_v41, %v6379_v41  ;;  %v357_v49 = vadd.f32 %v356_v57, %v355_v12  ;;  %v513_v12 = vmul.f32 %v6335_v39, %v512_v18 }
  0x60   :  { %v362_v43 = vadd.f32 %v361_v5, %v360_v32  ;;  %5289 = vrsqrt.f32 %v6402_v47  ;;  %v194_v40 = vmul.f32 %v6423_v22, %v6423_v22  ;;  %v375_v32 = vadd.f32 %v374_v60, %v373_v59 }
  0x61   :  { %v365_v0 = vsel %vm203_vm0, %v190_v7, 0.0  ;;  %v6408_v56 = vpop.eup %5287  ;;  %v615_v5 = vmul.f32 %v497_v25, %v6077_v6  ;;  %v517_v25 = vsel %vm516_vm12, %v6335_v39, %v513_v12  ;;  %v6475_v39 = vld [vmem:[%s10955_s1 + $0x1d8] sm:$0xff]  ;;  %v619_v60 = vmul.f32 %v6389_v54, %v6119_v42 }
  0x62   :  { %v364_v51 = vadd.f32 %v363_v45, %v362_v43  ;;  %v519_v11 = vmul.f32 %v6408_v56, %v6347_v10  ;;  %v378_v7 = vsel %vm203_vm0, %v194_v40, 0.0  ;;  %v6446_v43 = vld [vmem:[%s10955_s1 + $0x1c0] sm:$0xff]  ;;  %v6451_v45 = vld [vmem:[%s10955_s1 + $0x1c8] sm:$0xff]  ;;  %v198_v12 = vmul.f32 %v6475_v39, %v6475_v39 }
  0x63   :  { %v195_v30 = vmul.f32 %v6446_v43, %v6446_v43  ;;  %v196_v6 = vmul.f32 %v6451_v45, %v6451_v45  ;;  %vm525_vm14 = vweird.f32 %v6408_v56  ;;  %vm534_vm1 = vweird.f32 %v6402_v47 }
  0x64   :  { %v366_v3 = vadd.f32 %v365_v0, %v364_v51  ;;  %v520_v4 = vmul.f32 %v6408_v56, %v519_v11  ;;  %vm526_vm15 = vmor %vm524_vm13, %vm525_vm14 }
  0x65   :  { %769 = vperm.xlu2 %5268, %v611_v13   ;;  %v358_v13 = vrot.slane %v357_v49, 1  ;;  %v386_v0 = vsel %vm203_vm0, %v195_v30, 0.0 }
  0x66   :  { %v6466_v51 = vpop.eup %5289  ;;  %v521_v61 = vmul.f32 0.5, %v520_v4 }
  0x67   :  { %764 = vperm.xlu1 %5267, %v610_v38   ;;  %759 = vperm.xlu0 %5266, %v609_v62   ;;  %v6413_v38 = vld [vmem:[%s10955_s1 + $0x1b0] sm:$0xff]  ;;  %v367_v62 = vrot.slane %v366_v3, 4  ;;  %v359_v57 = vadd.f32 %v358_v13, %v357_v49  ;;  %v529_v59 = vmul.f32 %v6466_v51, %v6402_v47  ;;  %vm535_vm2 = vweird.f32 %v6466_v51 }
  0x68   :  { %v193_v36 = vmul.f32 %v6413_v38, %v6413_v38  ;;  %vm536_vm3 = vmor %vm534_vm1, %vm535_vm2 }
  0x69   :  { %v368_v1 = vadd.f32 %v367_v62, %v366_v3  ;;  %v6459_v49 = vadd.f32 1e-16, %v359_v57  ;;  %v387_v3 = vsel %vm203_vm0, %v196_v6, 0.0  ;;  %v620_v62 = vmul.f32 %v517_v25, %v6145_v9 }
  0x6a   :  { %v376_v34 = vsel %vm203_vm0, %v193_v36, 0.0  ;;  %v388_v46 = vadd.f32 %v387_v3, %v386_v0  ;;  %v618_v57 = vmul.f32 %v6389_v54, %v6110_v8  ;;  %v623_v54 = vmul.f32 %v517_v25, %v6163_v35  ;;  %v6508_v35 = vld [vmem:[%s10955_s1 + $0x1e8] sm:$0xff] }
  0x6b   :  { %v377_v21 = vadd.f32 %v376_v34, %v375_v32  ;;  %5291 = vrsqrt.f32 %v6459_v49  ;;  %v522_v32 = vsub.f32 1.5, %v521_v61  ;;  %v622_v6 = vmul.f32 %v517_v25, %v6158_v24 }
  0x6c   :  { %vm544_vm4 = vweird.f32 %v6459_v49 }
  0x6d   :  { %784 = vperm.xlu2 %5268, %v614_v2   ;;  %v369_v2 = vrot.slane %v368_v1, 2  ;;  %v523_v8 = vmul.f32 %v6408_v56, %v522_v32 }
  0x6f   :  { %779 = vperm.xlu1 %5267, %v613_v15   ;;  %774 = vperm.xlu0 %5266, %v612_v52   ;;  %v6464_v15 = vld [vmem:[%s10955_s1 + $0x1d0] sm:$0xff]  ;;  %v379_v52 = vadd.f32 %v378_v7, %v377_v21  ;;  %v370_v13 = vadd.f32 %v369_v2, %v368_v1  ;;  %v391_v1 = vsel %vm203_vm0, %v198_v12, 0.0  ;;  %v527_v0 = vsel %vm526_vm15, %v6408_v56, %v523_v8 }
  0x70   :  { %v197_v18 = vmul.f32 %v6464_v15, %v6464_v15 }
  0x71   :  { %v371_v34 = vrot.slane %v370_v13, 1  ;;  %v6492_v7 = vpop.eup %5291 }
  0x72   :  { %v389_v36 = vsel %vm203_vm0, %v197_v18, 0.0  ;;  %v539_v10 = vmul.f32 %v6492_v7, %v6459_v49  ;;  %v6503_v18 = vld [vmem:[%s10955_s1 + $0x1e0] sm:$0xff]  ;;  %vm545_vm5 = vweird.f32 %v6492_v7 }
  0x73   :  { %v390_v40 = vadd.f32 %v389_v36, %v388_v46  ;;  %v372_v42 = vadd.f32 %v371_v34, %v370_v13  ;;  %v199_v24 = vmul.f32 %v6503_v18, %v6503_v18  ;;  %v6531_v36 = vld [vmem:[%s10955_s1 + $0x1f8] sm:$0xff] }
  0x75   :  { %799 = vperm.xlu2 %5268, %v617_v29   ;;  %v380_v29 = vrot.slane %v379_v52, 4  ;;  %v392_v9 = vadd.f32 %v391_v1, %v390_v40  ;;  %v6511_v3 = vadd.f32 1e-16, %v372_v42  ;;  %v202_v40 = vmul.f32 %v6531_v36, %v6531_v36 }
  0x77   :  { %794 = vperm.xlu1 %5267, %v616_v37   ;;  %789 = vperm.xlu0 %5266, %v615_v5   ;;  %v381_v11 = vadd.f32 %v380_v29, %v379_v52  ;;  %v530_v5 = vmul.f32 %v6466_v51, %v529_v59  ;;  %v393_v21 = vrot.slane %v392_v9, 4  ;;  %v621_v52 = vmul.f32 %v517_v25, %v6152_v17  ;;  %v6516_v17 = vld [vmem:[%s10955_s1 + $0x1f0] sm:$0xff] }
  0x78   :  { %v200_v25 = vmul.f32 %v6508_v35, %v6508_v35  ;;  %v540_v29 = vmul.f32 %v6492_v7, %v539_v10  ;;  %v201_v56 = vmul.f32 %v6516_v17, %v6516_v17  ;;  %v399_v59 = vsel %vm203_vm0, %v199_v24, 0.0 }
  0x79   :  { %v382_v37 = vrot.slane %v381_v11, 2  ;;  %v394_v2 = vadd.f32 %v393_v21, %v392_v9  ;;  %v531_v30 = vmul.f32 0.5, %v530_v5  ;;  %5293 = vrsqrt.f32 %v6511_v3 }
  0x7a   :  { %v402_v1 = vsel %vm203_vm0, %v201_v56, 0.0  ;;  %v541_v34 = vmul.f32 0.5, %v540_v29  ;;  %v625_v9 = vmul.f32 %v527_v0, %v6207_v26  ;;  %v404_v5 = vsel %vm203_vm0, %v202_v40, 0.0 }
  0x7b   :  { %v383_v4 = vadd.f32 %v382_v37, %v381_v11  ;;  %v395_v61 = vrot.slane %v394_v2, 2  ;;  %v532_v13 = vsub.f32 1.5, %v531_v30  ;;  %v400_v11 = vsel %vm203_vm0, %v200_v25, 0.0  ;;  %vm546_vm0 = vmor %vm544_vm4, %vm545_vm5 }
  0x7c   :  { %v624_v37 = vmul.f32 %v527_v0, %v6202_v33  ;;  %vm554_vm6 = vweird.f32 %v6511_v3 }
  0x7d   :  { %814 = vperm.xlu2 %5268, %v620_v62   ;;  %v384_v46 = vrot.slane %v383_v4, 1  ;;  %v626_v62 = vmul.f32 %v527_v0, %v6219_v44  ;;  %v396_v44 = vadd.f32 %v395_v61, %v394_v2  ;;  %v533_v32 = vmul.f32 %v6466_v51, %v532_v13 }
  0x7e   :  { %v542_v2 = vsub.f32 1.5, %v541_v34  ;;  %v627_v61 = vmul.f32 %v527_v0, %v6232_v50 }
  0x7f   :  { %809 = vperm.xlu1 %5267, %v619_v60   ;;  %804 = vperm.xlu0 %5266, %v618_v57   ;;  %v385_v60 = vadd.f32 %v384_v46, %v383_v4  ;;  %v401_v57 = vadd.f32 %v400_v11, %v399_v59  ;;  %v397_v8 = vrot.slane %v396_v44, 1  ;;  %v537_v4 = vsel %vm536_vm3, %v6466_v51, %v533_v32 }
  0x80   :  { %v629_v33 = vmul.f32 %v537_v4, %v6254_v31  ;;  %v628_v46 = vmul.f32 %v537_v4, %v6249_v19  ;;  %v631_v0 = vmul.f32 %v537_v4, %v6276_v20  ;;  %v630_v59 = vmul.f32 %v537_v4, %v6265_v28 }
  0x81   :  { %v403_v47 = vadd.f32 %v402_v1, %v401_v57  ;;  %v6545_v21 = vadd.f32 1e-16, %v385_v60  ;;  %v398_v10 = vadd.f32 %v397_v8, %v396_v44  ;;  %vm1036_vm3 = vcmask 195584  }
  0x83   :  { %v405_v42 = vadd.f32 %v404_v5, %v403_v47  ;;  %5295 = vrsqrt.f32 %v6545_v21  ;;  %v6558_v24 = vadd.f32 1e-16, %v398_v10  ;;  %vm564_vm9 = vweird.f32 %v6545_v21 }
  0x85   :  { %829 = vperm.xlu2 %5268, %v623_v54   ;;  %v5294_v54 = vpop.eup %5293  ;;  %v406_v26 = vrot.slane %v405_v42, 4  ;;  %5297 = vrsqrt.f32 %v6558_v24  ;;  %vm574_vm12 = vweird.f32 %v6558_v24 }
  0x86   :  { %v549_v51 = vmul.f32 %v5294_v54, %v6511_v3  ;;  %vm555_vm7 = vweird.f32 %v5294_v54 }
  0x87   :  { %824 = vperm.xlu1 %5267, %v622_v6   ;;  %819 = vperm.xlu0 %5266, %v621_v52   ;;  %v6525_v12 = vpop.permute.xlu2 %674  ;;  %v407_v6 = vadd.f32 %v406_v26, %v405_v42  ;;  %v543_v52 = vmul.f32 %v6492_v7, %v542_v2  ;;  %vm556_vm8 = vmor %vm554_vm6, %vm555_vm7 }
  0x88   :  { %v550_v31 = vmul.f32 %v5294_v54, %v549_v51 }
  0x89   :  { %v408_v49 = vrot.slane %v407_v6, 2  ;;  %v547_v25 = vsel %vm546_vm0, %v6492_v7, %v543_v52  ;;  %v5296_v13 = vpop.eup %5295 }
  0x8a   :  { %v632_v56 = vmul.f32 %v547_v25, %v6298_v63  ;;  %v559_v50 = vmul.f32 %v5296_v13, %v6545_v21  ;;  %v635_v20 = vmul.f32 %v547_v25, %v6322_v14  ;;  %vm565_vm10 = vweird.f32 %v5296_v13 }
  0x8b   :  { %v409_v19 = vadd.f32 %v408_v49, %v407_v6  ;;  %v5298_v60 = vpop.eup %5297  ;;  %vm566_vm11 = vmor %vm564_vm9, %vm565_vm10 }
  0x8c   :  { %v560_v40 = vmul.f32 %v5296_v13, %v559_v50  ;;  %v569_v34 = vmul.f32 %v5298_v60, %v6558_v24  ;;  %vm575_vm13 = vweird.f32 %v5298_v60 }
  0x8d   :  { %844 = vperm.xlu2 %5268, %v626_v62   ;;  %v551_v62 = vmul.f32 0.5, %v550_v31  ;;  %v410_v7 = vrot.slane %v409_v19, 1  ;;  %vm576_vm14 = vmor %vm574_vm12, %vm575_vm13 }
  0x8e   :  { %v561_v32 = vmul.f32 0.5, %v560_v40  ;;  %v570_v8 = vmul.f32 %v5298_v60, %v569_v34  ;;  %v17_v40 = vld [vmem:[%s10956_s0 + $0x30] sm:$0xff] }
  0x8f   :  { %839 = vperm.xlu1 %5267, %v625_v9   ;;  %834 = vperm.xlu0 %5266, %v624_v37   ;;  %v6548_v30 = vpop.permute.xlu2 %679  ;;  %v552_v11 = vsub.f32 1.5, %v551_v62  ;;  %v411_v1 = vadd.f32 %v410_v7, %v409_v19  ;;  %v634_v9 = vmul.f32 %v547_v25, %v6308_v55  ;;  %v633_v37 = vmul.f32 %v547_v25, %v6303_v58 }
  0x90   :  { %v562_v5 = vsub.f32 1.5, %v561_v32  ;;  %v571_v2 = vmul.f32 0.5, %v570_v8 }
  0x91   :  { %v553_v28 = vmul.f32 %v5294_v54, %v552_v11  ;;  %v427_v47 = vadd.f32 1e-16, %v411_v1 }
  0x92   :  { %v563_v58 = vmul.f32 %v5296_v13, %v562_v5  ;;  %v572_v10 = vsub.f32 1.5, %v571_v2 }
  0x93   :  { %v557_v3 = vsel %vm556_vm8, %v5294_v54, %v553_v28  ;;  %5299 = vrsqrt.f32 %v427_v47  ;;  %vm584_vm15 = vweird.f32 %v427_v47 }
  0x94   :  { %v638_v55 = vmul.f32 %v557_v3, %v6368_v23  ;;  %v637_v54 = vmul.f32 %v557_v3, %v6357_v48  ;;  %v636_v26 = vmul.f32 %v557_v3, %v6352_v16  ;;  %v573_v48 = vmul.f32 %v5298_v60, %v572_v10 }
  0x95   :  { %859 = vperm.xlu2 %5268, %v629_v33   ;;  %v567_v33 = vsel %vm566_vm11, %v5296_v13, %v563_v58 }
  0x96   :  { %v641_v51 = vmul.f32 %v567_v33, %v6400_v53  ;;  %v640_v16 = vmul.f32 %v567_v33, %v6395_v27  ;;  %v577_v49 = vsel %vm576_vm14, %v5298_v60, %v573_v48  ;;  %v643_v19 = vmul.f32 %v567_v33, %v6423_v22  ;;  %v6617_v22 = vld [vmem:[%s10956_s0 + $0x28] sm:$0xff]  ;;  %v27_v48 = vld [vmem:[%s10956_s0 + $0x80] sm:$0xff] }
  0x97   :  { %854 = vperm.xlu1 %5267, %v628_v46   ;;  %849 = vperm.xlu0 %5266, %v627_v61   ;;  %v6561_v29 = vpop.permute.xlu2 %694  ;;  %v639_v61 = vmul.f32 %v557_v3, %v6379_v41  ;;  %v642_v27 = vmul.f32 %v567_v33, %v6413_v38  ;;  %v645_v11 = vmul.f32 %v577_v49, %v6451_v45  ;;  %v6612_v38 = vld [vmem:[%s10956_s0 + $0x20] sm:$0xff]  ;;  %v6627_v45 = vld [vmem:[%s10956_s0 + $0x8] sm:$0xff]  ;;  %v6679_v33 = vld [vmem:[%s10956_s0 + $0x18] sm:$0xff] }
  0x98   :  { %v976_v60 = vmul.f32 %v6525_v12, %v6612_v38  ;;  %v6646_v12 = vld [vmem:[%s10956_s0 + $0x10] sm:$0xff] }
  0x99   :  { %v5300_v6 = vpop.eup %5299 }
  0x9a   :  { %v579_v46 = vmul.f32 %v5300_v6, %v427_v47  ;;  %vm585_vm1 = vweird.f32 %v5300_v6  ;;  %v1050_v3 = vsel %vm1036_vm3, %v976_v60, 0.0  ;;  %v31_v60 = vld [vmem:[%s10956_s0 + $0xa0] sm:$0xff] }
  0x9b   :  { %vm586_vm2 = vmor %vm584_vm15, %vm585_vm1 }
  0x9c   :  { %v580_v25 = vmul.f32 %v5300_v6, %v579_v46 }
  0x9d   :  { %874 = vperm.xlu2 %5268, %v632_v56   ;;  %v644_v56 = vmul.f32 %v577_v49, %v6446_v43  ;;  %v646_v43 = vmul.f32 %v577_v49, %v6464_v15 }
  0x9e   :  { %v581_v53 = vmul.f32 0.5, %v580_v25 }
  0x9f   :  { %869 = vperm.xlu1 %5267, %v631_v0   ;;  %864 = vperm.xlu0 %5266, %v630_v59   ;;  %v6568_v44 = vpop.permute.xlu2 %709  ;;  %v647_v59 = vmul.f32 %v577_v49, %v6475_v39  ;;  %v6622_v39 = vld [vmem:[%s10956_s0] sm:$0xff] }
  0xa0   :  { %v582_v41 = vsub.f32 1.5, %v581_v53  ;;  %v29_v53 = vld [vmem:[%s10956_s0 + $0x90] sm:$0xff] }
  0xa1   :  { %v6571_v63 = vpop.permute.xlu1 %664  ;;  %v6573_v57 = vpop.permute.xlu0 %654 }
  0xa2   :  { %v583_v7 = vmul.f32 %v5300_v6, %v582_v41  ;;  %v972_v1 = vmul.f32 %v6573_v57, %v6622_v39  ;;  %v974_v58 = vmul.f32 %v6571_v63, %v6646_v12  ;;  %v26_v41 = vld [vmem:[%s10956_s0 + $0x78] sm:$0xff] }
  0xa4   :  { %v587_v15 = vsel %vm586_vm2, %v5300_v6, %v583_v7  ;;  %v1037_v8 = vsel %vm1036_vm3, %v972_v1, 0.0  ;;  %v1040_v25 = vsel %vm1036_vm3, %v974_v58, 0.0 }
  0xa5   :  { %889 = vperm.xlu2 %5268, %v635_v20   ;;  %v977_v20 = vmul.f32 %v6548_v30, %v6617_v22  ;;  %v649_v30 = vmul.f32 %v587_v15, %v6508_v35  ;;  %v648_v57 = vmul.f32 %v587_v15, %v6503_v18  ;;  %v24_v18 = vld [vmem:[%s10956_s0 + $0x68] sm:$0xff]  ;;  %v23_v35 = vld [vmem:[%s10956_s0 + $0x60] sm:$0xff] }
  0xa7   :  { %884 = vperm.xlu1 %5267, %v634_v9   ;;  %879 = vperm.xlu0 %5266, %v633_v37   ;;  %v6579_v42 = vpop.permute.xlu2 %724  ;;  %v650_v9 = vmul.f32 %v587_v15, %v6516_v17  ;;  %v1051_v5 = vsel %vm1036_vm3, %v977_v20, 0.0 }
  0xa9   :  { %v6582_v14 = vpop.permute.xlu1 %669  ;;  %v6584_v4 = vpop.permute.xlu0 %659 }
  0xaa   :  { %v973_v28 = vmul.f32 %v6584_v4, %v6627_v45  ;;  %v6657_v4 = vld [vmem:[%s10956_s0 + $0x38] sm:$0xff] }
  0xac   :  { %v1038_v17 = vsel %vm1036_vm3, %v973_v28, 0.0 }
  0xad   :  { %904 = vperm.xlu2 %5268, %v638_v55   ;;  %v20_v55 = vld [vmem:[%s10956_s0 + $0x48] sm:$0xff]  ;;  %v1039_v10 = vadd.f32 %v1038_v17, %v1037_v8 }
  0xaf   :  { %899 = vperm.xlu1 %5267, %v637_v54   ;;  %894 = vperm.xlu0 %5266, %v636_v26   ;;  %v6589_v21 = vpop.permute.xlu2 %739  ;;  %v1052_v54 = vadd.f32 %v1051_v5, %v1050_v3  ;;  %v6674_v26 = vld [vmem:[%s10956_s0 + $0x40] sm:$0xff] }
  0xb0   :  { %v980_v49 = vmul.f32 %v6561_v29, %v6674_v26  ;;  %v6705_v29 = vld [vmem:[%s10956_s0 + $0x50] sm:$0xff] }
  0xb1   :  { %v6592_v23 = vpop.permute.xlu1 %689  ;;  %v685_v52 = vpop.permute.xlu0 %684 }
  0xb2   :  { %v978_v37 = vmul.f32 %v685_v52, %v17_v40  ;;  %v979_v6 = vmul.f32 %v6592_v23, %v6657_v4  ;;  %v975_v23 = vmul.f32 %v6582_v14, %v6679_v33  ;;  %v651_v14 = vmul.f32 %v587_v15, %v6531_v36 }
  0xb3   :  { %v1063_v1 = vsel %vm1036_vm3, %v980_v49, 0.0  ;;  %v34_v49 = vld [vmem:[%s10956_s0 + $0xb8] sm:$0xff] }
  0xb4   :  { %v1053_v2 = vsel %vm1036_vm3, %v978_v37, 0.0  ;;  %v1042_v28 = vsel %vm1036_vm3, %v975_v23, 0.0 }
  0xb5   :  { %919 = vperm.xlu2 %5268, %v641_v51   ;;  %v1054_v46 = vadd.f32 %v1053_v2, %v1052_v54 }
  0xb7   :  { %914 = vperm.xlu1 %5267, %v640_v16   ;;  %909 = vperm.xlu0 %5266, %v639_v61   ;;  %v6597_v31 = vpop.permute.xlu2 %754 }
  0xb8   :  { %v992_v5 = vmul.f32 %v6597_v31, %v31_v60 }
  0xb9   :  { %v6599_v24 = vpop.permute.xlu1 %704  ;;  %v700_v13 = vpop.permute.xlu0 %699 }
  0xba   :  { %v981_v63 = vmul.f32 %v700_v13, %v20_v55  ;;  %v28_v13 = vld [vmem:[%s10956_s0 + $0x88] sm:$0xff] }
  0xbb   :  { %v989_v36 = vmul.f32 %v6589_v21, %v28_v13  ;;  %v32_v21 = vld [vmem:[%s10956_s0 + $0xa8] sm:$0xff] }
  0xbd   :  { %934 = vperm.xlu2 %5268, %v644_v56   ;;  %v6692_v56 = vld [vmem:[%s10956_s0 + $0x70] sm:$0xff]  ;;  %v1090_v8 = vsel %vm1036_vm3, %v989_v36, 0.0 }
  0xbe   :  { %v986_v40 = vmul.f32 %v6579_v42, %v6692_v56 }
  0xbf   :  { %929 = vperm.xlu1 %5267, %v643_v19   ;;  %924 = vperm.xlu0 %5266, %v642_v27   ;;  %v6604_v62 = vpop.permute.xlu2 %769  ;;  %v1041_v19 = vadd.f32 %v1040_v25, %v1039_v10 }
  0xc1   :  { %v720_v50 = vpop.permute.xlu1 %719  ;;  %v715_v0 = vpop.permute.xlu0 %714  ;;  %v1043_v37 = vadd.f32 %v1042_v28, %v1041_v19 }
  0xc2   :  { %v985_v52 = vmul.f32 %v720_v50, %v24_v18  ;;  %v984_v51 = vmul.f32 %v715_v0, %v23_v35  ;;  %v1055_v50 = vsel %vm1036_vm3, %v979_v6, 0.0  ;;  %v1064_v0 = vsel %vm1036_vm3, %v981_v63, 0.0  ;;  %v33_v35 = vld [vmem:[%s10956_s0 + $0xb0] sm:$0xff] }
  0xc3   :  { %v1056_v15 = vadd.f32 %v1055_v50, %v1054_v46 }
  0xc4   :  { %v1076_v7 = vsel %vm1036_vm3, %v984_v51, 0.0  ;;  %v1102_v51 = vsel %vm1036_vm3, %v992_v5, 0.0 }
  0xc5   :  { %949 = vperm.xlu2 %5268, %v647_v59   ;;  %v1077_v59 = vsel %vm1036_vm3, %v985_v52, 0.0  ;;  %v1057_v17 = vrot.slane %v1056_v15, 4  ;;  %v1044_v52 = vrot.slane %v1043_v37, 4 }
  0xc7   :  { %944 = vperm.xlu1 %5267, %v646_v43   ;;  %939 = vperm.xlu0 %5266, %v645_v11   ;;  %v6641_v47 = vpop.permute.xlu2 %784  ;;  %v6720_v11 = vld [vmem:[%s10956_s0 + $0x58] sm:$0xff]  ;;  %v1058_v13 = vadd.f32 %v1057_v17, %v1056_v15  ;;  %v1045_v50 = vadd.f32 %v1044_v52, %v1043_v37 }
  0xc8   :  { %v983_v3 = vmul.f32 %v6568_v44, %v6720_v11 }
  0xc9   :  { %v735_v32 = vpop.permute.xlu1 %734  ;;  %v730_v34 = vpop.permute.xlu0 %729 }
  0xca   :  { %v988_v27 = vmul.f32 %v735_v32, %v27_v48  ;;  %v982_v32 = vmul.f32 %v6599_v24, %v6705_v29  ;;  %v30_v24 = vld [vmem:[%s10956_s0 + $0x98] sm:$0xff] }
  0xcc   :  { %v1089_v42 = vsel %vm1036_vm3, %v988_v27, 0.0  ;;  %v1066_v44 = vsel %vm1036_vm3, %v982_v32, 0.0  ;;  %v37_v32 = vld [vmem:[%s10956_s0 + $0xd0] sm:$0xff] }
  0xcd   :  { %964 = vperm.xlu2 %5268, %v650_v9   ;;  %v987_v9 = vmul.f32 %v730_v34, %v26_v41  ;;  %v1079_v34 = vsel %vm1036_vm3, %v986_v40, 0.0  ;;  %v1091_v31 = vadd.f32 %v1090_v8, %v1089_v42  ;;  %v36_v41 = vld [vmem:[%s10956_s0 + $0xc8] sm:$0xff]  ;;  %v38_v8 = vld [vmem:[%s10956_s0 + $0xd8] sm:$0xff] }
  0xcf   :  { %959 = vperm.xlu1 %5267, %v649_v30   ;;  %954 = vperm.xlu0 %5266, %v648_v57   ;;  %v6715_v43 = vpop.permute.xlu2 %799  ;;  %v1065_v30 = vadd.f32 %v1064_v0, %v1063_v1  ;;  %v1078_v57 = vadd.f32 %v1077_v59, %v1076_v7  ;;  %v1081_v2 = vsel %vm1036_vm3, %v987_v9, 0.0  ;;  %v995_v0 = vmul.f32 %v6604_v62, %v34_v49 }
  0xd0   :  { %v1046_v9 = vrot.slane %v1045_v50, 2 }
  0xd1   :  { %v750_v16 = vpop.permute.xlu1 %749  ;;  %v745_v61 = vpop.permute.xlu0 %744  ;;  %v1067_v10 = vadd.f32 %v1066_v44, %v1065_v30  ;;  %v1080_v6 = vadd.f32 %v1079_v34, %v1078_v57  ;;  %v1107_v37 = vsel %vm1036_vm3, %v995_v0, 0.0  ;;  %v39_v44 = vld [vmem:[%s10956_s0 + $0xe0] sm:$0xff] }
  0xd2   :  { %v990_v20 = vmul.f32 %v745_v61, %v29_v53  ;;  %v991_v63 = vmul.f32 %v750_v16, %v30_v24  ;;  %v1068_v53 = vsel %vm1036_vm3, %v983_v3, 0.0  ;;  %v998_v24 = vmul.f32 %v6641_v47, %v37_v32 }
  0xd3   :  { %v1082_v25 = vadd.f32 %v1081_v2, %v1080_v6  ;;  %v1069_v27 = vadd.f32 %v1068_v53, %v1067_v10 }
  0xd4   :  { %v1092_v55 = vsel %vm1036_vm3, %v990_v20, 0.0  ;;  %v1094_v16 = vsel %vm1036_vm3, %v991_v63, 0.0  ;;  %v1059_v20 = vrot.slane %v1058_v13, 2  ;;  %v1118_v47 = vsel %vm1036_vm3, %v998_v24, 0.0  ;;  %v6786_v63 = vld [vmem:[%s10956_s0 + $0xe8] sm:$0xff] }
  0xd5   :  { %v1093_v48 = vadd.f32 %v1092_v55, %v1091_v31  ;;  %v1083_v40 = vrot.slane %v1082_v25, 4  ;;  %v1070_v30 = vrot.slane %v1069_v27, 4 }
  0xd6   :  { %v1060_v5 = vadd.f32 %v1059_v20, %v1058_v13 }
  0xd7   :  { %969 = vperm.xlu0 %5266, %v651_v14   ;;  %v6756_v19 = vpop.permute.xlu2 %814  ;;  %v35_v14 = vld [vmem:[%s10956_s0 + $0xc0] sm:$0xff]  ;;  %v1095_v59 = vadd.f32 %v1094_v16, %v1093_v48  ;;  %v1071_v17 = vadd.f32 %v1070_v30, %v1069_v27  ;;  %v1001_v27 = vmul.f32 %v6715_v43, %v6786_v63 }
  0xd8   :  { %v1061_v2 = vrot.slane %v1060_v5, 1 }
  0xd9   :  { %v765_v18 = vpop.permute.xlu1 %764  ;;  %v760_v58 = vpop.permute.xlu0 %759  ;;  %v1096_v57 = vrot.slane %v1095_v59, 4 }
  0xda   :  { %v993_v54 = vmul.f32 %v760_v58, %v32_v21  ;;  %v994_v46 = vmul.f32 %v765_v18, %v33_v35  ;;  %v1084_v21 = vadd.f32 %v1083_v40, %v1082_v25  ;;  %v1047_v18 = vadd.f32 %v1046_v9, %v1045_v50 }
  0xdb   :  { %v1097_v35 = vadd.f32 %v1096_v57, %v1095_v59  ;;  %v6810_v57 = vld [vmem:[%s10956_s0 + $0x100] sm:$0xff] }
  0xdc   :  { %v1103_v61 = vsel %vm1036_vm3, %v993_v54, 0.0  ;;  %v1105_v7 = vsel %vm1036_vm3, %v994_v46, 0.0  ;;  %v1085_v54 = vrot.slane %v1084_v21, 2 }
  0xdd   :  { %v1104_v23 = vadd.f32 %v1103_v61, %v1102_v51  ;;  %v1072_v51 = vrot.slane %v1071_v17, 2  ;;  %v1048_v61 = vrot.slane %v1047_v18, 1  ;;  %v1098_v49 = vrot.slane %v1097_v35, 2 }
  0xde   :  { %v1086_v13 = vadd.f32 %v1085_v54, %v1084_v21 }
  0xdf   :  { %v1106_v36 = vadd.f32 %v1105_v7, %v1104_v23  ;;  %v6777_v55 = vpop.permute.xlu2 %829  ;;  %v6789_v23 = vadd.f32 %v1061_v2, %v1060_v5  ;;  %v1073_v50 = vadd.f32 %v1072_v51, %v1071_v17  ;;  %v6800_v59 = vadd.f32 %v1048_v61, %v1047_v18 }
  0xe0   :  { %v1099_v7 = vadd.f32 %v1098_v49, %v1097_v35  ;;  %v1004_v18 = vmul.f32 %v6756_v19, %v6810_v57  ;;  %v6839_v19 = vld [vmem:[%s10956_s0 + $0x118] sm:$0xff] }
  0xe1   :  { %v780_v15 = vpop.permute.xlu1 %779  ;;  %v775_v60 = vpop.permute.xlu0 %774  ;;  %v1108_v3 = vadd.f32 %v1107_v37, %v1106_v36  ;;  %v1246_v43 = vmul.f32 %v6789_v23, %v6789_v23  ;;  %v1074_v37 = vrot.slane %v1073_v50, 1 }
  0xe2   :  { %v997_v1 = vmul.f32 %v780_v15, %v36_v41  ;;  %v996_v28 = vmul.f32 %v775_v60, %v35_v14  ;;  %v42_v41 = vld [vmem:[%s10956_s0 + $0xf8] sm:$0xff]  ;;  %v41_v14 = vld [vmem:[%s10956_s0 + $0xf0] sm:$0xff]  ;;  %v1087_v60 = vrot.slane %v1086_v13, 1  ;;  %v1100_v21 = vrot.slane %v1099_v7, 1 }
  0xe3   :  { %v1109_v10 = vrot.slane %v1108_v3, 4  ;;  %v1264_v24 = vsel %vm1036_vm3, %v1246_v43, 0.0  ;;  %v1141_v49 = vsel %vm1036_vm3, %v1004_v18, 0.0  ;;  %v6865_v43 = vld [vmem:[%s10956_s0 + $0x120] sm:$0xff] }
  0xe4   :  { %v1116_v62 = vsel %vm1036_vm3, %v997_v1, 0.0  ;;  %v1115_v42 = vsel %vm1036_vm3, %v996_v28, 0.0  ;;  %v1129_v1 = vsel %vm1036_vm3, %v1001_v27, 0.0  ;;  %v6834_v54 = vadd.f32 %v1100_v21, %v1099_v7 }
  0xe5   :  { %v1117_v34 = vadd.f32 %v1116_v62, %v1115_v42  ;;  %v1110_v53 = vadd.f32 %v1109_v10, %v1108_v3  ;;  %v1245_v42 = vmul.f32 %v6800_v59, %v6800_v59 }
  0xe7   :  { %v1119_v52 = vadd.f32 %v1118_v47, %v1117_v34  ;;  %v1111_v20 = vrot.slane %v1110_v53, 2  ;;  %v6805_v28 = vpop.permute.xlu2 %844  ;;  %v6816_v34 = vadd.f32 %v1087_v60, %v1086_v13  ;;  %v1261_v2 = vsel %vm1036_vm3, %v1245_v42, 0.0 }
  0xe9   :  { %v795_v58 = vpop.permute.xlu1 %794  ;;  %v790_v31 = vpop.permute.xlu0 %789  ;;  %v1248_v51 = vmul.f32 %v6816_v34, %v6816_v34 }
  0xea   :  { %v999_v6 = vmul.f32 %v790_v31, %v38_v8  ;;  %v1000_v48 = vmul.f32 %v795_v58, %v39_v44  ;;  %v1112_v8 = vadd.f32 %v1111_v20, %v1110_v53  ;;  %v6824_v58 = vld [vmem:[%s10956_s0 + $0x110] sm:$0xff]  ;;  %v6829_v44 = vld [vmem:[%s10956_s0 + $0x108] sm:$0xff]  ;;  %v6831_v31 = vadd.f32 %v1074_v37, %v1073_v50 }
  0xeb   :  { %v1007_v53 = vmul.f32 %v6777_v55, %v6839_v19  ;;  %v6860_v55 = vld [vmem:[%s10956_s0 + $0x128] sm:$0xff] }
  0xec   :  { %v1120_v46 = vsel %vm1036_vm3, %v999_v6, 0.0  ;;  %v1128_v0 = vsel %vm1036_vm3, %v1000_v48, 0.0  ;;  %v1113_v48 = vrot.slane %v1112_v8, 1 }
  0xed   :  { %v1121_v25 = vadd.f32 %v1120_v46, %v1119_v52  ;;  %v1130_v30 = vadd.f32 %v1129_v1, %v1128_v0  ;;  %v1270_v0 = vsel %vm1036_vm3, %v1248_v51, 0.0  ;;  %v1146_v20 = vsel %vm1036_vm3, %v1007_v53, 0.0  ;;  %v6902_v53 = vld [vmem:[%s10956_s0 + $0x140] sm:$0xff] }
  0xee   :  { %v6854_v7 = vadd.f32 %v1113_v48, %v1112_v8 }
  0xef   :  { %v1122_v16 = vrot.slane %v1121_v25, 4  ;;  %v860_v27 = vpop.permute.xlu2 %859 }
  0xf0   :  { %v1250_v42 = vmul.f32 %v6854_v7, %v6854_v7 }
  0xf1   :  { %v1123_v40 = vadd.f32 %v1122_v16, %v1121_v25  ;;  %v810_v36 = vpop.permute.xlu1 %809  ;;  %v805_v15 = vpop.permute.xlu0 %804  ;;  %v1247_v25 = vmul.f32 %v6831_v31, %v6831_v31 }
  0xf2   :  { %v1003_v32 = vmul.f32 %v810_v36, %v42_v41  ;;  %v1002_v9 = vmul.f32 %v805_v15, %v41_v14  ;;  %v1249_v41 = vmul.f32 %v6834_v54, %v6834_v54 }
  0xf3   :  { %v1124_v3 = vrot.slane %v1123_v40, 2  ;;  %v1267_v1 = vsel %vm1036_vm3, %v1247_v25, 0.0 }
  0xf4   :  { %v1131_v62 = vsel %vm1036_vm3, %v1002_v9, 0.0  ;;  %v1133_v17 = vsel %vm1036_vm3, %v1003_v32, 0.0  ;;  %v1273_v32 = vsel %vm1036_vm3, %v1249_v41, 0.0 }
  0xf5   :  { %v1132_v5 = vadd.f32 %v1131_v62, %v1130_v30  ;;  %v1125_v10 = vadd.f32 %v1124_v3, %v1123_v40 }
  0xf6   :  { %1265 = vadd.xlane.f32.xlu2 %v1264_v24  ;;  %v6879_v24 = vld [vmem:[%s10956_s0 + $0x130] sm:$0xff] }
  0xf7   :  { %v1134_v35 = vadd.f32 %v1133_v17, %v1132_v5  ;;  %v1126_v14 = vrot.slane %v1125_v10, 1  ;;  %v875_v51 = vpop.permute.xlu2 %874 }
  0xf9   :  { %v1135_v47 = vrot.slane %v1134_v35, 4  ;;  %v825_v6 = vpop.permute.xlu1 %824  ;;  %v820_v52 = vpop.permute.xlu0 %819  ;;  %1262 = vadd.xlane.f32.xlu1 %v1261_v2  ;;  %v6870_v9 = vadd.f32 %v1126_v14, %v1125_v10  ;;  %v1276_v10 = vsel %vm1036_vm3, %v1250_v42, 0.0 }
  0xfa   :  { %v1006_v46 = vmul.f32 %v825_v6, %v6824_v58  ;;  %v1005_v61 = vmul.f32 %v820_v52, %v6829_v44  ;;  %v1010_v52 = vmul.f32 %v6805_v28, %v6879_v24 }
  0xfb   :  { %v1136_v13 = vadd.f32 %v1135_v47, %v1134_v35  ;;  %v1251_v2 = vmul.f32 %v6870_v9, %v6870_v9 }
  0xfc   :  { %v1142_v16 = vsel %vm1036_vm3, %v1005_v61, 0.0  ;;  %v1144_v36 = vsel %vm1036_vm3, %v1006_v46, 0.0  ;;  %v6895_v46 = vld [vmem:[%s10956_s0 + $0x138] sm:$0xff]  ;;  %v1157_v41 = vsel %vm1036_vm3, %v1010_v52, 0.0  ;;  %v6937_v52 = vld [vmem:[%s10956_s0 + $0x160] sm:$0xff] }
  0xfd   :  { %v1143_v50 = vadd.f32 %v1142_v16, %v1141_v49  ;;  %v1137_v40 = vrot.slane %v1136_v13, 2  ;;  %v1279_v25 = vsel %vm1036_vm3, %v1251_v2, 0.0 }
  0xfe   :  { %1271 = vadd.xlane.f32.xlu2 %v1270_v0 }
  0xff   :  { %v1145_v15 = vadd.f32 %v1144_v36, %v1143_v50  ;;  %v1138_v60 = vadd.f32 %v1137_v40, %v1136_v13  ;;  %v6909_v50 = vld [vmem:[%s10956_s0 + $0x148] sm:$0xff]  ;;  %v890_v42 = vpop.permute.xlu2 %889 }
 0x101   :  { %v1147_v30 = vadd.f32 %v1146_v20, %v1145_v15  ;;  %v840_v37 = vpop.permute.xlu1 %839  ;;  %v835_v62 = vpop.permute.xlu0 %834  ;;  %1268 = vadd.xlane.f32.xlu0 %v1267_v1  ;;  %1274 = vadd.xlane.f32.xlu1 %v1273_v32  ;;  %v1139_v21 = vrot.slane %v1138_v60, 1  ;;  %v1013_v1 = vmul.f32 %v860_v27, %v6909_v50 }
 0x102   :  { %v1009_v3 = vmul.f32 %v840_v37, %v6860_v55  ;;  %v1008_v5 = vmul.f32 %v835_v62, %v6865_v43  ;;  %v6924_v37 = vld [vmem:[%s10956_s0 + $0x150] sm:$0xff] }
 0x103   :  { %v6881_v8 = vadd.f32 %v1139_v21, %v1138_v60  ;;  %v1148_v17 = vrot.slane %v1147_v30, 4 }
 0x104   :  { %v1155_v18 = vsel %vm1036_vm3, %v1009_v3, 0.0  ;;  %v1154_v35 = vsel %vm1036_vm3, %v1008_v5, 0.0 }
 0x105   :  { %v1252_v47 = vmul.f32 %v6881_v8, %v6881_v8  ;;  %v1149_v6 = vadd.f32 %v1148_v17, %v1147_v30  ;;  %v1156_v48 = vadd.f32 %v1155_v18, %v1154_v35  ;;  %v6919_v30 = vld [vmem:[%s10956_s0 + $0x158] sm:$0xff]  ;;  %v1168_v18 = vsel %vm1036_vm3, %v1013_v1, 0.0 }
 0x106   :  { %1277 = vadd.xlane.f32.xlu2 %v1276_v10 }
 0x107   :  { %v1282_v61 = vsel %vm1036_vm3, %v1252_v47, 0.0  ;;  %v1150_v49 = vrot.slane %v1149_v6, 2  ;;  %v1158_v0 = vadd.f32 %v1157_v41, %v1156_v48  ;;  %v1016_v41 = vmul.f32 %v875_v51, %v6937_v52 }
 0x109   :  { %v855_v13 = vpop.permute.xlu1 %854  ;;  %v850_v28 = vpop.permute.xlu0 %849  ;;  %1280 = vadd.xlane.f32.xlu0 %v1279_v25  ;;  %1283 = vadd.xlane.f32.xlu1 %v1282_v61  ;;  %v1151_v16 = vadd.f32 %v1150_v49, %v1149_v6  ;;  %v1180_v51 = vsel %vm1036_vm3, %v1016_v41, 0.0 }
 0x10a   :  { %v1011_v14 = vmul.f32 %v850_v28, %v6895_v46  ;;  %v1012_v36 = vmul.f32 %v855_v13, %v6902_v53  ;;  %v6943_v13 = vld [vmem:[%s10956_s0 + $0x170] sm:$0xff]  ;;  %v6948_v28 = vld [vmem:[%s10956_s0 + $0x168] sm:$0xff] }
 0x10b   :  { %v1152_v40 = vrot.slane %v1151_v16, 1 }
 0x10c   :  { %v1159_v15 = vsel %vm1036_vm3, %v1011_v14, 0.0  ;;  %v1167_v21 = vsel %vm1036_vm3, %v1012_v36, 0.0  ;;  %v6954_v14 = vld [vmem:[%s10956_s0 + $0x178] sm:$0xff] }
 0x10d   :  { %v1160_v60 = vadd.f32 %v1159_v15, %v1158_v0  ;;  %v6913_v20 = vadd.f32 %v1152_v40, %v1151_v16  ;;  %v1169_v10 = vadd.f32 %v1168_v18, %v1167_v21 }
 0x10f   :  { %v1161_v32 = vrot.slane %v1160_v60, 4  ;;  %v1253_v62 = vmul.f32 %v6913_v20, %v6913_v20 }
 0x111   :  { %v1162_v3 = vadd.f32 %v1161_v32, %v1160_v60  ;;  %v870_v5 = vpop.permute.xlu1 %869  ;;  %v865_v27 = vpop.permute.xlu0 %864  ;;  %v1285_v17 = vsel %vm1036_vm3, %v1253_v62, 0.0 }
 0x112   :  { %v1015_v35 = vmul.f32 %v870_v5, %v6919_v30  ;;  %v1014_v2 = vmul.f32 %v865_v27, %v6924_v37  ;;  %1286 = vadd.xlane.f32.xlu2 %v1285_v17  ;;  %v905_v60 = vpop.permute.xlu2 %904 }
 0x113   :  { %v1163_v47 = vrot.slane %v1162_v3, 2 }
 0x114   :  { %v1170_v6 = vsel %vm1036_vm3, %v1014_v2, 0.0  ;;  %v1172_v49 = vsel %vm1036_vm3, %v1015_v35, 0.0 }
 0x115   :  { %v1171_v48 = vadd.f32 %v1170_v6, %v1169_v10  ;;  %v1164_v61 = vadd.f32 %v1163_v47, %v1162_v3  ;;  %v1019_v3 = vmul.f32 %v890_v42, %v6954_v14  ;;  %v6970_v10 = vld [vmem:[%s10956_s0 + $0x188] sm:$0xff]  ;;  %v6975_v47 = vld [vmem:[%s10956_s0 + $0x180] sm:$0xff] }
 0x116   :  { %10986 = vst [vmem:[#allocation2_spill] sm:$0xff] %v6970_v10 }
 0x117   :  { %v1173_v25 = vadd.f32 %v1172_v49, %v1171_v48  ;;  %v1165_v16 = vrot.slane %v1164_v61, 1  ;;  %v1185_v6 = vsel %vm1036_vm3, %v1019_v3, 0.0 }
 0x119   :  { %v1174_v0 = vrot.slane %v1173_v25, 4  ;;  %v885_v40 = vpop.permute.xlu1 %884  ;;  %v880_v36 = vpop.permute.xlu0 %879  ;;  %v6956_v15 = vadd.f32 %v1165_v16, %v1164_v61 }
 0x11a   :  { %v1018_v1 = vmul.f32 %v885_v40, %v6943_v13  ;;  %v1017_v32 = vmul.f32 %v880_v36, %v6948_v28 }
 0x11b   :  { %v1254_v62 = vmul.f32 %v6956_v15, %v6956_v15  ;;  %v1175_v21 = vadd.f32 %v1174_v0, %v1173_v25  ;;  %v6983_v0 = vld [vmem:[%s10956_s0 + $0x190] sm:$0xff] }
 0x11c   :  { %v1181_v5 = vsel %vm1036_vm3, %v1017_v32, 0.0  ;;  %v1183_v35 = vsel %vm1036_vm3, %v1018_v1, 0.0  ;;  %v920_v1 = vpop.permute.xlu2 %919  ;;  %v1022_v3 = vmul.f32 %v905_v60, %v6983_v0 }
 0x11d   :  { %v1182_v27 = vadd.f32 %v1181_v5, %v1180_v51  ;;  %v1288_v17 = vsel %vm1036_vm3, %v1254_v62, 0.0  ;;  %v1176_v18 = vrot.slane %v1175_v21, 2 }
 0x11e   :  { %1289 = vadd.xlane.f32.xlu0 %v1288_v17  ;;  %v6996_v17 = vld [vmem:[%s10956_s0 + $0x198] sm:$0xff]  ;;  %v1196_v60 = vsel %vm1036_vm3, %v1022_v3, 0.0 }
 0x11f   :  { %v1184_v2 = vadd.f32 %v1183_v35, %v1182_v27  ;;  %v1177_v42 = vadd.f32 %v1176_v18, %v1175_v21  ;;  %10987 = vst [vmem:[#allocation3_spill] sm:$0xff] %v6996_v17  ;;  %v7018_v3 = vld [vmem:[%s10956_s0 + $0x1b8] sm:$0xff] }
 0x120   :  { %10990 = vst [vmem:[#allocation6_spill] sm:$0xff] %v7018_v3 }
 0x121   :  { %v1186_v48 = vadd.f32 %v1185_v6, %v1184_v2  ;;  %v900_v61 = vpop.permute.xlu1 %899  ;;  %v895_v49 = vpop.permute.xlu0 %894  ;;  %v1178_v25 = vrot.slane %v1177_v42, 1  ;;  %v7001_v2 = vld [vmem:[%s10956_s0 + $0x1a0] sm:$0xff] }
 0x122   :  { %v1021_v16 = vmul.f32 %v900_v61, %v6970_v10  ;;  %v1020_v41 = vmul.f32 %v895_v49, %v6975_v47  ;;  %10988 = vst [vmem:[#allocation4_spill] sm:$0xff] %v7001_v2  ;;  %v7008_v61 = vld [vmem:[%s10956_s0 + $0x1a8] sm:$0xff] }
 0x123   :  { %v6985_v40 = vadd.f32 %v1178_v25, %v1177_v42  ;;  %v1187_v36 = vrot.slane %v1186_v48, 4  ;;  %10989 = vst [vmem:[#allocation5_spill] sm:$0xff] %v7008_v61 }
 0x124   :  { %v1194_v32 = vsel %vm1036_vm3, %v1021_v16, 0.0  ;;  %v1193_v62 = vsel %vm1036_vm3, %v1020_v41, 0.0 }
 0x125   :  { %v1255_v21 = vmul.f32 %v6985_v40, %v6985_v40  ;;  %v1188_v51 = vadd.f32 %v1187_v36, %v1186_v48  ;;  %v1195_v5 = vadd.f32 %v1194_v32, %v1193_v62  ;;  %v1025_v62 = vmul.f32 %v920_v1, %v7008_v61 }
 0x127   :  { %v1291_v27 = vsel %vm1036_vm3, %v1255_v21, 0.0  ;;  %v1189_v18 = vrot.slane %v1188_v51, 2  ;;  %v1197_v49 = vadd.f32 %v1196_v60, %v1195_v5  ;;  %v935_v21 = vpop.permute.xlu2 %934  ;;  %v7023_v5 = vld [vmem:[%s10956_s0 + $0x1b0] sm:$0xff]  ;;  %v1207_v60 = vsel %vm1036_vm3, %v1025_v62, 0.0 }
 0x128   :  { %1292 = vadd.xlane.f32.xlu1 %v1291_v27  ;;  %10991 = vst [vmem:[#allocation7_spill] sm:$0xff] %v7023_v5  ;;  %v69_v62 = vld [vmem:[%s10956_s0 + $0x1d0] sm:$0xff] }
 0x129   :  { %v915_v35 = vpop.permute.xlu1 %914  ;;  %v910_v42 = vpop.permute.xlu0 %909  ;;  %v1190_v6 = vadd.f32 %v1189_v18, %v1188_v51 }
 0x12a   :  { %v1023_v48 = vmul.f32 %v910_v42, %v6996_v17  ;;  %v1024_v16 = vmul.f32 %v915_v35, %v7001_v2 }
 0x12b   :  { %v1191_v25 = vrot.slane %v1190_v6, 1 }
 0x12c   :  { %v1198_v41 = vsel %vm1036_vm3, %v1023_v48, 0.0  ;;  %v1206_v18 = vsel %vm1036_vm3, %v1024_v16, 0.0  ;;  %v7036_v16 = vld [vmem:[%s10956_s0 + $0x1c0] sm:$0xff] }
 0x12d   :  { %v1199_v36 = vadd.f32 %v1198_v41, %v1197_v49  ;;  %v7012_v32 = vadd.f32 %v1191_v25, %v1190_v6  ;;  %v1208_v25 = vadd.f32 %v1207_v60, %v1206_v18  ;;  %10992 = vst [vmem:[#allocation8_spill] sm:$0xff] %v7036_v16  ;;  %v7045_v18 = vld [vmem:[%s10956_s0 + $0x1c8] sm:$0xff] }
 0x12e   :  { %10993 = vst [vmem:[#allocation9_spill] sm:$0xff] %v7045_v18 }
 0x12f   :  { %v1200_v51 = vrot.slane %v1199_v36, 4  ;;  %v1256_v27 = vmul.f32 %v7012_v32, %v7012_v32 }
 0x131   :  { %v1201_v35 = vadd.f32 %v1200_v51, %v1199_v36  ;;  %v930_v42 = vpop.permute.xlu1 %929  ;;  %v925_v1 = vpop.permute.xlu0 %924  ;;  %v1294_v6 = vsel %vm1036_vm3, %v1256_v27, 0.0 }
 0x132   :  { %v1027_v48 = vmul.f32 %v930_v42, %v7018_v3  ;;  %v1026_v49 = vmul.f32 %v925_v1, %v7023_v5  ;;  %1295 = vadd.xlane.f32.xlu2 %v1294_v6  ;;  %v1028_v1 = vmul.f32 %v935_v21, %v7036_v16  ;;  %v950_v6 = vpop.permute.xlu2 %949 }
 0x133   :  { %v1202_v41 = vrot.slane %v1201_v35, 2 }
 0x134   :  { %v1209_v2 = vsel %vm1036_vm3, %v1026_v49, 0.0  ;;  %v1211_v27 = vsel %vm1036_vm3, %v1027_v48, 0.0  ;;  %v1219_v21 = vsel %vm1036_vm3, %v1028_v1, 0.0 }
 0x135   :  { %v1210_v36 = vadd.f32 %v1209_v2, %v1208_v25  ;;  %v1203_v51 = vadd.f32 %v1202_v41, %v1201_v35  ;;  %v7051_v2 = vld [vmem:[%s10956_s0 + $0x1d8] sm:$0xff] }
 0x136   :  { %10994 = vst [vmem:[#allocation10_spill] sm:$0xff] %v7051_v2  ;;  %v1031_v3 = vmul.f32 %v950_v6, %v7051_v2 }
 0x137   :  { %v1212_v17 = vadd.f32 %v1211_v27, %v1210_v36  ;;  %v1204_v42 = vrot.slane %v1203_v51, 1 }
 0x138   :  { %v1224_v6 = vsel %vm1036_vm3, %v1031_v3, 0.0 }
 0x139   :  { %v1213_v35 = vrot.slane %v1212_v17, 4  ;;  %v945_v60 = vpop.permute.xlu1 %944  ;;  %v940_v48 = vpop.permute.xlu0 %939  ;;  %v7053_v49 = vadd.f32 %v1204_v42, %v1203_v51  ;;  %v72_v42 = vld [vmem:[%s10956_s0 + $0x1e8] sm:$0xff] }
 0x13a   :  { %v1030_v25 = vmul.f32 %v945_v60, %v69_v62  ;;  %v1029_v41 = vmul.f32 %v940_v48, %v7045_v18 }
 0x13b   :  { %v1257_v36 = vmul.f32 %v7053_v49, %v7053_v49  ;;  %v1214_v27 = vadd.f32 %v1213_v35, %v1212_v17  ;;  %v71_v17 = vld [vmem:[%s10956_s0 + $0x1e0] sm:$0xff] }
 0x13c   :  { %v1220_v5 = vsel %vm1036_vm3, %v1029_v41, 0.0  ;;  %v1222_v51 = vsel %vm1036_vm3, %v1030_v25, 0.0  ;;  %v965_v25 = vpop.permute.xlu2 %964 }
 0x13d   :  { %v1221_v16 = vadd.f32 %v1220_v5, %v1219_v21  ;;  %v1297_v61 = vsel %vm1036_vm3, %v1257_v36, 0.0  ;;  %v1215_v10 = vrot.slane %v1214_v27, 2 }
 0x13e   :  { %1298 = vadd.xlane.f32.xlu0 %v1297_v61  ;;  %v7073_v61 = vld [vmem:[%s10956_s0 + $0x1f0] sm:$0xff] }
 0x13f   :  { %v1223_v62 = vadd.f32 %v1222_v51, %v1221_v16  ;;  %v1216_v1 = vadd.f32 %v1215_v10, %v1214_v27  ;;  %10995 = vst [vmem:[#allocation11_spill] sm:$0xff] %v7073_v61 }
 0x141   :  { %v1225_v35 = vadd.f32 %v1224_v6, %v1223_v62  ;;  %v960_v5 = vpop.permute.xlu1 %959  ;;  %v955_v60 = vpop.permute.xlu0 %954  ;;  %v1217_v48 = vrot.slane %v1216_v1, 1  ;;  %v1034_v62 = vmul.f32 %v965_v25, %v7073_v61  ;;  %v74_v6 = vld [vmem:[%s10956_s0 + $0x1f8] sm:$0xff] }
 0x142   :  { %v1033_v41 = vmul.f32 %v960_v5, %v72_v42  ;;  %v1032_v36 = vmul.f32 %v955_v60, %v71_v17 }
 0x143   :  { %v7075_v16 = vadd.f32 %v1217_v48, %v1216_v1  ;;  %v1226_v21 = vrot.slane %v1225_v35, 4  ;;  %v1235_v48 = vsel %vm1036_vm3, %v1034_v62, 0.0 }
 0x144   :  { %v1233_v51 = vsel %vm1036_vm3, %v1033_v41, 0.0  ;;  %v1232_v10 = vsel %vm1036_vm3, %v1032_v36, 0.0 }
 0x145   :  { %v1258_v3 = vmul.f32 %v7075_v16, %v7075_v16  ;;  %v1227_v27 = vadd.f32 %v1226_v21, %v1225_v35  ;;  %v1234_v42 = vadd.f32 %v1233_v51, %v1232_v10 }
 0x147   :  { %v1300_v17 = vsel %vm1036_vm3, %v1258_v3, 0.0  ;;  %v1228_v1 = vrot.slane %v1227_v27, 2  ;;  %v1236_v36 = vadd.f32 %v1235_v48, %v1234_v42 }
 0x148   :  { %1301 = vadd.xlane.f32.xlu1 %v1300_v17 }
 0x149   :  { %v970_v5 = vpop.permute.xlu0 %969  ;;  %v1229_v60 = vadd.f32 %v1228_v1, %v1227_v27 }
 0x14a   :  { %v1035_v41 = vmul.f32 %v970_v5, %v74_v6 }
 0x14b   :  { %v1230_v18 = vrot.slane %v1229_v60, 1 }
 0x14c   :  { %v1237_v35 = vsel %vm1036_vm3, %v1035_v41, 0.0 }
 0x14d   :  { %v1238_v21 = vadd.f32 %v1237_v35, %v1236_v36  ;;  %v7088_v25 = vadd.f32 %v1230_v18, %v1229_v60 }
 0x14f   :  { %10996 = vst [vmem:[#allocation12_spill] sm:$0xff] %v7088_v25  ;;  %v1239_v51 = vrot.slane %v1238_v21, 4  ;;  %v1259_v10 = vmul.f32 %v7088_v25, %v7088_v25 }
 0x151   :  { %v1240_v3 = vadd.f32 %v1239_v51, %v1238_v21  ;;  %v1303_v61 = vsel %vm1036_vm3, %v1259_v10, 0.0 }
 0x152   :  { %1304 = vadd.xlane.f32.xlu2 %v1303_v61 }
 0x153   :  { %v1241_v17 = vrot.slane %v1240_v3, 2 }
 0x155   :  { %v1242_v27 = vadd.f32 %v1241_v17, %v1240_v3 }
 0x157   :  { %v1243_v1 = vrot.slane %v1242_v27, 1 }
 0x159   :  { %v7093_v62 = vadd.f32 %v1243_v1, %v1242_v27 }
 0x15b   :  { %10997 = vst [vmem:[#allocation13_spill] sm:$0xff] %v7093_v62  ;;  %v1260_v42 = vmul.f32 %v7093_v62, %v7093_v62 }
 0x15d   :  { %v1306_v6 = vsel %vm1036_vm3, %v1260_v42, 0.0 }
 0x15e   :  { %1307 = vadd.xlane.f32.xlu0 %v1306_v6 }
 0x169   :  { %v1266_v18 = vpop.xlane.xlu2 %1265 }
 0x16a   :  { %v1310_v5 = vadd.f32 1e-16, %v1266_v18 }
 0x16c   :  { %5301 = vrsqrt.f32 %v1310_v5  ;;  %v1263_v60 = vpop.xlane.xlu1 %1262  ;;  %vm1341_vm7 = vweird.f32 %v1310_v5 }
 0x16d   :  { %v1309_v48 = vadd.f32 1e-16, %v1263_v60 }
 0x16f   :  { %5303 = vrsqrt.f32 %v1309_v48  ;;  %vm1331_vm5 = vweird.f32 %v1309_v48 }
 0x171   :  { %v1272_v17 = vpop.xlane.xlu2 %1271 }
 0x172   :  { %v5302_v41 = vpop.eup %5301  ;;  %v7098_v6 = vadd.f32 1e-16, %v1272_v17 }
 0x173   :  { %v1336_v36 = vmul.f32 %v5302_v41, %v1310_v5  ;;  %vm1342_vm6 = vweird.f32 %v5302_v41 }
 0x174   :  { %v1269_v61 = vpop.xlane.xlu0 %1268  ;;  %vm1343_vm8 = vmor %vm1341_vm7, %vm1342_vm6  ;;  %vm1361_vm13 = vweird.f32 %v7098_v6 }
 0x175   :  { %v5304_v35 = vpop.eup %5303  ;;  %v1311_v21 = vadd.f32 1e-16, %v1269_v61  ;;  %v1337_v51 = vmul.f32 %v5302_v41, %v1336_v36 }
 0x176   :  { %v1326_v10 = vmul.f32 %v5304_v35, %v1309_v48  ;;  %vm1332_vm4 = vweird.f32 %v5304_v35 }
 0x177   :  { %5305 = vrsqrt.f32 %v1311_v21  ;;  %v1338_v27 = vmul.f32 0.5, %v1337_v51  ;;  %vm1333_vm0 = vmor %vm1331_vm5, %vm1332_vm4  ;;  %vm1351_vm10 = vweird.f32 %v1311_v21 }
 0x178   :  { %v1327_v3 = vmul.f32 %v5304_v35, %v1326_v10  ;;  %5307 = vrsqrt.f32 %v7098_v6 }
 0x179   :  { %v1339_v62 = vsub.f32 1.5, %v1338_v27 }
 0x17a   :  { %v1328_v1 = vmul.f32 0.5, %v1327_v3  ;;  %v1275_v3 = vpop.xlane.xlu1 %1274 }
 0x17b   :  { %v1340_v10 = vmul.f32 %v5302_v41, %v1339_v62  ;;  %v7102_v17 = vadd.f32 1e-16, %v1275_v3 }
 0x17c   :  { %v1329_v42 = vsub.f32 1.5, %v1328_v1 }
 0x17d   :  { %v5306_v18 = vpop.eup %5305  ;;  %v1344_v48 = vsel %vm1343_vm8, %v5302_v41, %v1340_v10  ;;  %5309 = vrsqrt.f32 %v7102_v17  ;;  %vm1371_vm1 = vweird.f32 %v7102_v17 }
 0x17e   :  { %v1330_v60 = vmul.f32 %v5304_v35, %v1329_v42  ;;  %v1346_v2 = vmul.f32 %v5306_v18, %v1311_v21  ;;  %v7105_v1 = vpop.eup %5307  ;;  %v1486_v62 = vmul.f32 %v1344_v48, %v6789_v23  ;;  %vm1352_vm9 = vweird.f32 %v5306_v18 }
 0x17f   :  { %vm1353_vm11 = vmor %vm1351_vm10, %vm1352_vm9  ;;  %vm1362_vm12 = vweird.f32 %v7105_v1 }
 0x180   :  { %v1334_v25 = vsel %vm1333_vm0, %v5304_v35, %v1330_v60  ;;  %v1347_v36 = vmul.f32 %v5306_v18, %v1346_v2  ;;  %v1505_v23 = vmul.f32 %v1486_v62, %v6612_v38  ;;  %vm1363_vm14 = vmor %vm1361_vm13, %vm1362_vm12 }
 0x181   :  { %v1485_v61 = vmul.f32 %v1334_v25, %v6800_v59  ;;  %v1356_v59 = vmul.f32 %v7105_v1, %v7098_v6 }
 0x182   :  { %v1348_v51 = vmul.f32 0.5, %v1347_v36  ;;  %v1506_v36 = vmul.f32 %v1486_v62, %v6617_v22  ;;  %v1577_v22 = vsel %vm1036_vm3, %v1505_v23, 0.0 }
 0x183   :  { %v1503_v27 = vmul.f32 %v1485_v61, %v6646_v12  ;;  %v1502_v35 = vmul.f32 %v1485_v61, %v6627_v45  ;;  %v1501_v2 = vmul.f32 %v1485_v61, %v6622_v39  ;;  %v1278_v12 = vpop.xlane.xlu2 %1277  ;;  %v1357_v39 = vmul.f32 %v7105_v1, %v1356_v59  ;;  %v7122_v3 = vpop.eup %5309 }
 0x184   :  { %v1349_v42 = vsub.f32 1.5, %v1348_v51  ;;  %v7117_v45 = vadd.f32 1e-16, %v1278_v12  ;;  %v1504_v51 = vmul.f32 %v1485_v61, %v6679_v33  ;;  %v1580_v48 = vsel %vm1036_vm3, %v1506_v36, 0.0 }
 0x185   :  { %v1571_v25 = vsel %vm1036_vm3, %v1503_v27, 0.0  ;;  %v1568_v41 = vsel %vm1036_vm3, %v1502_v35, 0.0  ;;  %v1565_v60 = vsel %vm1036_vm3, %v1501_v2, 0.0  ;;  %v1358_v27 = vmul.f32 0.5, %v1357_v39 }
 0x186   :  { %v1350_v5 = vmul.f32 %v5306_v18, %v1349_v42  ;;  %1572 = vadd.xlane.f32.xlu0 %v1571_v25  ;;  %1569 = vadd.xlane.f32.xlu2 %v1568_v41  ;;  %5311 = vrsqrt.f32 %v7117_v45  ;;  %v1366_v42 = vmul.f32 %v7122_v3, %v7102_v17  ;;  %v1508_v35 = vmul.f32 %v1486_v62, %v6657_v4  ;;  %v1281_v4 = vpop.xlane.xlu0 %1280 }
 0x187   :  { %1566 = vadd.xlane.f32.xlu1 %v1565_v60  ;;  %v1359_v38 = vsub.f32 1.5, %v1358_v27  ;;  %v7151_v39 = vadd.f32 1e-16, %v1281_v4  ;;  %v7159_v27 = vld [vmem:[%s10956_s0 + $0x48] sm:$0xff]  ;;  %vm1372_vm15 = vweird.f32 %v7122_v3  ;;  %vm1381_vm5 = vweird.f32 %v7117_v45 }
 0x188   :  { %v1354_v10 = vsel %vm1353_vm11, %v5306_v18, %v1350_v5  ;;  %v1574_v18 = vsel %vm1036_vm3, %v1504_v51, 0.0  ;;  %v1367_v61 = vmul.f32 %v7122_v3, %v1366_v42  ;;  %v1586_v41 = vsel %vm1036_vm3, %v1508_v35, 0.0  ;;  %vm1373_vm2 = vmor %vm1371_vm1, %vm1372_vm15 }
 0x189   :  { %v1487_v21 = vmul.f32 %v1354_v10, %v6831_v31  ;;  %v7137_v31 = vld [vmem:[%s10956_s0 + $0x30] sm:$0xff]  ;;  %v1360_v25 = vmul.f32 %v7105_v1, %v1359_v38  ;;  %5313 = vrsqrt.f32 %v7151_v39  ;;  %vm1391_vm7 = vweird.f32 %v7151_v39 }
 0x18a   :  { %v1507_v2 = vmul.f32 %v7137_v31, %v1486_v62 }
 0x18b   :  { %v1509_v33 = vmul.f32 %v1487_v21, %v6674_v26  ;;  %v1368_v26 = vmul.f32 0.5, %v1367_v61  ;;  %v1364_v62 = vsel %vm1363_vm14, %v7105_v1, %v1360_v25  ;;  %v1512_v36 = vmul.f32 %v1487_v21, %v6720_v11  ;;  %v1284_v1 = vpop.xlane.xlu1 %1283  ;;  %v5527_v61 = vld [vmem:[%s10956_s0 + $0x68] sm:$0xff] }
 0x18c   :  { %v7140_v59 = vpop.eup %5311  ;;  %v1583_v60 = vsel %vm1036_vm3, %v1507_v2, 0.0  ;;  %v1511_v51 = vmul.f32 %v1487_v21, %v6705_v29  ;;  %v1510_v6 = vmul.f32 %v7159_v27, %v1487_v21  ;;  %v1488_v11 = vmul.f32 %v1364_v62, %v6816_v34  ;;  %v5528_v2 = vld [vmem:[%s10956_s0 + $0x60] sm:$0xff] }
 0x18d   :  { %v1589_v5 = vsel %vm1036_vm3, %v1509_v33, 0.0  ;;  %v1376_v12 = vmul.f32 %v7140_v59, %v7117_v45  ;;  %v1369_v10 = vsub.f32 1.5, %v1368_v26  ;;  %v7170_v21 = vadd.f32 1e-16, %v1284_v1  ;;  %v5531_v45 = vld [vmem:[%s10956_s0 + $0x80] sm:$0xff] }
 0x18e   :  { %1581 = vadd.xlane.f32.xlu0 %v1580_v48  ;;  %1578 = vadd.xlane.f32.xlu2 %v1577_v22  ;;  %v1598_v48 = vsel %vm1036_vm3, %v1512_v36, 0.0  ;;  %v1595_v29 = vsel %vm1036_vm3, %v1511_v51, 0.0  ;;  %v1515_v38 = vmul.f32 %v1488_v11, %v6692_v56  ;;  %v1514_v35 = vmul.f32 %v5527_v61, %v1488_v11  ;;  %v5530_v51 = vld [vmem:[%s10956_s0 + $0x78] sm:$0xff] }
 0x18f   :  { %1575 = vadd.xlane.f32.xlu1 %v1574_v18  ;;  %v1377_v23 = vmul.f32 %v7140_v59, %v1376_v12  ;;  %v1370_v42 = vmul.f32 %v7122_v3, %v1369_v10  ;;  %v1592_v18 = vsel %vm1036_vm3, %v1510_v6, 0.0  ;;  %v1513_v25 = vmul.f32 %v5528_v2, %v1488_v11  ;;  %v1287_v12 = vpop.xlane.xlu2 %1286 }
 0x190   :  { %5315 = vrsqrt.f32 %v7170_v21  ;;  %vm1382_vm4 = vweird.f32 %v7140_v59  ;;  %v1607_v56 = vsel %vm1036_vm3, %v1515_v38, 0.0  ;;  %v1604_v4 = vsel %vm1036_vm3, %v1514_v35, 0.0  ;;  %v5532_v38 = vld [vmem:[%s10956_s0 + $0xa0] sm:$0xff]  ;;  %v5534_v35 = vld [vmem:[%s10956_s0 + $0x98] sm:$0xff] }
 0x191   :  { %v1378_v22 = vmul.f32 0.5, %v1377_v23  ;;  %v1374_v33 = vsel %vm1373_vm2, %v7122_v3, %v1370_v42  ;;  %vm1383_vm0 = vmor %vm1381_vm5, %vm1382_vm4  ;;  %v1516_v6 = vmul.f32 %v5530_v51, %v1488_v11  ;;  %vm1401_vm10 = vweird.f32 %v7170_v21 }
 0x192   :  { %v1489_v17 = vmul.f32 %v1374_v33, %v6834_v54  ;;  %v5529_v54 = vld [vmem:[%s10956_s0 + $0x88] sm:$0xff] }
 0x193   :  { %v1379_v34 = vsub.f32 1.5, %v1378_v22 }
 0x194   :  { %v1518_v62 = vmul.f32 %v5529_v54, %v1489_v17  ;;  %v1517_v1 = vmul.f32 %v5531_v45, %v1489_v17  ;;  %v1520_v2 = vmul.f32 %v5534_v35, %v1489_v17  ;;  %v5536_v45 = vld [vmem:[%s10956_s0 + $0xa8] sm:$0xff] }
 0x195   :  { %v1380_v3 = vmul.f32 %v7140_v59, %v1379_v34 }
 0x196   :  { %1590 = vadd.xlane.f32.xlu0 %v1589_v5  ;;  %1587 = vadd.xlane.f32.xlu2 %v1586_v41  ;;  %v7180_v5 = vpop.eup %5313  ;;  %v1601_v41 = vsel %vm1036_vm3, %v1513_v25, 0.0  ;;  %v1616_v42 = vsel %vm1036_vm3, %v1518_v62, 0.0  ;;  %v1613_v11 = vsel %vm1036_vm3, %v1517_v1, 0.0  ;;  %v1622_v54 = vsel %vm1036_vm3, %v1520_v2, 0.0 }
 0x197   :  { %1584 = vadd.xlane.f32.xlu1 %v1583_v60  ;;  %v1386_v26 = vmul.f32 %v7180_v5, %v7151_v39  ;;  %v7192_v60 = vadd.f32 1e-16, %v1287_v12  ;;  %v7197_v36 = vpop.eup %5315  ;;  %v1384_v10 = vsel %vm1383_vm0, %v7140_v59, %v1380_v3  ;;  %vm1392_vm6 = vweird.f32 %v7180_v5  ;;  %v5537_v39 = vld [vmem:[%s10956_s0 + $0xb0] sm:$0xff] }
 0x198   :  { %v1490_v59 = vmul.f32 %v1384_v10, %v6854_v7  ;;  %v5533_v7 = vld [vmem:[%s10956_s0 + $0x90] sm:$0xff]  ;;  %vm1393_vm8 = vmor %vm1391_vm7, %vm1392_vm6  ;;  %v5535_v10 = vld [vmem:[%s10956_s0 + $0xb8] sm:$0xff]  ;;  %vm1402_vm9 = vweird.f32 %v7197_v36 }
 0x199   :  { %v1387_v23 = vmul.f32 %v7180_v5, %v1386_v26  ;;  %5317 = vrsqrt.f32 %v7192_v60  ;;  %v1519_v61 = vmul.f32 %v5533_v7, %v1489_v17  ;;  %vm1403_vm11 = vmor %vm1401_vm10, %vm1402_vm9  ;;  %vm1411_vm13 = vweird.f32 %v7192_v60 }
 0x19a   :  { %v1521_v33 = vmul.f32 %v5532_v38, %v1490_v59  ;;  %v1522_v1 = vmul.f32 %v5536_v45, %v1490_v59  ;;  %v5542_v45 = vld [vmem:[%s10956_s0 + $0xe0] sm:$0xff] }
 0x19b   :  { %v1388_v22 = vmul.f32 0.5, %v1387_v23  ;;  %v1524_v23 = vmul.f32 %v5535_v10, %v1490_v59 }
 0x19c   :  { %v1625_v3 = vsel %vm1036_vm3, %v1521_v33, 0.0 }
 0x19d   :  { %v1389_v34 = vsub.f32 1.5, %v1388_v22 }
 0x19e   :  { %1599 = vadd.xlane.f32.xlu0 %v1598_v48  ;;  %1596 = vadd.xlane.f32.xlu2 %v1595_v29  ;;  %v1396_v48 = vmul.f32 %v7197_v36, %v7170_v21  ;;  %v1610_v29 = vsel %vm1036_vm3, %v1516_v6, 0.0  ;;  %v5540_v21 = vld [vmem:[%s10956_s0 + $0xc8] sm:$0xff] }
 0x19f   :  { %1593 = vadd.xlane.f32.xlu1 %v1592_v18  ;;  %v7224_v25 = vpop.eup %5317  ;;  %v1390_v26 = vmul.f32 %v7180_v5, %v1389_v34 }
 0x1a0   :  { %v1397_v18 = vmul.f32 %v7197_v36, %v1396_v48  ;;  %v1406_v12 = vmul.f32 %v7224_v25, %v7192_v60  ;;  %v1523_v48 = vmul.f32 %v5537_v39, %v1490_v59  ;;  %vm1412_vm12 = vweird.f32 %v7224_v25 }
 0x1a1   :  { %v1394_v51 = vsel %vm1393_vm8, %v7180_v5, %v1390_v26  ;;  %vm1413_vm14 = vmor %vm1411_vm13, %vm1412_vm12 }
 0x1a2   :  { %v1407_v6 = vmul.f32 %v7224_v25, %v1406_v12  ;;  %v1491_v5 = vmul.f32 %v1394_v51, %v6870_v9  ;;  %v1631_v38 = vsel %vm1036_vm3, %v1523_v48, 0.0  ;;  %v5538_v9 = vld [vmem:[%s10956_s0 + $0xd0] sm:$0xff]  ;;  %v5541_v51 = vld [vmem:[%s10956_s0 + $0xd8] sm:$0xff] }
 0x1a4   :  { %v1527_v33 = vmul.f32 %v5538_v9, %v1491_v5  ;;  %v1526_v2 = vmul.f32 %v5540_v21, %v1491_v5 }
 0x1a6   :  { %1608 = vadd.xlane.f32.xlu0 %v1607_v56  ;;  %1605 = vadd.xlane.f32.xlu2 %v1604_v4  ;;  %v1398_v56 = vmul.f32 0.5, %v1397_v18  ;;  %v1290_v4 = vpop.xlane.xlu0 %1289  ;;  %v1628_v18 = vsel %vm1036_vm3, %v1522_v1, 0.0 }
 0x1a7   :  { %1602 = vadd.xlane.f32.xlu1 %v1601_v41  ;;  %v1619_v41 = vsel %vm1036_vm3, %v1519_v61, 0.0  ;;  %v7234_v62 = vadd.f32 1e-16, %v1290_v4  ;;  %v5539_v61 = vld [vmem:[%s10956_s0 + $0xc0] sm:$0xff]  ;;  %v1296_v4 = vpop.xlane.xlu2 %1295 }
 0x1a8   :  { %v1399_v17 = vsub.f32 1.5, %v1398_v56  ;;  %v1525_v35 = vmul.f32 %v5539_v61, %v1491_v5 }
 0x1a9   :  { %5319 = vrsqrt.f32 %v7234_v62  ;;  %vm1421_vm1 = vweird.f32 %v7234_v62 }
 0x1aa   :  { %v1400_v22 = vmul.f32 %v7197_v36, %v1399_v17  ;;  %v7279_v17 = vadd.f32 1e-16, %v1296_v4 }
 0x1ac   :  { %v1404_v34 = vsel %vm1403_vm11, %v7197_v36, %v1400_v22  ;;  %v5543_v22 = vld [vmem:[%s10956_s0 + $0xf0] sm:$0xff]  ;;  %vm1441_vm7 = vweird.f32 %v7279_v17 }
 0x1ad   :  { %v1492_v36 = vmul.f32 %v1404_v34, %v6881_v8 }
 0x1ae   :  { %1617 = vadd.xlane.f32.xlu0 %v1616_v42  ;;  %1614 = vadd.xlane.f32.xlu2 %v1613_v11  ;;  %v1634_v42 = vsel %vm1036_vm3, %v1524_v23, 0.0  ;;  %v1293_v11 = vpop.xlane.xlu1 %1292 }
 0x1af   :  { %1611 = vadd.xlane.f32.xlu1 %v1610_v29  ;;  %v1408_v29 = vmul.f32 0.5, %v1407_v6  ;;  %v7255_v59 = vadd.f32 1e-16, %v1293_v11  ;;  %v7267_v56 = vpop.eup %5319  ;;  %v1530_v8 = vmul.f32 %v1492_v36, %v6786_v63  ;;  %v1528_v6 = vmul.f32 %v5541_v51, %v1491_v5 }
 0x1b0   :  { %v1416_v12 = vmul.f32 %v7267_v56, %v7234_v62  ;;  %v1529_v1 = vmul.f32 %v5542_v45, %v1492_v36  ;;  %vm1422_vm15 = vweird.f32 %v7267_v56 }
 0x1b1   :  { %v1409_v7 = vsub.f32 1.5, %v1408_v29  ;;  %5321 = vrsqrt.f32 %v7255_v59  ;;  %v1652_v63 = vsel %vm1036_vm3, %v1530_v8, 0.0  ;;  %v1531_v29 = vmul.f32 %v5543_v22, %v1492_v36  ;;  %v1299_v34 = vpop.xlane.xlu0 %1298  ;;  %vm1423_vm2 = vmor %vm1421_vm1, %vm1422_vm15 }
 0x1b2   :  { %v1417_v23 = vmul.f32 %v7267_v56, %v1416_v12  ;;  %5323 = vrsqrt.f32 %v7279_v17  ;;  %v1649_v5 = vsel %vm1036_vm3, %v1529_v1, 0.0  ;;  %vm1431_vm5 = vweird.f32 %v7255_v59 }
 0x1b3   :  { %v1410_v26 = vmul.f32 %v7224_v25, %v1409_v7  ;;  %v1655_v7 = vsel %vm1036_vm3, %v1531_v29, 0.0 }
 0x1b4   :  { %v1418_v39 = vmul.f32 0.5, %v1417_v23 }
 0x1b5   :  { %v1414_v10 = vsel %vm1413_vm14, %v7224_v25, %v1410_v26 }
 0x1b6   :  { %1626 = vadd.xlane.f32.xlu0 %v1625_v3  ;;  %1623 = vadd.xlane.f32.xlu2 %v1622_v54  ;;  %v1643_v3 = vsel %vm1036_vm3, %v1527_v33, 0.0  ;;  %v1640_v54 = vsel %vm1036_vm3, %v1526_v2, 0.0  ;;  %v1493_v25 = vmul.f32 %v1414_v10, %v6913_v20 }
 0x1b7   :  { %1620 = vadd.xlane.f32.xlu1 %v1619_v41  ;;  %v1637_v41 = vsel %vm1036_vm3, %v1525_v35, 0.0  ;;  %v7290_v60 = vpop.eup %5321 }
 0x1b8   :  { %v1426_v48 = vmul.f32 %v7290_v60, %v7255_v59  ;;  %v1533_v11 = vmul.f32 %v1493_v25, %v6810_v57  ;;  %v7307_v33 = vpop.eup %5323  ;;  %v1536_v26 = vmul.f32 %v1493_v25, %v6839_v19  ;;  %vm1432_vm4 = vweird.f32 %v7290_v60 }
 0x1b9   :  { %v1436_v21 = vmul.f32 %v7307_v33, %v7279_v17  ;;  %vm1433_vm0 = vmor %vm1431_vm5, %vm1432_vm4  ;;  %vm1442_vm6 = vweird.f32 %v7307_v33 }
 0x1ba   :  { %v1427_v20 = vmul.f32 %v7290_v60, %v1426_v48  ;;  %v1661_v61 = vsel %vm1036_vm3, %v1533_v11, 0.0  ;;  %v1670_v62 = vsel %vm1036_vm3, %v1536_v26, 0.0  ;;  %vm1443_vm8 = vmor %vm1441_vm7, %vm1442_vm6 }
 0x1bb   :  { %v1302_v19 = vpop.xlane.xlu1 %1301 }
 0x1bc   :  { %v1428_v57 = vmul.f32 0.5, %v1427_v20 }
 0x1be   :  { %1635 = vadd.xlane.f32.xlu0 %v1634_v42  ;;  %1632 = vadd.xlane.f32.xlu2 %v1631_v38  ;;  %v1646_v42 = vsel %vm1036_vm3, %v1528_v6, 0.0  ;;  %v5544_v38 = vld [vmem:[%s10956_s0 + $0xf8] sm:$0xff]  ;;  %v1429_v4 = vsub.f32 1.5, %v1428_v57 }
 0x1bf   :  { %1629 = vadd.xlane.f32.xlu1 %v1628_v18  ;;  %v1419_v18 = vsub.f32 1.5, %v1418_v39  ;;  %v1532_v9 = vmul.f32 %v5544_v38, %v1492_v36  ;;  %v1534_v36 = vmul.f32 %v1493_v25, %v6829_v44 }
 0x1c0   :  { %v1430_v23 = vmul.f32 %v7290_v60, %v1429_v4 }
 0x1c1   :  { %v1420_v35 = vmul.f32 %v7267_v56, %v1419_v18  ;;  %v1658_v2 = vsel %vm1036_vm3, %v1532_v9, 0.0  ;;  %v1664_v8 = vsel %vm1036_vm3, %v1534_v36, 0.0 }
 0x1c3   :  { %v1424_v12 = vsel %vm1423_vm2, %v7267_v56, %v1420_v35 }
 0x1c4   :  { %v1494_v10 = vmul.f32 %v1424_v12, %v6956_v15  ;;  %v1434_v15 = vsel %vm1433_vm0, %v7290_v60, %v1430_v23 }
 0x1c5   :  { %v1305_v59 = vpop.xlane.xlu2 %1304  ;;  %v1495_v48 = vmul.f32 %v1434_v15, %v6985_v40 }
 0x1c6   :  { %1644 = vadd.xlane.f32.xlu0 %v1643_v3  ;;  %1641 = vadd.xlane.f32.xlu2 %v1640_v54  ;;  %v7317_v3 = vadd.f32 1e-16, %v1299_v34  ;;  %v1535_v54 = vmul.f32 %v1493_v25, %v6824_v58  ;;  %v7332_v58 = vadd.f32 1e-16, %v1302_v19  ;;  %v1539_v51 = vmul.f32 %v1494_v10, %v6879_v24 }
 0x1c7   :  { %1638 = vadd.xlane.f32.xlu1 %v1637_v41  ;;  %v1437_v41 = vmul.f32 %v7307_v33, %v1436_v21  ;;  %v1537_v1 = vmul.f32 %v1494_v10, %v6865_v43  ;;  %v1542_v40 = vmul.f32 %v1495_v48, %v6909_v50  ;;  %v1540_v22 = vmul.f32 %v1494_v10, %v6895_v46 }
 0x1c8   :  { %5325 = vrsqrt.f32 %v7317_v3  ;;  %v1667_v56 = vsel %vm1036_vm3, %v1535_v54, 0.0  ;;  %v1679_v39 = vsel %vm1036_vm3, %v1539_v51, 0.0  ;;  %v1541_v29 = vmul.f32 %v1495_v48, %v6902_v53 }
 0x1c9   :  { %v1438_v44 = vmul.f32 0.5, %v1437_v41  ;;  %5327 = vrsqrt.f32 %v7332_v58  ;;  %v1673_v60 = vsel %vm1036_vm3, %v1537_v1, 0.0  ;;  %v1688_v17 = vsel %vm1036_vm3, %v1542_v40, 0.0 }
 0x1ca   :  { %v1682_v50 = vsel %vm1036_vm3, %v1540_v22, 0.0  ;;  %v1685_v9 = vsel %vm1036_vm3, %v1541_v29, 0.0  ;;  %vm1451_vm10 = vweird.f32 %v7317_v3  ;;  %vm1461_vm13 = vweird.f32 %v7332_v58 }
 0x1cb   :  { %v1439_v45 = vsub.f32 1.5, %v1438_v44 }
 0x1cd   :  { %v1440_v24 = vmul.f32 %v7307_v33, %v1439_v45 }
 0x1ce   :  { %1653 = vadd.xlane.f32.xlu0 %v1652_v63  ;;  %1650 = vadd.xlane.f32.xlu2 %v1649_v5  ;;  %v7335_v6 = vpop.eup %5325  ;;  %v1538_v63 = vmul.f32 %v1494_v10, %v6860_v55  ;;  %v7350_v55 = vadd.f32 1e-16, %v1305_v59 }
 0x1cf   :  { %1647 = vadd.xlane.f32.xlu1 %v1646_v42  ;;  %v1446_v25 = vmul.f32 %v7335_v6, %v7317_v3  ;;  %v1444_v5 = vsel %vm1443_vm8, %v7307_v33, %v1440_v24  ;;  %v7357_v11 = vpop.eup %5327  ;;  %vm1452_vm9 = vweird.f32 %v7335_v6 }
 0x1d0   :  { %v1676_v43 = vsel %vm1036_vm3, %v1538_v63, 0.0  ;;  %5329 = vrsqrt.f32 %v7350_v55  ;;  %v1496_v20 = vmul.f32 %v1444_v5, %v7012_v32  ;;  %v1456_v38 = vmul.f32 %v7357_v11, %v7332_v58  ;;  %vm1453_vm11 = vmor %vm1451_vm10, %vm1452_vm9  ;;  %v11000_v58 = vld [vmem:[#allocation2_spill] sm:$0xff] }
 0x1d1   :  { %v1447_v42 = vmul.f32 %v7335_v6, %v1446_v25  ;;  %v1308_v53 = vpop.xlane.xlu0 %1307  ;;  %v1543_v32 = vmul.f32 %v1495_v48, %v6924_v37  ;;  %vm1462_vm12 = vweird.f32 %v7357_v11  ;;  %vm1471_vm1 = vweird.f32 %v7350_v55 }
 0x1d2   :  { %v1545_v33 = vmul.f32 %v1496_v20, %v6937_v52  ;;  %v7382_v26 = vadd.f32 1e-16, %v1308_v53  ;;  %v1548_v4 = vmul.f32 %v1496_v20, %v6954_v14  ;;  %v1546_v3 = vmul.f32 %v1496_v20, %v6948_v28  ;;  %vm7406_vm14 = vmor %vm1461_vm13, %vm1462_vm12 }
 0x1d3   :  { %v1448_v18 = vmul.f32 0.5, %v1447_v42  ;;  %v1691_v52 = vsel %vm1036_vm3, %v1543_v32, 0.0  ;;  %v11003_v32 = vld [vmem:[#allocation4_spill] sm:$0xff] }
 0x1d4   :  { %v1697_v21 = vsel %vm1036_vm3, %v1545_v33, 0.0  ;;  %5331 = vrsqrt.f32 %v7382_v26  ;;  %v1706_v14 = vsel %vm1036_vm3, %v1548_v4, 0.0  ;;  %v1700_v28 = vsel %vm1036_vm3, %v1546_v3, 0.0  ;;  %v11002_v33 = vld [vmem:[#allocation3_spill] sm:$0xff] }
 0x1d5   :  { %v1449_v46 = vsub.f32 1.5, %v1448_v18  ;;  %vm1481_vm5 = vweird.f32 %v7382_v26 }
 0x1d6   :  { %1662 = vadd.xlane.f32.xlu0 %v1661_v61  ;;  %1659 = vadd.xlane.f32.xlu2 %v1658_v2  ;;  %v7367_v34 = vpop.eup %5329  ;;  %v1544_v61 = vmul.f32 %v1495_v48, %v6919_v30 }
 0x1d7   :  { %1656 = vadd.xlane.f32.xlu1 %v1655_v7  ;;  %v1457_v7 = vmul.f32 %v7357_v11, %v1456_v38  ;;  %v1450_v35 = vmul.f32 %v7335_v6, %v1449_v46  ;;  %v1466_v57 = vmul.f32 %v7367_v34, %v7350_v55  ;;  %vm1472_vm15 = vweird.f32 %v7367_v34 }
 0x1d8   :  { %v1694_v36 = vsel %vm1036_vm3, %v1544_v61, 0.0  ;;  %vm1473_vm2 = vmor %vm1471_vm1, %vm1472_vm15 }
 0x1d9   :  { %v1458_v2 = vmul.f32 0.5, %v1457_v7  ;;  %v1454_v30 = vsel %vm1453_vm11, %v7335_v6, %v1450_v35  ;;  %v1467_v37 = vmul.f32 %v7367_v34, %v1466_v57 }
 0x1da   :  { %v1497_v44 = vmul.f32 %v1454_v30, %v7053_v49  ;;  %v7423_v48 = vpop.eup %5331 }
 0x1db   :  { %v1459_v41 = vsub.f32 1.5, %v1458_v2  ;;  %v1468_v19 = vmul.f32 0.5, %v1467_v37  ;;  %vm1482_vm4 = vweird.f32 %v7423_v48 }
 0x1dc   :  { %v1551_v49 = vmul.f32 %v1497_v44, %v6983_v0  ;;  %v1549_v0 = vmul.f32 %v1497_v44, %v6975_v47  ;;  %v1476_v47 = vmul.f32 %v7423_v48, %v7382_v26  ;;  %v1552_v7 = vmul.f32 %v1497_v44, %v11002_v33  ;;  %vm7485_vm0 = vmor %vm1481_vm5, %vm1482_vm4 }
 0x1dd   :  { %v1469_v15 = vsub.f32 1.5, %v1468_v19 }
 0x1de   :  { %1671 = vadd.xlane.f32.xlu0 %v1670_v62  ;;  %1668 = vadd.xlane.f32.xlu2 %v1667_v56  ;;  %v1547_v62 = vmul.f32 %v1496_v20, %v6943_v13  ;;  %v1460_v56 = vmul.f32 %v7357_v11, %v1459_v41  ;;  %v1709_v22 = vsel %vm1036_vm3, %v1549_v0, 0.0  ;;  %v1477_v46 = vmul.f32 %v7423_v48, %v1476_v47 }
 0x1df   :  { %1665 = vadd.xlane.f32.xlu1 %v1664_v8  ;;  %v1470_v42 = vmul.f32 %v7367_v34, %v1469_v15  ;;  %v1718_v41 = vsel %vm1036_vm3, %v1552_v7, 0.0  ;;  %v11007_v15 = vld [vmem:[#allocation6_spill] sm:$0xff] }
 0x1e0   :  { %v1703_v13 = vsel %vm1036_vm3, %v1547_v62, 0.0  ;;  %v1464_v63 = vsel %vm7406_vm14, %v7357_v11, %v1460_v56  ;;  %v1478_v4 = vmul.f32 0.5, %v1477_v46 }
 0x1e1   :  { %v1498_v5 = vmul.f32 %v1464_v63, %v7075_v16  ;;  %v1474_v16 = vsel %vm1473_vm2, %v7367_v34, %v1470_v42 }
 0x1e3   :  { %v1553_v61 = vmul.f32 %v1498_v5, %v11003_v32  ;;  %v11011_v32 = vld [vmem:[#allocation9_spill] sm:$0xff] }
 0x1e5   :  { %v1721_v3 = vsel %vm1036_vm3, %v1553_v61, 0.0  ;;  %v5545_v61 = vld [vmem:[%s10956_s0 + $0x1d0] sm:$0xff] }
 0x1e6   :  { %1680 = vadd.xlane.f32.xlu0 %v1679_v39  ;;  %1677 = vadd.xlane.f32.xlu2 %v1676_v43  ;;  %v1550_v39 = vmul.f32 %v1497_v44, %v11000_v58  ;;  %v1715_v43 = vsel %vm1036_vm3, %v1551_v49, 0.0  ;;  %v11006_v49 = vld [vmem:[#allocation7_spill] sm:$0xff] }
 0x1e7   :  { %1674 = vadd.xlane.f32.xlu1 %v1673_v60  ;;  %v1555_v6 = vmul.f32 %v1498_v5, %v11006_v49 }
 0x1e8   :  { %v1712_v29 = vsel %vm1036_vm3, %v1550_v39, 0.0 }
 0x1ee   :  { %1689 = vadd.xlane.f32.xlu0 %v1688_v17  ;;  %1686 = vadd.xlane.f32.xlu2 %v1685_v9 }
 0x1ef   :  { %1683 = vadd.xlane.f32.xlu1 %v1682_v50  ;;  %v11001_v50 = vld [vmem:[#allocation5_spill] sm:$0xff] }
 0x1f0   :  { %v1554_v9 = vmul.f32 %v1498_v5, %v11001_v50  ;;  %v11010_v50 = vld [vmem:[#allocation10_spill] sm:$0xff] }
 0x1f2   :  { %v1724_v37 = vsel %vm1036_vm3, %v1554_v9, 0.0 }
 0x1f6   :  { %1698 = vadd.xlane.f32.xlu0 %v1697_v21  ;;  %1695 = vadd.xlane.f32.xlu2 %v1694_v36  ;;  %v11004_v21 = vld [vmem:[#allocation12_spill] sm:$0xff] }
 0x1f7   :  { %1692 = vadd.xlane.f32.xlu1 %v1691_v52  ;;  %v1499_v2 = vmul.f32 %v1474_v16, %v11004_v21 }
 0x1f9   :  { %v7384_v12 = vpop.xlane.xlu0 %1572  ;;  %v7387_v54 = vpop.xlane.xlu2 %1569  ;;  %v1560_v9 = vmul.f32 %v1499_v2, %v11010_v50  ;;  %v1558_v26 = vmul.f32 %v1499_v2, %v11011_v32 }
 0x1fa   :  { %v7389_v8 = vpop.xlane.xlu1 %1566  ;;  %v1758_v10 = vmul.f32 %v7387_v54, %v7387_v54  ;;  %v1759_v45 = vmul.f32 %v7384_v12, %v7384_v12 }
 0x1fb   :  { %v1757_v23 = vmul.f32 %v7389_v8, %v7389_v8 }
 0x1fd   :  { %v1821_v51 = vadd.f32 %v1758_v10, %v1757_v23  ;;  %v11005_v23 = vld [vmem:[#allocation8_spill] sm:$0xff] }
 0x1fe   :  { %1707 = vadd.xlane.f32.xlu0 %v1706_v14  ;;  %1704 = vadd.xlane.f32.xlu2 %v1703_v13  ;;  %v1557_v44 = vmul.f32 %v1499_v2, %v11005_v23 }
 0x1ff   :  { %1701 = vadd.xlane.f32.xlu1 %v1700_v28  ;;  %v1822_v24 = vadd.f32 %v1821_v51, %v1759_v45  ;;  %v1479_v28 = vsub.f32 1.5, %v1478_v4  ;;  %v1556_v45 = vmul.f32 %v1498_v5, %v11007_v15  ;;  %v1727_v5 = vsel %vm1036_vm3, %v1555_v6, 0.0  ;;  %v11013_v6 = vld [vmem:[#allocation11_spill] sm:$0xff] }
 0x200   :  { %v1742_v4 = vsel %vm1036_vm3, %v1560_v9, 0.0  ;;  %v5548_v9 = vld [vmem:[%s10956_s0 + $0x1f8] sm:$0xff] }
 0x201   :  { %v7412_v1 = vpop.xlane.xlu0 %1581  ;;  %v7417_v25 = vpop.xlane.xlu2 %1578  ;;  %v1730_v47 = vsel %vm1036_vm3, %v1556_v45, 0.0 }
 0x202   :  { %v7419_v59 = vpop.xlane.xlu1 %1575  ;;  %v1762_v11 = vmul.f32 %v7412_v1, %v7412_v1  ;;  %v1761_v18 = vmul.f32 %v7417_v25, %v7417_v25 }
 0x203   :  { %v1760_v60 = vmul.f32 %v7419_v59, %v7419_v59 }
 0x204   :  { %v1830_v35 = vadd.f32 %v1762_v11, %v1761_v18 }
 0x205   :  { %v1823_v40 = vadd.f32 %v1822_v24, %v1760_v60  ;;  %v1733_v24 = vsel %vm1036_vm3, %v1557_v44, 0.0 }
 0x206   :  { %1716 = vadd.xlane.f32.xlu0 %v1715_v43  ;;  %1713 = vadd.xlane.f32.xlu2 %v1712_v29 }
 0x207   :  { %v1824_v17 = vrot.slane %v1823_v40, 4  ;;  %1710 = vadd.xlane.f32.xlu1 %v1709_v22 }
 0x209   :  { %v1825_v20 = vadd.f32 %v1824_v17, %v1823_v40  ;;  %v7441_v38 = vpop.xlane.xlu0 %1590  ;;  %v7445_v55 = vpop.xlane.xlu2 %1587  ;;  %v1480_v40 = vmul.f32 %v7423_v48, %v1479_v28 }
 0x20a   :  { %v7447_v53 = vpop.xlane.xlu1 %1584  ;;  %v1764_v36 = vmul.f32 %v7445_v55, %v7445_v55  ;;  %v1765_v0 = vmul.f32 %v7441_v38, %v7441_v38 }
 0x20b   :  { %v1826_v57 = vrot.slane %v1825_v20, 2  ;;  %v1763_v34 = vmul.f32 %v7447_v53, %v7447_v53  ;;  %v1484_v46 = vsel %vm7485_vm0, %v7423_v48, %v1480_v40  ;;  %v5547_v40 = vld [vmem:[%s10956_s0 + $0x1e8] sm:$0xff] }
 0x20d   :  { %v1827_v52 = vadd.f32 %v1826_v57, %v1825_v20  ;;  %v1831_v30 = vadd.f32 %v1830_v35, %v1763_v34  ;;  %v1559_v35 = vmul.f32 %v5545_v61, %v1499_v2  ;;  %v1736_v2 = vsel %vm1036_vm3, %v1558_v26, 0.0 }
 0x20e   :  { %1725 = vadd.xlane.f32.xlu0 %v1724_v37  ;;  %1722 = vadd.xlane.f32.xlu2 %v1721_v3 }
 0x20f   :  { %v1828_v62 = vrot.slane %v1827_v52, 1  ;;  %v1832_v10 = vadd.f32 %v1831_v30, %v1764_v36  ;;  %1719 = vadd.xlane.f32.xlu1 %v1718_v41  ;;  %v11012_v41 = vld [vmem:[#allocation13_spill] sm:$0xff] }
 0x210   :  { %v1500_v3 = vmul.f32 %v1484_v46, %v11012_v41 }
 0x211   :  { %v1829_v19 = vadd.f32 %v1828_v62, %v1827_v52  ;;  %v1833_v14 = vrot.slane %v1832_v10, 4  ;;  %v7460_v56 = vpop.xlane.xlu0 %1599  ;;  %v7462_v13 = vpop.xlane.xlu2 %1596 }
 0x212   :  { %v7464_v51 = vpop.xlane.xlu1 %1593  ;;  %v1767_v43 = vmul.f32 %v7462_v13, %v7462_v13  ;;  %v1768_v29 = vmul.f32 %v7460_v56, %v7460_v56  ;;  %v1563_v15 = vmul.f32 %v1500_v3, %v11013_v6  ;;  %v1564_v46 = vmul.f32 %v5548_v9, %v1500_v3 }
 0x213   :  { %v7468_v63 = vadd.f32 1e-16, %v1829_v19  ;;  %v1834_v58 = vadd.f32 %v1833_v14, %v1832_v10  ;;  %v1766_v39 = vmul.f32 %v7464_v51, %v7464_v51  ;;  %v1739_v10 = vsel %vm1036_vm3, %v1559_v35, 0.0 }
 0x214   :  { %v1751_v18 = vsel %vm1036_vm3, %v1563_v15, 0.0  ;;  %v1754_v15 = vsel %vm1036_vm3, %v1564_v46, 0.0 }
 0x215   :  { %5333 = vrsqrt.f32 %v7468_v63  ;;  %v1835_v60 = vrot.slane %v1834_v58, 2  ;;  %v1839_v42 = vadd.f32 %v1766_v39, %v1765_v0  ;;  %v5546_v39 = vld [vmem:[%s10956_s0 + $0x1e0] sm:$0xff]  ;;  %vm1987_vm7 = vweird.f32 %v7468_v63 }
 0x216   :  { %1734 = vadd.xlane.f32.xlu0 %v1733_v24  ;;  %1731 = vadd.xlane.f32.xlu2 %v1730_v47  ;;  %v1561_v24 = vmul.f32 %v5546_v39, %v1500_v3 }
 0x217   :  { %v1836_v22 = vadd.f32 %v1835_v60, %v1834_v58  ;;  %v1840_v11 = vadd.f32 %v1839_v42, %v1767_v43  ;;  %1728 = vadd.xlane.f32.xlu1 %v1727_v5  ;;  %v1562_v5 = vmul.f32 %v5547_v40, %v1500_v3 }
 0x218   :  { %v1745_v50 = vsel %vm1036_vm3, %v1561_v24, 0.0 }
 0x219   :  { %v1837_v17 = vrot.slane %v1836_v22, 1  ;;  %v1841_v16 = vadd.f32 %v1840_v11, %v1768_v29  ;;  %v7489_v20 = vpop.xlane.xlu0 %1608  ;;  %v7495_v33 = vpop.xlane.xlu2 %1605  ;;  %v1748_v61 = vsel %vm1036_vm3, %v1562_v5, 0.0 }
 0x21a   :  { %v7497_v7 = vpop.xlane.xlu1 %1602  ;;  %v1770_v52 = vmul.f32 %v7495_v33, %v7495_v33  ;;  %v1771_v28 = vmul.f32 %v7489_v20, %v7489_v20 }
 0x21b   :  { %v5334_v57 = vpop.eup %5333  ;;  %v1838_v34 = vadd.f32 %v1837_v17, %v1836_v22  ;;  %v1842_v21 = vrot.slane %v1841_v16, 4  ;;  %v1769_v48 = vmul.f32 %v7497_v7, %v7497_v7 }
 0x21c   :  { %v1982_v36 = vmul.f32 %v5334_v57, %v7468_v63  ;;  %vm1988_vm6 = vweird.f32 %v5334_v57 }
 0x21d   :  { %v7508_v30 = vadd.f32 1e-16, %v1838_v34  ;;  %v1843_v37 = vadd.f32 %v1842_v21, %v1841_v16  ;;  %v1848_v44 = vadd.f32 %v1770_v52, %v1769_v48  ;;  %vm1989_vm8 = vmor %vm1987_vm7, %vm1988_vm6 }
 0x21e   :  { %v1983_v62 = vmul.f32 %v5334_v57, %v1982_v36  ;;  %1743 = vadd.xlane.f32.xlu0 %v1742_v4  ;;  %1740 = vadd.xlane.f32.xlu2 %v1739_v10  ;;  %v5551_v4 = vld [vmem:[%s10956_s0 + $0x10] sm:$0xff] }
 0x21f   :  { %5335 = vrsqrt.f32 %v7508_v30  ;;  %v1844_v23 = vrot.slane %v1843_v37, 2  ;;  %1737 = vadd.xlane.f32.xlu1 %v1736_v2  ;;  %v1849_v43 = vadd.f32 %v1848_v44, %v1771_v28  ;;  %vm1997_vm10 = vweird.f32 %v7508_v30 }
 0x220   :  { %v1984_v19 = vmul.f32 0.5, %v1983_v62 }
 0x221   :  { %v1845_v14 = vadd.f32 %v1844_v23, %v1843_v37  ;;  %v7517_v49 = vpop.xlane.xlu0 %1617  ;;  %v7520_v0 = vpop.xlane.xlu2 %1614 }
 0x222   :  { %v1985_v45 = vsub.f32 1.5, %v1984_v19  ;;  %v7522_v58 = vpop.xlane.xlu1 %1611  ;;  %v1774_v34 = vmul.f32 %v7517_v49, %v7517_v49  ;;  %v1773_v36 = vmul.f32 %v7520_v0, %v7520_v0 }
 0x223   :  { %v1846_v60 = vrot.slane %v1845_v14, 1  ;;  %v1772_v42 = vmul.f32 %v7522_v58, %v7522_v58 }
 0x224   :  { %v1986_v47 = vmul.f32 %v5334_v57, %v1985_v45  ;;  %v1857_v28 = vadd.f32 %v1774_v34, %v1773_v36  ;;  %v5552_v45 = vld [vmem:[%s10956_s0 + $0x18] sm:$0xff] }
 0x225   :  { %v5336_v22 = vpop.eup %5335  ;;  %v1847_v29 = vadd.f32 %v1846_v60, %v1845_v14  ;;  %v1850_v11 = vadd.f32 %v1849_v43, %v1772_v42 }
 0x226   :  { %v1990_v17 = vsel %vm1989_vm8, %v5334_v57, %v1986_v47  ;;  %v1992_v16 = vmul.f32 %v5336_v22, %v7508_v30  ;;  %1752 = vadd.xlane.f32.xlu0 %v1751_v18  ;;  %1749 = vadd.xlane.f32.xlu2 %v1748_v61  ;;  %vm1998_vm9 = vweird.f32 %v5336_v22 }
 0x227   :  { %v2141_v32 = vmul.f32 %v1990_v17, %v7389_v8  ;;  %v2142_v63 = vmul.f32 %v1990_v17, %v7387_v54  ;;  %v2143_v26 = vmul.f32 %v1990_v17, %v7384_v12  ;;  %1746 = vadd.xlane.f32.xlu1 %v1745_v50  ;;  %v7543_v57 = vadd.f32 1e-16, %v1847_v29  ;;  %v5549_v8 = vld [vmem:[%s10956_s0] sm:$0xff]  ;;  %v5550_v12 = vld [vmem:[%s10956_s0 + $0x8] sm:$0xff]  ;;  %vm1999_vm11 = vmor %vm1997_vm10, %vm1998_vm9 }
 0x228   :  { %v1993_v35 = vmul.f32 %v5336_v22, %v1992_v16  ;;  %v1851_v21 = vrot.slane %v1850_v11, 4  ;;  %v2144_v52 = vmul.f32 %v1990_v17, %v7419_v59 }
 0x229   :  { %v2205_v54 = vmul.f32 %v5549_v8, %v2141_v32  ;;  %v2206_v48 = vmul.f32 %v5550_v12, %v2142_v63  ;;  %v7556_v37 = vpop.xlane.xlu0 %1626  ;;  %v2207_v59 = vmul.f32 %v5551_v4, %v2143_v26  ;;  %5337 = vrsqrt.f32 %v7543_v57  ;;  %v7562_v62 = vpop.xlane.xlu2 %1623 }
 0x22a   :  { %v1994_v41 = vmul.f32 0.5, %v1993_v35  ;;  %v1852_v3 = vadd.f32 %v1851_v21, %v1850_v11  ;;  %v7564_v2 = vpop.xlane.xlu1 %1620  ;;  %v2208_v39 = vmul.f32 %v5552_v45, %v2144_v52  ;;  %v1776_v29 = vmul.f32 %v7562_v62, %v7562_v62 }
 0x22b   :  { %v2269_v10 = vsel %vm1036_vm3, %v2205_v54, 0.0  ;;  %v2270_v23 = vsel %vm1036_vm3, %v2206_v48, 0.0  ;;  %v1775_v6 = vmul.f32 %v7564_v2, %v7564_v2  ;;  %v2272_v24 = vsel %vm1036_vm3, %v2207_v59, 0.0 }
 0x22c   :  { %v2271_v44 = vadd.f32 %v2270_v23, %v2269_v10  ;;  %v1995_v19 = vsub.f32 1.5, %v1994_v41  ;;  %v1853_v14 = vrot.slane %v1852_v3, 2  ;;  %v2274_v50 = vsel %vm1036_vm3, %v2208_v39, 0.0 }
 0x22d   :  { %v1858_v40 = vadd.f32 %v1857_v28, %v1775_v6  ;;  %v1777_v12 = vmul.f32 %v7556_v37, %v7556_v37  ;;  %vm2007_vm13 = vweird.f32 %v7543_v57 }
 0x22e   :  { %v1996_v60 = vmul.f32 %v5336_v22, %v1995_v19  ;;  %v1854_v43 = vadd.f32 %v1853_v14, %v1852_v3  ;;  %v2273_v42 = vadd.f32 %v2272_v24, %v2271_v44  ;;  %v5555_v19 = vld [vmem:[%s10956_s0 + $0x38] sm:$0xff] }
 0x22f   :  { %1755 = vadd.xlane.f32.xlu1 %v1754_v15  ;;  %v5338_v30 = vpop.eup %5337  ;;  %v1859_v32 = vadd.f32 %v1858_v40, %v1776_v29 }
 0x230   :  { %v2000_v5 = vsel %vm1999_vm11, %v5336_v22, %v1996_v60  ;;  %v1855_v47 = vrot.slane %v1854_v43, 1  ;;  %v2002_v9 = vmul.f32 %v5338_v30, %v7543_v57  ;;  %v2275_v26 = vadd.f32 %v2274_v50, %v2273_v42 }
 0x231   :  { %v2145_v11 = vmul.f32 %v2000_v5, %v7417_v25  ;;  %v2146_v18 = vmul.f32 %v2000_v5, %v7412_v1  ;;  %v2147_v17 = vmul.f32 %v2000_v5, %v7447_v53  ;;  %v7581_v16 = vpop.xlane.xlu0 %1635  ;;  %v7585_v63 = vpop.xlane.xlu2 %1632  ;;  %v2148_v61 = vmul.f32 %v2000_v5, %v7445_v55  ;;  %v5553_v1 = vld [vmem:[%s10956_s0 + $0x20] sm:$0xff]  ;;  %v5554_v53 = vld [vmem:[%s10956_s0 + $0x28] sm:$0xff] }
 0x232   :  { %v1856_v46 = vadd.f32 %v1855_v47, %v1854_v43  ;;  %v7587_v22 = vpop.xlane.xlu1 %1629  ;;  %v2003_v21 = vmul.f32 %v5338_v30, %v2002_v9  ;;  %v1860_v8 = vrot.slane %v1859_v32, 4  ;;  %vm2008_vm12 = vweird.f32 %v5338_v30 }
 0x233   :  { %v2209_v25 = vmul.f32 %v5553_v1, %v2145_v11  ;;  %v2210_v35 = vmul.f32 %v5554_v53, %v2146_v18  ;;  %v2211_v34 = vmul.f32 %v7137_v31, %v2147_v17  ;;  %v1778_v48 = vmul.f32 %v7587_v22, %v7587_v22  ;;  %vm2009_vm14 = vmor %vm2007_vm13, %vm2008_vm12  ;;  %v5556_v1 = vld [vmem:[%s10956_s0 + $0x40] sm:$0xff] }
 0x234   :  { %v7597_v52 = vadd.f32 1e-16, %v1856_v46  ;;  %v2004_v4 = vmul.f32 0.5, %v2003_v21  ;;  %v1861_v31 = vadd.f32 %v1860_v8, %v1859_v32  ;;  %v1779_v59 = vmul.f32 %v7585_v63, %v7585_v63 }
 0x235   :  { %v2282_v54 = vsel %vm1036_vm3, %v2209_v25, 0.0  ;;  %v2283_v55 = vsel %vm1036_vm3, %v2210_v35, 0.0  ;;  %v1866_v41 = vadd.f32 %v1778_v48, %v1777_v12  ;;  %v2276_v3 = vrot.slane %v2275_v26, 4 }
 0x236   :  { %v2284_v36 = vadd.f32 %v2283_v55, %v2282_v54  ;;  %5339 = vrsqrt.f32 %v7597_v52  ;;  %v2285_v10 = vsel %vm1036_vm3, %v2211_v34, 0.0  ;;  %v2005_v23 = vsub.f32 1.5, %v2004_v4 }
 0x237   :  { %v1780_v44 = vmul.f32 %v7581_v16, %v7581_v16  ;;  %v2212_v14 = vmul.f32 %v5555_v19, %v2148_v61  ;;  %v1862_v6 = vrot.slane %v1861_v31, 2  ;;  %v1867_v15 = vadd.f32 %v1866_v41, %v1779_v59 }
 0x238   :  { %v2286_v28 = vadd.f32 %v2285_v10, %v2284_v36  ;;  %v2277_v39 = vadd.f32 %v2276_v3, %v2275_v26  ;;  %v2006_v24 = vmul.f32 %v5338_v30, %v2005_v23  ;;  %v5557_v3 = vld [vmem:[%s10956_s0 + $0x50] sm:$0xff]  ;;  %vm2017_vm1 = vweird.f32 %v7597_v52 }
 0x239   :  { %v7614_v45 = vpop.xlane.xlu0 %1644  ;;  %v7617_v60 = vpop.xlane.xlu2 %1641  ;;  %v1863_v42 = vadd.f32 %v1862_v6, %v1861_v31  ;;  %v1868_v40 = vadd.f32 %v1867_v15, %v1780_v44  ;;  %v2287_v17 = vsel %vm1036_vm3, %v2212_v14, 0.0 }
 0x23a   :  { %v7619_v43 = vpop.xlane.xlu1 %1638  ;;  %v1782_v5 = vmul.f32 %v7617_v60, %v7617_v60  ;;  %v2010_v11 = vsel %vm2009_vm14, %v5338_v30, %v2006_v24  ;;  %v2278_v18 = vrot.slane %v2277_v39, 2  ;;  %v2288_v9 = vadd.f32 %v2287_v17, %v2286_v28 }
 0x23b   :  { %v1781_v47 = vmul.f32 %v7619_v43, %v7619_v43  ;;  %v2149_v57 = vmul.f32 %v2010_v11, %v7441_v38  ;;  %v2150_v50 = vmul.f32 %v2010_v11, %v7464_v51  ;;  %v1864_v32 = vrot.slane %v1863_v42, 1 }
 0x23c   :  { %v5340_v29 = vpop.eup %5339  ;;  %v1869_v26 = vrot.slane %v1868_v40, 4  ;;  %v2151_v61 = vmul.f32 %v2010_v11, %v7462_v13  ;;  %v2279_v21 = vadd.f32 %v2278_v18, %v2277_v39  ;;  %v1783_v51 = vmul.f32 %v7614_v45, %v7614_v45 }
 0x23d   :  { %v2012_v46 = vmul.f32 %v5340_v29, %v7597_v52  ;;  %v2213_v25 = vmul.f32 %v5556_v1, %v2149_v57  ;;  %v2214_v30 = vmul.f32 %v7159_v27, %v2150_v50  ;;  %v1875_v53 = vadd.f32 %v1782_v5, %v1781_v47  ;;  %v5559_v1 = vld [vmem:[%s10956_s0 + $0x60] sm:$0xff] }
 0x23e   :  { %v1865_v34 = vadd.f32 %v1864_v32, %v1863_v42  ;;  %v1870_v38 = vadd.f32 %v1869_v26, %v1868_v40  ;;  %v2289_v54 = vrot.slane %v2288_v9, 4  ;;  %v2280_v31 = vrot.slane %v2279_v21, 1 }
 0x23f   :  { %v2013_v35 = vmul.f32 %v5340_v29, %v2012_v46  ;;  %v2295_v13 = vsel %vm1036_vm3, %v2213_v25, 0.0  ;;  %v2296_v4 = vsel %vm1036_vm3, %v2214_v30, 0.0  ;;  %v1876_v59 = vadd.f32 %v1875_v53, %v1783_v51  ;;  %v5560_v53 = vld [vmem:[%s10956_s0 + $0x68] sm:$0xff] }
 0x240   :  { %v7640_v12 = vadd.f32 1e-16, %v1865_v34  ;;  %v1871_v48 = vrot.slane %v1870_v38, 2  ;;  %v2215_v10 = vmul.f32 %v5557_v3, %v2151_v61  ;;  %vm2018_vm15 = vweird.f32 %v5340_v29 }
 0x241   :  { %v7637_v8 = vpop.xlane.xlu0 %1653  ;;  %v2014_v55 = vmul.f32 0.5, %v2013_v35  ;;  %v7642_v36 = vpop.xlane.xlu2 %1650  ;;  %v7653_v19 = vadd.f32 %v2280_v31, %v2279_v21  ;;  %v2152_v28 = vmul.f32 %v2010_v11, %v7460_v56  ;;  %v2297_v6 = vadd.f32 %v2296_v4, %v2295_v13  ;;  %vm2019_vm2 = vmor %vm2017_vm1, %vm2018_vm15 }
 0x242   :  { %v7644_v27 = vpop.xlane.xlu1 %1647  ;;  %5341 = vrsqrt.f32 %v7640_v12  ;;  %v1872_v44 = vadd.f32 %v1871_v48, %v1870_v38  ;;  %v2290_v40 = vadd.f32 %v2289_v54, %v2288_v9  ;;  %v2298_v5 = vsel %vm1036_vm3, %v2215_v10, 0.0 }
 0x243   :  { %v1784_v41 = vmul.f32 %v7644_v27, %v7644_v27  ;;  %v2015_v23 = vsub.f32 1.5, %v2014_v55  ;;  %v2477_v24 = vmul.f32 %v7653_v19, %v7653_v19  ;;  %v1786_v56 = vmul.f32 %v7637_v8, %v7637_v8  ;;  %v5561_v55 = vld [vmem:[%s10956_s0 + $0x70] sm:$0xff] }
 0x244   :  { %v1873_v39 = vrot.slane %v1872_v44, 1  ;;  %v1785_v52 = vmul.f32 %v7642_v36, %v7642_v36  ;;  %v2299_v26 = vadd.f32 %v2298_v5, %v2297_v6  ;;  %v2291_v30 = vrot.slane %v2290_v40, 2 }
 0x245   :  { %v1877_v14 = vadd.f32 %v1876_v59, %v1784_v41  ;;  %v2016_v15 = vmul.f32 %v5340_v29, %v2015_v23  ;;  %v2493_v46 = vsel %vm1036_vm3, %v2477_v24, 0.0  ;;  %vm2027_vm4 = vweird.f32 %v7640_v12 }
 0x246   :  { %v1874_v50 = vadd.f32 %v1873_v39, %v1872_v44  ;;  %2494 = vadd.xlane.f32.xlu2 %v2493_v46  ;;  %v2292_v59 = vadd.f32 %v2291_v30, %v2290_v40 }
 0x247   :  { %v1878_v42 = vrot.slane %v1877_v14, 4  ;;  %v2020_v47 = vsel %vm2019_vm2, %v5340_v29, %v2016_v15  ;;  %v5562_v15 = vld [vmem:[%s10956_s0 + $0x78] sm:$0xff] }
 0x248   :  { %v2153_v18 = vmul.f32 %v2020_v47, %v7497_v7  ;;  %v2154_v17 = vmul.f32 %v2020_v47, %v7495_v33  ;;  %v5342_v57 = vpop.eup %5341  ;;  %v5558_v33 = vld [vmem:[%s10956_s0 + $0x58] sm:$0xff]  ;;  %v2155_v61 = vmul.f32 %v2020_v47, %v7489_v20  ;;  %v7684_v38 = vadd.f32 1e-16, %v1874_v50 }
 0x249   :  { %v7666_v11 = vpop.xlane.xlu0 %1662  ;;  %v1879_v9 = vadd.f32 %v1878_v42, %v1877_v14  ;;  %v7669_v32 = vpop.xlane.xlu2 %1659  ;;  %v2216_v7 = vmul.f32 %v5558_v33, %v2152_v28  ;;  %v2022_v34 = vmul.f32 %v5342_v57, %v7640_v12  ;;  %v1884_v20 = vadd.f32 %v1786_v56, %v1785_v52 }
 0x24a   :  { %v7671_v29 = vpop.xlane.xlu1 %1656  ;;  %v2217_v25 = vmul.f32 %v5559_v1, %v2153_v18  ;;  %v2218_v35 = vmul.f32 %v5560_v53, %v2154_v17  ;;  %v2156_v51 = vmul.f32 %v2020_v47, %v7522_v58  ;;  %5343 = vrsqrt.f32 %v7684_v38 }
 0x24b   :  { %v1880_v21 = vrot.slane %v1879_v9, 2  ;;  %v2023_v54 = vmul.f32 %v5342_v57, %v2022_v34  ;;  %v2300_v13 = vsel %vm1036_vm3, %v2216_v7, 0.0  ;;  %v2219_v48 = vmul.f32 %v5561_v55, %v2155_v61 }
 0x24c   :  { %v1787_v31 = vmul.f32 %v7671_v29, %v7671_v29  ;;  %v2308_v41 = vsel %vm1036_vm3, %v2217_v25, 0.0  ;;  %v2309_v3 = vsel %vm1036_vm3, %v2218_v35, 0.0  ;;  %v2301_v10 = vadd.f32 %v2300_v13, %v2299_v26 }
 0x24d   :  { %v1881_v4 = vadd.f32 %v1880_v21, %v1879_v9  ;;  %v2024_v58 = vmul.f32 0.5, %v2023_v54  ;;  %v1788_v44 = vmul.f32 %v7669_v32, %v7669_v32  ;;  %v2293_v28 = vrot.slane %v2292_v59, 1 }
 0x24e   :  { %v1885_v14 = vadd.f32 %v1884_v20, %v1787_v31  ;;  %v2220_v39 = vmul.f32 %v5562_v15, %v2156_v51  ;;  %vm2028_vm5 = vweird.f32 %v5342_v57  ;;  %v2302_v5 = vrot.slane %v2301_v10, 4 }
 0x24f   :  { %v1882_v23 = vrot.slane %v1881_v4, 1  ;;  %v2025_v24 = vsub.f32 1.5, %v2024_v58  ;;  %v2310_v47 = vadd.f32 %v2309_v3, %v2308_v41  ;;  %v7708_v56 = vadd.f32 %v2293_v28, %v2292_v59  ;;  %vm2029_vm0 = vmor %vm2027_vm4, %vm2028_vm5 }
 0x250   :  { %v1886_v17 = vadd.f32 %v1885_v14, %v1788_v44  ;;  %v5344_v52 = vpop.eup %5343  ;;  %v2311_v50 = vsel %vm1036_vm3, %v2219_v48, 0.0  ;;  %v1789_v9 = vmul.f32 %v7666_v11, %v7666_v11  ;;  %v2303_v1 = vadd.f32 %v2302_v5, %v2301_v10  ;;  %v5565_v14 = vld [vmem:[%s10956_s0 + $0x90] sm:$0xff] }
 0x251   :  { %v7699_v6 = vpop.xlane.xlu0 %1671  ;;  %v7704_v42 = vpop.xlane.xlu2 %1668  ;;  %v1883_v18 = vadd.f32 %v1882_v23, %v1881_v4  ;;  %v2026_v46 = vmul.f32 %v5342_v57, %v2025_v24  ;;  %v2032_v7 = vmul.f32 %v5344_v52, %v7684_v38  ;;  %v2313_v25 = vsel %vm1036_vm3, %v2220_v39, 0.0 }
 0x252   :  { %v7706_v40 = vpop.xlane.xlu1 %1665  ;;  %v1887_v61 = vrot.slane %v1886_v17, 4  ;;  %v2478_v53 = vmul.f32 %v7708_v56, %v7708_v56  ;;  %v2312_v34 = vadd.f32 %v2311_v50, %v2310_v47  ;;  %v1791_v12 = vmul.f32 %v7704_v42, %v7704_v42 }
 0x253   :  { %v1790_v33 = vmul.f32 %v7706_v40, %v7706_v40  ;;  %v7718_v26 = vadd.f32 1e-16, %v1883_v18  ;;  %v2030_v30 = vsel %vm2029_vm0, %v5342_v57, %v2026_v46  ;;  %v2033_v54 = vmul.f32 %v5344_v52, %v2032_v7  ;;  %v5563_v57 = vld [vmem:[%s10956_s0 + $0x80] sm:$0xff] }
 0x254   :  { %v2157_v21 = vmul.f32 %v2030_v30, %v7520_v0  ;;  %v2158_v20 = vmul.f32 %v2030_v30, %v7517_v49  ;;  %v2159_v51 = vmul.f32 %v2030_v30, %v7564_v2  ;;  %v1888_v13 = vadd.f32 %v1887_v61, %v1886_v17  ;;  %v5564_v0 = vld [vmem:[%s10956_s0 + $0x88] sm:$0xff] }
 0x255   :  { %v1893_v35 = vadd.f32 %v1790_v33, %v1789_v9  ;;  %5345 = vrsqrt.f32 %v7718_v26  ;;  %v1792_v49 = vmul.f32 %v7699_v6, %v7699_v6  ;;  %v2304_v4 = vrot.slane %v2303_v1, 2  ;;  %v5566_v33 = vld [vmem:[%s10956_s0 + $0x98] sm:$0xff] }
 0x256   :  { %v2221_v55 = vmul.f32 %v5563_v57, %v2157_v21  ;;  %v2222_v48 = vmul.f32 %v5564_v0, %v2158_v20  ;;  %v2034_v2 = vmul.f32 0.5, %v2033_v54  ;;  %v1889_v59 = vrot.slane %v1888_v13, 2 }
 0x257   :  { %v2496_v41 = vsel %vm1036_vm3, %v2478_v53, 0.0  ;;  %v1894_v3 = vadd.f32 %v1893_v35, %v1791_v12  ;;  %v2314_v23 = vadd.f32 %v2313_v25, %v2312_v34  ;;  %v2160_v44 = vmul.f32 %v2030_v30, %v7562_v62 }
 0x258   :  { %vm2038_vm6 = vweird.f32 %v5344_v52  ;;  %2497 = vadd.xlane.f32.xlu0 %v2496_v41  ;;  %v2223_v28 = vmul.f32 %v5565_v14, %v2159_v51  ;;  %v2035_v15 = vsub.f32 1.5, %v2034_v2  ;;  %v1890_v39 = vadd.f32 %v1889_v59, %v1888_v13 }
 0x259   :  { %v7737_v31 = vpop.xlane.xlu0 %1680  ;;  %v7740_v58 = vpop.xlane.xlu2 %1677  ;;  %v1895_v24 = vadd.f32 %v1894_v3, %v1792_v49  ;;  %v2321_v5 = vsel %vm1036_vm3, %v2221_v55, 0.0  ;;  %vm2037_vm7 = vweird.f32 %v7684_v38  ;;  %v2305_v47 = vadd.f32 %v2304_v4, %v2303_v1 }
 0x25a   :  { %v7742_v10 = vpop.xlane.xlu1 %1674  ;;  %v2322_v17 = vsel %vm1036_vm3, %v2222_v48, 0.0  ;;  %v2036_v62 = vmul.f32 %v5344_v52, %v2035_v15  ;;  %v1891_v50 = vrot.slane %v1890_v39, 1  ;;  %v2315_v9 = vrot.slane %v2314_v23, 4  ;;  %vm2039_vm8 = vmor %vm2037_vm7, %vm2038_vm6  ;;  %v5568_v48 = vld [vmem:[%s10956_s0 + $0xa8] sm:$0xff] }
 0x25b   :  { %v7750_v18 = vpop.eup %5345  ;;  %v1896_v46 = vrot.slane %v1895_v24, 4  ;;  %v2224_v7 = vmul.f32 %v5566_v33, %v2160_v44  ;;  %v2306_v38 = vrot.slane %v2305_v47, 1  ;;  %v2324_v1 = vsel %vm1036_vm3, %v2223_v28, 0.0 }
 0x25c   :  { %v2042_v61 = vmul.f32 %v7750_v18, %v7718_v26  ;;  %v2040_v25 = vsel %vm2039_vm8, %v5344_v52, %v2036_v62  ;;  %vm2047_vm9 = vweird.f32 %v7718_v26  ;;  %v1892_v30 = vadd.f32 %v1891_v50, %v1890_v39 }
 0x25d   :  { %v1897_v53 = vadd.f32 %v1896_v46, %v1895_v24  ;;  %v2323_v35 = vadd.f32 %v2322_v17, %v2321_v5  ;;  %v2161_v34 = vmul.f32 %v2040_v25, %v7556_v37  ;;  %v2162_v21 = vmul.f32 %v2040_v25, %v7587_v22  ;;  %v5567_v22 = vld [vmem:[%s10956_s0 + $0xa0] sm:$0xff]  ;;  %v5569_v5 = vld [vmem:[%s10956_s0 + $0xb0] sm:$0xff] }
 0x25e   :  { %v1794_v20 = vmul.f32 %v7740_v58, %v7740_v58  ;;  %v2043_v51 = vmul.f32 %v7750_v18, %v2042_v61  ;;  %v7768_v54 = vadd.f32 1e-16, %v1892_v30  ;;  %v7770_v52 = vadd.f32 %v2306_v38, %v2305_v47 }
 0x25f   :  { %v1898_v13 = vrot.slane %v1897_v53, 2  ;;  %v2163_v37 = vmul.f32 %v2040_v25, %v7585_v63  ;;  %v2225_v0 = vmul.f32 %v5567_v22, %v2161_v34  ;;  %v2226_v49 = vmul.f32 %v5568_v48, %v2162_v21  ;;  %v5570_v21 = vld [vmem:[%s10956_s0 + $0xb8] sm:$0xff] }
 0x260   :  { %v1793_v4 = vmul.f32 %v7742_v10, %v7742_v10  ;;  %v2326_v2 = vsel %vm1036_vm3, %v2224_v7, 0.0  ;;  %v2044_v59 = vmul.f32 0.5, %v2043_v51  ;;  %5347 = vrsqrt.f32 %v7768_v54 }
 0x261   :  { %v7765_v12 = vpop.xlane.xlu0 %1689  ;;  %v7772_v57 = vpop.xlane.xlu2 %1686  ;;  %v1899_v41 = vadd.f32 %v1898_v13, %v1897_v53  ;;  %v2325_v63 = vadd.f32 %v2324_v1, %v2323_v35  ;;  %v2334_v3 = vsel %vm1036_vm3, %v2225_v0, 0.0  ;;  %v2335_v44 = vsel %vm1036_vm3, %v2226_v49, 0.0  ;;  %v5571_v49 = vld [vmem:[%s10956_s0 + $0xc0] sm:$0xff] }
 0x262   :  { %v7774_v55 = vpop.xlane.xlu1 %1683  ;;  %v2479_v14 = vmul.f32 %v7770_v52, %v7770_v52  ;;  %v2045_v28 = vsub.f32 1.5, %v2044_v59  ;;  %vm2048_vm10 = vweird.f32 %v7750_v18  ;;  %v2316_v39 = vadd.f32 %v2315_v9, %v2314_v23 }
 0x263   :  { %v1900_v15 = vrot.slane %v1899_v41, 1  ;;  %v2164_v24 = vmul.f32 %v2040_v25, %v7581_v16  ;;  %v2227_v47 = vmul.f32 %v5569_v5, %v2163_v37  ;;  %v1902_v62 = vadd.f32 %v1794_v20, %v1793_v4  ;;  %vm2049_vm11 = vmor %vm2047_vm9, %vm2048_vm10 }
 0x264   :  { %v2499_v17 = vsel %vm1036_vm3, %v2479_v14, 0.0  ;;  %v2336_v50 = vadd.f32 %v2335_v44, %v2334_v3  ;;  %v2046_v46 = vmul.f32 %v7750_v18, %v2045_v28  ;;  %v2317_v7 = vrot.slane %v2316_v39, 2 }
 0x265   :  { %v1901_v33 = vadd.f32 %v1900_v15, %v1899_v41  ;;  %2500 = vadd.xlane.f32.xlu1 %v2499_v17  ;;  %v2327_v61 = vadd.f32 %v2326_v2, %v2325_v63  ;;  %v1795_v16 = vmul.f32 %v7737_v31, %v7737_v31  ;;  %v1798_v23 = vmul.f32 %v7765_v12, %v7765_v12 }
 0x266   :  { %v1797_v9 = vmul.f32 %v7772_v57, %v7772_v57  ;;  %v7808_v1 = vpop.eup %5347  ;;  %v2050_v25 = vsel %vm2049_vm11, %v7750_v18, %v2046_v46  ;;  %v2318_v53 = vadd.f32 %v2317_v7, %v2316_v39  ;;  %v1796_v26 = vmul.f32 %v7774_v55, %v7774_v55 }
 0x267   :  { %v7811_v30 = vadd.f32 1e-16, %v1901_v33  ;;  %v2228_v20 = vmul.f32 %v5570_v21, %v2164_v24  ;;  %v2337_v51 = vsel %vm1036_vm3, %v2227_v47, 0.0  ;;  %v2165_v13 = vmul.f32 %v2050_v25, %v7619_v43  ;;  %v5573_v47 = vld [vmem:[%s10956_s0 + $0xd0] sm:$0xff] }
 0x268   :  { %v2166_v18 = vmul.f32 %v2050_v25, %v7617_v60  ;;  %v2338_v37 = vadd.f32 %v2337_v51, %v2336_v50  ;;  %v2052_v22 = vmul.f32 %v7808_v1, %v7768_v54  ;;  %vm2057_vm12 = vweird.f32 %v7768_v54  ;;  %v5572_v60 = vld [vmem:[%s10956_s0 + $0xc8] sm:$0xff] }
 0x269   :  { %v7806_v38 = vpop.xlane.xlu0 %1698  ;;  %v7815_v35 = vpop.xlane.xlu2 %1695  ;;  %5349 = vrsqrt.f32 %v7811_v30  ;;  %v1903_v0 = vadd.f32 %v1902_v62, %v1795_v16  ;;  %v2167_v48 = vmul.f32 %v2050_v25, %v7614_v45  ;;  %v2229_v4 = vmul.f32 %v5571_v49, %v2165_v13 }
 0x26a   :  { %v7817_v34 = vpop.xlane.xlu1 %1692  ;;  %v2230_v43 = vmul.f32 %v5572_v60, %v2166_v18  ;;  %v2328_v2 = vrot.slane %v2327_v61, 4  ;;  %v2053_v59 = vmul.f32 %v7808_v1, %v2052_v22  ;;  %v2319_v41 = vrot.slane %v2318_v53, 1  ;;  %v5574_v18 = vld [vmem:[%s10956_s0 + $0xd8] sm:$0xff] }
 0x26b   :  { %v1911_v63 = vadd.f32 %v1798_v23, %v1797_v9  ;;  %v1904_v3 = vadd.f32 %v1903_v0, %v1796_v26  ;;  %v2168_v44 = vmul.f32 %v2050_v25, %v7644_v27  ;;  %v2347_v45 = vsel %vm1036_vm3, %v2229_v4, 0.0 }
 0x26c   :  { %v7841_v14 = vmul.f32 %v7806_v38, %v7806_v38  ;;  %v2339_v28 = vsel %vm1036_vm3, %v2228_v20, 0.0  ;;  %v2348_v15 = vsel %vm1036_vm3, %v2230_v43, 0.0  ;;  %v2054_v39 = vmul.f32 0.5, %v2053_v59 }
 0x26d   :  { %v7845_v24 = vadd.f32 %v2319_v41, %v2318_v53  ;;  %v1905_v5 = vrot.slane %v1904_v3, 4  ;;  %v2231_v17 = vmul.f32 %v5573_v47, %v2167_v48  ;;  %vm2058_vm13 = vweird.f32 %v7808_v1 }
 0x26e   :  { %v1799_v27 = vmul.f32 %v7817_v34, %v7817_v34  ;;  %v2329_v62 = vadd.f32 %v2328_v2, %v2327_v61  ;;  %v2055_v33 = vsub.f32 1.5, %v2054_v39  ;;  %v1800_v23 = vmul.f32 %v7815_v35, %v7815_v35  ;;  %vm2059_vm15 = vmor %vm2057_vm12, %vm2058_vm13 }
 0x26f   :  { %v7855_v46 = vpop.eup %5349  ;;  %v2480_v7 = vmul.f32 %v7845_v24, %v7845_v24  ;;  %v1906_v16 = vadd.f32 %v1905_v5, %v1904_v3  ;;  %v2349_v53 = vadd.f32 %v2348_v15, %v2347_v45  ;;  %vm2067_vm14 = vweird.f32 %v7811_v30  ;;  %v5575_v5 = vld [vmem:[%s10956_s0 + $0xe0] sm:$0xff] }
 0x270   :  { %v2062_v61 = vmul.f32 %v7855_v46, %v7811_v30  ;;  %v1912_v26 = vadd.f32 %v1911_v63, %v1799_v27  ;;  %v2330_v21 = vrot.slane %v2329_v62, 2  ;;  %v2056_v20 = vmul.f32 %v7808_v1, %v2055_v33  ;;  %v5577_v33 = vld [vmem:[%s10956_s0 + $0xf0] sm:$0xff] }
 0x271   :  { %v7853_v50 = vpop.xlane.xlu0 %1707  ;;  %v7861_v9 = vpop.xlane.xlu2 %1704  ;;  %v2502_v51 = vsel %vm1036_vm3, %v2480_v7, 0.0  ;;  %v1907_v13 = vrot.slane %v1906_v16, 2  ;;  %v2232_v22 = vmul.f32 %v5574_v18, %v2168_v44  ;;  %v2350_v4 = vsel %vm1036_vm3, %v2231_v17, 0.0 }
 0x272   :  { %v7863_v25 = vpop.xlane.xlu1 %1701  ;;  %v2063_v0 = vmul.f32 %v7855_v46, %v2062_v61  ;;  %2503 = vadd.xlane.f32.xlu2 %v2502_v51  ;;  %v1913_v48 = vadd.f32 %v1912_v26, %v1800_v23  ;;  %v2331_v49 = vadd.f32 %v2330_v21, %v2329_v62  ;;  %v2060_v60 = vsel %vm2059_vm15, %v7808_v1, %v2056_v20  ;;  %v5578_v20 = vld [vmem:[%s10956_s0 + $0xf8] sm:$0xff] }
 0x273   :  { %v1908_v43 = vadd.f32 %v1907_v13, %v1906_v16  ;;  %v2340_v2 = vadd.f32 %v2339_v28, %v2338_v37  ;;  %v2351_v59 = vadd.f32 %v2350_v4, %v2349_v53  ;;  %v2169_v41 = vmul.f32 %v2060_v60, %v7642_v36  ;;  %v5576_v37 = vld [vmem:[%s10956_s0 + $0xe8] sm:$0xff] }
 0x274   :  { %v2170_v63 = vmul.f32 %v2060_v60, %v7637_v8  ;;  %v2171_v3 = vmul.f32 %v2060_v60, %v7671_v29  ;;  %v2064_v54 = vmul.f32 0.5, %v2063_v0  ;;  %v1914_v45 = vrot.slane %v1913_v48, 4 }
 0x275   :  { %v1909_v44 = vrot.slane %v1908_v43, 1  ;;  %v2332_v15 = vrot.slane %v2331_v49, 1  ;;  %v2172_v39 = vmul.f32 %v2060_v60, %v7669_v32  ;;  %v2233_v1 = vmul.f32 %v5575_v5, %v2169_v41 }
 0x276   :  { %v2234_v36 = vmul.f32 %v5576_v37, %v2170_v63  ;;  %vm2068_vm1 = vweird.f32 %v7855_v46  ;;  %v2065_v29 = vsub.f32 1.5, %v2064_v54  ;;  %v1915_v47 = vadd.f32 %v1914_v45, %v1913_v48 }
 0x277   :  { %v1910_v28 = vadd.f32 %v1909_v44, %v1908_v43  ;;  %v7893_v17 = vadd.f32 %v2332_v15, %v2331_v49  ;;  %v2352_v62 = vsel %vm1036_vm3, %v2232_v22, 0.0  ;;  %v2235_v7 = vmul.f32 %v5577_v33, %v2171_v3  ;;  %vm2069_vm2 = vmor %vm2067_vm14, %vm2068_vm1 }
 0x278   :  { %v2360_v16 = vsel %vm1036_vm3, %v2233_v1, 0.0  ;;  %v2361_v23 = vsel %vm1036_vm3, %v2234_v36, 0.0  ;;  %v2353_v53 = vadd.f32 %v2352_v62, %v2351_v59  ;;  %v2066_v61 = vmul.f32 %v7855_v46, %v2065_v29 }
 0x279   :  { %v7891_v8 = vpop.xlane.xlu0 %1716  ;;  %v7895_v32 = vpop.xlane.xlu2 %1713  ;;  %v7906_v26 = vadd.f32 1e-16, %v1910_v28  ;;  %v1916_v21 = vrot.slane %v1915_v47, 2  ;;  %v2236_v51 = vmul.f32 %v5578_v20, %v2172_v39  ;;  %v2362_v13 = vadd.f32 %v2361_v23, %v2360_v16 }
 0x27a   :  { %v7897_v27 = vpop.xlane.xlu1 %1710  ;;  %v2481_v18 = vmul.f32 %v7893_v17, %v7893_v17  ;;  %v1802_v22 = vmul.f32 %v7863_v25, %v7863_v25  ;;  %v2070_v0 = vsel %vm2069_vm2, %v7855_v46, %v2066_v61  ;;  %v1804_v48 = vmul.f32 %v7853_v50, %v7853_v50  ;;  %v5582_v61 = vld [vmem:[%s10956_s0 + $0x118] sm:$0xff] }
 0x27b   :  { %5351 = vrsqrt.f32 %v7906_v26  ;;  %v2341_v49 = vrot.slane %v2340_v2, 4  ;;  %v2363_v4 = vsel %vm1036_vm3, %v2235_v7, 0.0  ;;  %v2173_v60 = vmul.f32 %v2070_v0, %v7666_v11 }
 0x27c   :  { %v2174_v30 = vmul.f32 %v2070_v0, %v7706_v40  ;;  %v1803_v43 = vmul.f32 %v7861_v9, %v7861_v9  ;;  %v2175_v59 = vmul.f32 %v2070_v0, %v7704_v42  ;;  %v1917_v41 = vadd.f32 %v1916_v21, %v1915_v47  ;;  %v5581_v47 = vld [vmem:[%s10956_s0 + $0x110] sm:$0xff] }
 0x27d   :  { %v2505_v46 = vsel %vm1036_vm3, %v2481_v18, 0.0  ;;  %v1920_v63 = vadd.f32 %v1802_v22, %v7841_v14  ;;  %v2354_v3 = vrot.slane %v2353_v53, 4  ;;  %v2364_v54 = vadd.f32 %v2363_v4, %v2362_v13  ;;  %v5579_v14 = vld [vmem:[%s10956_s0 + $0x100] sm:$0xff] }
 0x27e   :  { %v2365_v44 = vsel %vm1036_vm3, %v2236_v51, 0.0  ;;  %v2176_v45 = vmul.f32 %v2070_v0, %v7699_v6  ;;  %2506 = vadd.xlane.f32.xlu0 %v2505_v46  ;;  %v1918_v40 = vrot.slane %v1917_v41, 1  ;;  %v2342_v39 = vadd.f32 %v2341_v49, %v2340_v2  ;;  %v5580_v6 = vld [vmem:[%s10956_s0 + $0x108] sm:$0xff] }
 0x27f   :  { %v1921_v15 = vadd.f32 %v1920_v63, %v1803_v43  ;;  %v1806_v42 = vmul.f32 %v7895_v32, %v7895_v32  ;;  %v2237_v37 = vmul.f32 %v5579_v14, %v2173_v60  ;;  %v2238_v36 = vmul.f32 %v5580_v6, %v2174_v30 }
 0x280   :  { %v1807_v2 = vmul.f32 %v7891_v8, %v7891_v8  ;;  %v1805_v29 = vmul.f32 %v7897_v27, %v7897_v27  ;;  %v2239_v62 = vmul.f32 %v5581_v47, %v2175_v59  ;;  %v1919_v33 = vadd.f32 %v1918_v40, %v1917_v41 }
 0x281   :  { %v7933_v11 = vpop.xlane.xlu0 %1725  ;;  %v7937_v5 = vpop.xlane.xlu2 %1722  ;;  %v1922_v7 = vadd.f32 %v1921_v15, %v1804_v48  ;;  %v2343_v16 = vrot.slane %v2342_v39, 2  ;;  %v7954_v23 = vadd.f32 %v2365_v44, %v2364_v54  ;;  %v7959_v21 = vmul.f32 %v5582_v61, %v2176_v45 }
 0x282   :  { %v7939_v1 = vpop.xlane.xlu1 %1719  ;;  %v5352_v28 = vpop.eup %5351  ;;  %vm2077_vm4 = vweird.f32 %v7906_v26  ;;  %v2355_v51 = vadd.f32 %v2354_v3, %v2353_v53  ;;  %v7963_v13 = vadd.f32 1e-16, %v1919_v33  ;;  %v1929_v0 = vadd.f32 %v1806_v42, %v1805_v29 }
 0x283   :  { %v2072_v20 = vmul.f32 %v5352_v28, %v7906_v26  ;;  %v1923_v18 = vrot.slane %v1922_v7, 4  ;;  %v2344_v22 = vadd.f32 %v2343_v16, %v2342_v39  ;;  %v2373_v48 = vsel %vm1036_vm3, %v2237_v37, 0.0 }
 0x284   :  { %v2374_v49 = vsel %vm1036_vm3, %v2238_v36, 0.0  ;;  %v2356_v60 = vrot.slane %v2355_v51, 2  ;;  %v2376_v30 = vsel %vm1036_vm3, %v2239_v62, 0.0  ;;  %5353 = vrsqrt.f32 %v7963_v13 }
 0x285   :  { %v2073_v4 = vmul.f32 %v5352_v28, %v2072_v20  ;;  %v1924_v43 = vadd.f32 %v1923_v18, %v1922_v7  ;;  %v2345_v59 = vrot.slane %v2344_v22, 1  ;;  %v1810_v53 = vmul.f32 %v7933_v11, %v7933_v11 }
 0x286   :  { %v2357_v46 = vadd.f32 %v2356_v60, %v2355_v51  ;;  %v1809_v63 = vmul.f32 %v7937_v5, %v7937_v5  ;;  %v1930_v44 = vadd.f32 %v1929_v0, %v1807_v2  ;;  %v1808_v45 = vmul.f32 %v7939_v1, %v7939_v1 }
 0x287   :  { %v2074_v41 = vmul.f32 0.5, %v2073_v4  ;;  %v1925_v3 = vrot.slane %v1924_v43, 2  ;;  %v7973_v54 = vadd.f32 %v2345_v59, %v2344_v22  ;;  %vm2078_vm5 = vweird.f32 %v5352_v28 }
 0x288   :  { %v2358_v42 = vrot.slane %v2357_v46, 1  ;;  %v2375_v37 = vadd.f32 %v2374_v49, %v2373_v48  ;;  %v1931_v29 = vadd.f32 %v1930_v44, %v1808_v45  ;;  %v1938_v33 = vadd.f32 %v1810_v53, %v1809_v63  ;;  %vm2079_vm0 = vmor %vm2077_vm4, %vm2078_vm5  ;;  %v5583_v53 = vld [vmem:[%s10956_s0 + $0x120] sm:$0xff] }
 0x289   :  { %v7977_v40 = vpop.xlane.xlu2 %1731  ;;  %v2075_v39 = vsub.f32 1.5, %v2074_v41  ;;  %v1926_v6 = vadd.f32 %v1925_v3, %v1924_v43  ;;  %v2482_v36 = vmul.f32 %v7973_v54, %v7973_v54  ;;  %v7985_v2 = vpop.xlane.xlu0 %1734  ;;  %v2367_v18 = vrot.slane %v7954_v23, 4 }
 0x28a   :  { %v7979_v15 = vpop.xlane.xlu1 %1728  ;;  %v7987_v62 = vadd.f32 %v2358_v42, %v2357_v46  ;;  %v1812_v7 = vmul.f32 %v7977_v40, %v7977_v40  ;;  %v5354_v16 = vpop.eup %5353  ;;  %v1932_v51 = vrot.slane %v1931_v29, 4  ;;  %vm2087_vm7 = vweird.f32 %v7963_v13 }
 0x28b   :  { %v1811_v14 = vmul.f32 %v7979_v15, %v7979_v15  ;;  %v2076_v47 = vmul.f32 %v5352_v28, %v2075_v39  ;;  %v1927_v61 = vrot.slane %v1926_v6, 1  ;;  %v2508_v20 = vsel %vm1036_vm3, %v2482_v36, 0.0 }
 0x28c   :  { %v2082_v0 = vmul.f32 %v5354_v16, %v7963_v13  ;;  %2509 = vadd.xlane.f32.xlu1 %v2508_v20  ;;  %v2483_v48 = vmul.f32 %v7987_v62, %v7987_v62  ;;  %vm2088_vm6 = vweird.f32 %v5354_v16  ;;  %v2378_v13 = vsel %vm1036_vm3, %v7959_v21, 0.0  ;;  %v5588_v21 = vld [vmem:[%s10956_s0 + $0x148] sm:$0xff] }
 0x28d   :  { %v2080_v22 = vsel %vm2079_vm0, %v5352_v28, %v2076_v47  ;;  %v1939_v49 = vadd.f32 %v1938_v33, %v1811_v14  ;;  %v1928_v41 = vadd.f32 %v1927_v61, %v1926_v6  ;;  %v1933_v28 = vadd.f32 %v1932_v51, %v1931_v29  ;;  %v5586_v33 = vld [vmem:[%s10956_s0 + $0x138] sm:$0xff]  ;;  %vm2089_vm8 = vmor %vm2087_vm7, %vm2088_vm6 }
 0x28e   :  { %v2177_v4 = vmul.f32 %v2080_v22, %v7742_v10  ;;  %v2178_v60 = vmul.f32 %v2080_v22, %v7740_v58  ;;  %v2179_v26 = vmul.f32 %v2080_v22, %v7737_v31  ;;  %v2180_v43 = vmul.f32 %v2080_v22, %v7774_v55  ;;  %v5584_v10 = vld [vmem:[%s10956_s0 + $0x128] sm:$0xff]  ;;  %v5585_v31 = vld [vmem:[%s10956_s0 + $0x130] sm:$0xff] }
 0x28f   :  { %v2083_v59 = vmul.f32 %v5354_v16, %v2082_v0  ;;  %v2511_v46 = vsel %vm1036_vm3, %v2483_v48, 0.0  ;;  %v2368_v55 = vadd.f32 %v2367_v18, %v7954_v23  ;;  %v8013_v45 = vadd.f32 1e-16, %v1928_v41 }
 0x290   :  { %v2241_v63 = vmul.f32 %v5583_v53, %v2177_v4  ;;  %v2242_v3 = vmul.f32 %v5584_v10, %v2178_v60  ;;  %v2243_v58 = vmul.f32 %v5585_v31, %v2179_v26  ;;  %2512 = vadd.xlane.f32.xlu2 %v2511_v46  ;;  %v1934_v39 = vrot.slane %v1933_v28, 2 }
 0x291   :  { %v2084_v44 = vmul.f32 0.5, %v2083_v59  ;;  %v1940_v42 = vadd.f32 %v1939_v49, %v1812_v7  ;;  %v2377_v6 = vadd.f32 %v2376_v30, %v2375_v37  ;;  %v8019_v47 = vpop.xlane.xlu2 %1740  ;;  %v2244_v23 = vmul.f32 %v5586_v33, %v2180_v43  ;;  %v8026_v18 = vpop.xlane.xlu0 %1743 }
 0x292   :  { %v8015_v14 = vpop.xlane.xlu1 %1737  ;;  %v2386_v36 = vsel %vm1036_vm3, %v2241_v63, 0.0  ;;  %v2387_v29 = vsel %vm1036_vm3, %v2242_v3, 0.0  ;;  %5355 = vrsqrt.f32 %v8013_v45  ;;  %v2389_v7 = vsel %vm1036_vm3, %v2243_v58, 0.0 }
 0x293   :  { %v2388_v61 = vadd.f32 %v2387_v29, %v2386_v36  ;;  %v2085_v20 = vsub.f32 1.5, %v2084_v44  ;;  %v1935_v51 = vadd.f32 %v1934_v39, %v1933_v28  ;;  %v1941_v30 = vrot.slane %v1940_v42, 4 }
 0x294   :  { %v2369_v37 = vrot.slane %v2368_v55, 2  ;;  %v1814_v48 = vmul.f32 %v8015_v14, %v8015_v14  ;;  %v1813_v4 = vmul.f32 %v7985_v2, %v7985_v2  ;;  %v2391_v43 = vsel %vm1036_vm3, %v2244_v23, 0.0 }
 0x295   :  { %v2390_v22 = vadd.f32 %v2389_v7, %v2388_v61  ;;  %v2086_v0 = vmul.f32 %v5354_v16, %v2085_v20  ;;  %v1936_v49 = vrot.slane %v1935_v51, 1  ;;  %v1942_v60 = vadd.f32 %v1941_v30, %v1940_v42 }
 0x296   :  { %v2370_v26 = vadd.f32 %v2369_v37, %v2368_v55  ;;  %v1816_v41 = vmul.f32 %v8026_v18, %v8026_v18  ;;  %v1947_v58 = vadd.f32 %v1814_v48, %v1813_v4  ;;  %v2379_v55 = vadd.f32 %v2378_v13, %v2377_v6  ;;  %v5590_v4 = vld [vmem:[%s10956_s0 + $0x158] sm:$0xff] }
 0x297   :  { %v2090_v59 = vsel %vm2089_vm8, %v5354_v16, %v2086_v0  ;;  %v2392_v46 = vadd.f32 %v2391_v43, %v2390_v22  ;;  %v1937_v3 = vadd.f32 %v1936_v49, %v1935_v51  ;;  %v1943_v31 = vrot.slane %v1942_v60, 2  ;;  %v5587_v16 = vld [vmem:[%s10956_s0 + $0x140] sm:$0xff] }
 0x298   :  { %v2181_v28 = vmul.f32 %v2090_v59, %v7772_v57  ;;  %v2182_v53 = vmul.f32 %v2090_v59, %v7765_v12  ;;  %v2183_v63 = vmul.f32 %v2090_v59, %v7817_v34  ;;  %v5356_v10 = vpop.eup %5355  ;;  %v5589_v12 = vld [vmem:[%s10956_s0 + $0x150] sm:$0xff]  ;;  %v2371_v34 = vrot.slane %v2370_v26, 1 }
 0x299   :  { %v2184_v42 = vmul.f32 %v2090_v59, %v7815_v35  ;;  %v2092_v6 = vmul.f32 %v5356_v10, %v8013_v45  ;;  %vm2097_vm9 = vweird.f32 %v8013_v45  ;;  %v8054_v36 = vadd.f32 1e-16, %v1937_v3  ;;  %v8062_v51 = vpop.xlane.xlu2 %1749 }
 0x29a   :  { %v2245_v44 = vmul.f32 %v5587_v16, %v2181_v28  ;;  %v2246_v39 = vmul.f32 %v5588_v21, %v2182_v53  ;;  %v2247_v57 = vmul.f32 %v5589_v12, %v2183_v63  ;;  %v1944_v29 = vadd.f32 %v1943_v31, %v1942_v60  ;;  %v8056_v33 = vpop.xlane.xlu1 %1746 }
 0x29b   :  { %v2393_v23 = vrot.slane %v2392_v46, 4  ;;  %v1815_v7 = vmul.f32 %v8019_v47, %v8019_v47  ;;  %v2093_v37 = vmul.f32 %v5356_v10, %v2092_v6  ;;  %5357 = vrsqrt.f32 %v8054_v36 }
 0x29c   :  { %v2399_v61 = vsel %vm1036_vm3, %v2245_v44, 0.0  ;;  %v2400_v20 = vsel %vm1036_vm3, %v2246_v39, 0.0  ;;  %v2402_v30 = vsel %vm1036_vm3, %v2247_v57, 0.0  ;;  %v1945_v22 = vrot.slane %v1944_v29, 1 }
 0x29d   :  { %v2401_v35 = vadd.f32 %v2400_v20, %v2399_v61  ;;  %v8066_v0 = vadd.f32 %v2371_v34, %v2370_v26  ;;  %v1948_v48 = vadd.f32 %v1947_v58, %v1815_v7  ;;  %v2380_v49 = vrot.slane %v2379_v55, 4  ;;  %v8075_v26 = vpop.xlane.xlu0 %1752 }
 0x29e   :  { %v2248_v60 = vmul.f32 %v5590_v4, %v2184_v42  ;;  %v2094_v59 = vmul.f32 0.5, %v2093_v37  ;;  %v1818_v13 = vmul.f32 %v8062_v51, %v8062_v51  ;;  %v1946_v28 = vadd.f32 %v1945_v22, %v1944_v29 }
 0x29f   :  { %v2403_v43 = vadd.f32 %v2402_v30, %v2401_v35  ;;  %v2484_v53 = vmul.f32 %v8066_v0, %v8066_v0  ;;  %v1949_v63 = vadd.f32 %v1948_v48, %v1816_v41  ;;  %v2381_v3 = vadd.f32 %v2380_v49, %v2379_v55 }
 0x2a0   :  { %v2095_v31 = vsub.f32 1.5, %v2094_v59  ;;  %vm2098_vm10 = vweird.f32 %v5356_v10  ;;  %v1817_v58 = vmul.f32 %v8056_v33, %v8056_v33  ;;  %v2394_v16 = vadd.f32 %v2393_v23, %v2392_v46  ;;  %v8102_v59 = vld [vmem:[%s10956_s0 + $0x168] sm:$0xff] }
 0x2a1   :  { %v8079_v44 = vadd.f32 1e-16, %v1946_v28  ;;  %v2514_v21 = vsel %vm1036_vm3, %v2484_v53, 0.0  ;;  %v1950_v39 = vrot.slane %v1949_v63, 4  ;;  %v2382_v12 = vrot.slane %v2381_v3, 2  ;;  %v5358_v57 = vpop.eup %5357  ;;  %vm2099_vm11 = vmor %vm2097_vm9, %vm2098_vm10 }
 0x2a2   :  { %v2404_v34 = vsel %vm1036_vm3, %v2248_v60, 0.0  ;;  %v2096_v42 = vmul.f32 %v5356_v10, %v2095_v31  ;;  %2515 = vadd.xlane.f32.xlu0 %v2514_v21  ;;  %v1819_v41 = vmul.f32 %v8075_v26, %v8075_v26  ;;  %v2395_v55 = vrot.slane %v2394_v16, 2  ;;  %v8090_v35 = vpop.xlane.xlu1 %1755  ;;  %v5594_v21 = vld [vmem:[%s10956_s0 + $0x178] sm:$0xff] }
 0x2a3   :  { %v2405_v6 = vadd.f32 %v2404_v34, %v2403_v43  ;;  %v2102_v46 = vmul.f32 %v5358_v57, %v8054_v36  ;;  %5359 = vrsqrt.f32 %v8079_v44  ;;  %v1956_v29 = vadd.f32 %v1818_v13, %v1817_v58 }
 0x2a4   :  { %v2100_v23 = vsel %vm2099_vm11, %v5356_v10, %v2096_v42  ;;  %vm2107_vm12 = vweird.f32 %v8054_v36  ;;  %v1951_v61 = vadd.f32 %v1950_v39, %v1949_v63  ;;  %v2383_v20 = vadd.f32 %v2382_v12, %v2381_v3  ;;  %v5591_v10 = vld [vmem:[%s10956_s0 + $0x160] sm:$0xff] }
 0x2a5   :  { %v2396_v7 = vadd.f32 %v2395_v55, %v2394_v16  ;;  %v2185_v30 = vmul.f32 %v2100_v23, %v7806_v38  ;;  %v2186_v37 = vmul.f32 %v2100_v23, %v7863_v25  ;;  %v2187_v45 = vmul.f32 %v2100_v23, %v7861_v9 }
 0x2a6   :  { %v2188_v22 = vmul.f32 %v2100_v23, %v7853_v50  ;;  %v2103_v48 = vmul.f32 %v5358_v57, %v2102_v46  ;;  %v1952_v49 = vrot.slane %v1951_v61, 2  ;;  %v2384_v4 = vrot.slane %v2383_v20, 1  ;;  %v5593_v50 = vld [vmem:[%s10956_s0 + $0x170] sm:$0xff] }
 0x2a7   :  { %v2397_v60 = vrot.slane %v2396_v7, 1  ;;  %v2249_v43 = vmul.f32 %v5591_v10, %v2185_v30  ;;  %v2250_v38 = vmul.f32 %v8102_v59, %v2186_v37  ;;  %v2251_v9 = vmul.f32 %v5593_v50, %v2187_v45 }
 0x2a8   :  { %v1820_v25 = vmul.f32 %v8090_v35, %v8090_v35  ;;  %v2104_v13 = vmul.f32 0.5, %v2103_v48  ;;  %v1953_v28 = vadd.f32 %v1952_v49, %v1951_v61  ;;  %v8110_v53 = vadd.f32 %v2384_v4, %v2383_v20 }
 0x2a9   :  { %v8112_v63 = vadd.f32 %v2397_v60, %v2396_v7  ;;  %v5360_v3 = vpop.eup %5359  ;;  %v2412_v31 = vsel %vm1036_vm3, %v2249_v43, 0.0  ;;  %v2413_v58 = vsel %vm1036_vm3, %v2250_v38, 0.0  ;;  %vm2108_vm13 = vweird.f32 %v5358_v57 }
 0x2aa   :  { %v1957_v16 = vadd.f32 %v1956_v29, %v1819_v41  ;;  %v2252_v39 = vmul.f32 %v5594_v21, %v2188_v22  ;;  %v2415_v12 = vsel %vm1036_vm3, %v2251_v9, 0.0  ;;  %v2105_v34 = vsub.f32 1.5, %v2104_v13  ;;  %vm2109_vm15 = vmor %vm2107_vm12, %vm2108_vm13 }
 0x2ab   :  { %v2112_v42 = vmul.f32 %v5360_v3, %v8079_v44  ;;  %vm2117_vm14 = vweird.f32 %v8079_v44  ;;  %v1954_v55 = vrot.slane %v1953_v28, 1  ;;  %v2485_v46 = vmul.f32 %v8110_v53, %v8110_v53  ;;  %v8171_v44 = vld [vmem:[%s10956_s0 + $0x1a0] sm:$0xff] }
 0x2ac   :  { %v2486_v23 = vmul.f32 %v8112_v63, %v8112_v63  ;;  %v1958_v41 = vadd.f32 %v1957_v16, %v1820_v25  ;;  %v2414_v29 = vadd.f32 %v2413_v58, %v2412_v31  ;;  %v2106_v61 = vmul.f32 %v5358_v57, %v2105_v34  ;;  %v5598_v16 = vld [vmem:[%s10956_s0 + $0x198] sm:$0xff] }
 0x2ad   :  { %v2113_v20 = vmul.f32 %v5360_v3, %v2112_v42  ;;  %v2406_v7 = vrot.slane %v2405_v6, 4  ;;  %v1955_v30 = vadd.f32 %v1954_v55, %v1953_v28  ;;  %v2517_v37 = vsel %vm1036_vm3, %v2485_v46, 0.0 }
 0x2ae   :  { %v2520_v45 = vsel %vm1036_vm3, %v2486_v23, 0.0  ;;  %v1959_v22 = vrot.slane %v1958_v41, 4  ;;  %v2110_v48 = vsel %vm2109_vm15, %v5358_v57, %v2106_v61  ;;  %vm2118_vm1 = vweird.f32 %v5360_v3  ;;  %2518 = vadd.xlane.f32.xlu1 %v2517_v37  ;;  %v8140_v57 = vld [vmem:[%s10956_s0 + $0x180] sm:$0xff] }
 0x2af   :  { %v2114_v49 = vmul.f32 0.5, %v2113_v20  ;;  %2521 = vadd.xlane.f32.xlu2 %v2520_v45  ;;  %v2407_v4 = vadd.f32 %v2406_v7, %v2405_v6  ;;  %v2189_v60 = vmul.f32 %v2110_v48, %v7897_v27  ;;  %v2190_v10 = vmul.f32 %v2110_v48, %v7895_v32  ;;  %v8146_v32 = vld [vmem:[%s10956_s0 + $0x188] sm:$0xff]  ;;  %v5597_v27 = vld [vmem:[%s10956_s0 + $0x190] sm:$0xff]  ;;  %vm2119_vm2 = vmor %vm2117_vm14, %vm2118_vm1 }
 0x2b0   :  { %v2191_v43 = vmul.f32 %v2110_v48, %v7891_v8  ;;  %v2192_v36 = vmul.f32 %v2110_v48, %v7939_v1  ;;  %v8135_v50 = vadd.f32 1e-16, %v1955_v30  ;;  %v1960_v9 = vadd.f32 %v1959_v22, %v1958_v41 }
 0x2b1   :  { %v2115_v38 = vsub.f32 1.5, %v2114_v49  ;;  %v2408_v25 = vrot.slane %v2407_v4, 2  ;;  %v2416_v13 = vadd.f32 %v2415_v12, %v2414_v29  ;;  %v2253_v6 = vmul.f32 %v8140_v57, %v2189_v60 }
 0x2b2   :  { %v2254_v8 = vmul.f32 %v8146_v32, %v2190_v10  ;;  %v2255_v1 = vmul.f32 %v5597_v27, %v2191_v43  ;;  %5361 = vrsqrt.f32 %v8135_v50  ;;  %v1961_v31 = vrot.slane %v1960_v9, 2  ;;  %v5602_v43 = vld [vmem:[%s10956_s0 + $0x1b8] sm:$0xff] }
 0x2b3   :  { %v2116_v28 = vmul.f32 %v5360_v3, %v2115_v38  ;;  %v2417_v58 = vsel %vm1036_vm3, %v2252_v39, 0.0  ;;  %v2256_v21 = vmul.f32 %v5598_v16, %v2192_v36  ;;  %v2425_v12 = vsel %vm1036_vm3, %v2253_v6, 0.0 }
 0x2b4   :  { %v2426_v34 = vsel %vm1036_vm3, %v2254_v8, 0.0  ;;  %v2428_v42 = vsel %vm1036_vm3, %v2255_v1, 0.0  ;;  %v1962_v23 = vadd.f32 %v1961_v31, %v1960_v9  ;;  %v2409_v41 = vadd.f32 %v2408_v25, %v2407_v4 }
 0x2b5   :  { %v2427_v55 = vadd.f32 %v2426_v34, %v2425_v12  ;;  %v2120_v46 = vsel %vm2119_vm2, %v5360_v3, %v2116_v28  ;;  %v2418_v45 = vadd.f32 %v2417_v58, %v2416_v13  ;;  %v2430_v22 = vsel %vm1036_vm3, %v2256_v21, 0.0 }
 0x2b6   :  { %v2193_v39 = vmul.f32 %v2120_v46, %v7937_v5  ;;  %v2194_v29 = vmul.f32 %v2120_v46, %v7933_v11  ;;  %v2195_v61 = vmul.f32 %v2120_v46, %v7979_v15  ;;  %v2196_v20 = vmul.f32 %v2120_v46, %v7977_v40  ;;  %v8177_v11 = vld [vmem:[%s10956_s0 + $0x1a8] sm:$0xff]  ;;  %v5601_v40 = vld [vmem:[%s10956_s0 + $0x1b0] sm:$0xff] }
 0x2b7   :  { %v2429_v7 = vadd.f32 %v2428_v42, %v2427_v55  ;;  %v1963_v30 = vrot.slane %v1962_v23, 1  ;;  %v2410_v37 = vrot.slane %v2409_v41, 1  ;;  %v2419_v10 = vrot.slane %v2418_v45, 4 }
 0x2b8   :  { %v2257_v3 = vmul.f32 %v8171_v44, %v2193_v39  ;;  %v2258_v5 = vmul.f32 %v8177_v11, %v2194_v29  ;;  %v2259_v15 = vmul.f32 %v5601_v40, %v2195_v61  ;;  %v5362_v48 = vpop.eup %5361  ;;  %v2260_v36 = vmul.f32 %v5602_v43, %v2196_v20 }
 0x2b9   :  { %v2431_v49 = vadd.f32 %v2430_v22, %v2429_v7  ;;  %v1964_v4 = vadd.f32 %v1963_v30, %v1962_v23  ;;  %v8183_v60 = vadd.f32 %v2410_v37, %v2409_v41  ;;  %v2122_v6 = vmul.f32 %v5362_v48, %v8135_v50  ;;  %v2495_v28 = vpop.xlane.xlu2 %2494 }
 0x2ba   :  { %v2438_v38 = vsel %vm1036_vm3, %v2257_v3, 0.0  ;;  %v2439_v9 = vsel %vm1036_vm3, %v2258_v5, 0.0  ;;  %v2441_v8 = vsel %vm1036_vm3, %v2259_v15, 0.0  ;;  %v2420_v31 = vadd.f32 %v2419_v10, %v2418_v45 }
 0x2bb   :  { %v2432_v25 = vrot.slane %v2431_v49, 4  ;;  %v2440_v13 = vadd.f32 %v2439_v9, %v2438_v38  ;;  %v8192_v27 = vadd.f32 1e-16, %v1964_v4  ;;  %v2487_v1 = vmul.f32 %v8183_v60, %v8183_v60 }
 0x2bc   :  { %v2123_v16 = vmul.f32 %v5362_v48, %v2122_v6  ;;  %v8196_v21 = vadd.f32 1e-16, %v2495_v28  ;;  %v2443_v34 = vsel %vm1036_vm3, %v2260_v36, 0.0  ;;  %v2421_v55 = vrot.slane %v2420_v31, 2  ;;  %v5606_v28 = vld [vmem:[%s10956_s0 + $0x1d8] sm:$0xff] }
 0x2bd   :  { %v2442_v58 = vadd.f32 %v2441_v8, %v2440_v13  ;;  %v2433_v12 = vadd.f32 %v2432_v25, %v2431_v49  ;;  %5363 = vrsqrt.f32 %v8192_v27  ;;  %v2523_v42 = vsel %vm1036_vm3, %v2487_v1, 0.0 }
 0x2be   :  { %v2124_v23 = vmul.f32 0.5, %v2123_v16  ;;  %2524 = vadd.xlane.f32.xlu0 %v2523_v42  ;;  %5365 = vrsqrt.f32 %v8196_v21  ;;  %v2422_v41 = vadd.f32 %v2421_v55, %v2420_v31  ;;  %vm2128_vm4 = vweird.f32 %v5362_v48 }
 0x2bf   :  { %v2444_v46 = vadd.f32 %v2443_v34, %v2442_v58  ;;  %v2434_v39 = vrot.slane %v2433_v12, 2  ;;  %vm2127_vm5 = vweird.f32 %v8135_v50  ;;  %vm2137_vm7 = vweird.f32 %v8192_v27 }
 0x2c0   :  { %v2125_v29 = vsub.f32 1.5, %v2124_v23  ;;  %v2423_v20 = vrot.slane %v2422_v41, 1  ;;  %vm2129_vm0 = vmor %vm2127_vm5, %vm2128_vm4  ;;  %vm2563_vm10 = vweird.f32 %v8196_v21 }
 0x2c1   :  { %v2445_v61 = vrot.slane %v2444_v46, 4  ;;  %v2435_v7 = vadd.f32 %v2434_v39, %v2433_v12 }
 0x2c2   :  { %v2126_v30 = vmul.f32 %v5362_v48, %v2125_v29  ;;  %v8203_v22 = vadd.f32 %v2423_v20, %v2422_v41 }
 0x2c3   :  { %v2446_v37 = vadd.f32 %v2445_v61, %v2444_v46  ;;  %v5364_v45 = vpop.eup %5363  ;;  %v2436_v15 = vrot.slane %v2435_v7, 1 }
 0x2c4   :  { %v8205_v3 = vpop.eup %5365  ;;  %v2130_v5 = vsel %vm2129_vm0, %v5362_v48, %v2126_v30  ;;  %v2132_v40 = vmul.f32 %v5364_v45, %v8192_v27  ;;  %v2488_v9 = vmul.f32 %v8203_v22, %v8203_v22  ;;  %v8219_v48 = vld [vmem:[%s10956_s0 + $0x1c0] sm:$0xff]  ;;  %vm2138_vm6 = vweird.f32 %v5364_v45 }
 0x2c5   :  { %v2447_v49 = vrot.slane %v2446_v37, 2  ;;  %v2197_v4 = vmul.f32 %v2130_v5, %v7985_v2  ;;  %v2198_v10 = vmul.f32 %v2130_v5, %v8015_v14  ;;  %v2199_v43 = vmul.f32 %v2130_v5, %v8019_v47  ;;  %v8225_v14 = vld [vmem:[%s10956_s0 + $0x1c8] sm:$0xff]  ;;  %vm2139_vm9 = vmor %vm2137_vm7, %vm2138_vm6 }
 0x2c6   :  { %v2200_v50 = vmul.f32 %v2130_v5, %v8026_v18  ;;  %v2133_v36 = vmul.f32 %v5364_v45, %v2132_v40  ;;  %v2558_v38 = vmul.f32 %v8205_v3, %v8196_v21  ;;  %v8231_v18 = vld [vmem:[%s10956_s0 + $0x1d0] sm:$0xff]  ;;  %v2526_v8 = vsel %vm1036_vm3, %v2488_v9, 0.0 }
 0x2c7   :  { %v2261_v2 = vmul.f32 %v8219_v48, %v2197_v4  ;;  %v2262_v47 = vmul.f32 %v8225_v14, %v2198_v10  ;;  %v2263_v25 = vmul.f32 %v8231_v18, %v2199_v43  ;;  %v8236_v1 = vadd.f32 %v2436_v15, %v2435_v7  ;;  %2527 = vadd.xlane.f32.xlu1 %v2526_v8 }
 0x2c8   :  { %v2134_v13 = vmul.f32 0.5, %v2133_v36  ;;  %v2559_v6 = vmul.f32 %v8205_v3, %v2558_v38  ;;  %v2264_v31 = vmul.f32 %v5606_v28, %v2200_v50  ;;  %v2448_v12 = vadd.f32 %v2447_v49, %v2446_v37  ;;  %v8267_v50 = vld [vmem:[%s10956_s0 + $0x1e0] sm:$0xff] }
 0x2c9   :  { %v2451_v58 = vsel %vm1036_vm3, %v2261_v2, 0.0  ;;  %v2452_v16 = vsel %vm1036_vm3, %v2262_v47, 0.0  ;;  %v2489_v46 = vmul.f32 %v8236_v1, %v8236_v1  ;;  %v2454_v23 = vsel %vm1036_vm3, %v2263_v25, 0.0  ;;  %v8289_v2 = vld [vmem:[%s10956_s0 + $0x1f8] sm:$0xff] }
 0x2ca   :  { %v2453_v34 = vadd.f32 %v2452_v16, %v2451_v58  ;;  %v2135_v42 = vsub.f32 1.5, %v2134_v13  ;;  %v2560_v55 = vmul.f32 0.5, %v2559_v6  ;;  %vm2564_vm8 = vweird.f32 %v8205_v3  ;;  %v8298_v16 = vld [vmem:[%s10956_s0] sm:$0xff] }
 0x2cb   :  { %v2498_v41 = vpop.xlane.xlu0 %2497  ;;  %v2449_v39 = vrot.slane %v2448_v12, 1  ;;  %v2529_v30 = vsel %vm1036_vm3, %v2489_v46, 0.0  ;;  %v2456_v27 = vsel %vm1036_vm3, %v2264_v31, 0.0  ;;  %vm2565_vm11 = vmor %vm2563_vm10, %vm2564_vm8 }
 0x2cc   :  { %v2455_v29 = vadd.f32 %v2454_v23, %v2453_v34  ;;  %v2136_v61 = vmul.f32 %v5364_v45, %v2135_v42  ;;  %v2561_v20 = vsub.f32 1.5, %v2560_v55  ;;  %v2542_v7 = vadd.f32 1e-16, %v2498_v41  ;;  %2530 = vadd.xlane.f32.xlu2 %v2529_v30 }
 0x2cd   :  { %v8251_v37 = vadd.f32 %v2449_v39, %v2448_v12 }
 0x2ce   :  { %v2140_v5 = vsel %vm2139_vm9, %v5364_v45, %v2136_v61  ;;  %v2562_v40 = vmul.f32 %v8205_v3, %v2561_v20  ;;  %5367 = vrsqrt.f32 %v2542_v7  ;;  %v2457_v43 = vadd.f32 %v2456_v27, %v2455_v29 }
 0x2cf   :  { %v2201_v15 = vmul.f32 %v2140_v5, %v8056_v33  ;;  %v2202_v49 = vmul.f32 %v2140_v5, %v8062_v51  ;;  %v2203_v4 = vmul.f32 %v2140_v5, %v8075_v26  ;;  %v2204_v10 = vmul.f32 %v2140_v5, %v8090_v35  ;;  %v8273_v51 = vld [vmem:[%s10956_s0 + $0x1e8] sm:$0xff]  ;;  %v8279_v35 = vld [vmem:[%s10956_s0 + $0x1f0] sm:$0xff] }
 0x2d0   :  { %v2566_v21 = vsel %vm2565_vm11, %v8205_v3, %v2562_v40  ;;  %v2490_v45 = vmul.f32 %v8251_v37, %v8251_v37  ;;  %v2458_v9 = vrot.slane %v2457_v43, 4  ;;  %vm2573_vm13 = vweird.f32 %v2542_v7 }
 0x2d1   :  { %v2265_v33 = vmul.f32 %v8267_v50, %v2201_v15  ;;  %v2266_v26 = vmul.f32 %v8273_v51, %v2202_v49  ;;  %v2267_v3 = vmul.f32 %v8279_v35, %v2203_v4  ;;  %v8283_v36 = vmul.f32 %v2566_v21, %v7653_v19  ;;  %v8311_v4 = vld [vmem:[%s10956_s0 + $0x18] sm:$0xff] }
 0x2d2   :  { %v2532_v38 = vsel %vm1036_vm3, %v2490_v45, 0.0  ;;  %v2268_v47 = vmul.f32 %v8289_v2, %v2204_v10  ;;  %v2459_v28 = vadd.f32 %v2458_v9, %v2457_v43 }
 0x2d3   :  { %v2464_v25 = vsel %vm1036_vm3, %v2265_v33, 0.0  ;;  %v2465_v13 = vsel %vm1036_vm3, %v2266_v26, 0.0  ;;  %2533 = vadd.xlane.f32.xlu0 %v2532_v38  ;;  %v2467_v19 = vsel %vm1036_vm3, %v2267_v3, 0.0  ;;  %v2733_v12 = vmul.f32 %v8298_v16, %v8283_v36 }
 0x2d4   :  { %v5368_v6 = vpop.eup %5367  ;;  %v2466_v8 = vadd.f32 %v2465_v13, %v2464_v25  ;;  %v2460_v34 = vrot.slane %v2459_v28, 2  ;;  %v2469_v42 = vsel %vm1036_vm3, %v2268_v47, 0.0  ;;  %v2736_v10 = vmul.f32 %v8311_v4, %v8283_v36  ;;  %v8321_v47 = vld [vmem:[%s10956_s0 + $0x8] sm:$0xff] }
 0x2d5   :  { %v2568_v31 = vmul.f32 %v5368_v6, %v2542_v7  ;;  %v2797_v20 = vsel %vm1036_vm3, %v2733_v12, 0.0  ;;  %vm2574_vm12 = vweird.f32 %v5368_v6  ;;  %v2734_v25 = vmul.f32 %v8321_v47, %v8283_v36 }
 0x2d6   :  { %v2468_v58 = vadd.f32 %v2467_v19, %v2466_v8  ;;  %v2461_v41 = vadd.f32 %v2460_v34, %v2459_v28  ;;  %vm2575_vm14 = vmor %vm2573_vm13, %vm2574_vm12  ;;  %v2806_v38 = vsel %vm1036_vm3, %v2736_v10, 0.0 }
 0x2d7   :  { %v2569_v55 = vmul.f32 %v5368_v6, %v2568_v31  ;;  %v8332_v31 = vld [vmem:[%s10956_s0 + $0x30] sm:$0xff]  ;;  %v2800_v12 = vsel %vm1036_vm3, %v2734_v25, 0.0 }
 0x2d8   :  { %v2470_v46 = vadd.f32 %v2469_v42, %v2468_v58  ;;  %v2501_v23 = vpop.xlane.xlu1 %2500  ;;  %v2462_v30 = vrot.slane %v2461_v41, 1 }
 0x2d9   :  { %v2570_v39 = vmul.f32 0.5, %v2569_v55  ;;  %v2543_v29 = vadd.f32 1e-16, %v2501_v23 }
 0x2da   :  { %v2471_v61 = vrot.slane %v2470_v46, 4  ;;  %v8304_v40 = vadd.f32 %v2462_v30, %v2461_v41  ;;  %v8341_v41 = vld [vmem:[%s10956_s0 + $0x20] sm:$0xff] }
 0x2db   :  { %v2571_v5 = vsub.f32 1.5, %v2570_v39  ;;  %5369 = vrsqrt.f32 %v2543_v29  ;;  %2798 = vadd.xlane.f32.xlu0 %v2797_v20  ;;  %vm2583_vm1 = vweird.f32 %v2543_v29 }
 0x2dc   :  { %v2472_v27 = vadd.f32 %v2471_v61, %v2470_v46  ;;  %v2491_v49 = vmul.f32 %v8304_v40, %v8304_v40  ;;  %v8347_v61 = vld [vmem:[%s10956_s0 + $0x10] sm:$0xff] }
 0x2dd   :  { %v2572_v15 = vmul.f32 %v5368_v6, %v2571_v5 }
 0x2de   :  { %v2473_v21 = vrot.slane %v2472_v27, 2  ;;  %v2535_v43 = vsel %vm1036_vm3, %v2491_v49, 0.0 }
 0x2df   :  { %v2576_v45 = vsel %vm2575_vm14, %v5368_v6, %v2572_v15  ;;  %2536 = vadd.xlane.f32.xlu1 %v2535_v43 }
 0x2e0   :  { %v2474_v33 = vadd.f32 %v2473_v21, %v2472_v27  ;;  %v2718_v7 = vmul.f32 %v2576_v45, %v7708_v56  ;;  %v5617_v27 = vld [vmem:[%s10956_s0 + $0x48] sm:$0xff] }
 0x2e1   :  { %v5370_v26 = vpop.eup %5369 }
 0x2e2   :  { %v2578_v3 = vmul.f32 %v5370_v26, %v2543_v29  ;;  %v2475_v9 = vrot.slane %v2474_v33, 1  ;;  %v2739_v58 = vmul.f32 %v8332_v31, %v2718_v7  ;;  %vm2584_vm15 = vweird.f32 %v5370_v26 }
 0x2e3   :  { %2807 = vadd.xlane.f32.xlu0 %v2806_v38  ;;  %vm2585_vm2 = vmor %vm2583_vm1, %vm2584_vm15  ;;  %v2737_v39 = vmul.f32 %v8341_v41, %v2718_v7  ;;  %v2735_v29 = vmul.f32 %v8347_v61, %v8283_v36 }
 0x2e4   :  { %v2579_v13 = vmul.f32 %v5370_v26, %v2578_v3  ;;  %v8325_v6 = vadd.f32 %v2475_v9, %v2474_v33  ;;  %v2815_v46 = vsel %vm1036_vm3, %v2739_v58, 0.0  ;;  %v8367_v3 = vld [vmem:[%s10956_s0 + $0x28] sm:$0xff] }
 0x2e5   :  { %v2504_v8 = vpop.xlane.xlu2 %2503  ;;  %v2809_v49 = vsel %vm1036_vm3, %v2737_v39, 0.0  ;;  %v2803_v10 = vsel %vm1036_vm3, %v2735_v29, 0.0  ;;  %v2738_v38 = vmul.f32 %v8367_v3, %v2718_v7 }
 0x2e6   :  { %v2580_v28 = vmul.f32 0.5, %v2579_v13  ;;  %v2544_v19 = vadd.f32 1e-16, %v2504_v8  ;;  %v2492_v56 = vmul.f32 %v8325_v6, %v8325_v6 }
 0x2e7   :  { %2801 = vadd.xlane.f32.xlu1 %v2800_v12  ;;  %v2812_v8 = vsel %vm1036_vm3, %v2738_v38, 0.0  ;;  %v8397_v38 = vld [vmem:[%s10956_s0 + $0x58] sm:$0xff] }
 0x2e8   :  { %v2581_v34 = vsub.f32 1.5, %v2580_v28  ;;  %5371 = vrsqrt.f32 %v2544_v19  ;;  %v2538_v42 = vsel %vm1036_vm3, %v2492_v56, 0.0  ;;  %vm2593_vm5 = vweird.f32 %v2544_v19 }
 0x2e9   :  { %2539 = vadd.xlane.f32.xlu2 %v2538_v42 }
 0x2ea   :  { %v2582_v55 = vmul.f32 %v5370_v26, %v2581_v34 }
 0x2eb   :  { %2816 = vadd.xlane.f32.xlu0 %v2815_v46 }
 0x2ec   :  { %v2586_v23 = vsel %vm2585_vm2, %v5370_v26, %v2582_v55  ;;  %v8382_v55 = vld [vmem:[%s10956_s0 + $0x40] sm:$0xff] }
 0x2ed   :  { %v2719_v20 = vmul.f32 %v2586_v23, %v7770_v52  ;;  %v8361_v52 = vld [vmem:[%s10956_s0 + $0x38] sm:$0xff] }
 0x2ee   :  { %v5372_v30 = vpop.eup %5371  ;;  %v2740_v26 = vmul.f32 %v8361_v52, %v2718_v7  ;;  %v5620_v7 = vld [vmem:[%s10956_s0 + $0x60] sm:$0xff] }
 0x2ef   :  { %v2588_v5 = vmul.f32 %v5372_v30, %v2544_v19  ;;  %v2742_v15 = vmul.f32 %v5617_v27, %v2719_v20  ;;  %2810 = vadd.xlane.f32.xlu1 %v2809_v49  ;;  %vm2594_vm4 = vweird.f32 %v5372_v30  ;;  %v5621_v19 = vld [vmem:[%s10956_s0 + $0x50] sm:$0xff]  ;;  %v2741_v46 = vmul.f32 %v8382_v55, %v2719_v20 }
 0x2f0   :  { %vm2595_vm0 = vmor %vm2593_vm5, %vm2594_vm4  ;;  %v2818_v13 = vsel %vm1036_vm3, %v2740_v26, 0.0  ;;  %v2743_v42 = vmul.f32 %v5621_v19, %v2719_v20 }
 0x2f1   :  { %v2589_v21 = vmul.f32 %v5372_v30, %v2588_v5  ;;  %v2507_v45 = vpop.xlane.xlu0 %2506  ;;  %2804 = vadd.xlane.f32.xlu2 %v2803_v10  ;;  %v2824_v36 = vsel %vm1036_vm3, %v2742_v15, 0.0  ;;  %v2821_v27 = vsel %vm1036_vm3, %v2741_v46, 0.0  ;;  %v5623_v10 = vld [vmem:[%s10956_s0 + $0x78] sm:$0xff] }
 0x2f2   :  { %v2545_v43 = vadd.f32 1e-16, %v2507_v45  ;;  %v2827_v5 = vsel %vm1036_vm3, %v2743_v42, 0.0 }
 0x2f3   :  { %v2590_v33 = vmul.f32 0.5, %v2589_v21  ;;  %2825 = vadd.xlane.f32.xlu0 %v2824_v36 }
 0x2f4   :  { %5373 = vrsqrt.f32 %v2545_v43  ;;  %vm2603_vm7 = vweird.f32 %v2545_v43 }
 0x2f5   :  { %v2591_v9 = vsub.f32 1.5, %v2590_v33  ;;  %v5624_v33 = vld [vmem:[%s10956_s0 + $0x68] sm:$0xff] }
 0x2f7   :  { %v2592_v25 = vmul.f32 %v5372_v30, %v2591_v9  ;;  %2819 = vadd.xlane.f32.xlu1 %v2818_v13  ;;  %v2744_v9 = vmul.f32 %v8397_v38, %v2719_v20 }
 0x2f9   :  { %v2596_v28 = vsel %vm2595_vm0, %v5372_v30, %v2592_v25  ;;  %2813 = vadd.xlane.f32.xlu2 %v2812_v8 }
 0x2fa   :  { %v5374_v56 = vpop.eup %5373  ;;  %v2720_v58 = vmul.f32 %v2596_v28, %v7845_v24 }
 0x2fb   :  { %v2598_v12 = vmul.f32 %v5374_v56, %v2545_v43  ;;  %vm2604_vm6 = vweird.f32 %v5374_v56 }
 0x2fc   :  { %v2745_v34 = vmul.f32 %v5620_v7, %v2720_v58  ;;  %v2748_v21 = vmul.f32 %v5623_v10, %v2720_v58  ;;  %vm2605_vm8 = vmor %vm2603_vm7, %vm2604_vm6  ;;  %v2746_v26 = vmul.f32 %v5624_v33, %v2720_v58 }
 0x2fd   :  { %v2599_v23 = vmul.f32 %v5374_v56, %v2598_v12  ;;  %v2830_v12 = vsel %vm1036_vm3, %v2744_v9, 0.0  ;;  %v5629_v9 = vld [vmem:[%s10956_s0 + $0x98] sm:$0xff] }
 0x2fe   :  { %v2833_v24 = vsel %vm1036_vm3, %v2745_v34, 0.0  ;;  %v2842_v43 = vsel %vm1036_vm3, %v2748_v21, 0.0  ;;  %v2836_v28 = vsel %vm1036_vm3, %v2746_v26, 0.0  ;;  %v5626_v34 = vld [vmem:[%s10956_s0 + $0x90] sm:$0xff] }
 0x2ff   :  { %v2600_v39 = vmul.f32 0.5, %v2599_v23  ;;  %v2510_v29 = vpop.xlane.xlu1 %2509  ;;  %2834 = vadd.xlane.f32.xlu0 %v2833_v24  ;;  %2828 = vadd.xlane.f32.xlu1 %v2827_v5  ;;  %v5628_v23 = vld [vmem:[%s10956_s0 + $0x70] sm:$0xff] }
 0x300   :  { %v2546_v30 = vadd.f32 1e-16, %v2510_v29  ;;  %v2747_v24 = vmul.f32 %v5628_v23, %v2720_v58 }
 0x301   :  { %v2601_v15 = vsub.f32 1.5, %v2600_v39  ;;  %2822 = vadd.xlane.f32.xlu2 %v2821_v27 }
 0x302   :  { %5375 = vrsqrt.f32 %v2546_v30  ;;  %v2839_v10 = vsel %vm1036_vm3, %v2747_v24, 0.0  ;;  %vm2613_vm10 = vweird.f32 %v2546_v30 }
 0x303   :  { %v2513_v49 = vpop.xlane.xlu2 %2512  ;;  %v2602_v45 = vmul.f32 %v5374_v56, %v2601_v15 }
 0x304   :  { %v2547_v36 = vadd.f32 1e-16, %v2513_v49 }
 0x305   :  { %v2606_v25 = vsel %vm2605_vm8, %v5374_v56, %v2602_v45 }
 0x306   :  { %5377 = vrsqrt.f32 %v2547_v36  ;;  %v2721_v13 = vmul.f32 %v2606_v25, %v7893_v17  ;;  %v5627_v17 = vld [vmem:[%s10956_s0 + $0x80] sm:$0xff]  ;;  %vm2623_vm13 = vweird.f32 %v2547_v36 }
 0x307   :  { %2843 = vadd.xlane.f32.xlu0 %v2842_v43  ;;  %2837 = vadd.xlane.f32.xlu1 %v2836_v28 }
 0x308   :  { %v5376_v8 = vpop.eup %5375  ;;  %v2751_v20 = vmul.f32 %v5626_v34, %v2721_v13  ;;  %v2749_v46 = vmul.f32 %v5627_v17, %v2721_v13  ;;  %v2752_v25 = vmul.f32 %v5629_v9, %v2721_v13  ;;  %v5634_v17 = vld [vmem:[%s10956_s0 + $0xa0] sm:$0xff]  ;;  %v5636_v9 = vld [vmem:[%s10956_s0 + $0xc8] sm:$0xff] }
 0x309   :  { %v2608_v7 = vmul.f32 %v5376_v8, %v2546_v30  ;;  %2831 = vadd.xlane.f32.xlu2 %v2830_v12  ;;  %vm2614_vm9 = vweird.f32 %v5376_v8  ;;  %v5630_v30 = vld [vmem:[%s10956_s0 + $0x88] sm:$0xff] }
 0x30a   :  { %v2851_v5 = vsel %vm1036_vm3, %v2751_v20, 0.0  ;;  %v2845_v49 = vsel %vm1036_vm3, %v2749_v46, 0.0  ;;  %vm2615_vm11 = vmor %vm2613_vm10, %vm2614_vm9  ;;  %v2750_v28 = vmul.f32 %v5630_v30, %v2721_v13  ;;  %v2854_v20 = vsel %vm1036_vm3, %v2752_v25, 0.0  ;;  %v5632_v13 = vld [vmem:[%s10956_s0 + $0xc0] sm:$0xff]  ;;  %v5637_v30 = vld [vmem:[%s10956_s0 + $0xb8] sm:$0xff] }
 0x30b   :  { %v2609_v19 = vmul.f32 %v5376_v8, %v2608_v7 }
 0x30c   :  { %v5378_v56 = vpop.eup %5377 }
 0x30d   :  { %v2618_v42 = vmul.f32 %v5378_v56, %v2547_v36  ;;  %v2610_v39 = vmul.f32 0.5, %v2609_v19  ;;  %vm2624_vm12 = vweird.f32 %v5378_v56  ;;  %v2848_v19 = vsel %vm1036_vm3, %v2750_v28, 0.0 }
 0x30e   :  { %vm2625_vm14 = vmor %vm2623_vm13, %vm2624_vm12 }
 0x30f   :  { %v2619_v29 = vmul.f32 %v5378_v56, %v2618_v42  ;;  %v2611_v27 = vsub.f32 1.5, %v2610_v39  ;;  %2852 = vadd.xlane.f32.xlu0 %v2851_v5  ;;  %2846 = vadd.xlane.f32.xlu1 %v2845_v49  ;;  %v5633_v42 = vld [vmem:[%s10956_s0 + $0xb0] sm:$0xff] }
 0x311   :  { %v2620_v15 = vmul.f32 0.5, %v2619_v29  ;;  %v2612_v21 = vmul.f32 %v5376_v8, %v2611_v27  ;;  %2840 = vadd.xlane.f32.xlu2 %v2839_v10 }
 0x313   :  { %v2621_v45 = vsub.f32 1.5, %v2620_v15  ;;  %v2616_v58 = vsel %vm2615_vm11, %v5376_v8, %v2612_v21 }
 0x314   :  { %v2722_v33 = vmul.f32 %v2616_v58, %v7973_v54  ;;  %v5631_v54 = vld [vmem:[%s10956_s0 + $0xa8] sm:$0xff]  ;;  %v5635_v58 = vld [vmem:[%s10956_s0 + $0xd8] sm:$0xff] }
 0x315   :  { %v2622_v26 = vmul.f32 %v5378_v56, %v2621_v45  ;;  %v2516_v43 = vpop.xlane.xlu0 %2515 }
 0x316   :  { %v2548_v7 = vadd.f32 1e-16, %v2516_v43  ;;  %v2754_v8 = vmul.f32 %v5631_v54, %v2722_v33  ;;  %v2753_v46 = vmul.f32 %v5634_v17, %v2722_v33  ;;  %v2756_v28 = vmul.f32 %v5637_v30, %v2722_v33  ;;  %v5639_v17 = vld [vmem:[%s10956_s0 + $0xe0] sm:$0xff] }
 0x317   :  { %v2626_v12 = vsel %vm2625_vm14, %v5378_v56, %v2622_v26  ;;  %2855 = vadd.xlane.f32.xlu1 %v2854_v20 }
 0x318   :  { %v2723_v36 = vmul.f32 %v2626_v12, %v7987_v62  ;;  %5379 = vrsqrt.f32 %v2548_v7  ;;  %v2860_v34 = vsel %vm1036_vm3, %v2754_v8, 0.0  ;;  %v2755_v62 = vmul.f32 %v5633_v42, %v2722_v33  ;;  %v5638_v33 = vld [vmem:[%s10956_s0 + $0xf0] sm:$0xff] }
 0x319   :  { %2861 = vadd.xlane.f32.xlu0 %v2860_v34  ;;  %2849 = vadd.xlane.f32.xlu2 %v2848_v19  ;;  %v2857_v49 = vsel %vm1036_vm3, %v2753_v46, 0.0  ;;  %vm2633_vm1 = vweird.f32 %v2548_v7  ;;  %v2866_v20 = vsel %vm1036_vm3, %v2756_v28, 0.0 }
 0x31a   :  { %v2757_v56 = vmul.f32 %v5632_v13, %v2723_v36  ;;  %v2863_v29 = vsel %vm1036_vm3, %v2755_v62, 0.0  ;;  %v2760_v26 = vmul.f32 %v5635_v58, %v2723_v36  ;;  %v2758_v25 = vmul.f32 %v5636_v9, %v2723_v36 }
 0x31c   :  { %v2869_v39 = vsel %vm1036_vm3, %v2757_v56, 0.0  ;;  %v2878_v54 = vsel %vm1036_vm3, %v2760_v26, 0.0  ;;  %v2872_v8 = vsel %vm1036_vm3, %v2758_v25, 0.0 }
 0x31e   :  { %v5380_v23 = vpop.eup %5379 }
 0x31f   :  { %v2628_v24 = vmul.f32 %v5380_v23, %v2548_v7  ;;  %2864 = vadd.xlane.f32.xlu1 %v2863_v29  ;;  %vm2634_vm15 = vweird.f32 %v5380_v23 }
 0x320   :  { %vm2635_vm2 = vmor %vm2633_vm1, %vm2634_vm15 }
 0x321   :  { %v2629_v5 = vmul.f32 %v5380_v23, %v2628_v24  ;;  %v2519_v27 = vpop.xlane.xlu1 %2518  ;;  %2870 = vadd.xlane.f32.xlu0 %v2869_v39  ;;  %2858 = vadd.xlane.f32.xlu2 %v2857_v49  ;;  %v5640_v24 = vld [vmem:[%s10956_s0 + $0xd0] sm:$0xff] }
 0x322   :  { %v2522_v15 = vpop.xlane.xlu2 %2521  ;;  %v2549_v10 = vadd.f32 1e-16, %v2519_v27 }
 0x323   :  { %v2550_v21 = vadd.f32 1e-16, %v2522_v15  ;;  %v2630_v45 = vmul.f32 0.5, %v2629_v5 }
 0x324   :  { %5381 = vrsqrt.f32 %v2549_v10  ;;  %vm2643_vm5 = vweird.f32 %v2549_v10 }
 0x325   :  { %v2631_v43 = vsub.f32 1.5, %v2630_v45  ;;  %5383 = vrsqrt.f32 %v2550_v21  ;;  %vm2653_vm7 = vweird.f32 %v2550_v21 }
 0x327   :  { %v2632_v12 = vmul.f32 %v5380_v23, %v2631_v43  ;;  %2873 = vadd.xlane.f32.xlu1 %v2872_v8  ;;  %v5641_v43 = vld [vmem:[%s10956_s0 + $0xf8] sm:$0xff] }
 0x329   :  { %v2636_v34 = vsel %vm2635_vm2, %v5380_v23, %v2632_v12  ;;  %2879 = vadd.xlane.f32.xlu0 %v2878_v54  ;;  %2867 = vadd.xlane.f32.xlu2 %v2866_v20  ;;  %v5642_v12 = vld [vmem:[%s10956_s0 + $0xe8] sm:$0xff] }
 0x32a   :  { %v5382_v19 = vpop.eup %5381  ;;  %v2724_v13 = vmul.f32 %v2636_v34, %v8066_v0  ;;  %v2759_v0 = vmul.f32 %v5640_v24, %v2723_v36  ;;  %v5643_v34 = vld [vmem:[%s10956_s0 + $0x108] sm:$0xff] }
 0x32b   :  { %v5384_v56 = vpop.eup %5383  ;;  %v2638_v42 = vmul.f32 %v5382_v19, %v2549_v10  ;;  %vm2644_vm4 = vweird.f32 %v5382_v19 }
 0x32c   :  { %v2648_v62 = vmul.f32 %v5384_v56, %v2550_v21  ;;  %v2763_v7 = vmul.f32 %v5638_v33, %v2724_v13  ;;  %v2761_v46 = vmul.f32 %v5639_v17, %v2724_v13  ;;  %v2875_v58 = vsel %vm1036_vm3, %v2759_v0, 0.0  ;;  %vm2645_vm6 = vmor %vm2643_vm5, %vm2644_vm4 }
 0x32d   :  { %v2639_v23 = vmul.f32 %v5382_v19, %v2638_v42  ;;  %vm2654_vm0 = vweird.f32 %v5384_v56  ;;  %v2764_v30 = vmul.f32 %v5641_v43, %v2724_v13  ;;  %v2762_v54 = vmul.f32 %v5642_v12, %v2724_v13 }
 0x32e   :  { %v2649_v39 = vmul.f32 %v5384_v56, %v2648_v62  ;;  %v2887_v27 = vsel %vm1036_vm3, %v2763_v7, 0.0  ;;  %v2881_v15 = vsel %vm1036_vm3, %v2761_v46, 0.0  ;;  %vm2655_vm8 = vmor %vm2653_vm7, %vm2654_vm0 }
 0x32f   :  { %v2640_v29 = vmul.f32 0.5, %v2639_v23  ;;  %2882 = vadd.xlane.f32.xlu1 %v2881_v15  ;;  %v2890_v42 = vsel %vm1036_vm3, %v2764_v30, 0.0  ;;  %v5645_v23 = vld [vmem:[%s10956_s0 + $0x100] sm:$0xff]  ;;  %v5648_v30 = vld [vmem:[%s10956_s0 + $0x118] sm:$0xff] }
 0x330   :  { %v2650_v5 = vmul.f32 0.5, %v2649_v39 }
 0x331   :  { %v2641_v49 = vsub.f32 1.5, %v2640_v29  ;;  %v2525_v45 = vpop.xlane.xlu0 %2524  ;;  %2888 = vadd.xlane.f32.xlu0 %v2887_v27  ;;  %2876 = vadd.xlane.f32.xlu2 %v2875_v58 }
 0x332   :  { %v2651_v26 = vsub.f32 1.5, %v2650_v5  ;;  %v2551_v9 = vadd.f32 1e-16, %v2525_v45 }
 0x333   :  { %v2642_v25 = vmul.f32 %v5382_v19, %v2641_v49 }
 0x334   :  { %v2652_v36 = vmul.f32 %v5384_v56, %v2651_v26  ;;  %5385 = vrsqrt.f32 %v2551_v9  ;;  %vm2663_vm10 = vweird.f32 %v2551_v9  ;;  %v5647_v26 = vld [vmem:[%s10956_s0 + $0x128] sm:$0xff] }
 0x335   :  { %v2646_v28 = vsel %vm2645_vm6, %v5382_v19, %v2642_v25  ;;  %v2884_v19 = vsel %vm1036_vm3, %v2762_v54, 0.0 }
 0x336   :  { %v2725_v8 = vmul.f32 %v2646_v28, %v8110_v53  ;;  %v2656_v10 = vsel %vm2655_vm8, %v5384_v56, %v2652_v36  ;;  %v5644_v56 = vld [vmem:[%s10956_s0 + $0x110] sm:$0xff] }
 0x337   :  { %2891 = vadd.xlane.f32.xlu1 %v2890_v42  ;;  %v2726_v62 = vmul.f32 %v2656_v10, %v8112_v63  ;;  %v5646_v63 = vld [vmem:[%s10956_s0 + $0x120] sm:$0xff] }
 0x338   :  { %v2766_v20 = vmul.f32 %v5643_v34, %v2725_v8  ;;  %v2767_v7 = vmul.f32 %v5644_v56, %v2725_v8  ;;  %v2765_v24 = vmul.f32 %v5645_v23, %v2725_v8  ;;  %v2768_v28 = vmul.f32 %v5648_v30, %v2725_v8  ;;  %v5651_v23 = vld [vmem:[%s10956_s0 + $0x130] sm:$0xff] }
 0x339   :  { %2885 = vadd.xlane.f32.xlu2 %v2884_v19  ;;  %v2769_v0 = vmul.f32 %v5646_v63, %v2726_v62  ;;  %v2770_v25 = vmul.f32 %v5647_v26, %v2726_v62 }
 0x33a   :  { %v5386_v21 = vpop.eup %5385  ;;  %v2896_v33 = vsel %vm1036_vm3, %v2766_v20, 0.0  ;;  %v2528_v53 = vpop.xlane.xlu1 %2527  ;;  %v2899_v29 = vsel %vm1036_vm3, %v2767_v7, 0.0  ;;  %v2893_v15 = vsel %vm1036_vm3, %v2765_v24, 0.0  ;;  %v2771_v24 = vmul.f32 %v5651_v23, %v2726_v62 }
 0x33b   :  { %v2658_v13 = vmul.f32 %v5386_v21, %v2551_v9  ;;  %2897 = vadd.xlane.f32.xlu0 %v2896_v33  ;;  %v2552_v46 = vadd.f32 1e-16, %v2528_v53  ;;  %vm2664_vm9 = vweird.f32 %v5386_v21  ;;  %v2905_v49 = vsel %vm1036_vm3, %v2769_v0, 0.0  ;;  %v5649_v9 = vld [vmem:[%s10956_s0 + $0x138] sm:$0xff]  ;;  %v5652_v0 = vld [vmem:[%s10956_s0 + $0x150] sm:$0xff] }
 0x33c   :  { %vm2665_vm11 = vmor %vm2663_vm10, %vm2664_vm9  ;;  %v2772_v54 = vmul.f32 %v5649_v9, %v2726_v62  ;;  %v2908_v19 = vsel %vm1036_vm3, %v2770_v25, 0.0  ;;  %v2911_v62 = vsel %vm1036_vm3, %v2771_v24, 0.0  ;;  %v5655_v24 = vld [vmem:[%s10956_s0 + $0x160] sm:$0xff] }
 0x33d   :  { %v2659_v17 = vmul.f32 %v5386_v21, %v2658_v13  ;;  %5387 = vrsqrt.f32 %v2552_v46  ;;  %vm2673_vm13 = vweird.f32 %v2552_v46 }
 0x33e   :  { %v2914_v8 = vsel %vm1036_vm3, %v2772_v54, 0.0 }
 0x33f   :  { %v2660_v39 = vmul.f32 0.5, %v2659_v17  ;;  %v2531_v27 = vpop.xlane.xlu2 %2530  ;;  %2900 = vadd.xlane.f32.xlu1 %v2899_v29 }
 0x340   :  { %v2553_v45 = vadd.f32 1e-16, %v2531_v27 }
 0x341   :  { %v2661_v5 = vsub.f32 1.5, %v2660_v39  ;;  %2894 = vadd.xlane.f32.xlu2 %v2893_v15 }
 0x342   :  { %5389 = vrsqrt.f32 %v2553_v45  ;;  %vm2683_vm1 = vweird.f32 %v2553_v45 }
 0x343   :  { %v2662_v58 = vmul.f32 %v5386_v21, %v2661_v5  ;;  %2906 = vadd.xlane.f32.xlu0 %v2905_v49  ;;  %v5388_v36 = vpop.eup %5387 }
 0x344   :  { %v2668_v12 = vmul.f32 %v5388_v36, %v2552_v46  ;;  %vm2674_vm12 = vweird.f32 %v5388_v36 }
 0x345   :  { %v2666_v43 = vsel %vm2665_vm11, %v5386_v21, %v2662_v58  ;;  %v2902_v21 = vsel %vm1036_vm3, %v2768_v28, 0.0  ;;  %vm2675_vm14 = vmor %vm2673_vm13, %vm2674_vm12 }
 0x346   :  { %v2534_v10 = vpop.xlane.xlu0 %2533  ;;  %v2727_v20 = vmul.f32 %v2666_v43, %v8183_v60  ;;  %v2669_v42 = vmul.f32 %v5388_v36, %v2668_v12  ;;  %v5650_v60 = vld [vmem:[%s10956_s0 + $0x140] sm:$0xff]  ;;  %v5653_v12 = vld [vmem:[%s10956_s0 + $0x158] sm:$0xff] }
 0x347   :  { %v2554_v34 = vadd.f32 1e-16, %v2534_v10  ;;  %2909 = vadd.xlane.f32.xlu1 %v2908_v19 }
 0x348   :  { %v5390_v33 = vpop.eup %5389  ;;  %v2670_v13 = vmul.f32 0.5, %v2669_v42  ;;  %v2773_v7 = vmul.f32 %v5650_v60, %v2727_v20  ;;  %v2775_v39 = vmul.f32 %v5652_v0, %v2727_v20  ;;  %v2776_v9 = vmul.f32 %v5653_v12, %v2727_v20 }
 0x349   :  { %5391 = vrsqrt.f32 %v2554_v34  ;;  %2903 = vadd.xlane.f32.xlu2 %v2902_v21  ;;  %v2678_v53 = vmul.f32 %v5390_v33, %v2553_v45  ;;  %vm2684_vm15 = vweird.f32 %v5390_v33  ;;  %vm2693_vm5 = vweird.f32 %v2554_v34 }
 0x34a   :  { %v2671_v56 = vsub.f32 1.5, %v2670_v13  ;;  %v2917_v58 = vsel %vm1036_vm3, %v2773_v7, 0.0  ;;  %v2923_v43 = vsel %vm1036_vm3, %v2775_v39, 0.0  ;;  %vm2685_vm2 = vmor %vm2683_vm1, %vm2684_vm15 }
 0x34b   :  { %2915 = vadd.xlane.f32.xlu0 %v2914_v8  ;;  %v2679_v17 = vmul.f32 %v5390_v33, %v2678_v53 }
 0x34c   :  { %v2672_v63 = vmul.f32 %v5388_v36, %v2671_v56 }
 0x34d   :  { %v2680_v27 = vmul.f32 0.5, %v2679_v17 }
 0x34e   :  { %v8515_v29 = vpop.xlane.xlu0 %2798  ;;  %v2676_v15 = vsel %vm2675_vm14, %v5388_v36, %v2672_v63 }
 0x34f   :  { %v5392_v5 = vpop.eup %5391  ;;  %v2681_v26 = vsub.f32 1.5, %v2680_v27  ;;  %2918 = vadd.xlane.f32.xlu1 %v2917_v58  ;;  %v8520_v46 = vmul.f32 %v2676_v15, %v8203_v22  ;;  %v5654_v22 = vld [vmem:[%s10956_s0 + $0x148] sm:$0xff] }
 0x350   :  { %v2688_v49 = vmul.f32 %v5392_v5, %v2554_v34  ;;  %v2774_v42 = vmul.f32 %v5654_v22, %v2727_v20  ;;  %vm2694_vm4 = vweird.f32 %v5392_v5 }
 0x351   :  { %2912 = vadd.xlane.f32.xlu2 %v2911_v62  ;;  %v2682_v30 = vmul.f32 %v5390_v33, %v2681_v26  ;;  %v2778_v45 = vmul.f32 %v8102_v59, %v8520_v46  ;;  %vm2695_vm0 = vmor %vm2693_vm5, %vm2694_vm4  ;;  %v2777_v63 = vmul.f32 %v5655_v24, %v8520_v46 }
 0x352   :  { %v2689_v25 = vmul.f32 %v5392_v5, %v2688_v49  ;;  %v2537_v28 = vpop.xlane.xlu1 %2536  ;;  %v2920_v53 = vsel %vm1036_vm3, %v2774_v42, 0.0  ;;  %v2989_v49 = vmul.f32 %v8515_v29, %v8515_v29 }
 0x353   :  { %2924 = vadd.xlane.f32.xlu0 %v2923_v43  ;;  %v2686_v54 = vsel %vm2685_vm2, %v5390_v33, %v2682_v30  ;;  %v2555_v10 = vadd.f32 1e-16, %v2537_v28  ;;  %v2926_v33 = vsel %vm1036_vm3, %v2776_v9, 0.0  ;;  %v2932_v56 = vsel %vm1036_vm3, %v2778_v45, 0.0 }
 0x354   :  { %v2690_v36 = vmul.f32 0.5, %v2689_v25  ;;  %v8534_v13 = vmul.f32 %v2686_v54, %v8236_v1 }
 0x355   :  { %5393 = vrsqrt.f32 %v2555_v10  ;;  %vm2703_vm7 = vweird.f32 %v2555_v10 }
 0x356   :  { %v2691_v19 = vsub.f32 1.5, %v2690_v36  ;;  %v8531_v21 = vpop.xlane.xlu0 %2807  ;;  %v2781_v34 = vmul.f32 %v8140_v57, %v8534_v13  ;;  %v2782_v28 = vmul.f32 %v8146_v32, %v8534_v13 }
 0x357   :  { %2927 = vadd.xlane.f32.xlu1 %v2926_v33  ;;  %v2992_v54 = vmul.f32 %v8531_v21, %v8531_v21 }
 0x358   :  { %v2692_v8 = vmul.f32 %v5392_v5, %v2691_v19  ;;  %v2944_v32 = vsel %vm1036_vm3, %v2782_v28, 0.0 }
 0x359   :  { %2921 = vadd.xlane.f32.xlu2 %v2920_v53 }
 0x35a   :  { %v2696_v20 = vsel %vm2695_vm0, %v5392_v5, %v2692_v8  ;;  %v8542_v60 = vpop.xlane.xlu1 %2801  ;;  %v2941_v5 = vsel %vm1036_vm3, %v2781_v34, 0.0 }
 0x35b   :  { %v8540_v59 = vmul.f32 %v2696_v20, %v8251_v37  ;;  %2933 = vadd.xlane.f32.xlu0 %v2932_v56  ;;  %v5394_v7 = vpop.eup %5393  ;;  %v2990_v27 = vmul.f32 %v8542_v60, %v8542_v60 }
 0x35c   :  { %v2540_v1 = vpop.xlane.xlu2 %2539  ;;  %v2698_v37 = vmul.f32 %v5394_v7, %v2555_v10  ;;  %vm2704_vm6 = vweird.f32 %v5394_v7 }
 0x35d   :  { %v2556_v17 = vadd.f32 1e-16, %v2540_v1  ;;  %v2785_v23 = vmul.f32 %v8171_v44, %v8540_v59  ;;  %v2929_v44 = vsel %vm1036_vm3, %v2777_v63, 0.0  ;;  %v2786_v25 = vmul.f32 %v8177_v11, %v8540_v59  ;;  %vm2705_vm8 = vmor %vm2703_vm7, %vm2704_vm6 }
 0x35e   :  { %v8552_v0 = vpop.xlane.xlu0 %2816  ;;  %v2699_v39 = vmul.f32 %v5394_v7, %v2698_v37  ;;  %v3053_v30 = vadd.f32 %v2990_v27, %v2989_v49 }
 0x35f   :  { %5395 = vrsqrt.f32 %v2556_v17  ;;  %v2953_v57 = vsel %vm1036_vm3, %v2785_v23, 0.0  ;;  %2942 = vadd.xlane.f32.xlu1 %v2941_v5  ;;  %v2956_v11 = vsel %vm1036_vm3, %v2786_v25, 0.0  ;;  %vm2713_vm10 = vweird.f32 %v2556_v17 }
 0x360   :  { %v2700_v15 = vmul.f32 0.5, %v2699_v39 }
 0x361   :  { %2930 = vadd.xlane.f32.xlu2 %v2929_v44  ;;  %v5656_v44 = vld [vmem:[%s10956_s0 + $0x170] sm:$0xff] }
 0x362   :  { %v2701_v58 = vsub.f32 1.5, %v2700_v15  ;;  %v8561_v26 = vpop.xlane.xlu1 %2810  ;;  %v2779_v15 = vmul.f32 %v5656_v44, %v8520_v46 }
 0x363   :  { %2954 = vadd.xlane.f32.xlu0 %v2953_v57  ;;  %v2993_v1 = vmul.f32 %v8561_v26, %v8561_v26 }
 0x364   :  { %v8563_v62 = vpop.xlane.xlu2 %2804  ;;  %v2702_v12 = vmul.f32 %v5394_v7, %v2701_v58 }
 0x365   :  { %v5396_v43 = vpop.eup %5395  ;;  %v2991_v36 = vmul.f32 %v8563_v62, %v8563_v62 }
 0x366   :  { %v2708_v9 = vmul.f32 %v5396_v43, %v2556_v17  ;;  %v2706_v42 = vsel %vm2705_vm8, %v5394_v7, %v2702_v12  ;;  %v8574_v45 = vpop.xlane.xlu0 %2825  ;;  %vm2714_vm9 = vweird.f32 %v5396_v43  ;;  %v2935_v12 = vsel %vm1036_vm3, %v2779_v15, 0.0 }
 0x367   :  { %v3054_v22 = vadd.f32 %v3053_v30, %v2991_v36  ;;  %v8577_v8 = vmul.f32 %v2706_v42, %v8304_v40  ;;  %2957 = vadd.xlane.f32.xlu1 %v2956_v11  ;;  %vm2715_vm11 = vmor %vm2713_vm10, %vm2714_vm9 }
 0x368   :  { %v2709_v19 = vmul.f32 %v5396_v43, %v2708_v9 }
 0x369   :  { %v3055_v33 = vadd.f32 %v3054_v22, %v2992_v54  ;;  %2945 = vadd.xlane.f32.xlu2 %v2944_v32  ;;  %v2790_v20 = vmul.f32 %v8225_v14, %v8577_v8  ;;  %v2789_v63 = vmul.f32 %v8219_v48, %v8577_v8  ;;  %v2995_v14 = vmul.f32 %v8552_v0, %v8552_v0 }
 0x36a   :  { %v2710_v10 = vmul.f32 0.5, %v2709_v19  ;;  %v8584_v34 = vpop.xlane.xlu1 %2819  ;;  %v2791_v32 = vmul.f32 %v8231_v18, %v8577_v8 }
 0x36b   :  { %v3056_v53 = vrot.slane %v3055_v33, 4  ;;  %v2968_v23 = vsel %vm1036_vm3, %v2790_v20, 0.0  ;;  %v2996_v27 = vmul.f32 %v8584_v34, %v8584_v34  ;;  %v2965_v58 = vsel %vm1036_vm3, %v2789_v63, 0.0  ;;  %v5658_v63 = vld [vmem:[%s10956_s0 + $0x1b0] sm:$0xff] }
 0x36c   :  { %v2711_v56 = vsub.f32 1.5, %v2710_v10  ;;  %v8586_v7 = vpop.xlane.xlu2 %2813  ;;  %2969 = vadd.xlane.f32.xlu0 %v2968_v23 }
 0x36d   :  { %v3057_v40 = vadd.f32 %v3056_v53, %v3055_v33  ;;  %v2994_v24 = vmul.f32 %v8586_v7, %v8586_v7 }
 0x36e   :  { %v2712_v37 = vmul.f32 %v5396_v43, %v2711_v56  ;;  %v5657_v56 = vld [vmem:[%s10956_s0 + $0x190] sm:$0xff] }
 0x36f   :  { %v3058_v39 = vrot.slane %v3057_v40, 2  ;;  %v3062_v5 = vadd.f32 %v2994_v24, %v2993_v1  ;;  %v2783_v1 = vmul.f32 %v5657_v56, %v8534_v13 }
 0x370   :  { %v2716_v57 = vsel %vm2715_vm11, %v5396_v43, %v2712_v37  ;;  %v2787_v37 = vmul.f32 %v5658_v63, %v8540_v59 }
 0x371   :  { %v8602_v48 = vmul.f32 %v2716_v57, %v8325_v6  ;;  %v3059_v17 = vadd.f32 %v3058_v39, %v3057_v40  ;;  %v3063_v49 = vadd.f32 %v3062_v5, %v2995_v14  ;;  %2966 = vadd.xlane.f32.xlu2 %v2965_v58  ;;  %v2971_v39 = vsel %vm1036_vm3, %v2791_v32, 0.0  ;;  %v5659_v58 = vld [vmem:[%s10956_s0 + $0x198] sm:$0xff] }
 0x372   :  { %v8605_v25 = vpop.xlane.xlu0 %2834  ;;  %v8609_v28 = vpop.xlane.xlu1 %2828 }
 0x373   :  { %v3060_v43 = vrot.slane %v3059_v17, 1  ;;  %v3064_v30 = vadd.f32 %v3063_v49, %v2996_v27  ;;  %v2793_v36 = vmul.f32 %v8267_v50, %v8602_v48  ;;  %v2794_v42 = vmul.f32 %v8273_v51, %v8602_v48 }
 0x374   :  { %v8612_v9 = vpop.xlane.xlu2 %2822  ;;  %2936 = vadd.xlane.f32.xlu0 %v2935_v12  ;;  %v2998_v50 = vmul.f32 %v8574_v45, %v8574_v45  ;;  %v2999_v23 = vmul.f32 %v8609_v28, %v8609_v28  ;;  %v2947_v27 = vsel %vm1036_vm3, %v2783_v1, 0.0 }
 0x375   :  { %v3061_v6 = vadd.f32 %v3060_v43, %v3059_v17  ;;  %v3065_v54 = vrot.slane %v3064_v30, 4  ;;  %v2997_v22 = vmul.f32 %v8612_v9, %v8612_v9  ;;  %v2977_v19 = vsel %vm1036_vm3, %v2793_v36, 0.0 }
 0x376   :  { %2978 = vadd.xlane.f32.xlu1 %v2977_v19  ;;  %v2980_v20 = vsel %vm1036_vm3, %v2794_v42, 0.0  ;;  %v2784_v43 = vmul.f32 %v5659_v58, %v8534_v13  ;;  %v2795_v42 = vmul.f32 %v8279_v35, %v8602_v48  ;;  %v3001_v13 = vmul.f32 %v8605_v25, %v8605_v25  ;;  %v5661_v58 = vld [vmem:[%s10956_s0 + $0x1b8] sm:$0xff] }
 0x377   :  { %v8619_v11 = vadd.f32 1e-16, %v3061_v6  ;;  %v3066_v33 = vadd.f32 %v3065_v54, %v3064_v30  ;;  %v3071_v53 = vadd.f32 %v2998_v50, %v2997_v22  ;;  %v2959_v6 = vsel %vm1036_vm3, %v2787_v37, 0.0 }
 0x378   :  { %v2950_v35 = vsel %vm1036_vm3, %v2784_v43, 0.0  ;;  %v2788_v43 = vmul.f32 %v5661_v58, %v8540_v59 }
 0x379   :  { %5397 = vrsqrt.f32 %v8619_v11  ;;  %v3067_v10 = vrot.slane %v3066_v33, 2  ;;  %2981 = vadd.xlane.f32.xlu2 %v2980_v20  ;;  %v3072_v57 = vadd.f32 %v3071_v53, %v2999_v23  ;;  %v2983_v23 = vsel %vm1036_vm3, %v2795_v42, 0.0 }
 0x37a   :  { %v8627_v51 = vpop.xlane.xlu0 %2843  ;;  %v8635_v18 = vpop.xlane.xlu1 %2837  ;;  %vm3219_vm13 = vweird.f32 %v8619_v11 }
 0x37b   :  { %v3068_v40 = vadd.f32 %v3067_v10, %v3066_v33  ;;  %v3002_v36 = vmul.f32 %v8635_v18, %v8635_v18  ;;  %v5660_v10 = vld [vmem:[%s10956_s0 + $0x178] sm:$0xff]  ;;  %v3004_v63 = vmul.f32 %v8627_v51, %v8627_v51 }
 0x37c   :  { %v8637_v24 = vpop.xlane.xlu2 %2831  ;;  %2972 = vadd.xlane.f32.xlu0 %v2971_v39  ;;  %v2780_v53 = vmul.f32 %v5660_v10, %v8520_v46 }
 0x37d   :  { %v3069_v14 = vrot.slane %v3068_v40, 1  ;;  %v3000_v5 = vmul.f32 %v8637_v24, %v8637_v24  ;;  %v3080_v20 = vadd.f32 %v3002_v36, %v3001_v13 }
 0x37e   :  { %2948 = vadd.xlane.f32.xlu1 %v2947_v27  ;;  %v2938_v27 = vsel %vm1036_vm3, %v2780_v53, 0.0  ;;  %v2962_v53 = vsel %vm1036_vm3, %v2788_v43, 0.0 }
 0x37f   :  { %v5398_v44 = vpop.eup %5397  ;;  %v3070_v15 = vadd.f32 %v3069_v14, %v3068_v40  ;;  %v3073_v17 = vadd.f32 %v3072_v57, %v3000_v5 }
 0x380   :  { %v3214_v49 = vmul.f32 %v5398_v44, %v8619_v11  ;;  %vm3220_vm12 = vweird.f32 %v5398_v44  ;;  %v5662_v11 = vld [vmem:[%s10956_s0 + $0x1d8] sm:$0xff] }
 0x381   :  { %v8652_v30 = vadd.f32 1e-16, %v3070_v15  ;;  %v3074_v12 = vrot.slane %v3073_v17, 4  ;;  %2960 = vadd.xlane.f32.xlu2 %v2959_v6  ;;  %vm3221_vm14 = vmor %vm3219_vm13, %vm3220_vm12  ;;  %v2796_v15 = vmul.f32 %v8289_v2, %v8602_v48  ;;  %v2792_v36 = vmul.f32 %v5662_v11, %v8577_v8 }
 0x382   :  { %v3215_v54 = vmul.f32 %v5398_v44, %v3214_v49  ;;  %v8657_v22 = vpop.xlane.xlu0 %2852  ;;  %v8664_v33 = vpop.xlane.xlu1 %2846 }
 0x383   :  { %5399 = vrsqrt.f32 %v8652_v30  ;;  %v3075_v19 = vadd.f32 %v3074_v12, %v3073_v17  ;;  %vm3229_vm1 = vweird.f32 %v8652_v30 }
 0x384   :  { %v3216_v50 = vmul.f32 0.5, %v3215_v54  ;;  %v8666_v32 = vpop.xlane.xlu2 %2840  ;;  %2951 = vadd.xlane.f32.xlu0 %v2950_v35 }
 0x385   :  { %v3076_v56 = vrot.slane %v3075_v19, 2  ;;  %v3003_v1 = vmul.f32 %v8666_v32, %v8666_v32 }
 0x386   :  { %v3217_v40 = vsub.f32 1.5, %v3216_v50  ;;  %2984 = vadd.xlane.f32.xlu1 %v2983_v23 }
 0x387   :  { %v3077_v37 = vadd.f32 %v3076_v56, %v3075_v19  ;;  %v3081_v14 = vadd.f32 %v3080_v20, %v3003_v1 }
 0x388   :  { %v3218_v39 = vmul.f32 %v5398_v44, %v3217_v40  ;;  %v3005_v40 = vmul.f32 %v8664_v33, %v8664_v33 }
 0x389   :  { %v5400_v46 = vpop.eup %5399  ;;  %v3078_v5 = vrot.slane %v3077_v37, 1  ;;  %v3082_v57 = vadd.f32 %v3081_v14, %v3004_v63  ;;  %2939 = vadd.xlane.f32.xlu2 %v2938_v27 }
 0x38a   :  { %v3222_v17 = vsel %vm3221_vm14, %v5398_v44, %v3218_v39  ;;  %v3224_v49 = vmul.f32 %v5400_v46, %v8652_v30  ;;  %v8697_v59 = vpop.xlane.xlu1 %2855  ;;  %vm3230_vm15 = vweird.f32 %v5400_v46 }
 0x38b   :  { %v3373_v12 = vmul.f32 %v3222_v17, %v8515_v29  ;;  %v3374_v2 = vmul.f32 %v3222_v17, %v8542_v60  ;;  %v3375_v48 = vmul.f32 %v3222_v17, %v8563_v62  ;;  %v3376_v44 = vmul.f32 %v3222_v17, %v8531_v21  ;;  %vm3231_vm2 = vmor %vm3229_vm1, %vm3230_vm15 }
 0x38c   :  { %v3225_v6 = vmul.f32 %v5400_v46, %v3224_v49  ;;  %v3079_v54 = vadd.f32 %v3078_v5, %v3077_v37  ;;  %v3083_v42 = vrot.slane %v3082_v57, 4  ;;  %v8695_v13 = vpop.xlane.xlu0 %2861  ;;  %v2986_v29 = vsel %vm1036_vm3, %v2796_v15, 0.0  ;;  %v8703_v60 = vpop.xlane.xlu2 %2849 }
 0x38d   :  { %v3437_v19 = vmul.f32 %v8298_v16, %v3373_v12  ;;  %v3438_v50 = vmul.f32 %v8321_v47, %v3374_v2  ;;  %v3439_v8 = vmul.f32 %v8347_v61, %v3375_v48  ;;  %2987 = vadd.xlane.f32.xlu0 %v2986_v29  ;;  %v3440_v20 = vmul.f32 %v8311_v4, %v3376_v44 }
 0x38e   :  { %v3226_v62 = vmul.f32 0.5, %v3225_v6  ;;  %v8705_v10 = vadd.f32 1e-16, %v3079_v54  ;;  %v3084_v21 = vadd.f32 %v3083_v42, %v3082_v57  ;;  %2963 = vadd.xlane.f32.xlu1 %v2962_v53  ;;  %v2974_v47 = vsel %vm1036_vm3, %v2792_v36, 0.0 }
 0x38f   :  { %v3501_v56 = vsel %vm1036_vm3, %v3437_v19, 0.0  ;;  %v3502_v16 = vsel %vm1036_vm3, %v3438_v50, 0.0  ;;  %v3504_v1 = vsel %vm1036_vm3, %v3439_v8, 0.0  ;;  %v3006_v4 = vmul.f32 %v8703_v60, %v8703_v60 }
 0x390   :  { %v3503_v61 = vadd.f32 %v3502_v16, %v3501_v56  ;;  %v3227_v35 = vsub.f32 1.5, %v3226_v62  ;;  %5401 = vrsqrt.f32 %v8705_v10  ;;  %v3085_v23 = vrot.slane %v3084_v21, 2 }
 0x391   :  { %2975 = vadd.xlane.f32.xlu2 %v2974_v47  ;;  %v3506_v14 = vsel %vm1036_vm3, %v3440_v20, 0.0  ;;  %v3089_v5 = vadd.f32 %v3006_v4, %v3005_v40  ;;  %v3007_v15 = vmul.f32 %v8657_v22, %v8657_v22  ;;  %vm3239_vm5 = vweird.f32 %v8705_v10 }
 0x392   :  { %v3505_v63 = vadd.f32 %v3504_v1, %v3503_v61  ;;  %v3228_v37 = vmul.f32 %v5400_v46, %v3227_v35  ;;  %v3086_v39 = vadd.f32 %v3085_v23, %v3084_v21  ;;  %v8724_v49 = vpop.xlane.xlu1 %2864 }
 0x393   :  { %v3090_v48 = vadd.f32 %v3089_v5, %v3007_v15  ;;  %v3011_v35 = vmul.f32 %v8724_v49, %v8724_v49 }
 0x394   :  { %v3507_v57 = vadd.f32 %v3506_v14, %v3505_v63  ;;  %v3232_v27 = vsel %vm3231_vm2, %v5400_v46, %v3228_v37  ;;  %v8722_v17 = vpop.xlane.xlu0 %2870  ;;  %v8730_v36 = vpop.xlane.xlu2 %2858  ;;  %v3087_v2 = vrot.slane %v3086_v39, 1  ;;  %v3008_v46 = vmul.f32 %v8697_v59, %v8697_v59 }
 0x395   :  { %v3377_v58 = vmul.f32 %v3232_v27, %v8561_v26  ;;  %v3378_v43 = vmul.f32 %v3232_v27, %v8586_v7  ;;  %v3379_v30 = vmul.f32 %v3232_v27, %v8552_v0  ;;  %v3380_v11 = vmul.f32 %v3232_v27, %v8584_v34 }
 0x396   :  { %v5402_v12 = vpop.eup %5401  ;;  %v3508_v44 = vrot.slane %v3507_v57, 4  ;;  %v3088_v0 = vadd.f32 %v3087_v2, %v3086_v39  ;;  %v3091_v42 = vadd.f32 %v3090_v48, %v3008_v46 }
 0x397   :  { %v3441_v6 = vmul.f32 %v8341_v41, %v3377_v58  ;;  %v3442_v54 = vmul.f32 %v8367_v3, %v3378_v43  ;;  %v3443_v26 = vmul.f32 %v8332_v31, %v3379_v30  ;;  %v3234_v7 = vmul.f32 %v5402_v12, %v8705_v10 }
 0x398   :  { %v3444_v34 = vmul.f32 %v8361_v52, %v3380_v11  ;;  %v8741_v62 = vadd.f32 1e-16, %v3088_v0  ;;  %v3092_v21 = vrot.slane %v3091_v42, 4  ;;  %v3010_v31 = vmul.f32 %v8695_v13, %v8695_v13 }
 0x399   :  { %v3514_v19 = vsel %vm1036_vm3, %v3441_v6, 0.0  ;;  %v3515_v50 = vsel %vm1036_vm3, %v3442_v54, 0.0  ;;  %v3235_v29 = vmul.f32 %v5402_v12, %v3234_v7  ;;  %v3517_v41 = vsel %vm1036_vm3, %v3443_v26, 0.0 }
 0x39a   :  { %v3516_v8 = vadd.f32 %v3515_v50, %v3514_v19  ;;  %v3009_v3 = vmul.f32 %v8730_v36, %v8730_v36  ;;  %v3509_v53 = vadd.f32 %v3508_v44, %v3507_v57  ;;  %vm3240_vm4 = vweird.f32 %v5402_v12  ;;  %v8751_v16 = vpop.xlane.xlu1 %2873 }
 0x39b   :  { %v3236_v52 = vmul.f32 0.5, %v3235_v29  ;;  %5403 = vrsqrt.f32 %v8741_v62  ;;  %v3519_v47 = vsel %vm1036_vm3, %v3444_v34, 0.0  ;;  %v3093_v61 = vadd.f32 %v3092_v21, %v3091_v42  ;;  %vm3241_vm0 = vmor %vm3239_vm5, %vm3240_vm4 }
 0x39c   :  { %v3518_v20 = vadd.f32 %v3517_v41, %v3516_v8  ;;  %v8749_v56 = vpop.xlane.xlu0 %2879  ;;  %v3098_v1 = vadd.f32 %v3010_v31, %v3009_v3  ;;  %v8756_v40 = vpop.xlane.xlu2 %2867  ;;  %v3510_v37 = vrot.slane %v3509_v53, 2  ;;  %v3013_v11 = vmul.f32 %v8722_v17, %v8722_v17 }
 0x39d   :  { %v3237_v4 = vsub.f32 1.5, %v3236_v52  ;;  %v3012_v63 = vmul.f32 %v8756_v40, %v8756_v40  ;;  %v3094_v14 = vrot.slane %v3093_v61, 2  ;;  %v3014_v2 = vmul.f32 %v8751_v16, %v8751_v16 }
 0x39e   :  { %v3520_v23 = vadd.f32 %v3519_v47, %v3518_v20  ;;  %v3099_v39 = vadd.f32 %v3098_v1, %v3011_v35  ;;  %v3511_v57 = vadd.f32 %v3510_v37, %v3509_v53  ;;  %v3016_v29 = vmul.f32 %v8749_v56, %v8749_v56 }
 0x39f   :  { %v3238_v5 = vmul.f32 %v5402_v12, %v3237_v4  ;;  %v3095_v27 = vadd.f32 %v3094_v14, %v3093_v61  ;;  %v3107_v3 = vadd.f32 %v3014_v2, %v3013_v11  ;;  %vm3249_vm7 = vweird.f32 %v8741_v62 }
 0x3a0   :  { %v3100_v15 = vadd.f32 %v3099_v39, %v3012_v63  ;;  %v3521_v58 = vrot.slane %v3520_v23, 4  ;;  %v3512_v0 = vrot.slane %v3511_v57, 1 }
 0x3a1   :  { %v5404_v43 = vpop.eup %5403  ;;  %v3242_v30 = vsel %vm3241_vm0, %v5402_v12, %v3238_v5  ;;  %v3096_v54 = vrot.slane %v3095_v27, 1 }
 0x3a2   :  { %v3381_v46 = vmul.f32 %v3242_v30, %v8612_v9  ;;  %v3382_v48 = vmul.f32 %v3242_v30, %v8574_v45  ;;  %v3383_v10 = vmul.f32 %v3242_v30, %v8609_v28  ;;  %v3384_v44 = vmul.f32 %v3242_v30, %v8637_v24  ;;  %v8773_v12 = vpop.xlane.xlu1 %2882  ;;  %v5663_v9 = vld [vmem:[%s10956_s0 + $0x48] sm:$0xff]  ;;  %v5664_v28 = vld [vmem:[%s10956_s0 + $0x50] sm:$0xff] }
 0x3a3   :  { %v3244_v6 = vmul.f32 %v5404_v43, %v8741_v62  ;;  %v3101_v26 = vrot.slane %v3100_v15, 4  ;;  %v3522_v19 = vadd.f32 %v3521_v58, %v3520_v23  ;;  %v3097_v8 = vadd.f32 %v3096_v54, %v3095_v27 }
 0x3a4   :  { %v8771_v7 = vpop.xlane.xlu0 %2888  ;;  %v3445_v42 = vmul.f32 %v8382_v55, %v3381_v46  ;;  %v3446_v45 = vmul.f32 %v5663_v9, %v3382_v48  ;;  %v3447_v24 = vmul.f32 %v5664_v28, %v3383_v10  ;;  %v8782_v34 = vpop.xlane.xlu2 %2876  ;;  %v3448_v55 = vmul.f32 %v8397_v38, %v3384_v44 }
 0x3a5   :  { %v3245_v50 = vmul.f32 %v5404_v43, %v3244_v6  ;;  %v3102_v21 = vadd.f32 %v3101_v26, %v3100_v15  ;;  %v8789_v52 = vadd.f32 1e-16, %v3097_v8  ;;  %v3015_v35 = vmul.f32 %v8782_v34, %v8782_v34 }
 0x3a6   :  { %v3527_v41 = vsel %vm1036_vm3, %v3445_v42, 0.0  ;;  %v3528_v31 = vsel %vm1036_vm3, %v3446_v45, 0.0  ;;  %v3530_v61 = vsel %vm1036_vm3, %v3447_v24, 0.0  ;;  %v8794_v1 = vadd.f32 %v3512_v0, %v3511_v57 }
 0x3a7   :  { %v3529_v53 = vadd.f32 %v3528_v31, %v3527_v41  ;;  %v3246_v20 = vmul.f32 0.5, %v3245_v50  ;;  %v3103_v47 = vrot.slane %v3102_v21, 2  ;;  %v3523_v23 = vrot.slane %v3522_v19, 2 }
 0x3a8   :  { %vm3250_vm6 = vweird.f32 %v5404_v43  ;;  %5405 = vrsqrt.f32 %v8789_v52  ;;  %v3532_v63 = vsel %vm1036_vm3, %v3448_v55, 0.0  ;;  %v3108_v14 = vadd.f32 %v3107_v3, %v3015_v35 }
 0x3a9   :  { %v3531_v4 = vadd.f32 %v3530_v61, %v3529_v53  ;;  %v3247_v38 = vsub.f32 1.5, %v3246_v20  ;;  %v3104_v37 = vadd.f32 %v3103_v47, %v3102_v21  ;;  %v3709_v39 = vmul.f32 %v8794_v1, %v8794_v1  ;;  %vm3251_vm8 = vmor %vm3249_vm7, %vm3250_vm6 }
 0x3aa   :  { %v8801_v15 = vpop.xlane.xlu1 %2891  ;;  %v3109_v58 = vadd.f32 %v3108_v14, %v3016_v29  ;;  %v3524_v2 = vadd.f32 %v3523_v23, %v3522_v19  ;;  %v5668_v29 = vld [vmem:[%s10956_s0 + $0x78] sm:$0xff]  ;;  %v3017_v31 = vmul.f32 %v8773_v12, %v8773_v12  ;;  %v3019_v20 = vmul.f32 %v8771_v7, %v8771_v7 }
 0x3ab   :  { %v3533_v5 = vadd.f32 %v3532_v63, %v3531_v4  ;;  %v3248_v27 = vmul.f32 %v5404_v43, %v3247_v38  ;;  %v3105_v57 = vrot.slane %v3104_v37, 1  ;;  %v3725_v30 = vsel %vm1036_vm3, %v3709_v39, 0.0 }
 0x3ac   :  { %v8804_v11 = vpop.xlane.xlu2 %2885  ;;  %3726 = vadd.xlane.f32.xlu1 %v3725_v30  ;;  %v3110_v42 = vrot.slane %v3109_v58, 4  ;;  %v3525_v28 = vrot.slane %v3524_v2, 1  ;;  %v3020_v14 = vmul.f32 %v8801_v15, %v8801_v15  ;;  %vm3259_vm10 = vweird.f32 %v8789_v52 }
 0x3ad   :  { %v3534_v46 = vrot.slane %v3533_v5, 4  ;;  %v3252_v48 = vsel %vm3251_vm8, %v5404_v43, %v3248_v27  ;;  %v3106_v0 = vadd.f32 %v3105_v57, %v3104_v37  ;;  %v3018_v9 = vmul.f32 %v8804_v11, %v8804_v11  ;;  %v5665_v43 = vld [vmem:[%s10956_s0 + $0x60] sm:$0xff] }
 0x3ae   :  { %v8806_v10 = vpop.xlane.xlu0 %2897  ;;  %v3385_v44 = vmul.f32 %v3252_v48, %v8605_v25  ;;  %v3386_v6 = vmul.f32 %v3252_v48, %v8635_v18  ;;  %v3387_v62 = vmul.f32 %v3252_v48, %v8666_v32  ;;  %v3388_v54 = vmul.f32 %v3252_v48, %v8627_v51  ;;  %v5406_v26 = vpop.eup %5405  ;;  %v5666_v25 = vld [vmem:[%s10956_s0 + $0x68] sm:$0xff]  ;;  %v5667_v51 = vld [vmem:[%s10956_s0 + $0x70] sm:$0xff] }
 0x3af   :  { %v3535_v24 = vadd.f32 %v3534_v46, %v3533_v5  ;;  %v3254_v19 = vmul.f32 %v5406_v26, %v8789_v52  ;;  %v8824_v50 = vadd.f32 1e-16, %v3106_v0  ;;  %v3111_v8 = vadd.f32 %v3110_v42, %v3109_v58 }
 0x3b0   :  { %v3449_v45 = vmul.f32 %v5665_v43, %v3385_v44  ;;  %v3450_v18 = vmul.f32 %v5666_v25, %v3386_v6  ;;  %v3451_v32 = vmul.f32 %v5667_v51, %v3387_v62  ;;  %v3452_v21 = vmul.f32 %v5668_v29, %v3388_v54 }
 0x3b1   :  { %v3255_v53 = vmul.f32 %v5406_v26, %v3254_v19  ;;  %5407 = vrsqrt.f32 %v8824_v50  ;;  %v3112_v35 = vrot.slane %v3111_v8, 2  ;;  %v3116_v23 = vadd.f32 %v3018_v9, %v3017_v31 }
 0x3b2   :  { %v3540_v55 = vsel %vm1036_vm3, %v3449_v45, 0.0  ;;  %v3541_v41 = vsel %vm1036_vm3, %v3450_v18, 0.0  ;;  %v8836_v47 = vpop.xlane.xlu1 %2900  ;;  %v3543_v61 = vsel %vm1036_vm3, %v3451_v32, 0.0  ;;  %v8839_v4 = vadd.f32 %v3525_v28, %v3524_v2 }
 0x3b3   :  { %v3542_v3 = vadd.f32 %v3541_v41, %v3540_v55  ;;  %v3256_v37 = vmul.f32 0.5, %v3255_v53  ;;  %v3536_v5 = vrot.slane %v3535_v24, 2  ;;  %v3545_v27 = vsel %vm1036_vm3, %v3452_v21, 0.0 }
 0x3b4   :  { %v8841_v38 = vpop.xlane.xlu2 %2894  ;;  %v3113_v57 = vadd.f32 %v3112_v35, %v3111_v8  ;;  %v3117_v58 = vadd.f32 %v3116_v23, %v3019_v20  ;;  %v3710_v30 = vmul.f32 %v8839_v4, %v8839_v4  ;;  %vm3260_vm9 = vweird.f32 %v5406_v26  ;;  %v5671_v23 = vld [vmem:[%s10956_s0 + $0x90] sm:$0xff] }
 0x3b5   :  { %v3544_v63 = vadd.f32 %v3543_v61, %v3542_v3  ;;  %v3257_v2 = vsub.f32 1.5, %v3256_v37  ;;  %v3537_v48 = vadd.f32 %v3536_v5, %v3535_v24  ;;  %v3021_v9 = vmul.f32 %v8841_v38, %v8841_v38  ;;  %vm3261_vm11 = vmor %vm3259_vm10, %vm3260_vm9  ;;  %v5672_v37 = vld [vmem:[%s10956_s0 + $0x98] sm:$0xff] }
 0x3b6   :  { %v8845_v39 = vpop.xlane.xlu0 %2906  ;;  %v3114_v44 = vrot.slane %v3113_v57, 1  ;;  %v3118_v6 = vadd.f32 %v3117_v58, %v3020_v14  ;;  %v3728_v62 = vsel %vm1036_vm3, %v3710_v30, 0.0  ;;  %vm3269_vm12 = vweird.f32 %v8824_v50 }
 0x3b7   :  { %v3546_v46 = vadd.f32 %v3545_v27, %v3544_v63  ;;  %v8851_v54 = vpop.eup %5407  ;;  %v3258_v42 = vmul.f32 %v5406_v26, %v3257_v2  ;;  %3729 = vadd.xlane.f32.xlu2 %v3728_v62  ;;  %v3538_v18 = vrot.slane %v3537_v48, 1  ;;  %v3022_v32 = vmul.f32 %v8806_v10, %v8806_v10 }
 0x3b8   :  { %v3264_v43 = vmul.f32 %v8851_v54, %v8824_v50  ;;  %v3115_v45 = vadd.f32 %v3114_v44, %v3113_v57  ;;  %v3119_v25 = vrot.slane %v3118_v6, 4  ;;  %v3023_v35 = vmul.f32 %v8836_v47, %v8836_v47 }
 0x3b9   :  { %v3547_v0 = vrot.slane %v3546_v46, 4  ;;  %v3262_v51 = vsel %vm3261_vm11, %v5406_v26, %v3258_v42  ;;  %v3125_v41 = vadd.f32 %v3022_v32, %v3021_v9  ;;  %vm3270_vm13 = vweird.f32 %v8851_v54 }
 0x3ba   :  { %v8861_v28 = vpop.xlane.xlu1 %2909  ;;  %v3389_v52 = vmul.f32 %v3262_v51, %v8664_v33  ;;  %v3390_v24 = vmul.f32 %v3262_v51, %v8703_v60  ;;  %v3391_v19 = vmul.f32 %v3262_v51, %v8657_v22  ;;  %v3392_v8 = vmul.f32 %v3262_v51, %v8697_v59  ;;  %v5669_v33 = vld [vmem:[%s10956_s0 + $0x80] sm:$0xff]  ;;  %v5670_v22 = vld [vmem:[%s10956_s0 + $0x88] sm:$0xff]  ;;  %vm3271_vm14 = vmor %vm3269_vm12, %vm3270_vm13 }
 0x3bb   :  { %v3265_v21 = vmul.f32 %v8851_v54, %v3264_v43  ;;  %v8870_v26 = vadd.f32 1e-16, %v3115_v45  ;;  %v3120_v55 = vadd.f32 %v3119_v25, %v3118_v6  ;;  %v8880_v60 = vadd.f32 %v3538_v18, %v3537_v48 }
 0x3bc   :  { %v8867_v29 = vpop.xlane.xlu2 %2903  ;;  %v3453_v3 = vmul.f32 %v5669_v33, %v3389_v52  ;;  %v3454_v59 = vmul.f32 %v5670_v22, %v3390_v24  ;;  %v3548_v53 = vadd.f32 %v3547_v0, %v3546_v46  ;;  %v3455_v63 = vmul.f32 %v5671_v23, %v3391_v19 }
 0x3bd   :  { %v3266_v20 = vmul.f32 0.5, %v3265_v21  ;;  %5409 = vrsqrt.f32 %v8870_v26  ;;  %v3121_v61 = vrot.slane %v3120_v55, 2  ;;  %v3456_v14 = vmul.f32 %v5672_v37, %v3392_v8 }
 0x3be   :  { %v8872_v31 = vpop.xlane.xlu0 %2915  ;;  %v3553_v5 = vsel %vm1036_vm3, %v3453_v3, 0.0  ;;  %v3554_v27 = vsel %vm1036_vm3, %v3454_v59, 0.0  ;;  %v3711_v46 = vmul.f32 %v8880_v60, %v8880_v60  ;;  %v3024_v2 = vmul.f32 %v8867_v29, %v8867_v29 }
 0x3bf   :  { %v3555_v57 = vadd.f32 %v3554_v27, %v3553_v5  ;;  %v3267_v58 = vsub.f32 1.5, %v3266_v20  ;;  %v3122_v30 = vadd.f32 %v3121_v61, %v3120_v55  ;;  %v3126_v48 = vadd.f32 %v3125_v41, %v3023_v35  ;;  %v5673_v20 = vld [vmem:[%s10956_s0 + $0xa0] sm:$0xff] }
 0x3c0   :  { %v3549_v44 = vrot.slane %v3548_v53, 2  ;;  %v3025_v0 = vmul.f32 %v8845_v39, %v8845_v39  ;;  %v3026_v42 = vmul.f32 %v8861_v28, %v8861_v28  ;;  %v3556_v43 = vsel %vm1036_vm3, %v3455_v63, 0.0 }
 0x3c1   :  { %v3268_v6 = vmul.f32 %v8851_v54, %v3267_v58  ;;  %v3123_v62 = vrot.slane %v3122_v30, 1  ;;  %v3558_v45 = vsel %vm1036_vm3, %v3456_v14, 0.0  ;;  %v3731_v25 = vsel %vm1036_vm3, %v3711_v46, 0.0 }
 0x3c2   :  { %v8903_v9 = vpop.xlane.xlu1 %2918  ;;  %v3127_v18 = vadd.f32 %v3126_v48, %v3024_v2  ;;  %v3557_v52 = vadd.f32 %v3556_v43, %v3555_v57  ;;  %v3028_v8 = vmul.f32 %v8872_v31, %v8872_v31  ;;  %3732 = vadd.xlane.f32.xlu0 %v3731_v25  ;;  %v3550_v33 = vadd.f32 %v3549_v44, %v3548_v53  ;;  %v5676_v57 = vld [vmem:[%s10956_s0 + $0xb8] sm:$0xff] }
 0x3c3   :  { %v5410_v32 = vpop.eup %5409  ;;  %v3272_v24 = vsel %vm3271_vm14, %v8851_v54, %v3268_v6  ;;  %v3124_v19 = vadd.f32 %v3123_v62, %v3122_v30  ;;  %v3134_v23 = vadd.f32 %v3026_v42, %v3025_v0  ;;  %v3029_v27 = vmul.f32 %v8903_v9, %v8903_v9 }
 0x3c4   :  { %v8910_v51 = vpop.xlane.xlu2 %2912  ;;  %v3393_v21 = vmul.f32 %v3272_v24, %v8730_v36  ;;  %v3394_v55 = vmul.f32 %v3272_v24, %v8695_v13  ;;  %v3395_v50 = vmul.f32 %v3272_v24, %v8724_v49  ;;  %v3396_v3 = vmul.f32 %v3272_v24, %v8756_v40  ;;  %v5674_v13 = vld [vmem:[%s10956_s0 + $0xa8] sm:$0xff]  ;;  %v5675_v36 = vld [vmem:[%s10956_s0 + $0xb0] sm:$0xff] }
 0x3c5   :  { %v3274_v22 = vmul.f32 %v5410_v32, %v8870_v26  ;;  %v8922_v59 = vadd.f32 1e-16, %v3124_v19  ;;  %v3128_v54 = vrot.slane %v3127_v18, 4  ;;  %v3027_v53 = vmul.f32 %v8910_v51, %v8910_v51 }
 0x3c6   :  { %v8918_v41 = vpop.xlane.xlu0 %2924  ;;  %v3457_v61 = vmul.f32 %v5673_v20, %v3393_v21  ;;  %v3458_v49 = vmul.f32 %v5674_v13, %v3394_v55  ;;  %v3459_v40 = vmul.f32 %v5675_v36, %v3395_v50  ;;  %v3559_v37 = vadd.f32 %v3558_v45, %v3557_v52 }
 0x3c7   :  { %v3275_v35 = vmul.f32 %v5410_v32, %v3274_v22  ;;  %5411 = vrsqrt.f32 %v8922_v59  ;;  %v3129_v63 = vadd.f32 %v3128_v54, %v3127_v18  ;;  %v3460_v58 = vmul.f32 %v5676_v57, %v3396_v3 }
 0x3c8   :  { %v3566_v14 = vsel %vm1036_vm3, %v3457_v61, 0.0  ;;  %v3567_v5 = vsel %vm1036_vm3, %v3458_v49, 0.0  ;;  %v3569_v48 = vsel %vm1036_vm3, %v3459_v40, 0.0  ;;  %vm3280_vm15 = vweird.f32 %v5410_v32 }
 0x3c9   :  { %v3568_v30 = vadd.f32 %v3567_v5, %v3566_v14  ;;  %v3276_v46 = vmul.f32 0.5, %v3275_v35  ;;  %v3130_v2 = vrot.slane %v3129_v63, 2  ;;  %v3135_v44 = vadd.f32 %v3134_v23, %v3027_v53 }
 0x3ca   :  { %v3551_v6 = vrot.slane %v3550_v33, 1  ;;  %v8946_v45 = vpop.xlane.xlu1 %2927  ;;  %vm3279_vm1 = vweird.f32 %v8870_v26  ;;  %v3571_v19 = vsel %vm1036_vm3, %v3460_v58, 0.0  ;;  %v3031_v22 = vmul.f32 %v8918_v41, %v8918_v41 }
 0x3cb   :  { %v3570_v0 = vadd.f32 %v3569_v48, %v3568_v30  ;;  %v3277_v42 = vsub.f32 1.5, %v3276_v46  ;;  %v3131_v43 = vadd.f32 %v3130_v2, %v3129_v63  ;;  %v3136_v18 = vadd.f32 %v3135_v44, %v3028_v8  ;;  %vm3281_vm2 = vmor %vm3279_vm1, %vm3280_vm15 }
 0x3cc   :  { %v8944_v62 = vpop.xlane.xlu2 %2921  ;;  %v8951_v52 = vadd.f32 %v3551_v6, %v3550_v33  ;;  %v3032_v26 = vmul.f32 %v8946_v45, %v8946_v45  ;;  %v3560_v13 = vrot.slane %v3559_v37, 4  ;;  %vm3289_vm5 = vweird.f32 %v8922_v59 }
 0x3cd   :  { %v3030_v25 = vmul.f32 %v8944_v62, %v8944_v62  ;;  %v5412_v24 = vpop.eup %5411  ;;  %v3278_v21 = vmul.f32 %v5410_v32, %v3277_v42  ;;  %v3132_v55 = vrot.slane %v3131_v43, 1  ;;  %v3137_v54 = vrot.slane %v3136_v18, 4 }
 0x3ce   :  { %v3284_v3 = vmul.f32 %v5412_v24, %v8922_v59  ;;  %v8958_v20 = vpop.xlane.xlu0 %2933  ;;  %v3572_v8 = vadd.f32 %v3571_v19, %v3570_v0  ;;  %v3712_v53 = vmul.f32 %v8951_v52, %v8951_v52  ;;  %v3561_v46 = vadd.f32 %v3560_v13, %v3559_v37 }
 0x3cf   :  { %v3143_v50 = vadd.f32 %v3030_v25, %v3029_v27  ;;  %v3282_v33 = vsel %vm3281_vm2, %v5410_v32, %v3278_v21  ;;  %v3133_v61 = vadd.f32 %v3132_v55, %v3131_v43  ;;  %v3138_v63 = vadd.f32 %v3137_v54, %v3136_v18  ;;  %v5677_v32 = vld [vmem:[%s10956_s0 + $0xc0] sm:$0xff]  ;;  %v5680_v18 = vld [vmem:[%s10956_s0 + $0xd8] sm:$0xff] }
 0x3d0   :  { %v3397_v49 = vmul.f32 %v3282_v33, %v8722_v17  ;;  %v3398_v36 = vmul.f32 %v3282_v33, %v8751_v16  ;;  %v3399_v40 = vmul.f32 %v3282_v33, %v8782_v34  ;;  %v3285_v35 = vmul.f32 %v5412_v24, %v3284_v3  ;;  %v5678_v17 = vld [vmem:[%s10956_s0 + $0xc8] sm:$0xff]  ;;  %v5679_v34 = vld [vmem:[%s10956_s0 + $0xd0] sm:$0xff] }
 0x3d1   :  { %v8967_v23 = vadd.f32 1e-16, %v3133_v61  ;;  %v3144_v14 = vadd.f32 %v3143_v50, %v3031_v22  ;;  %v3400_v5 = vmul.f32 %v3282_v33, %v8749_v56  ;;  %v3139_v56 = vrot.slane %v3138_v63, 2 }
 0x3d2   :  { %v3461_v27 = vmul.f32 %v5677_v32, %v3397_v49  ;;  %v3462_v16 = vmul.f32 %v5678_v17, %v3398_v36  ;;  %v3463_v57 = vmul.f32 %v5679_v34, %v3399_v40  ;;  %v3286_v30 = vmul.f32 0.5, %v3285_v35  ;;  %v8985_v25 = vpop.xlane.xlu1 %2942  ;;  %v5681_v32 = vld [vmem:[%s10956_s0 + $0xe0] sm:$0xff] }
 0x3d3   :  { %5413 = vrsqrt.f32 %v8967_v23  ;;  %v3573_v2 = vrot.slane %v3572_v8, 4  ;;  %vm3290_vm4 = vweird.f32 %v5412_v24  ;;  %v3140_v42 = vadd.f32 %v3139_v56, %v3138_v63 }
 0x3d4   :  { %v8979_v58 = vpop.xlane.xlu2 %2930  ;;  %v3579_v48 = vsel %vm1036_vm3, %v3461_v27, 0.0  ;;  %v3580_v44 = vsel %vm1036_vm3, %v3462_v16, 0.0  ;;  %v3287_v0 = vsub.f32 1.5, %v3286_v30  ;;  %v3734_v43 = vsel %vm1036_vm3, %v3712_v53, 0.0  ;;  %vm3291_vm0 = vmor %vm3289_vm5, %vm3290_vm4 }
 0x3d5   :  { %v3581_v6 = vadd.f32 %v3580_v44, %v3579_v48  ;;  %v3464_v19 = vmul.f32 %v5680_v18, %v3400_v5  ;;  %v3582_v37 = vsel %vm1036_vm3, %v3463_v57, 0.0  ;;  %3735 = vadd.xlane.f32.xlu1 %v3734_v43  ;;  %v3145_v21 = vadd.f32 %v3144_v14, %v3032_v26 }
 0x3d6   :  { %v8992_v55 = vpop.xlane.xlu0 %2954  ;;  %v3288_v3 = vmul.f32 %v5412_v24, %v3287_v0  ;;  %v3141_v22 = vrot.slane %v3140_v42, 1  ;;  %v3562_v54 = vrot.slane %v3561_v46, 2  ;;  %v3574_v33 = vadd.f32 %v3573_v2, %v3572_v8 }
 0x3d7   :  { %v3583_v50 = vadd.f32 %v3582_v37, %v3581_v6  ;;  %v3146_v36 = vrot.slane %v3145_v21, 4  ;;  %v3584_v40 = vsel %vm1036_vm3, %v3464_v19, 0.0  ;;  %v9014_v16 = vmul.f32 %v8958_v20, %v8958_v20 }
 0x3d8   :  { %v3292_v13 = vsel %vm3291_vm0, %v5412_v24, %v3288_v3  ;;  %v3142_v49 = vadd.f32 %v3141_v22, %v3140_v42  ;;  %v3563_v5 = vadd.f32 %v3562_v54, %v3561_v46  ;;  %vm3299_vm6 = vweird.f32 %v8967_v23  ;;  %v5684_v42 = vld [vmem:[%s10956_s0 + $0xf8] sm:$0xff] }
 0x3d9   :  { %v5414_v61 = vpop.eup %5413  ;;  %v3401_v53 = vmul.f32 %v3292_v13, %v8773_v12  ;;  %v3402_v59 = vmul.f32 %v3292_v13, %v8804_v11  ;;  %v3403_v26 = vmul.f32 %v3292_v13, %v8771_v7  ;;  %v3585_v63 = vadd.f32 %v3584_v40, %v3583_v50  ;;  %v5682_v12 = vld [vmem:[%s10956_s0 + $0xe8] sm:$0xff] }
 0x3da   :  { %v3294_v14 = vmul.f32 %v5414_v61, %v8967_v23  ;;  %v9002_v8 = vadd.f32 1e-16, %v3142_v49  ;;  %v3404_v24 = vmul.f32 %v3292_v13, %v8801_v15  ;;  %v3575_v11 = vrot.slane %v3574_v33, 2  ;;  %v5683_v15 = vld [vmem:[%s10956_s0 + $0xf0] sm:$0xff]  ;;  %v9024_v0 = vpop.xlane.xlu1 %2957 }
 0x3db   :  { %v3465_v27 = vmul.f32 %v5681_v32, %v3401_v53  ;;  %v3466_v7 = vmul.f32 %v5682_v12, %v3402_v59  ;;  %v3147_v34 = vadd.f32 %v3146_v36, %v3145_v21  ;;  %v3467_v57 = vmul.f32 %v5683_v15, %v3403_v26 }
 0x3dc   :  { %v8999_v35 = vpop.xlane.xlu2 %2945  ;;  %v3295_v17 = vmul.f32 %v5414_v61, %v3294_v14  ;;  %5415 = vrsqrt.f32 %v9002_v8  ;;  %v3586_v2 = vrot.slane %v3585_v63, 4  ;;  %v3564_v6 = vrot.slane %v3563_v5, 1 }
 0x3dd   :  { %v3592_v30 = vsel %vm1036_vm3, %v3465_v27, 0.0  ;;  %v3593_v56 = vsel %vm1036_vm3, %v3466_v7, 0.0  ;;  %v3148_v44 = vrot.slane %v3147_v34, 2  ;;  %v3468_v43 = vmul.f32 %v5684_v42, %v3404_v24 }
 0x3de   :  { %v3296_v48 = vmul.f32 0.5, %v3295_v17  ;;  %vm3300_vm7 = vweird.f32 %v5414_v61  ;;  %v9031_v18 = vmul.f32 %v8985_v25, %v8985_v25  ;;  %v3576_v19 = vadd.f32 %v3575_v11, %v3574_v33 }
 0x3df   :  { %v9022_v46 = vpop.xlane.xlu0 %2969  ;;  %v3594_v37 = vadd.f32 %v3593_v56, %v3592_v30  ;;  %v3149_v50 = vadd.f32 %v3148_v44, %v3147_v34  ;;  %v9033_v3 = vadd.f32 %v3564_v6, %v3563_v5  ;;  %v3595_v22 = vsel %vm1036_vm3, %v3467_v57, 0.0  ;;  %vm3301_vm8 = vmor %vm3299_vm6, %vm3300_vm7 }
 0x3e0   :  { %v3297_v21 = vsub.f32 1.5, %v3296_v48  ;;  %v3041_v54 = vmul.f32 %v8992_v55, %v8992_v55  ;;  %v3033_v13 = vmul.f32 %v8979_v58, %v8979_v58  ;;  %v3577_v49 = vrot.slane %v3576_v19, 1  ;;  %v5687_v48 = vld [vmem:[%s10956_s0 + $0x110] sm:$0xff] }
 0x3e1   :  { %v3150_v33 = vrot.slane %v3149_v50, 1  ;;  %v3713_v59 = vmul.f32 %v9033_v3, %v9033_v3  ;;  %v3587_v26 = vadd.f32 %v3586_v2, %v3585_v63  ;;  %v3597_v14 = vsel %vm1036_vm3, %v3468_v43, 0.0 }
 0x3e2   :  { %v9042_v40 = vpop.eup %5415  ;;  %v3298_v53 = vmul.f32 %v5414_v61, %v3297_v21  ;;  %v3042_v24 = vmul.f32 %v9024_v0, %v9024_v0  ;;  %v9054_v32 = vadd.f32 %v3577_v49, %v3576_v19  ;;  %v3596_v27 = vadd.f32 %v3595_v22, %v3594_v37  ;;  %v5688_v37 = vld [vmem:[%s10956_s0 + $0x118] sm:$0xff] }
 0x3e3   :  { %v3304_v5 = vmul.f32 %v9042_v40, %v9002_v8  ;;  %v3151_v7 = vadd.f32 %v3150_v33, %v3149_v50  ;;  %v3737_v11 = vsel %vm1036_vm3, %v3713_v59, 0.0  ;;  %v3588_v56 = vrot.slane %v3587_v26, 2 }
 0x3e4   :  { %v9040_v36 = vpop.xlane.xlu2 %2966  ;;  %v3302_v12 = vsel %vm3301_vm8, %v5414_v61, %v3298_v53  ;;  %3738 = vadd.xlane.f32.xlu2 %v3737_v11  ;;  %v3714_v61 = vmul.f32 %v9054_v32, %v9054_v32  ;;  %v3038_v6 = vmul.f32 %v8999_v35, %v8999_v35  ;;  %v3598_v42 = vadd.f32 %v3597_v14, %v3596_v27 }
 0x3e5   :  { %v3405_v63 = vmul.f32 %v3302_v12, %v8841_v38  ;;  %v3406_v17 = vmul.f32 %v3302_v12, %v8806_v10  ;;  %v3407_v23 = vmul.f32 %v3302_v12, %v8836_v47  ;;  %v3408_v34 = vmul.f32 %v3302_v12, %v8867_v29  ;;  %v5685_v10 = vld [vmem:[%s10956_s0 + $0x100] sm:$0xff]  ;;  %v5686_v38 = vld [vmem:[%s10956_s0 + $0x108] sm:$0xff] }
 0x3e6   :  { %v3305_v57 = vmul.f32 %v9042_v40, %v3304_v5  ;;  %v9064_v30 = vadd.f32 1e-16, %v3151_v7  ;;  %v3740_v19 = vsel %vm1036_vm3, %v3714_v61, 0.0  ;;  %v3045_v49 = vmul.f32 %v9040_v36, %v9040_v36 }
 0x3e7   :  { %v9061_v15 = vpop.xlane.xlu0 %2936  ;;  %v3469_v47 = vmul.f32 %v5685_v10, %v3405_v63  ;;  %v3470_v29 = vmul.f32 %v5686_v38, %v3406_v17  ;;  %v3471_v44 = vmul.f32 %v5687_v48, %v3407_v23  ;;  %v3472_v21 = vmul.f32 %v5688_v37, %v3408_v34  ;;  %3741 = vadd.xlane.f32.xlu0 %v3740_v19 }
 0x3e8   :  { %v3306_v43 = vmul.f32 0.5, %v3305_v57  ;;  %5417 = vrsqrt.f32 %v9064_v30  ;;  %vm3310_vm9 = vweird.f32 %v9042_v40  ;;  %v3589_v14 = vadd.f32 %v3588_v56, %v3587_v26 }
 0x3e9   :  { %v9068_v2 = vpop.xlane.xlu1 %2978  ;;  %v3605_v50 = vsel %vm1036_vm3, %v3469_v47, 0.0  ;;  %v3606_v22 = vsel %vm1036_vm3, %v3470_v29, 0.0  ;;  %v3608_v5 = vsel %vm1036_vm3, %v3471_v44, 0.0  ;;  %vm3309_vm10 = vweird.f32 %v9002_v8 }
 0x3ea   :  { %v3607_v33 = vadd.f32 %v3606_v22, %v3605_v50  ;;  %v3307_v59 = vsub.f32 1.5, %v3306_v43  ;;  %v3152_v27 = vadd.f32 %v9014_v16, %v3033_v13  ;;  %v3046_v12 = vmul.f32 %v9022_v46, %v9022_v46  ;;  %vm3311_vm11 = vmor %vm3309_vm10, %vm3310_vm9 }
 0x3eb   :  { %v3590_v63 = vrot.slane %v3589_v14, 1  ;;  %v3599_v17 = vrot.slane %v3598_v42, 4  ;;  %v3610_v23 = vsel %vm1036_vm3, %v3472_v21, 0.0  ;;  %v3170_v34 = vadd.f32 %v3042_v24, %v3041_v54 }
 0x3ec   :  { %v9090_v53 = vpop.xlane.xlu2 %2981  ;;  %v3609_v7 = vadd.f32 %v3608_v5, %v3607_v33  ;;  %v3308_v11 = vmul.f32 %v9042_v40, %v3307_v59  ;;  %v3161_v26 = vadd.f32 %v3038_v6, %v9031_v18  ;;  %v3179_v57 = vadd.f32 %v3046_v12, %v3045_v49  ;;  %v5689_v6 = vld [vmem:[%s10956_s0 + $0x120] sm:$0xff]  ;;  %v5692_v49 = vld [vmem:[%s10956_s0 + $0x138] sm:$0xff] }
 0x3ed   :  { %v3035_v13 = vmul.f32 %v9061_v15, %v9061_v15  ;;  %v9106_v10 = vadd.f32 %v3590_v63, %v3589_v14  ;;  %vm3319_vm12 = vweird.f32 %v9064_v30  ;;  %v3600_v44 = vadd.f32 %v3599_v17, %v3598_v42 }
 0x3ee   :  { %v5418_v8 = vpop.eup %5417  ;;  %v3611_v56 = vadd.f32 %v3610_v23, %v3609_v7  ;;  %v3312_v16 = vsel %vm3311_vm11, %v9042_v40, %v3308_v11  ;;  %v3049_v19 = vmul.f32 %v9068_v2, %v9068_v2  ;;  %v3050_v22 = vmul.f32 %v9090_v53, %v9090_v53 }
 0x3ef   :  { %v9101_v61 = vpop.xlane.xlu0 %2972  ;;  %v3409_v38 = vmul.f32 %v3312_v16, %v8845_v39  ;;  %v3410_v54 = vmul.f32 %v3312_v16, %v8861_v28  ;;  %v3411_v18 = vmul.f32 %v3312_v16, %v8910_v51  ;;  %v3412_v24 = vmul.f32 %v3312_v16, %v8872_v31  ;;  %v5690_v28 = vld [vmem:[%s10956_s0 + $0x128] sm:$0xff]  ;;  %v5691_v31 = vld [vmem:[%s10956_s0 + $0x130] sm:$0xff] }
 0x3f0   :  { %v3612_v29 = vrot.slane %v3611_v56, 4  ;;  %v3314_v48 = vmul.f32 %v5418_v8, %v9064_v30  ;;  %v3715_v40 = vmul.f32 %v9106_v10, %v9106_v10  ;;  %v3047_v5 = vmul.f32 %v9101_v61, %v9101_v61 }
 0x3f1   :  { %v9108_v47 = vpop.xlane.xlu1 %2948  ;;  %v3473_v39 = vmul.f32 %v5689_v6, %v3409_v38  ;;  %v3474_v51 = vmul.f32 %v5690_v28, %v3410_v54  ;;  %v3475_v43 = vmul.f32 %v5691_v31, %v3411_v18  ;;  %v3476_v33 = vmul.f32 %v5692_v49, %v3412_v24 }
 0x3f2   :  { %v3613_v42 = vadd.f32 %v3612_v29, %v3611_v56  ;;  %v3315_v21 = vmul.f32 %v5418_v8, %v3314_v48  ;;  %v3743_v50 = vsel %vm1036_vm3, %v3715_v40, 0.0  ;;  %v3601_v11 = vrot.slane %v3600_v44, 2 }
 0x3f3   :  { %v3618_v59 = vsel %vm1036_vm3, %v3473_v39, 0.0  ;;  %v3619_v14 = vsel %vm1036_vm3, %v3474_v51, 0.0  ;;  %3744 = vadd.xlane.f32.xlu1 %v3743_v50  ;;  %v3039_v63 = vmul.f32 %v9108_v47, %v9108_v47  ;;  %v3621_v17 = vsel %vm1036_vm3, %v3475_v43, 0.0 }
 0x3f4   :  { %v9129_v37 = vpop.xlane.xlu2 %2960  ;;  %v3620_v12 = vadd.f32 %v3619_v14, %v3618_v59  ;;  %v3316_v7 = vmul.f32 0.5, %v3315_v21  ;;  %v3153_v23 = vadd.f32 %v3152_v27, %v3035_v13  ;;  %v3614_v38 = vrot.slane %v3613_v42, 2 }
 0x3f5   :  { %v3043_v56 = vmul.f32 %v9129_v37, %v9129_v37  ;;  %vm3320_vm13 = vweird.f32 %v5418_v8  ;;  %v3602_v24 = vadd.f32 %v3601_v11, %v3600_v44  ;;  %v3188_v48 = vadd.f32 %v3050_v22, %v3049_v19 }
 0x3f6   :  { %v3622_v54 = vadd.f32 %v3621_v17, %v3620_v12  ;;  %v3317_v18 = vsub.f32 1.5, %v3316_v7  ;;  %v3162_v40 = vadd.f32 %v3161_v26, %v3039_v63  ;;  %v3615_v39 = vadd.f32 %v3614_v38, %v3613_v42  ;;  %vm3321_vm14 = vmor %vm3319_vm12, %vm3320_vm13  ;;  %v9174_v12 = vld [vmem:[%s10956_s0 + $0x140] sm:$0xff] }
 0x3f7   :  { %v9146_v16 = vpop.xlane.xlu0 %2951  ;;  %v3623_v27 = vsel %vm1036_vm3, %v3476_v33, 0.0  ;;  %v3180_v28 = vadd.f32 %v3179_v57, %v3047_v5  ;;  %v3603_v51 = vrot.slane %v3602_v24, 1  ;;  %v3171_v43 = vadd.f32 %v3170_v34, %v3043_v56 }
 0x3f8   :  { %v3040_v6 = vmul.f32 %v9146_v16, %v9146_v16  ;;  %v3318_v13 = vmul.f32 %v5418_v8, %v3317_v18  ;;  %v3624_v31 = vadd.f32 %v3623_v27, %v3622_v54  ;;  %v3616_v44 = vrot.slane %v3615_v39, 1  ;;  %v5696_v54 = vld [vmem:[%s10956_s0 + $0x158] sm:$0xff] }
 0x3f9   :  { %v9148_v29 = vpop.xlane.xlu1 %2984  ;;  %v9157_v26 = vadd.f32 %v3603_v51, %v3602_v24 }
 0x3fa   :  { %v3163_v21 = vadd.f32 %v3162_v40, %v3040_v6  ;;  %v3322_v19 = vsel %vm3321_vm14, %v5418_v8, %v3318_v13  ;;  %v3051_v42 = vmul.f32 %v9148_v29, %v9148_v29  ;;  %v9169_v59 = vadd.f32 %v3616_v44, %v3615_v39 }
 0x3fb   :  { %v3413_v57 = vmul.f32 %v3322_v19, %v8903_v9  ;;  %v3414_v49 = vmul.f32 %v3322_v19, %v8944_v62  ;;  %v3415_v30 = vmul.f32 %v3322_v19, %v8918_v41  ;;  %v3416_v34 = vmul.f32 %v3322_v19, %v8946_v45  ;;  %v9180_v41 = vld [vmem:[%s10956_s0 + $0x148] sm:$0xff]  ;;  %v5695_v45 = vld [vmem:[%s10956_s0 + $0x150] sm:$0xff] }
 0x3fc   :  { %v9155_v50 = vpop.xlane.xlu2 %2939  ;;  %v3716_v33 = vmul.f32 %v9157_v26, %v9157_v26  ;;  %v3164_v8 = vrot.slane %v3163_v21, 4  ;;  %v3625_v5 = vrot.slane %v3624_v31, 4  ;;  %v3717_v17 = vmul.f32 %v9169_v59, %v9169_v59 }
 0x3fd   :  { %v3036_v22 = vmul.f32 %v9155_v50, %v9155_v50  ;;  %v3477_v9 = vmul.f32 %v9174_v12, %v3413_v57  ;;  %v3478_v62 = vmul.f32 %v9180_v41, %v3414_v49  ;;  %v3479_v7 = vmul.f32 %v5695_v45, %v3415_v30 }
 0x3fe   :  { %v3746_v11 = vsel %vm1036_vm3, %v3716_v33, 0.0  ;;  %v3165_v63 = vadd.f32 %v3164_v8, %v3163_v21  ;;  %v3480_v18 = vmul.f32 %v5696_v54, %v3416_v34  ;;  %v3189_v6 = vadd.f32 %v3188_v48, %v3051_v42 }
 0x3ff   :  { %v3154_v14 = vadd.f32 %v3153_v23, %v3036_v22  ;;  %v3631_v24 = vsel %vm1036_vm3, %v3477_v9, 0.0  ;;  %v3632_v40 = vsel %vm1036_vm3, %v3478_v62, 0.0  ;;  %3747 = vadd.xlane.f32.xlu2 %v3746_v11  ;;  %v3749_v13 = vsel %vm1036_vm3, %v3717_v17, 0.0 }
 0x400   :  { %v9189_v56 = vpop.xlane.xlu0 %2987  ;;  %v3633_v39 = vadd.f32 %v3632_v40, %v3631_v24  ;;  %v3166_v27 = vrot.slane %v3165_v63, 2  ;;  %v3634_v21 = vsel %vm1036_vm3, %v3479_v7, 0.0  ;;  %3750 = vadd.xlane.f32.xlu0 %v3749_v13  ;;  %v3626_v57 = vadd.f32 %v3625_v5, %v3624_v31 }
 0x401   :  { %v3155_v23 = vrot.slane %v3154_v14, 4  ;;  %v9191_v38 = vpop.xlane.xlu1 %2963  ;;  %v3052_v44 = vmul.f32 %v9189_v56, %v9189_v56  ;;  %v3636_v34 = vsel %vm1036_vm3, %v3480_v18, 0.0 }
 0x402   :  { %v3044_v19 = vmul.f32 %v9191_v38, %v9191_v38  ;;  %v3635_v49 = vadd.f32 %v3634_v21, %v3633_v39  ;;  %v3167_v30 = vadd.f32 %v3166_v27, %v3165_v63 }
 0x403   :  { %v3156_v51 = vadd.f32 %v3155_v23, %v3154_v14  ;;  %v3190_v33 = vadd.f32 %v3189_v6, %v3052_v44  ;;  %v3627_v14 = vrot.slane %v3626_v57, 2 }
 0x404   :  { %v9204_v22 = vpop.xlane.xlu2 %2975  ;;  %v3172_v8 = vadd.f32 %v3171_v43, %v3044_v19  ;;  %v3637_v9 = vadd.f32 %v3636_v34, %v3635_v49  ;;  %v3168_v62 = vrot.slane %v3167_v30, 1 }
 0x405   :  { %v3157_v48 = vrot.slane %v3156_v51, 2  ;;  %v3048_v42 = vmul.f32 %v9204_v22, %v9204_v22  ;;  %v3191_v11 = vrot.slane %v3190_v33, 4  ;;  %v3628_v23 = vadd.f32 %v3627_v14, %v3626_v57 }
 0x406   :  { %v3173_v17 = vrot.slane %v3172_v8, 4  ;;  %v3169_v54 = vadd.f32 %v3168_v62, %v3167_v30  ;;  %v3638_v63 = vrot.slane %v3637_v9, 4 }
 0x407   :  { %v3158_v45 = vadd.f32 %v3157_v48, %v3156_v51  ;;  %v3181_v7 = vadd.f32 %v3180_v28, %v3048_v42  ;;  %v3192_v24 = vadd.f32 %v3191_v11, %v3190_v33  ;;  %v3629_v39 = vrot.slane %v3628_v23, 1 }
 0x408   :  { %v3174_v40 = vadd.f32 %v3173_v17, %v3172_v8  ;;  %v3209_v27 = vadd.f32 1e-16, %v3169_v54  ;;  %v3639_v6 = vadd.f32 %v3638_v63, %v3637_v9 }
 0x409   :  { %v3159_v31 = vrot.slane %v3158_v45, 1  ;;  %v3182_v5 = vrot.slane %v3181_v7, 4  ;;  %v3193_v43 = vrot.slane %v3192_v24, 2  ;;  %v9209_v44 = vadd.f32 %v3629_v39, %v3628_v23 }
 0x40a   :  { %v3175_v21 = vrot.slane %v3174_v40, 2  ;;  %5419 = vrsqrt.f32 %v3209_v27  ;;  %v3640_v30 = vrot.slane %v3639_v6, 2  ;;  %vm3339_vm1 = vweird.f32 %v3209_v27 }
 0x40b   :  { %v3160_v13 = vadd.f32 %v3159_v31, %v3158_v45  ;;  %v3183_v18 = vadd.f32 %v3182_v5, %v3181_v7  ;;  %v3194_v19 = vadd.f32 %v3193_v43, %v3192_v24  ;;  %v3718_v49 = vmul.f32 %v9209_v44, %v9209_v44 }
 0x40c   :  { %v3176_v57 = vadd.f32 %v3175_v21, %v3174_v40  ;;  %v3641_v8 = vadd.f32 %v3640_v30, %v3639_v6 }
 0x40d   :  { %v3208_v28 = vadd.f32 1e-16, %v3160_v13  ;;  %v3184_v51 = vrot.slane %v3183_v18, 2  ;;  %v3195_v42 = vrot.slane %v3194_v19, 1  ;;  %v3752_v33 = vsel %vm1036_vm3, %v3718_v49, 0.0 }
 0x40e   :  { %v3177_v34 = vrot.slane %v3176_v57, 1  ;;  %3753 = vadd.xlane.f32.xlu1 %v3752_v33  ;;  %v3642_v45 = vrot.slane %v3641_v8, 1 }
 0x40f   :  { %5421 = vrsqrt.f32 %v3208_v28  ;;  %v3185_v48 = vadd.f32 %v3184_v51, %v3183_v18  ;;  %v3196_v9 = vadd.f32 %v3195_v42, %v3194_v19  ;;  %vm3329_vm5 = vweird.f32 %v3208_v28 }
 0x410   :  { %v3178_v62 = vadd.f32 %v3177_v34, %v3176_v57  ;;  %v5420_v7 = vpop.eup %5419  ;;  %v9220_v63 = vadd.f32 %v3642_v45, %v3641_v8 }
 0x411   :  { %v3186_v14 = vrot.slane %v3185_v48, 1  ;;  %v3334_v17 = vmul.f32 %v5420_v7, %v3209_v27  ;;  %v9214_v23 = vadd.f32 1e-16, %v3196_v9  ;;  %vm3340_vm15 = vweird.f32 %v5420_v7 }
 0x412   :  { %v9216_v54 = vadd.f32 1e-16, %v3178_v62  ;;  %v3719_v18 = vmul.f32 %v9220_v63, %v9220_v63  ;;  %vm3341_vm4 = vmor %vm3339_vm1, %vm3340_vm15 }
 0x413   :  { %v3187_v11 = vadd.f32 %v3186_v14, %v3185_v48  ;;  %v3335_v24 = vmul.f32 %v5420_v7, %v3334_v17  ;;  %5423 = vrsqrt.f32 %v9214_v23  ;;  %vm3369_vm6 = vweird.f32 %v9214_v23 }
 0x414   :  { %5425 = vrsqrt.f32 %v9216_v54  ;;  %v3755_v21 = vsel %vm1036_vm3, %v3719_v18, 0.0  ;;  %vm3349_vm9 = vweird.f32 %v9216_v54 }
 0x415   :  { %v5422_v31 = vpop.eup %5421  ;;  %v9218_v5 = vadd.f32 1e-16, %v3187_v11  ;;  %v3336_v39 = vmul.f32 0.5, %v3335_v24  ;;  %3756 = vadd.xlane.f32.xlu2 %v3755_v21 }
 0x416   :  { %v3324_v40 = vmul.f32 %v5422_v31, %v3208_v28  ;;  %vm3330_vm2 = vweird.f32 %v5422_v31 }
 0x417   :  { %5427 = vrsqrt.f32 %v9218_v5  ;;  %v3337_v6 = vsub.f32 1.5, %v3336_v39  ;;  %vm3331_vm0 = vmor %vm3329_vm5, %vm3330_vm2  ;;  %vm3359_vm12 = vweird.f32 %v9218_v5 }
 0x418   :  { %v3325_v13 = vmul.f32 %v5422_v31, %v3324_v40 }
 0x419   :  { %v9228_v51 = vpop.eup %5423  ;;  %v3338_v19 = vmul.f32 %v5420_v7, %v3337_v6 }
 0x41a   :  { %v3326_v43 = vmul.f32 0.5, %v3325_v13  ;;  %v9230_v49 = vpop.eup %5425  ;;  %v3364_v30 = vmul.f32 %v9228_v51, %v9214_v23  ;;  %vm3370_vm7 = vweird.f32 %v9228_v51  ;;  %v5700_v13 = vld [vmem:[%s10956_s0 + $0x198] sm:$0xff] }
 0x41b   :  { %v3342_v42 = vsel %vm3341_vm4, %v5420_v7, %v3338_v19  ;;  %v3344_v33 = vmul.f32 %v9230_v49, %v9216_v54  ;;  %v5699_v7 = vld [vmem:[%s10956_s0 + $0x190] sm:$0xff]  ;;  %vm3350_vm8 = vweird.f32 %v9230_v49  ;;  %vm3371_vm10 = vmor %vm3369_vm6, %vm3370_vm7 }
 0x41c   :  { %v3327_v57 = vsub.f32 1.5, %v3326_v43  ;;  %v3421_v8 = vmul.f32 %v3342_v42, %v8985_v25  ;;  %v3422_v27 = vmul.f32 %v3342_v42, %v8999_v35  ;;  %v3423_v14 = vmul.f32 %v3342_v42, %v9108_v47  ;;  %v9249_v25 = vld [vmem:[%s10956_s0 + $0x180] sm:$0xff]  ;;  %v9255_v47 = vld [vmem:[%s10956_s0 + $0x188] sm:$0xff]  ;;  %v5703_v19 = vld [vmem:[%s10956_s0 + $0x170] sm:$0xff] }
 0x41d   :  { %v9234_v48 = vpop.eup %5427  ;;  %v3424_v9 = vmul.f32 %v3342_v42, %v9146_v16  ;;  %v3365_v45 = vmul.f32 %v9228_v51, %v3364_v30  ;;  %v3345_v28 = vmul.f32 %v9230_v49, %v3344_v33  ;;  %vm3351_vm11 = vmor %vm3349_vm9, %vm3350_vm8 }
 0x41e   :  { %v3328_v34 = vmul.f32 %v5422_v31, %v3327_v57  ;;  %v3485_v35 = vmul.f32 %v9249_v25, %v3421_v8  ;;  %v3486_v16 = vmul.f32 %v9255_v47, %v3422_v27  ;;  %v3487_v11 = vmul.f32 %v5699_v7, %v3423_v14  ;;  %v5704_v14 = vld [vmem:[%s10956_s0 + $0x178] sm:$0xff] }
 0x41f   :  { %v3354_v17 = vmul.f32 %v9234_v48, %v9218_v5  ;;  %v3488_v18 = vmul.f32 %v5700_v13, %v3424_v9  ;;  %v3366_v42 = vmul.f32 0.5, %v3365_v45  ;;  %v3727_v8 = vpop.xlane.xlu1 %3726  ;;  %vm3360_vm13 = vweird.f32 %v9234_v48 }
 0x420   :  { %v3332_v62 = vsel %vm3331_vm0, %v5422_v31, %v3328_v34  ;;  %v3657_v6 = vsel %vm1036_vm3, %v3485_v35, 0.0  ;;  %v3658_v43 = vsel %vm1036_vm3, %v3486_v16, 0.0  ;;  %v3660_v30 = vsel %vm1036_vm3, %v3487_v11, 0.0  ;;  %vm3361_vm14 = vmor %vm3359_vm12, %vm3360_vm13 }
 0x421   :  { %v3417_v31 = vmul.f32 %v3332_v62, %v8979_v58  ;;  %v3418_v24 = vmul.f32 %v3332_v62, %v8958_v20  ;;  %v3419_v40 = vmul.f32 %v3332_v62, %v9061_v15  ;;  %v3420_v39 = vmul.f32 %v3332_v62, %v9155_v50  ;;  %v9276_v20 = vld [vmem:[%s10956_s0 + $0x160] sm:$0xff]  ;;  %v9282_v15 = vld [vmem:[%s10956_s0 + $0x168] sm:$0xff] }
 0x422   :  { %v3659_v21 = vadd.f32 %v3658_v43, %v3657_v6  ;;  %v3346_v34 = vmul.f32 0.5, %v3345_v28  ;;  %v3355_v33 = vmul.f32 %v9234_v48, %v3354_v17  ;;  %v3662_v16 = vsel %vm1036_vm3, %v3488_v18, 0.0 }
 0x423   :  { %v3481_v58 = vmul.f32 %v9276_v20, %v3417_v31  ;;  %v3482_v50 = vmul.f32 %v9282_v15, %v3418_v24  ;;  %v3483_v57 = vmul.f32 %v5703_v19, %v3419_v40  ;;  %v3484_v9 = vmul.f32 %v5704_v14, %v3420_v39 }
 0x424   :  { %v3661_v27 = vadd.f32 %v3660_v30, %v3659_v21  ;;  %v3367_v31 = vsub.f32 1.5, %v3366_v42  ;;  %v3347_v11 = vsub.f32 1.5, %v3346_v34  ;;  %v9298_v17 = vadd.f32 1e-16, %v3727_v8  ;;  %v5708_v34 = vld [vmem:[%s10956_s0 + $0x1f8] sm:$0xff] }
 0x425   :  { %v3644_v62 = vsel %vm1036_vm3, %v3481_v58, 0.0  ;;  %v3645_v35 = vsel %vm1036_vm3, %v3482_v50, 0.0  ;;  %v3647_v28 = vsel %vm1036_vm3, %v3483_v57, 0.0  ;;  %v3356_v13 = vmul.f32 0.5, %v3355_v33 }
 0x426   :  { %v3646_v7 = vadd.f32 %v3645_v35, %v3644_v62  ;;  %v3663_v45 = vadd.f32 %v3662_v16, %v3661_v27  ;;  %v3368_v40 = vmul.f32 %v9228_v51, %v3367_v31  ;;  %v3348_v39 = vmul.f32 %v9230_v49, %v3347_v11  ;;  %v9343_v27 = vld [vmem:[%s10956_s0 + $0x1a0] sm:$0xff]  ;;  %v9353_v16 = vld [vmem:[%s10956_s0 + $0x1a8] sm:$0xff]  ;;  %v5711_v11 = vld [vmem:[%s10956_s0 + $0x1b0] sm:$0xff] }
 0x427   :  { %v3649_v18 = vsel %vm1036_vm3, %v3484_v9, 0.0  ;;  %5429 = vrsqrt.f32 %v9298_v17  ;;  %v3357_v42 = vsub.f32 1.5, %v3356_v13  ;;  %vm3795_vm1 = vweird.f32 %v9298_v17 }
 0x428   :  { %v3648_v24 = vadd.f32 %v3647_v28, %v3646_v7  ;;  %v3372_v6 = vsel %vm3371_vm10, %v9228_v51, %v3368_v40  ;;  %v3352_v43 = vsel %vm3351_vm11, %v9230_v49, %v3348_v39  ;;  %v3664_v23 = vrot.slane %v3663_v45, 4  ;;  %v9323_v51 = vld [vmem:[%s10956_s0 + $0x1e0] sm:$0xff] }
 0x429   :  { %v3433_v21 = vmul.f32 %v3372_v6, %v9068_v2  ;;  %v3434_v58 = vmul.f32 %v3372_v6, %v9090_v53  ;;  %v3435_v50 = vmul.f32 %v3372_v6, %v9148_v29  ;;  %v3436_v19 = vmul.f32 %v3372_v6, %v9189_v56  ;;  %v9329_v2 = vld [vmem:[%s10956_s0 + $0x1e8] sm:$0xff] }
 0x42a   :  { %v3650_v54 = vadd.f32 %v3649_v18, %v3648_v24  ;;  %v3425_v57 = vmul.f32 %v3352_v43, %v8992_v55  ;;  %v3426_v30 = vmul.f32 %v3352_v43, %v9024_v0  ;;  %v5707_v55 = vld [vmem:[%s10956_s0 + $0x1f0] sm:$0xff]  ;;  %v3427_v29 = vmul.f32 %v3352_v43, %v9129_v37  ;;  %v3730_v40 = vpop.xlane.xlu2 %3729 }
 0x42b   :  { %v3497_v49 = vmul.f32 %v9323_v51, %v3433_v21  ;;  %v3498_v53 = vmul.f32 %v9329_v2, %v3434_v58  ;;  %v3499_v0 = vmul.f32 %v5707_v55, %v3435_v50  ;;  %v3500_v33 = vmul.f32 %v5708_v34, %v3436_v19 }
 0x42c   :  { %v3651_v56 = vrot.slane %v3650_v54, 4  ;;  %v3428_v8 = vmul.f32 %v3352_v43, %v9191_v38  ;;  %v3489_v14 = vmul.f32 %v9343_v27, %v3425_v57  ;;  %v3665_v62 = vadd.f32 %v3664_v23, %v3663_v45  ;;  %v5712_v45 = vld [vmem:[%s10956_s0 + $0x1b8] sm:$0xff] }
 0x42d   :  { %v9346_v9 = vpop.eup %5429  ;;  %v3696_v37 = vsel %vm1036_vm3, %v3497_v49, 0.0  ;;  %v3697_v35 = vsel %vm1036_vm3, %v3498_v53, 0.0  ;;  %v3490_v38 = vmul.f32 %v9353_v16, %v3426_v30  ;;  %v3699_v31 = vsel %vm1036_vm3, %v3499_v0, 0.0 }
 0x42e   :  { %v3698_v7 = vadd.f32 %v3697_v35, %v3696_v37  ;;  %v3491_v28 = vmul.f32 %v5711_v11, %v3427_v29  ;;  %v3492_v24 = vmul.f32 %v5712_v45, %v3428_v8  ;;  %v3670_v39 = vsel %vm1036_vm3, %v3489_v14, 0.0 }
 0x42f   :  { %v3671_v13 = vsel %vm1036_vm3, %v3490_v38, 0.0  ;;  %v3358_v18 = vmul.f32 %v9234_v48, %v3357_v42  ;;  %v3790_v6 = vmul.f32 %v9346_v9, %v9298_v17  ;;  %v3652_v43 = vadd.f32 %v3651_v56, %v3650_v54  ;;  %v9387_v56 = vld [vmem:[%s10956_s0 + $0x1c0] sm:$0xff] }
 0x430   :  { %v3700_v23 = vadd.f32 %v3699_v31, %v3698_v7  ;;  %v3701_v21 = vsel %vm1036_vm3, %v3500_v33, 0.0  ;;  %v3672_v58 = vadd.f32 %v3671_v13, %v3670_v39  ;;  %v3673_v50 = vsel %vm1036_vm3, %v3491_v28, 0.0  ;;  %v5716_v33 = vld [vmem:[%s10956_s0 + $0x1d8] sm:$0xff] }
 0x431   :  { %v3362_v19 = vsel %vm3361_vm14, %v9234_v48, %v3358_v18  ;;  %v3791_v57 = vmul.f32 %v9346_v9, %v3790_v6  ;;  %v9376_v30 = vadd.f32 1e-16, %v3730_v40  ;;  %v3675_v55 = vsel %vm1036_vm3, %v3492_v24, 0.0 }
 0x432   :  { %v3702_v42 = vadd.f32 %v3701_v21, %v3700_v23  ;;  %v3674_v49 = vadd.f32 %v3673_v50, %v3672_v58  ;;  %v3429_v54 = vmul.f32 %v3362_v19, %v9040_v36  ;;  %v3430_v53 = vmul.f32 %v3362_v19, %v9022_v46  ;;  %v9393_v46 = vld [vmem:[%s10956_s0 + $0x1c8] sm:$0xff] }
 0x433   :  { %v3431_v0 = vmul.f32 %v3362_v19, %v9101_v61  ;;  %v3432_v5 = vmul.f32 %v3362_v19, %v9204_v22  ;;  %5431 = vrsqrt.f32 %v9376_v30  ;;  %v5715_v61 = vld [vmem:[%s10956_s0 + $0x1d0] sm:$0xff]  ;;  %v3792_v14 = vmul.f32 0.5, %v3791_v57 }
 0x434   :  { %v3703_v29 = vrot.slane %v3702_v42, 4  ;;  %v3676_v48 = vadd.f32 %v3675_v55, %v3674_v49  ;;  %v3493_v34 = vmul.f32 %v9387_v56, %v3429_v54  ;;  %v3494_v36 = vmul.f32 %v9393_v46, %v3430_v53 }
 0x435   :  { %v3495_v22 = vmul.f32 %v5715_v61, %v3431_v0  ;;  %v3496_v8 = vmul.f32 %v5716_v33, %v3432_v5  ;;  %v3733_v37 = vpop.xlane.xlu0 %3732  ;;  %v3666_v40 = vrot.slane %v3665_v62, 2  ;;  %v3653_v39 = vrot.slane %v3652_v43, 2 }
 0x436   :  { %v3704_v35 = vadd.f32 %v3703_v29, %v3702_v42  ;;  %v3677_v38 = vrot.slane %v3676_v48, 4  ;;  %v3683_v7 = vsel %vm1036_vm3, %v3493_v34, 0.0  ;;  %v3684_v31 = vsel %vm1036_vm3, %v3494_v36, 0.0 }
 0x437   :  { %v3685_v11 = vadd.f32 %v3684_v31, %v3683_v7  ;;  %v3686_v28 = vsel %vm1036_vm3, %v3495_v22, 0.0  ;;  %v9405_v24 = vadd.f32 1e-16, %v3733_v37  ;;  %v3688_v23 = vsel %vm1036_vm3, %v3496_v8, 0.0 }
 0x438   :  { %v3678_v45 = vadd.f32 %v3677_v38, %v3676_v48  ;;  %v3705_v6 = vrot.slane %v3704_v35, 2  ;;  %v3793_v21 = vsub.f32 1.5, %v3792_v14  ;;  %v3667_v50 = vadd.f32 %v3666_v40, %v3665_v62 }
 0x439   :  { %v9407_v13 = vpop.eup %5431  ;;  %v3687_v18 = vadd.f32 %v3686_v28, %v3685_v11  ;;  %5433 = vrsqrt.f32 %v9405_v24  ;;  %v3654_v19 = vadd.f32 %v3653_v39, %v3652_v43  ;;  %vm3796_vm15 = vweird.f32 %v9346_v9 }
 0x43a   :  { %v3800_v57 = vmul.f32 %v9407_v13, %v9376_v30  ;;  %v3706_v42 = vadd.f32 %v3705_v6, %v3704_v35  ;;  %v3679_v49 = vrot.slane %v3678_v45, 2  ;;  %v3668_v53 = vrot.slane %v3667_v50, 1  ;;  %vm3797_vm2 = vmor %vm3795_vm1, %vm3796_vm15 }
 0x43b   :  { %v3689_v58 = vadd.f32 %v3688_v23, %v3687_v18  ;;  %v3655_v55 = vrot.slane %v3654_v19, 1  ;;  %v3794_v48 = vmul.f32 %v9346_v9, %v3793_v21  ;;  %vm3806_vm4 = vweird.f32 %v9407_v13 }
 0x43c   :  { %v3707_v0 = vrot.slane %v3706_v42, 1  ;;  %v3680_v5 = vadd.f32 %v3679_v49, %v3678_v45  ;;  %v9415_v34 = vadd.f32 %v3668_v53, %v3667_v50  ;;  %v3801_v62 = vmul.f32 %v9407_v13, %v3800_v57 }
 0x43d   :  { %v3690_v54 = vrot.slane %v3689_v58, 4  ;;  %v9417_v36 = vadd.f32 %v3655_v55, %v3654_v19  ;;  %v3798_v35 = vsel %vm3797_vm2, %v9346_v9, %v3794_v48  ;;  %vm3805_vm5 = vweird.f32 %v9376_v30  ;;  %v5718_v55 = vld [vmem:[%s10956_s0 + $0x10] sm:$0xff]  ;;  %v5719_v48 = vld [vmem:[%s10956_s0 + $0x8] sm:$0xff] }
 0x43e   :  { %v3681_v43 = vrot.slane %v3680_v5, 1  ;;  %v3721_v22 = vmul.f32 %v9415_v34, %v9415_v34  ;;  %v9427_v8 = vadd.f32 %v3707_v0, %v3706_v42  ;;  %v3802_v31 = vmul.f32 0.5, %v3801_v62  ;;  %vm3807_vm0 = vmor %vm3805_vm5, %vm3806_vm4 }
 0x43f   :  { %v3691_v29 = vadd.f32 %v3690_v54, %v3689_v58  ;;  %v9420_v61 = vpop.eup %5433  ;;  %v3720_v33 = vmul.f32 %v9417_v36, %v9417_v36  ;;  %v3949_v40 = vmul.f32 %v3798_v35, %v8794_v1  ;;  %v5717_v1 = vld [vmem:[%s10956_s0] sm:$0xff]  ;;  %vm3815_vm7 = vweird.f32 %v9405_v24 }
 0x440   :  { %v9429_v14 = vadd.f32 %v3681_v43, %v3680_v5  ;;  %v3761_v38 = vsel %vm1036_vm3, %v3721_v22, 0.0  ;;  %v3810_v17 = vmul.f32 %v9420_v61, %v9405_v24  ;;  %v3724_v45 = vmul.f32 %v9427_v8, %v9427_v8  ;;  %v5720_v22 = vld [vmem:[%s10956_s0 + $0x18] sm:$0xff]  ;;  %v5723_v24 = vld [vmem:[%s10956_s0 + $0x30] sm:$0xff] }
 0x441   :  { %v3692_v37 = vrot.slane %v3691_v29, 2  ;;  %v3758_v7 = vsel %vm1036_vm3, %v3720_v33, 0.0  ;;  %3762 = vadd.xlane.f32.xlu1 %v3761_v38  ;;  %v3803_v18 = vsub.f32 1.5, %v3802_v31  ;;  %v3965_v57 = vmul.f32 %v5717_v1, %v3949_v40 }
 0x442   :  { %3759 = vadd.xlane.f32.xlu0 %v3758_v7  ;;  %v3722_v11 = vmul.f32 %v9429_v14, %v9429_v14  ;;  %v3811_v6 = vmul.f32 %v9420_v61, %v3810_v17  ;;  %v3770_v50 = vsel %vm1036_vm3, %v3724_v45, 0.0  ;;  %v3967_v0 = vmul.f32 %v5718_v55, %v3949_v40 }
 0x443   :  { %v3693_v28 = vadd.f32 %v3692_v37, %v3691_v29  ;;  %v3804_v42 = vmul.f32 %v9407_v13, %v3803_v18  ;;  %v4029_v53 = vsel %vm1036_vm3, %v3965_v57, 0.0  ;;  %v3966_v62 = vmul.f32 %v5719_v48, %v3949_v40 }
 0x444   :  { %v3764_v9 = vsel %vm1036_vm3, %v3722_v11, 0.0  ;;  %v3812_v49 = vmul.f32 0.5, %v3811_v6  ;;  %v3968_v33 = vmul.f32 %v5720_v22, %v3949_v40  ;;  %v4035_v35 = vsel %vm1036_vm3, %v3967_v0, 0.0  ;;  %v5722_v40 = vld [vmem:[%s10956_s0 + $0x20] sm:$0xff] }
 0x445   :  { %v3694_v39 = vrot.slane %v3693_v28, 1  ;;  %3765 = vadd.xlane.f32.xlu2 %v3764_v9  ;;  %v3808_v5 = vsel %vm3807_vm0, %v9407_v13, %v3804_v42  ;;  %vm3816_vm6 = vweird.f32 %v9420_v61  ;;  %v4032_v7 = vsel %vm1036_vm3, %v3966_v62, 0.0 }
 0x446   :  { %v3813_v29 = vsub.f32 1.5, %v3812_v49  ;;  %v3950_v37 = vmul.f32 %v3808_v5, %v8839_v4  ;;  %v4038_v31 = vsel %vm1036_vm3, %v3968_v33, 0.0  ;;  %vm3817_vm8 = vmor %vm3815_vm7, %vm3816_vm6  ;;  %v5721_v4 = vld [vmem:[%s10956_s0 + $0x28] sm:$0xff] }
 0x447   :  { %v9443_v21 = vadd.f32 %v3694_v39, %v3693_v28  ;;  %v5726_v5 = vld [vmem:[%s10956_s0 + $0x48] sm:$0xff] }
 0x448   :  { %v3736_v23 = vpop.xlane.xlu1 %3735  ;;  %v3814_v13 = vmul.f32 %v9420_v61, %v3813_v29  ;;  %v3970_v11 = vmul.f32 %v5721_v4, %v3950_v37  ;;  %v3969_v9 = vmul.f32 %v5722_v40, %v3950_v37  ;;  %v3971_v18 = vmul.f32 %v5723_v24, %v3950_v37 }
 0x449   :  { %v9445_v58 = vadd.f32 1e-16, %v3736_v23  ;;  %v3723_v19 = vmul.f32 %v9443_v21, %v9443_v21  ;;  %3771 = vadd.xlane.f32.xlu1 %v3770_v50 }
 0x44a   :  { %v3818_v28 = vsel %vm3817_vm8, %v9420_v61, %v3814_v13  ;;  %v4044_v50 = vsel %vm1036_vm3, %v3970_v11, 0.0  ;;  %v4047_v57 = vsel %vm1036_vm3, %v3971_v18, 0.0 }
 0x44b   :  { %5435 = vrsqrt.f32 %v9445_v58  ;;  %v3767_v54 = vsel %vm1036_vm3, %v3723_v19, 0.0  ;;  %v3951_v6 = vmul.f32 %v3818_v28, %v8880_v60  ;;  %v4041_v19 = vsel %vm1036_vm3, %v3969_v9, 0.0  ;;  %v5724_v60 = vld [vmem:[%s10956_s0 + $0x40] sm:$0xff] }
 0x44c   :  { %3768 = vadd.xlane.f32.xlu0 %v3767_v54  ;;  %v5725_v54 = vld [vmem:[%s10956_s0 + $0x38] sm:$0xff]  ;;  %vm3825_vm10 = vweird.f32 %v9445_v58  ;;  %v5729_v28 = vld [vmem:[%s10956_s0 + $0x60] sm:$0xff] }
 0x44d   :  { %4030 = vadd.xlane.f32.xlu2 %v4029_v53  ;;  %v3973_v49 = vmul.f32 %v5724_v60, %v3951_v6  ;;  %v3972_v53 = vmul.f32 %v5725_v54, %v3950_v37  ;;  %v3974_v29 = vmul.f32 %v5726_v5, %v3951_v6 }
 0x44f   :  { %v4053_v62 = vsel %vm1036_vm3, %v3973_v49, 0.0  ;;  %v4050_v22 = vsel %vm1036_vm3, %v3972_v53, 0.0  ;;  %v5732_v53 = vld [vmem:[%s10956_s0 + $0x78] sm:$0xff] }
 0x451   :  { %v5436_v43 = vpop.eup %5435  ;;  %4036 = vadd.xlane.f32.xlu1 %v4035_v35 }
 0x452   :  { %v3820_v30 = vmul.f32 %v5436_v43, %v9445_v58  ;;  %vm3826_vm9 = vweird.f32 %v5436_v43 }
 0x453   :  { %vm3827_vm11 = vmor %vm3825_vm10, %vm3826_vm9 }
 0x454   :  { %v3821_v38 = vmul.f32 %v5436_v43, %v3820_v30  ;;  %4033 = vadd.xlane.f32.xlu0 %v4032_v7 }
 0x455   :  { %4039 = vadd.xlane.f32.xlu2 %v4038_v31 }
 0x456   :  { %v3822_v17 = vmul.f32 0.5, %v3821_v38  ;;  %v4056_v38 = vsel %vm1036_vm3, %v3974_v29, 0.0 }
 0x457   :  { %v3739_v45 = vpop.xlane.xlu2 %3738 }
 0x458   :  { %v3777_v39 = vadd.f32 1e-16, %v3739_v45  ;;  %v3823_v23 = vsub.f32 1.5, %v3822_v17 }
 0x459   :  { %4045 = vadd.xlane.f32.xlu1 %v4044_v50  ;;  %v5730_v50 = vld [vmem:[%s10956_s0 + $0x70] sm:$0xff] }
 0x45a   :  { %5437 = vrsqrt.f32 %v3777_v39  ;;  %v3742_v61 = vpop.xlane.xlu0 %3741  ;;  %v3824_v42 = vmul.f32 %v5436_v43, %v3823_v23  ;;  %vm3835_vm13 = vweird.f32 %v3777_v39 }
 0x45b   :  { %v9490_v1 = vadd.f32 1e-16, %v3742_v61 }
 0x45c   :  { %4042 = vadd.xlane.f32.xlu0 %v4041_v19  ;;  %v3828_v48 = vsel %vm3827_vm11, %v5436_v43, %v3824_v42  ;;  %v5727_v43 = vld [vmem:[%s10956_s0 + $0x58] sm:$0xff] }
 0x45d   :  { %5439 = vrsqrt.f32 %v9490_v1  ;;  %4048 = vadd.xlane.f32.xlu2 %v4047_v57  ;;  %v3952_v37 = vmul.f32 %v3828_v48, %v8951_v52  ;;  %v3976_v31 = vmul.f32 %v5727_v43, %v3951_v6  ;;  %v5728_v52 = vld [vmem:[%s10956_s0 + $0x50] sm:$0xff]  ;;  %vm3845_vm1 = vweird.f32 %v9490_v1  ;;  %v5734_v43 = vld [vmem:[%s10956_s0 + $0x80] sm:$0xff] }
 0x45e   :  { %v3975_v11 = vmul.f32 %v5728_v52, %v3951_v6 }
 0x45f   :  { %v3977_v45 = vmul.f32 %v5729_v28, %v3952_v37  ;;  %v4062_v40 = vsel %vm1036_vm3, %v3976_v31, 0.0  ;;  %v3979_v61 = vmul.f32 %v5730_v50, %v3952_v37  ;;  %v5737_v50 = vld [vmem:[%s10956_s0 + $0x98] sm:$0xff] }
 0x460   :  { %v5438_v55 = vpop.eup %5437  ;;  %v4059_v18 = vsel %vm1036_vm3, %v3975_v11, 0.0 }
 0x461   :  { %v3830_v0 = vmul.f32 %v5438_v55, %v3777_v39  ;;  %4054 = vadd.xlane.f32.xlu1 %v4053_v62  ;;  %vm3836_vm12 = vweird.f32 %v5438_v55  ;;  %v4065_v23 = vsel %vm1036_vm3, %v3977_v45, 0.0  ;;  %v5731_v39 = vld [vmem:[%s10956_s0 + $0x68] sm:$0xff]  ;;  %v4071_v29 = vsel %vm1036_vm3, %v3979_v61, 0.0 }
 0x462   :  { %vm3837_vm14 = vmor %vm3835_vm13, %vm3836_vm12  ;;  %v3978_v60 = vmul.f32 %v5731_v39, %v3952_v37 }
 0x463   :  { %v3831_v30 = vmul.f32 %v5438_v55, %v3830_v0  ;;  %v9506_v33 = vpop.eup %5439  ;;  %v3980_v0 = vmul.f32 %v5732_v53, %v3952_v37  ;;  %v5733_v37 = vld [vmem:[%s10956_s0 + $0x88] sm:$0xff] }
 0x464   :  { %4051 = vadd.xlane.f32.xlu0 %v4050_v22  ;;  %v3840_v35 = vmul.f32 %v9506_v33, %v9490_v1  ;;  %vm3846_vm15 = vweird.f32 %v9506_v33  ;;  %v5735_v1 = vld [vmem:[%s10956_s0 + $0x90] sm:$0xff] }
 0x465   :  { %v3832_v58 = vmul.f32 0.5, %v3831_v30  ;;  %4057 = vadd.xlane.f32.xlu2 %v4056_v38  ;;  %v4068_v30 = vsel %vm1036_vm3, %v3978_v60, 0.0  ;;  %vm3847_vm2 = vmor %vm3845_vm1, %vm3846_vm15 }
 0x466   :  { %v3745_v13 = vpop.xlane.xlu1 %3744  ;;  %v3841_v4 = vmul.f32 %v9506_v33, %v3840_v35 }
 0x467   :  { %v9512_v7 = vadd.f32 1e-16, %v3745_v13  ;;  %v3833_v17 = vsub.f32 1.5, %v3832_v58 }
 0x468   :  { %v3842_v24 = vmul.f32 0.5, %v3841_v4 }
 0x469   :  { %5441 = vrsqrt.f32 %v9512_v7  ;;  %v3834_v9 = vmul.f32 %v5438_v55, %v3833_v17  ;;  %4063 = vadd.xlane.f32.xlu1 %v4062_v40  ;;  %vm3855_vm5 = vweird.f32 %v9512_v7 }
 0x46a   :  { %v3843_v57 = vsub.f32 1.5, %v3842_v24 }
 0x46b   :  { %v3838_v19 = vsel %vm3837_vm14, %v5438_v55, %v3834_v9 }
 0x46c   :  { %4060 = vadd.xlane.f32.xlu0 %v4059_v18  ;;  %v3953_v5 = vmul.f32 %v3838_v19, %v9033_v3  ;;  %v3844_v48 = vmul.f32 %v9506_v33, %v3843_v57  ;;  %v4074_v3 = vsel %vm1036_vm3, %v3980_v0, 0.0  ;;  %v5736_v18 = vld [vmem:[%s10956_s0 + $0xa0] sm:$0xff] }
 0x46d   :  { %4066 = vadd.xlane.f32.xlu2 %v4065_v23 }
 0x46e   :  { %v3982_v35 = vmul.f32 %v5733_v37, %v3953_v5  ;;  %v3848_v13 = vsel %vm3847_vm2, %v9506_v33, %v3844_v48  ;;  %v3981_v31 = vmul.f32 %v5734_v43, %v3953_v5  ;;  %v3983_v17 = vmul.f32 %v5735_v1, %v3953_v5  ;;  %v5740_v37 = vld [vmem:[%s10956_s0 + $0xb0] sm:$0xff] }
 0x46f   :  { %v9528_v6 = vpop.eup %5441  ;;  %v9566_v52 = vmul.f32 %v3848_v13, %v9054_v32  ;;  %v3984_v61 = vmul.f32 %v5737_v50, %v3953_v5  ;;  %v5741_v13 = vld [vmem:[%s10956_s0 + $0xc8] sm:$0xff] }
 0x470   :  { %v3850_v42 = vmul.f32 %v9528_v6, %v9512_v7  ;;  %v4080_v11 = vsel %vm1036_vm3, %v3982_v35, 0.0  ;;  %vm3856_vm4 = vweird.f32 %v9528_v6  ;;  %v4077_v45 = vsel %vm1036_vm3, %v3981_v31, 0.0 }
 0x471   :  { %4072 = vadd.xlane.f32.xlu1 %v4071_v29  ;;  %v4083_v32 = vsel %vm1036_vm3, %v3983_v17, 0.0  ;;  %vm3857_vm0 = vmor %vm3855_vm5, %vm3856_vm4  ;;  %v3985_v23 = vmul.f32 %v5736_v18, %v9566_v52  ;;  %v4086_v5 = vsel %vm1036_vm3, %v3984_v61, 0.0  ;;  %v3987_v35 = vmul.f32 %v5740_v37, %v9566_v52 }
 0x472   :  { %v3851_v49 = vmul.f32 %v9528_v6, %v3850_v42  ;;  %v3748_v54 = vpop.xlane.xlu2 %3747 }
 0x473   :  { %v9543_v55 = vadd.f32 1e-16, %v3748_v54  ;;  %v3751_v22 = vpop.xlane.xlu0 %3750  ;;  %v5738_v54 = vld [vmem:[%s10956_s0 + $0xa8] sm:$0xff]  ;;  %v4089_v29 = vsel %vm1036_vm3, %v3985_v23, 0.0 }
 0x474   :  { %v3852_v62 = vmul.f32 0.5, %v3851_v49  ;;  %4069 = vadd.xlane.f32.xlu0 %v4068_v30  ;;  %v9550_v58 = vadd.f32 1e-16, %v3751_v22  ;;  %v3986_v53 = vmul.f32 %v5738_v54, %v9566_v52 }
 0x475   :  { %5443 = vrsqrt.f32 %v9543_v55  ;;  %4075 = vadd.xlane.f32.xlu2 %v4074_v3  ;;  %vm3865_vm7 = vweird.f32 %v9543_v55 }
 0x476   :  { %5445 = vrsqrt.f32 %v9550_v58  ;;  %v3853_v38 = vsub.f32 1.5, %v3852_v62  ;;  %v4092_v62 = vsel %vm1036_vm3, %v3986_v53, 0.0  ;;  %vm3875_vm10 = vweird.f32 %v9550_v58 }
 0x478   :  { %v3854_v28 = vmul.f32 %v9528_v6, %v3853_v38 }
 0x479   :  { %4081 = vadd.xlane.f32.xlu1 %v4080_v11 }
 0x47a   :  { %v3858_v7 = vsel %vm3857_vm0, %v9528_v6, %v3854_v28 }
 0x47b   :  { %v5444_v4 = vpop.eup %5443  ;;  %v9589_v0 = vmul.f32 %v3858_v7, %v9106_v10  ;;  %v5739_v10 = vld [vmem:[%s10956_s0 + $0xc0] sm:$0xff] }
 0x47c   :  { %v3860_v33 = vmul.f32 %v5444_v4, %v9543_v55  ;;  %v5446_v40 = vpop.eup %5445  ;;  %4078 = vadd.xlane.f32.xlu0 %v4077_v45  ;;  %vm3866_vm6 = vweird.f32 %v5444_v4 }
 0x47d   :  { %v3870_v24 = vmul.f32 %v5446_v40, %v9550_v58  ;;  %4084 = vadd.xlane.f32.xlu2 %v4083_v32  ;;  %vm3867_vm8 = vmor %vm3865_vm7, %vm3866_vm6  ;;  %vm3876_vm9 = vweird.f32 %v5446_v40  ;;  %v3989_v22 = vmul.f32 %v5739_v10, %v9589_v0  ;;  %v3990_v38 = vmul.f32 %v5741_v13, %v9589_v0 }
 0x47e   :  { %v3861_v9 = vmul.f32 %v5444_v4, %v3860_v33  ;;  %vm3877_vm11 = vmor %vm3875_vm10, %vm3876_vm9  ;;  %v4095_v58 = vsel %vm1036_vm3, %v3987_v35, 0.0 }
 0x47f   :  { %v3871_v57 = vmul.f32 %v5446_v40, %v3870_v24  ;;  %v4101_v17 = vsel %vm1036_vm3, %v3989_v22, 0.0  ;;  %v4104_v45 = vsel %vm1036_vm3, %v3990_v38, 0.0  ;;  %v5743_v24 = vld [vmem:[%s10956_s0 + $0xe0] sm:$0xff] }
 0x480   :  { %v3862_v19 = vmul.f32 0.5, %v3861_v9 }
 0x481   :  { %v3754_v42 = vpop.xlane.xlu1 %3753  ;;  %v3872_v60 = vmul.f32 0.5, %v3871_v57  ;;  %4090 = vadd.xlane.f32.xlu1 %v4089_v29  ;;  %v5746_v29 = vld [vmem:[%s10956_s0 + $0x108] sm:$0xff] }
 0x482   :  { %v3863_v39 = vsub.f32 1.5, %v3862_v19  ;;  %v3782_v49 = vadd.f32 1e-16, %v3754_v42 }
 0x483   :  { %v3873_v48 = vsub.f32 1.5, %v3872_v60 }
 0x484   :  { %v3864_v6 = vmul.f32 %v5444_v4, %v3863_v39  ;;  %5447 = vrsqrt.f32 %v3782_v49  ;;  %4087 = vadd.xlane.f32.xlu0 %v4086_v5  ;;  %vm3885_vm13 = vweird.f32 %v3782_v49 }
 0x485   :  { %v3874_v30 = vmul.f32 %v5446_v40, %v3873_v48  ;;  %4093 = vadd.xlane.f32.xlu2 %v4092_v62  ;;  %v5747_v48 = vld [vmem:[%s10956_s0 + $0x128] sm:$0xff] }
 0x486   :  { %v3868_v3 = vsel %vm3867_vm8, %v5444_v4, %v3864_v6 }
 0x487   :  { %v9609_v43 = vmul.f32 %v3868_v3, %v9157_v26  ;;  %v3878_v31 = vsel %vm3877_vm11, %v5446_v40, %v3874_v30  ;;  %v5742_v26 = vld [vmem:[%s10956_s0 + $0xe8] sm:$0xff] }
 0x488   :  { %v3757_v4 = vpop.xlane.xlu2 %3756  ;;  %v9614_v33 = vmul.f32 %v3878_v31, %v9169_v59  ;;  %v5744_v59 = vld [vmem:[%s10956_s0 + $0x100] sm:$0xff] }
 0x489   :  { %4102 = vadd.xlane.f32.xlu1 %v4101_v17  ;;  %v3783_v11 = vadd.f32 1e-16, %v3757_v4  ;;  %v3994_v40 = vmul.f32 %v5742_v26, %v9609_v43  ;;  %v3993_v32 = vmul.f32 %v5743_v24, %v9609_v43 }
 0x48a   :  { %v5448_v55 = vpop.eup %5447  ;;  %v3997_v23 = vmul.f32 %v5744_v59, %v9614_v33  ;;  %v3998_v5 = vmul.f32 %v5746_v29, %v9614_v33 }
 0x48b   :  { %v3880_v1 = vmul.f32 %v5448_v55, %v3782_v49  ;;  %5449 = vrsqrt.f32 %v3783_v11  ;;  %vm3886_vm12 = vweird.f32 %v5448_v55  ;;  %v4116_v61 = vsel %vm1036_vm3, %v3994_v40, 0.0  ;;  %v5745_v49 = vld [vmem:[%s10956_s0 + $0x120] sm:$0xff] }
 0x48c   :  { %4096 = vadd.xlane.f32.xlu0 %v4095_v58  ;;  %vm3887_vm14 = vmor %vm3885_vm13, %vm3886_vm12  ;;  %v4113_v19 = vsel %vm1036_vm3, %v3993_v32, 0.0  ;;  %v4125_v60 = vsel %vm1036_vm3, %v3997_v23, 0.0  ;;  %v4128_v10 = vsel %vm1036_vm3, %v3998_v5, 0.0  ;;  %vm3895_vm1 = vweird.f32 %v3783_v11 }
 0x48d   :  { %v3881_v28 = vmul.f32 %v5448_v55, %v3880_v1  ;;  %4105 = vadd.xlane.f32.xlu2 %v4104_v45 }
 0x48f   :  { %v3882_v9 = vmul.f32 0.5, %v3881_v28 }
 0x491   :  { %v3883_v18 = vsub.f32 1.5, %v3882_v9  ;;  %v5450_v7 = vpop.eup %5449  ;;  %4117 = vadd.xlane.f32.xlu1 %v4116_v61 }
 0x492   :  { %v3890_v42 = vmul.f32 %v5450_v7, %v3783_v11  ;;  %vm3896_vm15 = vweird.f32 %v5450_v7 }
 0x493   :  { %v3884_v50 = vmul.f32 %v5448_v55, %v3883_v18  ;;  %vm3897_vm2 = vmor %vm3895_vm1, %vm3896_vm15 }
 0x494   :  { %4114 = vadd.xlane.f32.xlu0 %v4113_v19  ;;  %v3891_v54 = vmul.f32 %v5450_v7, %v3890_v42 }
 0x495   :  { %v3888_v57 = vsel %vm3887_vm14, %v5448_v55, %v3884_v50  ;;  %4126 = vadd.xlane.f32.xlu2 %v4125_v60 }
 0x496   :  { %v9632_v39 = vmul.f32 %v3888_v57, %v9209_v44  ;;  %v3892_v6 = vmul.f32 0.5, %v3891_v54 }
 0x498   :  { %v4001_v53 = vmul.f32 %v5745_v49, %v9632_v39  ;;  %v4002_v62 = vmul.f32 %v5747_v48, %v9632_v39  ;;  %v3893_v30 = vsub.f32 1.5, %v3892_v6 }
 0x49a   :  { %v4137_v44 = vsel %vm1036_vm3, %v4001_v53, 0.0  ;;  %v3894_v22 = vmul.f32 %v5450_v7, %v3893_v30  ;;  %v4140_v3 = vsel %vm1036_vm3, %v4002_v62, 0.0 }
 0x49b   :  { %4138 = vadd.xlane.f32.xlu1 %v4137_v44 }
 0x49c   :  { %4129 = vadd.xlane.f32.xlu0 %v4128_v10  ;;  %v3898_v37 = vsel %vm3897_vm2, %v5450_v7, %v3894_v22 }
 0x49d   :  { %4141 = vadd.xlane.f32.xlu2 %v4140_v3  ;;  %v9651_v35 = vmul.f32 %v3898_v37, %v9220_v63 }
 0x49f   :  { %v4005_v55 = vmul.f32 %v9174_v12, %v9651_v35  ;;  %v4006_v13 = vmul.f32 %v9180_v41, %v9651_v35 }
 0x4a1   :  { %v4149_v38 = vsel %vm1036_vm3, %v4005_v55, 0.0  ;;  %v4152_v31 = vsel %vm1036_vm3, %v4006_v13, 0.0 }
 0x4a3   :  { %4153 = vadd.xlane.f32.xlu1 %v4152_v31 }
 0x4a4   :  { %4150 = vadd.xlane.f32.xlu0 %v4149_v38 }
 0x4b4   :  { %v3763_v1 = vpop.xlane.xlu1 %3762 }
 0x4b5   :  { %v3760_v17 = vpop.xlane.xlu0 %3759  ;;  %v3785_v4 = vadd.f32 1e-16, %v3763_v1 }
 0x4b6   :  { %v3784_v11 = vadd.f32 1e-16, %v3760_v17 }
 0x4b7   :  { %5451 = vrsqrt.f32 %v3785_v4  ;;  %vm3915_vm4 = vweird.f32 %v3785_v4 }
 0x4b8   :  { %v3766_v58 = vpop.xlane.xlu2 %3765  ;;  %5453 = vrsqrt.f32 %v3784_v11  ;;  %vm3905_vm0 = vweird.f32 %v3784_v11 }
 0x4b9   :  { %v3786_v63 = vadd.f32 1e-16, %v3766_v58 }
 0x4bb   :  { %5455 = vrsqrt.f32 %v3786_v63  ;;  %vm3925_vm6 = vweird.f32 %v3786_v63 }
 0x4bc   :  { %v3772_v28 = vpop.xlane.xlu1 %3771 }
 0x4bd   :  { %v5452_v12 = vpop.eup %5451  ;;  %v9659_v45 = vadd.f32 1e-16, %v3772_v28 }
 0x4be   :  { %v5454_v9 = vpop.eup %5453  ;;  %v3910_v26 = vmul.f32 %v5452_v12, %v3785_v4  ;;  %vm3916_vm5 = vweird.f32 %v5452_v12 }
 0x4bf   :  { %v3769_v41 = vpop.xlane.xlu0 %3768  ;;  %v3900_v24 = vmul.f32 %v5454_v9, %v3784_v11  ;;  %5457 = vrsqrt.f32 %v9659_v45  ;;  %vm3906_vm7 = vweird.f32 %v5454_v9  ;;  %vm3917_vm9 = vmor %vm3915_vm4, %vm3916_vm5  ;;  %vm3945_vm14 = vweird.f32 %v9659_v45 }
 0x4c0   :  { %v9661_v40 = vadd.f32 1e-16, %v3769_v41  ;;  %v9664_v32 = vpop.xlane.xlu2 %4030  ;;  %v3911_v59 = vmul.f32 %v5452_v12, %v3910_v26  ;;  %vm3907_vm10 = vmor %vm3905_vm0, %vm3906_vm7 }
 0x4c1   :  { %v5456_v18 = vpop.eup %5455  ;;  %v3901_v23 = vmul.f32 %v5454_v9, %v3900_v24  ;;  %v4221_v53 = vmul.f32 %v9664_v32, %v9664_v32 }
 0x4c2   :  { %5459 = vrsqrt.f32 %v9661_v40  ;;  %v3920_v50 = vmul.f32 %v5456_v18, %v3786_v63  ;;  %v3912_v61 = vmul.f32 0.5, %v3911_v59  ;;  %vm3926_vm8 = vweird.f32 %v5456_v18 }
 0x4c3   :  { %v3902_v7 = vmul.f32 0.5, %v3901_v23  ;;  %vm3927_vm11 = vmor %vm3925_vm6, %vm3926_vm8  ;;  %vm3935_vm1 = vweird.f32 %v9661_v40 }
 0x4c4   :  { %v3921_v19 = vmul.f32 %v5456_v18, %v3920_v50  ;;  %v3913_v57 = vsub.f32 1.5, %v3912_v61  ;;  %v9667_v42 = vpop.xlane.xlu1 %4036 }
 0x4c5   :  { %v9669_v60 = vpop.eup %5457  ;;  %v3903_v54 = vsub.f32 1.5, %v3902_v7  ;;  %v4223_v22 = vmul.f32 %v9667_v42, %v9667_v42 }
 0x4c6   :  { %v3922_v49 = vmul.f32 0.5, %v3921_v19  ;;  %v3914_v6 = vmul.f32 %v5452_v12, %v3913_v57  ;;  %v3940_v44 = vmul.f32 %v9669_v60, %v9659_v45  ;;  %vm3946_vm12 = vweird.f32 %v9669_v60 }
 0x4c7   :  { %v9673_v29 = vpop.xlane.xlu0 %4033  ;;  %v3904_v62 = vmul.f32 %v5454_v9, %v3903_v54  ;;  %vm3947_vm15 = vmor %vm3945_vm14, %vm3946_vm12 }
 0x4c8   :  { %v9675_v5 = vpop.eup %5459  ;;  %v4222_v48 = vmul.f32 %v9673_v29, %v9673_v29  ;;  %v3923_v30 = vsub.f32 1.5, %v3922_v49  ;;  %v9687_v3 = vpop.xlane.xlu2 %4039  ;;  %v3918_v37 = vsel %vm3917_vm9, %v5452_v12, %v3914_v6  ;;  %v3941_v55 = vmul.f32 %v9669_v60, %v3940_v44 }
 0x4c9   :  { %v3930_v10 = vmul.f32 %v9675_v5, %v9661_v40  ;;  %v4224_v38 = vmul.f32 %v9687_v3, %v9687_v3  ;;  %v9695_v31 = vmul.f32 %v3918_v37, %v9415_v34  ;;  %v3908_v1 = vsel %vm3907_vm10, %v5454_v9, %v3904_v62 }
 0x4ca   :  { %v4285_v13 = vadd.f32 %v4222_v48, %v4221_v53  ;;  %v3924_v17 = vmul.f32 %v5456_v18, %v3923_v30  ;;  %v9699_v58 = vmul.f32 %v3908_v1, %v9417_v36  ;;  %v3942_v28 = vmul.f32 0.5, %v3941_v55 }
 0x4cb   :  { %v3931_v4 = vmul.f32 %v9675_v5, %v3930_v10  ;;  %v4013_v26 = vmul.f32 %v9249_v25, %v9695_v31  ;;  %vm3936_vm13 = vweird.f32 %v9675_v5  ;;  %v4014_v30 = vmul.f32 %v9255_v47, %v9695_v31 }
 0x4cc   :  { %v4286_v11 = vadd.f32 %v4285_v13, %v4223_v22  ;;  %v3928_v12 = vsel %vm3927_vm11, %v5456_v18, %v3924_v17  ;;  %v3943_v24 = vsub.f32 1.5, %v3942_v28  ;;  %v9708_v9 = vpop.xlane.xlu1 %4045  ;;  %v4010_v36 = vmul.f32 %v9282_v15, %v9699_v58  ;;  %vm3937_vm2 = vmor %vm3935_vm1, %vm3936_vm13 }
 0x4cd   :  { %v3932_v41 = vmul.f32 0.5, %v3931_v4  ;;  %v9706_v34 = vmul.f32 %v3928_v12, %v9429_v14  ;;  %v4173_v23 = vsel %vm1036_vm3, %v4013_v26, 0.0  ;;  %v4009_v25 = vmul.f32 %v9276_v20, %v9699_v58 }
 0x4ce   :  { %v4287_v59 = vadd.f32 %v4286_v11, %v4224_v38  ;;  %v3944_v50 = vmul.f32 %v9669_v60, %v3943_v24  ;;  %4174 = vadd.xlane.f32.xlu1 %v4173_v23  ;;  %v4164_v7 = vsel %vm1036_vm3, %v4010_v36, 0.0  ;;  %v4226_v54 = vmul.f32 %v9708_v9, %v9708_v9 }
 0x4cf   :  { %v3933_v63 = vsub.f32 1.5, %v3932_v41  ;;  %v9714_v18 = vpop.xlane.xlu0 %4042  ;;  %4165 = vadd.xlane.f32.xlu0 %v4164_v7  ;;  %v4161_v19 = vsel %vm1036_vm3, %v4009_v25, 0.0  ;;  %v4018_v20 = vmul.f32 %v9353_v16, %v9706_v34  ;;  %v4017_v45 = vmul.f32 %v9343_v27, %v9706_v34  ;;  %v5748_v7 = vld [vmem:[%s10956_s0 + $0xf0] sm:$0xff] }
 0x4d0   :  { %v4288_v14 = vrot.slane %v4287_v59, 4  ;;  %v4225_v61 = vmul.f32 %v9714_v18, %v9714_v18  ;;  %v9725_v57 = vpop.xlane.xlu2 %4048  ;;  %4162 = vadd.xlane.f32.xlu2 %v4161_v19  ;;  %v3948_v6 = vsel %vm3947_vm15, %v9669_v60, %v3944_v50  ;;  %v4176_v47 = vsel %vm1036_vm3, %v4014_v30, 0.0  ;;  %v5749_v19 = vld [vmem:[%s10956_s0 + $0xd0] sm:$0xff] }
 0x4d1   :  { %v3934_v15 = vmul.f32 %v9675_v5, %v3933_v63  ;;  %v4227_v53 = vmul.f32 %v9725_v57, %v9725_v57  ;;  %v4188_v62 = vsel %vm1036_vm3, %v4018_v20, 0.0  ;;  %v9747_v40 = vmul.f32 %v3948_v6, %v9427_v8 }
 0x4d2   :  { %v4289_v49 = vadd.f32 %v4288_v14, %v4287_v59  ;;  %v4294_v16 = vadd.f32 %v4226_v54, %v4225_v61  ;;  %v4185_v13 = vsel %vm1036_vm3, %v4017_v45, 0.0  ;;  %v3991_v20 = vmul.f32 %v5749_v19, %v9589_v0 }
 0x4d3   :  { %v3938_v48 = vsel %vm3937_vm2, %v9675_v5, %v3934_v15  ;;  %v3995_v15 = vmul.f32 %v5748_v7, %v9609_v43 }
 0x4d4   :  { %v4290_v44 = vrot.slane %v4289_v49, 2  ;;  %v9744_v22 = vpop.xlane.xlu1 %4054  ;;  %v4295_v37 = vadd.f32 %v4294_v16, %v4227_v53  ;;  %v9752_v55 = vmul.f32 %v3938_v48, %v9443_v21  ;;  %v4025_v21 = vmul.f32 %v9323_v51, %v9747_v40 }
 0x4d5   :  { %v4229_v28 = vmul.f32 %v9744_v22, %v9744_v22  ;;  %v4119_v30 = vsel %vm1036_vm3, %v3995_v15, 0.0 }
 0x4d6   :  { %v4291_v10 = vadd.f32 %v4290_v44, %v4289_v49  ;;  %4189 = vadd.xlane.f32.xlu1 %v4188_v62  ;;  %v4022_v12 = vmul.f32 %v9393_v46, %v9752_v55  ;;  %v4021_v41 = vmul.f32 %v9387_v56, %v9752_v55  ;;  %v4209_v51 = vsel %vm1036_vm3, %v4025_v21, 0.0 }
 0x4d7   :  { %v9749_v60 = vpop.xlane.xlu0 %4051  ;;  %4186 = vadd.xlane.f32.xlu0 %v4185_v13  ;;  %v4026_v44 = vmul.f32 %v9329_v2, %v9747_v40 }
 0x4d8   :  { %v4292_v27 = vrot.slane %v4291_v10, 1  ;;  %v4228_v5 = vmul.f32 %v9749_v60, %v9749_v60  ;;  %v9758_v38 = vpop.xlane.xlu2 %4057  ;;  %4177 = vadd.xlane.f32.xlu2 %v4176_v47  ;;  %v4200_v46 = vsel %vm1036_vm3, %v4022_v12, 0.0  ;;  %v4197_v56 = vsel %vm1036_vm3, %v4021_v41, 0.0 }
 0x4d9   :  { %v4230_v17 = vmul.f32 %v9758_v38, %v9758_v38 }
 0x4da   :  { %v4293_v1 = vadd.f32 %v4292_v27, %v4291_v10  ;;  %v4296_v8 = vadd.f32 %v4295_v37, %v4228_v5  ;;  %v4107_v37 = vsel %vm1036_vm3, %v3991_v20, 0.0 }
 0x4db   :  { %v4303_v59 = vadd.f32 %v4230_v17, %v4229_v28  ;;  %v5750_v17 = vld [vmem:[%s10956_s0 + $0x110] sm:$0xff] }
 0x4dc   :  { %v9764_v4 = vadd.f32 1e-16, %v4293_v1  ;;  %v4297_v11 = vrot.slane %v4296_v8, 4  ;;  %v9773_v24 = vpop.xlane.xlu1 %4063  ;;  %v4212_v1 = vsel %vm1036_vm3, %v4026_v44, 0.0  ;;  %v3999_v21 = vmul.f32 %v5750_v17, %v9614_v33 }
 0x4dd   :  { %v4232_v14 = vmul.f32 %v9773_v24, %v9773_v24 }
 0x4de   :  { %5461 = vrsqrt.f32 %v9764_v4  ;;  %v4298_v26 = vadd.f32 %v4297_v11, %v4296_v8  ;;  %4210 = vadd.xlane.f32.xlu1 %v4209_v51  ;;  %vm4451_vm5 = vweird.f32 %v9764_v4  ;;  %v4131_v20 = vsel %vm1036_vm3, %v3999_v21, 0.0 }
 0x4df   :  { %v9776_v36 = vpop.xlane.xlu0 %4060  ;;  %4201 = vadd.xlane.f32.xlu0 %v4200_v46  ;;  %v5752_v46 = vld [vmem:[%s10956_s0 + $0x130] sm:$0xff] }
 0x4e0   :  { %v4299_v63 = vrot.slane %v4298_v26, 2  ;;  %v4231_v23 = vmul.f32 %v9776_v36, %v9776_v36  ;;  %v9782_v25 = vpop.xlane.xlu2 %4066  ;;  %4198 = vadd.xlane.f32.xlu2 %v4197_v56  ;;  %v4003_v56 = vmul.f32 %v5752_v46, %v9632_v39 }
 0x4e1   :  { %v4233_v13 = vmul.f32 %v9782_v25, %v9782_v25 }
 0x4e2   :  { %v4300_v50 = vadd.f32 %v4299_v63, %v4298_v26  ;;  %v4304_v61 = vadd.f32 %v4303_v59, %v4231_v23  ;;  %v5751_v59 = vld [vmem:[%s10956_s0 + $0x150] sm:$0xff] }
 0x4e3   :  { %v4007_v51 = vmul.f32 %v5751_v59, %v9651_v35 }
 0x4e4   :  { %v5462_v54 = vpop.eup %5461  ;;  %v4301_v49 = vrot.slane %v4300_v50, 1  ;;  %v4305_v53 = vadd.f32 %v4304_v61, %v4232_v14  ;;  %v9797_v62 = vpop.xlane.xlu1 %4072 }
 0x4e5   :  { %v4446_v6 = vmul.f32 %v5462_v54, %v9764_v4  ;;  %v4235_v11 = vmul.f32 %v9797_v62, %v9797_v62  ;;  %vm4452_vm4 = vweird.f32 %v5462_v54  ;;  %v4155_v15 = vsel %vm1036_vm3, %v4007_v51, 0.0 }
 0x4e6   :  { %v4302_v16 = vadd.f32 %v4301_v49, %v4300_v50  ;;  %v4306_v45 = vrot.slane %v4305_v53, 4  ;;  %4120 = vadd.xlane.f32.xlu1 %v4119_v30  ;;  %vm4453_vm0 = vmor %vm4451_vm5, %vm4452_vm4  ;;  %v4143_v4 = vsel %vm1036_vm3, %v4003_v56, 0.0 }
 0x4e7   :  { %v4447_v48 = vmul.f32 %v5462_v54, %v4446_v6  ;;  %v9800_v10 = vpop.xlane.xlu0 %4069  ;;  %4108 = vadd.xlane.f32.xlu0 %v4107_v37  ;;  %v5753_v37 = vld [vmem:[%s10956_s0 + $0x1b0] sm:$0xff] }
 0x4e8   :  { %v9803_v27 = vadd.f32 1e-16, %v4302_v16  ;;  %v4307_v5 = vadd.f32 %v4306_v45, %v4305_v53  ;;  %v4234_v2 = vmul.f32 %v9800_v10, %v9800_v10  ;;  %v9810_v8 = vpop.xlane.xlu2 %4075  ;;  %4213 = vadd.xlane.f32.xlu2 %v4212_v1  ;;  %v5754_v1 = vld [vmem:[%s10956_s0 + $0x190] sm:$0xff] }
 0x4e9   :  { %v4448_v47 = vmul.f32 0.5, %v4447_v48  ;;  %v4236_v26 = vmul.f32 %v9810_v8, %v9810_v8  ;;  %v4015_v17 = vmul.f32 %v5754_v1, %v9695_v31 }
 0x4ea   :  { %5463 = vrsqrt.f32 %v9803_v27  ;;  %v4308_v28 = vrot.slane %v4307_v5, 2  ;;  %v4312_v12 = vadd.f32 %v4234_v2, %v4233_v13  ;;  %vm4461_vm7 = vweird.f32 %v9803_v27 }
 0x4eb   :  { %v4449_v41 = vsub.f32 1.5, %v4448_v47 }
 0x4ec   :  { %v4309_v63 = vadd.f32 %v4308_v28, %v4307_v5  ;;  %v4313_v23 = vadd.f32 %v4312_v12, %v4235_v11  ;;  %v4019_v5 = vmul.f32 %v5753_v37, %v9706_v34 }
 0x4ed   :  { %v4450_v50 = vmul.f32 %v5462_v54, %v4449_v41 }
 0x4ee   :  { %v4310_v14 = vrot.slane %v4309_v63, 1  ;;  %v4314_v61 = vadd.f32 %v4313_v23, %v4236_v26  ;;  %4156 = vadd.xlane.f32.xlu1 %v4155_v15 }
 0x4ef   :  { %v4454_v7 = vsel %vm4453_vm0, %v5462_v54, %v4450_v50  ;;  %v9831_v19 = vpop.xlane.xlu0 %4078  ;;  %v9839_v54 = vpop.xlane.xlu1 %4081  ;;  %4144 = vadd.xlane.f32.xlu0 %v4143_v4 }
 0x4f0   :  { %v5464_v49 = vpop.eup %5463  ;;  %v4605_v53 = vmul.f32 %v4454_v7, %v9664_v32  ;;  %v4606_v6 = vmul.f32 %v4454_v7, %v9673_v29  ;;  %v4607_v44 = vmul.f32 %v4454_v7, %v9667_v42  ;;  %v4311_v45 = vadd.f32 %v4310_v14, %v4309_v63  ;;  %v9841_v30 = vpop.xlane.xlu2 %4084  ;;  %4132 = vadd.xlane.f32.xlu2 %v4131_v20  ;;  %v5755_v63 = vld [vmem:[%s10956_s0 + $0x170] sm:$0xff] }
 0x4f1   :  { %v4456_v16 = vmul.f32 %v5464_v49, %v9803_v27  ;;  %v4315_v48 = vrot.slane %v4314_v61, 4  ;;  %v4608_v13 = vmul.f32 %v4454_v7, %v9687_v3  ;;  %v4237_v12 = vmul.f32 %v9831_v19, %v9831_v19  ;;  %v5757_v27 = vld [vmem:[%s10956_s0 + $0x1f0] sm:$0xff] }
 0x4f2   :  { %v4669_v2 = vmul.f32 %v4605_v53, %v9664_v32  ;;  %v4670_v47 = vmul.f32 %v4606_v6, %v9673_v29  ;;  %v9854_v28 = vadd.f32 1e-16, %v4311_v45  ;;  %v4671_v41 = vmul.f32 %v4607_v44, %v9667_v42  ;;  %v5756_v45 = vld [vmem:[%s10956_s0 + $0xb8] sm:$0xff] }
 0x4f3   :  { %v4457_v21 = vmul.f32 %v5464_v49, %v4456_v16  ;;  %v4316_v11 = vadd.f32 %v4315_v48, %v4314_v61  ;;  %v4238_v32 = vmul.f32 %v9839_v54, %v9839_v54  ;;  %v4239_v29 = vmul.f32 %v9841_v30, %v9841_v30 }
 0x4f4   :  { %v4733_v26 = vadd.f32 %v4670_v47, %v4669_v2  ;;  %5465 = vrsqrt.f32 %v9854_v28  ;;  %v4011_v23 = vmul.f32 %v5755_v63, %v9699_v58  ;;  %v4672_v46 = vmul.f32 %v4608_v13, %v9687_v3 }
 0x4f5   :  { %v4458_v59 = vmul.f32 0.5, %v4457_v21  ;;  %v4317_v51 = vrot.slane %v4316_v11, 2  ;;  %v4321_v56 = vadd.f32 %v4238_v32, %v4237_v12  ;;  %vm4462_vm6 = vweird.f32 %v5464_v49 }
 0x4f6   :  { %v4734_v42 = vadd.f32 %v4733_v26, %v4671_v41  ;;  %v4191_v61 = vsel %vm1036_vm3, %v4019_v5, 0.0  ;;  %v4179_v6 = vsel %vm1036_vm3, %v4015_v17, 0.0  ;;  %v4167_v4 = vsel %vm1036_vm3, %v4011_v23, 0.0  ;;  %vm4463_vm8 = vmor %vm4461_vm7, %vm4462_vm6 }
 0x4f7   :  { %v4459_v50 = vsub.f32 1.5, %v4458_v59  ;;  %v4318_v14 = vadd.f32 %v4317_v51, %v4316_v11  ;;  %v9870_v7 = vpop.xlane.xlu0 %4087  ;;  %v4322_v20 = vadd.f32 %v4321_v56, %v4239_v29  ;;  %4192 = vadd.xlane.f32.xlu1 %v4191_v61  ;;  %4180 = vadd.xlane.f32.xlu0 %v4179_v6  ;;  %v3988_v48 = vmul.f32 %v5756_v45, %v9566_v52  ;;  %v5759_v6 = vld [vmem:[%s10956_s0 + $0x118] sm:$0xff] }
 0x4f8   :  { %v4735_v15 = vadd.f32 %v4734_v42, %v4672_v46  ;;  %v4240_v53 = vmul.f32 %v9870_v7, %v9870_v7  ;;  %4168 = vadd.xlane.f32.xlu2 %v4167_v4  ;;  %v4027_v47 = vmul.f32 %v5757_v27, %v9747_v40  ;;  %v5761_v45 = vld [vmem:[%s10956_s0 + $0xf8] sm:$0xff]  ;;  %vm4471_vm10 = vweird.f32 %v9854_v28 }
 0x4f9   :  { %v4460_v44 = vmul.f32 %v5464_v49, %v4459_v50  ;;  %v4319_v3 = vrot.slane %v4318_v14, 1  ;;  %v4098_v63 = vsel %vm1036_vm3, %v3988_v48, 0.0  ;;  %v3996_v48 = vmul.f32 %v5761_v45, %v9609_v43  ;;  %v5762_v27 = vld [vmem:[%s10956_s0 + $0x138] sm:$0xff] }
 0x4fa   :  { %v4736_v16 = vrot.slane %v4735_v15, 4  ;;  %v5466_v37 = vpop.eup %5465  ;;  %v4323_v2 = vadd.f32 %v4322_v20, %v4240_v53  ;;  %v4215_v23 = vsel %vm1036_vm3, %v4027_v47, 0.0  ;;  %v4004_v47 = vmul.f32 %v5762_v27, %v9632_v39 }
 0x4fb   :  { %v4464_v5 = vsel %vm4463_vm8, %v5464_v49, %v4460_v44  ;;  %v4320_v13 = vadd.f32 %v4319_v3, %v4318_v14  ;;  %v4466_v12 = vmul.f32 %v5466_v37, %v9854_v28  ;;  %v5758_v49 = vld [vmem:[%s10956_s0 + $0x1d0] sm:$0xff]  ;;  %vm4472_vm9 = vweird.f32 %v5466_v37  ;;  %v5760_v44 = vld [vmem:[%s10956_s0 + $0xd8] sm:$0xff] }
 0x4fc   :  { %v4737_v1 = vadd.f32 %v4736_v16, %v4735_v15  ;;  %v4609_v17 = vmul.f32 %v4464_v5, %v9714_v18  ;;  %v4610_v21 = vmul.f32 %v4464_v5, %v9708_v9  ;;  %v4611_v11 = vmul.f32 %v4464_v5, %v9725_v57  ;;  %vm4473_vm11 = vmor %vm4471_vm10, %vm4472_vm9 }
 0x4fd   :  { %v9890_v52 = vadd.f32 1e-16, %v4320_v13  ;;  %v4023_v41 = vmul.f32 %v5758_v49, %v9752_v55  ;;  %v4612_v32 = vmul.f32 %v4464_v5, %v9749_v60  ;;  %v4467_v51 = vmul.f32 %v5466_v37, %v4466_v12 }
 0x4fe   :  { %v4738_v26 = vrot.slane %v4737_v1, 2  ;;  %v4673_v29 = vmul.f32 %v4609_v17, %v9714_v18  ;;  %v4674_v59 = vmul.f32 %v4610_v21, %v9708_v9  ;;  %v4675_v42 = vmul.f32 %v4611_v11, %v9725_v57  ;;  %v5763_v11 = vld [vmem:[%s10956_s0 + $0x158] sm:$0xff] }
 0x4ff   :  { %5467 = vrsqrt.f32 %v9890_v52  ;;  %v4324_v50 = vrot.slane %v4323_v2, 4  ;;  %4099 = vadd.xlane.f32.xlu1 %v4098_v63  ;;  %v4468_v14 = vmul.f32 0.5, %v4467_v51  ;;  %4216 = vadd.xlane.f32.xlu0 %v4215_v23  ;;  %v4203_v61 = vsel %vm1036_vm3, %v4023_v41, 0.0 }
 0x500   :  { %v4739_v46 = vadd.f32 %v4738_v26, %v4737_v1  ;;  %v4742_v56 = vadd.f32 %v4674_v59, %v4673_v29  ;;  %v4676_v9 = vmul.f32 %v4612_v32, %v9749_v60  ;;  %4204 = vadd.xlane.f32.xlu2 %v4203_v61  ;;  %v4000_v57 = vmul.f32 %v5759_v6, %v9614_v33  ;;  %v5764_v32 = vld [vmem:[%s10956_s0 + $0x178] sm:$0xff] }
 0x501   :  { %v4325_v20 = vadd.f32 %v4324_v50, %v4323_v2  ;;  %v4469_v53 = vsub.f32 1.5, %v4468_v14  ;;  %v3992_v3 = vmul.f32 %v5760_v44, %v9589_v0  ;;  %v4122_v21 = vsel %vm1036_vm3, %v3996_v48, 0.0  ;;  %v5765_v50 = vld [vmem:[%s10956_s0 + $0x1d8] sm:$0xff] }
 0x502   :  { %v4740_v18 = vrot.slane %v4739_v46, 1  ;;  %v4743_v15 = vadd.f32 %v4742_v56, %v4675_v42  ;;  %v4134_v1 = vsel %vm1036_vm3, %v4000_v57, 0.0  ;;  %v4008_v12 = vmul.f32 %v5763_v11, %v9651_v35 }
 0x503   :  { %v4326_v60 = vrot.slane %v4325_v20, 2  ;;  %v4470_v13 = vmul.f32 %v5466_v37, %v4469_v53  ;;  %v4110_v17 = vsel %vm1036_vm3, %v3992_v3, 0.0  ;;  %v4012_v29 = vmul.f32 %v5764_v32, %v9699_v58 }
 0x504   :  { %v4741_v4 = vadd.f32 %v4740_v18, %v4739_v46  ;;  %v4744_v16 = vadd.f32 %v4743_v15, %v4676_v9  ;;  %v4146_v59 = vsel %vm1036_vm3, %v4004_v47, 0.0  ;;  %v4158_v56 = vsel %vm1036_vm3, %v4008_v12, 0.0 }
 0x505   :  { %v9917_v5 = vpop.eup %5467  ;;  %v4474_v43 = vsel %vm4473_vm11, %v5466_v37, %v4470_v13  ;;  %v4327_v28 = vadd.f32 %v4326_v60, %v4325_v20  ;;  %v4024_v14 = vmul.f32 %v5765_v50, %v9752_v55  ;;  %v4170_v53 = vsel %vm1036_vm3, %v4012_v29, 0.0 }
 0x506   :  { %v9920_v33 = vadd.f32 1e-12, %v4741_v4  ;;  %v4745_v2 = vrot.slane %v4744_v16, 4  ;;  %v4476_v0 = vmul.f32 %v9917_v5, %v9890_v52  ;;  %v4613_v39 = vmul.f32 %v4474_v43, %v9744_v22 }
 0x507   :  { %4135 = vadd.xlane.f32.xlu1 %v4134_v1  ;;  %v4614_v37 = vmul.f32 %v4474_v43, %v9758_v38  ;;  %v4615_v41 = vmul.f32 %v4474_v43, %v9776_v36  ;;  %4123 = vadd.xlane.f32.xlu0 %v4122_v21  ;;  %v4616_v51 = vmul.f32 %v4474_v43, %v9773_v24  ;;  %v4328_v42 = vrot.slane %v4327_v28, 1 }
 0x508   :  { %5469 = vrcp.f32 %v9920_v33  ;;  %v4746_v49 = vadd.f32 %v4745_v2, %v4744_v16  ;;  %v4477_v26 = vmul.f32 %v9917_v5, %v4476_v0  ;;  %4111 = vadd.xlane.f32.xlu2 %v4110_v17  ;;  %v4677_v63 = vmul.f32 %v4613_v39, %v9744_v22  ;;  %v5766_v22 = vld [vmem:[%s10956_s0 + $0x1b8] sm:$0xff] }
 0x509   :  { %v4678_v23 = vmul.f32 %v4614_v37, %v9758_v38  ;;  %v4679_v61 = vmul.f32 %v4615_v41, %v9776_v36  ;;  %v4020_v38 = vmul.f32 %v5766_v22, %v9706_v34  ;;  %vm4482_vm12 = vweird.f32 %v9917_v5  ;;  %v5767_v34 = vld [vmem:[%s10956_s0 + $0x198] sm:$0xff] }
 0x50a   :  { %v4747_v35 = vrot.slane %v4746_v49, 2  ;;  %v4478_v46 = vmul.f32 0.5, %v4477_v26  ;;  %v4329_v20 = vadd.f32 %v4328_v42, %v4327_v28  ;;  %v4680_v57 = vmul.f32 %v4616_v51, %v9773_v24  ;;  %v5770_v51 = vld [vmem:[%s10956_s0 + $0x10] sm:$0xff]  ;;  %v5772_v22 = vld [vmem:[%s10956_s0 + $0x1f8] sm:$0xff] }
 0x50b   :  { %v4751_v18 = vadd.f32 %v4678_v23, %v4677_v63  ;;  %vm4481_vm13 = vweird.f32 %v9890_v52  ;;  %v4016_v4 = vmul.f32 %v5767_v34, %v9695_v31  ;;  %v4902_v60 = vand.u32 2147483647, %v9920_v33 }
 0x50c   :  { %v4748_v58 = vadd.f32 %v4747_v35, %v4746_v49  ;;  %v4479_v15 = vsub.f32 1.5, %v4478_v46  ;;  %v9965_v3 = vadd.f32 1e-16, %v4329_v20  ;;  %vm4483_vm14 = vmor %vm4481_vm13, %vm4482_vm12  ;;  %v4904_v24 = vand.u32 2147483648, %v9920_v33  ;;  %v9989_v49 = vpop.xlane.xlu1 %4090 }
 0x50d   :  { %v4752_v36 = vadd.f32 %v4751_v18, %v4679_v61  ;;  %v4206_v43 = vsel %vm1036_vm3, %v4024_v14, 0.0  ;;  %vm4898_vm1 = vweird.f32 %v9920_v33  ;;  %vm4903_vm4 = vcmp.eq.f32.partialorder %v4902_v60, 8.507059e+37 }
 0x50e   :  { %v5470_v9 = vpop.eup %5469  ;;  %v4749_v55 = vrot.slane %v4748_v58, 1  ;;  %v4480_v44 = vmul.f32 %v9917_v5, %v4479_v15  ;;  %5471 = vrsqrt.f32 %v9965_v3  ;;  %v4905_v17 = vor.u32 1.1754944e-38, %v4904_v24 }
 0x50f   :  { %v4894_v6 = vmul.f32 %v5470_v9, %v9920_v33  ;;  %4171 = vadd.xlane.f32.xlu1 %v4170_v53  ;;  %v4753_v48 = vadd.f32 %v4752_v36, %v4680_v57  ;;  %4159 = vadd.xlane.f32.xlu0 %v4158_v56  ;;  %vm4899_vm15 = vweird.f32 %v5470_v9  ;;  %v4194_v39 = vsel %vm1036_vm3, %v4020_v38, 0.0  ;;  %v10033_v53 = vpop.xlane.xlu0 %4096  ;;  %v10037_v36 = vpop.xlane.xlu2 %4093 }
 0x510   :  { %v4750_v45 = vadd.f32 %v4749_v55, %v4748_v58  ;;  %v4484_v52 = vsel %vm4483_vm14, %v9917_v5, %v4480_v44  ;;  %4147 = vadd.xlane.f32.xlu2 %v4146_v59  ;;  %vm4900_vm2 = vmor %vm4898_vm1, %vm4899_vm15  ;;  %v4182_v33 = vsel %vm1036_vm3, %v4016_v4, 0.0  ;;  %v5769_v59 = vld [vmem:[%s10956_s0 + $0x8] sm:$0xff]  ;;  %v4028_v38 = vmul.f32 %v5772_v22, %v9747_v40  ;;  %v5777_v22 = vld [vmem:[%s10956_s0 + $0x40] sm:$0xff] }
 0x511   :  { %v4895_v16 = vsub.f32 1.0, %v4894_v6  ;;  %v4754_v31 = vrot.slane %v4753_v48, 4  ;;  %v4617_v0 = vmul.f32 %v4484_v52, %v9782_v25  ;;  %v4618_v27 = vmul.f32 %v4484_v52, %v9800_v10 }
 0x512   :  { %v9977_v2 = vadd.f32 1e-12, %v4750_v45  ;;  %v4619_v47 = vmul.f32 %v4484_v52, %v9797_v62  ;;  %v4620_v5 = vmul.f32 %v4484_v52, %v9810_v8  ;;  %v4218_v60 = vsel %vm1036_vm3, %v4028_v38, 0.0 }
 0x513   :  { %v4896_v13 = vmul.f32 %v5470_v9, %v4895_v16  ;;  %v4755_v28 = vadd.f32 %v4754_v31, %v4753_v48  ;;  %v4681_v21 = vmul.f32 %v4617_v0, %v9782_v25  ;;  %v4682_v11 = vmul.f32 %v4618_v27, %v9800_v10  ;;  %v5768_v25 = vld [vmem:[%s10956_s0] sm:$0xff] }
 0x514   :  { %5473 = vrcp.f32 %v9977_v2  ;;  %v9993_v37 = vpop.eup %5471  ;;  %v4683_v32 = vmul.f32 %v4619_v47, %v9797_v62  ;;  %v4684_v23 = vmul.f32 %v4620_v5, %v9810_v8  ;;  %v5771_v62 = vld [vmem:[%s10956_s0 + $0x18] sm:$0xff]  ;;  %v4917_v6 = vand.u32 2147483647, %v9977_v2  ;;  %v10042_v16 = vpop.xlane.xlu1 %4102 }
 0x515   :  { %v4897_v1 = vadd.f32 %v5470_v9, %v4896_v13  ;;  %v4756_v26 = vrot.slane %v4755_v28, 2  ;;  %v4760_v29 = vadd.f32 %v4682_v11, %v4681_v21  ;;  %v4486_v50 = vmul.f32 %v9993_v37, %v9965_v3 }
 0x516   :  { %v4919_v55 = vand.u32 2147483648, %v9977_v2  ;;  %vm4492_vm0 = vweird.f32 %v9993_v37  ;;  %vm4913_vm6 = vweird.f32 %v9977_v2  ;;  %vm4491_vm8 = vweird.f32 %v9965_v3  ;;  %v5775_v3 = vld [vmem:[%s10956_s0 + $0x30] sm:$0xff] }
 0x517   :  { %v4901_v12 = vsel %vm4900_vm2, %v5470_v9, %v4897_v1  ;;  %4207 = vadd.xlane.f32.xlu1 %v4206_v43  ;;  %4195 = vadd.xlane.f32.xlu0 %v4194_v39  ;;  %v4757_v42 = vadd.f32 %v4756_v26, %v4755_v28  ;;  %v4761_v56 = vadd.f32 %v4760_v29, %v4683_v32  ;;  %vm4918_vm9 = vcmp.eq.f32.partialorder %v4917_v6, 8.507059e+37  ;;  %vm4493_vm10 = vmor %vm4491_vm8, %vm4492_vm0  ;;  %v5774_v43 = vld [vmem:[%s10956_s0 + $0x28] sm:$0xff]  ;;  %v10077_v29 = vpop.xlane.xlu2 %4105 }
 0x518   :  { %v4906_v41 = vsel %vm4903_vm4, %v4905_v17, %v4901_v12  ;;  %4183 = vadd.xlane.f32.xlu2 %v4182_v33  ;;  %v4487_v18 = vmul.f32 %v9993_v37, %v4486_v50  ;;  %v4920_v48 = vor.u32 1.1754944e-38, %v4919_v55  ;;  %v5776_v17 = vld [vmem:[%s10956_s0 + $0x38] sm:$0xff] }
 0x519   :  { %v5133_v10 = vmul.f32 %v5768_v25, %v4906_v41  ;;  %v5134_v35 = vmul.f32 %v5769_v59, %v4906_v41  ;;  %v5135_v63 = vmul.f32 %v5770_v51, %v4906_v41  ;;  %v5136_v46 = vmul.f32 %v5771_v62, %v4906_v41 }
 0x51a   :  { %v5474_v14 = vpop.eup %5473  ;;  %v4758_v58 = vrot.slane %v4757_v42, 1  ;;  %v4762_v61 = vadd.f32 %v4761_v56, %v4684_v23  ;;  %v4488_v57 = vmul.f32 0.5, %v4487_v18 }
 0x51b   :  { %5197 = vst.msk [vmem:[%s10957_s2] sm:$0xff] %vm1036_vm3, %v5133_v10  ;;  %v4909_v8 = vmul.f32 %v5474_v14, %v9977_v2  ;;  %vm4914_vm5 = vweird.f32 %v5474_v14  ;;  %v5773_v2 = vld [vmem:[%s10956_s0 + $0x20] sm:$0xff] }
 0x51c   :  { %5198 = vst.msk [vmem:[%s10957_s2 + $0x8] sm:$0xff] %vm1036_vm3, %v5134_v35  ;;  %v4759_v15 = vadd.f32 %v4758_v58, %v4757_v42  ;;  %v4763_v20 = vrot.slane %v4762_v61, 4  ;;  %v4489_v4 = vsub.f32 1.5, %v4488_v57  ;;  %vm4915_vm7 = vmor %vm4913_vm6, %vm4914_vm5  ;;  %v10089_v51 = vpop.xlane.xlu1 %4117  ;;  %v5780_v57 = vld [vmem:[%s10956_s0 + $0x58] sm:$0xff] }
 0x51d   :  { %5199 = vst.msk [vmem:[%s10957_s2 + $0x10] sm:$0xff] %vm1036_vm3, %v5135_v63  ;;  %v4910_v9 = vsub.f32 1.0, %v4909_v8 }
 0x51e   :  { %5200 = vst.msk [vmem:[%s10957_s2 + $0x18] sm:$0xff] %vm1036_vm3, %v5136_v46  ;;  %v10039_v40 = vadd.f32 1e-12, %v4759_v15  ;;  %v4764_v34 = vadd.f32 %v4763_v20, %v4762_v61  ;;  %v4490_v52 = vmul.f32 %v9993_v37, %v4489_v4  ;;  %v5779_v15 = vld [vmem:[%s10956_s0 + $0x50] sm:$0xff] }
 0x51f   :  { %v4911_v44 = vmul.f32 %v5474_v14, %v4910_v9  ;;  %v10107_v6 = vpop.xlane.xlu2 %4126 }
 0x520   :  { %5475 = vrcp.f32 %v10039_v40  ;;  %4219 = vadd.xlane.f32.xlu2 %v4218_v60  ;;  %v4765_v24 = vrot.slane %v4764_v34, 2  ;;  %v4494_v27 = vsel %vm4493_vm10, %v9993_v37, %v4490_v52  ;;  %v10069_v37 = vpop.xlane.xlu0 %4114  ;;  %v4932_v46 = vand.u32 2147483647, %v10039_v40 }
 0x521   :  { %v4912_v45 = vadd.f32 %v5474_v14, %v4911_v44  ;;  %v4621_v11 = vmul.f32 %v4494_v27, %v9831_v19  ;;  %v4622_v12 = vmul.f32 %v4494_v27, %v9839_v54  ;;  %v4623_v33 = vmul.f32 %v4494_v27, %v9841_v30 }
 0x522   :  { %v4766_v0 = vadd.f32 %v4765_v24, %v4764_v34  ;;  %v4624_v25 = vmul.f32 %v4494_v27, %v9870_v7  ;;  %vm4928_vm12 = vweird.f32 %v10039_v40  ;;  %vm4933_vm14 = vcmp.eq.f32.partialorder %v4932_v46, 8.507059e+37 }
 0x523   :  { %v4916_v13 = vsel %vm4915_vm7, %v5474_v14, %v4912_v45  ;;  %v4685_v32 = vmul.f32 %v4621_v11, %v9831_v19  ;;  %v4686_v10 = vmul.f32 %v4622_v12, %v9839_v54  ;;  %v4934_v19 = vand.u32 2147483648, %v10039_v40  ;;  %v5783_v11 = vld [vmem:[%s10956_s0 + $0x70] sm:$0xff] }
 0x524   :  { %v4921_v31 = vsel %vm4918_vm9, %v4920_v48, %v4916_v13  ;;  %v4767_v21 = vrot.slane %v4766_v0, 1  ;;  %v4687_v63 = vmul.f32 %v4623_v33, %v9841_v30  ;;  %v4688_v54 = vmul.f32 %v4624_v25, %v9870_v7  ;;  %v5778_v7 = vld [vmem:[%s10956_s0 + $0x48] sm:$0xff]  ;;  %v10109_v55 = vpop.xlane.xlu1 %4138 }
 0x525   :  { %v5137_v47 = vmul.f32 %v5773_v2, %v4921_v31  ;;  %v5138_v1 = vmul.f32 %v5774_v43, %v4921_v31  ;;  %v5139_v5 = vmul.f32 %v5775_v3, %v4921_v31  ;;  %v5140_v28 = vmul.f32 %v5776_v17, %v4921_v31  ;;  %11014 = vst [vmem:[#allocation2_spill] sm:$0xff] %v10109_v55 }
 0x526   :  { %v5476_v39 = vpop.eup %5475  ;;  %v4768_v26 = vadd.f32 %v4767_v21, %v4766_v0  ;;  %v4769_v23 = vadd.f32 %v4686_v10, %v4685_v32  ;;  %v4935_v50 = vor.u32 1.1754944e-38, %v4934_v19 }
 0x527   :  { %5201 = vst.msk [vmem:[%s10957_s2 + $0x20] sm:$0xff] %vm1036_vm3, %v5137_v47  ;;  %v4924_v41 = vmul.f32 %v5476_v39, %v10039_v40  ;;  %vm4929_vm11 = vweird.f32 %v5476_v39  ;;  %v10134_v3 = vpop.xlane.xlu2 %4141 }
 0x528   :  { %5202 = vst.msk [vmem:[%s10957_s2 + $0x28] sm:$0xff] %vm1036_vm3, %v5138_v1  ;;  %v4880_v35 = vadd.f32 1e-12, %v4768_v26  ;;  %v4770_v42 = vadd.f32 %v4769_v23, %v4687_v63  ;;  %vm4930_vm13 = vmor %vm4928_vm12, %vm4929_vm11  ;;  %v10096_v30 = vpop.xlane.xlu0 %4129 }
 0x529   :  { %5203 = vst.msk [vmem:[%s10957_s2 + $0x30] sm:$0xff] %vm1036_vm3, %v5139_v5  ;;  %v4925_v59 = vsub.f32 1.0, %v4924_v41  ;;  %v5781_v5 = vld [vmem:[%s10956_s0 + $0x60] sm:$0xff] }
 0x52a   :  { %5204 = vst.msk [vmem:[%s10957_s2 + $0x38] sm:$0xff] %vm1036_vm3, %v5140_v28  ;;  %5477 = vrcp.f32 %v4880_v35  ;;  %v4771_v14 = vadd.f32 %v4770_v42, %v4688_v54  ;;  %v4949_v45 = vand.u32 2147483648, %v4880_v35  ;;  %v4947_v24 = vand.u32 2147483647, %v4880_v35  ;;  %v5782_v28 = vld [vmem:[%s10956_s0 + $0x68] sm:$0xff] }
 0x52b   :  { %v4926_v62 = vmul.f32 %v5476_v39, %v4925_v59  ;;  %vm4943_vm1 = vweird.f32 %v4880_v35  ;;  %11015 = vst [vmem:[#allocation5_spill] sm:$0xff] %v10134_v3 }
 0x52c   :  { %v4772_v61 = vrot.slane %v4771_v14, 4  ;;  %v4950_v0 = vor.u32 1.1754944e-38, %v4949_v45  ;;  %v10130_v27 = vpop.xlane.xlu1 %4153  ;;  %vm4948_vm4 = vcmp.eq.f32.partialorder %v4947_v24, 8.507059e+37  ;;  %v4242_v24 = vmul.f32 %v10037_v36, %v10037_v36 }
 0x52d   :  { %v4927_v56 = vadd.f32 %v5476_v39, %v4926_v62 }
 0x52e   :  { %v4773_v34 = vadd.f32 %v4772_v61, %v4771_v14  ;;  %v5786_v61 = vld [vmem:[%s10956_s0 + $0x88] sm:$0xff] }
 0x52f   :  { %v4931_v8 = vsel %vm4930_vm13, %v5476_v39, %v4927_v56  ;;  %v5784_v39 = vld [vmem:[%s10956_s0 + $0x78] sm:$0xff] }
 0x530   :  { %v4936_v58 = vsel %vm4933_vm14, %v4935_v50, %v4931_v8  ;;  %v5478_v18 = vpop.eup %5477  ;;  %v4774_v60 = vrot.slane %v4773_v34, 2  ;;  %v10132_v43 = vpop.xlane.xlu0 %4150  ;;  %v5785_v8 = vld [vmem:[%s10956_s0 + $0x80] sm:$0xff] }
 0x531   :  { %v5141_v38 = vmul.f32 %v5777_v22, %v4936_v58  ;;  %v5142_v9 = vmul.f32 %v5778_v7, %v4936_v58  ;;  %v5143_v20 = vmul.f32 %v5779_v15, %v4936_v58  ;;  %v5144_v44 = vmul.f32 %v5780_v57, %v4936_v58  ;;  %v5787_v22 = vld [vmem:[%s10956_s0 + $0x90] sm:$0xff]  ;;  %v5788_v7 = vld [vmem:[%s10956_s0 + $0x98] sm:$0xff] }
 0x532   :  { %v4939_v40 = vmul.f32 %v5478_v18, %v4880_v35  ;;  %vm4944_vm15 = vweird.f32 %v5478_v18  ;;  %v4775_v52 = vadd.f32 %v4774_v60, %v4773_v34 }
 0x533   :  { %5205 = vst.msk [vmem:[%s10957_s2 + $0x40] sm:$0xff] %vm1036_vm3, %v5141_v38  ;;  %vm4945_vm2 = vmor %vm4943_vm1, %vm4944_vm15 }
 0x534   :  { %5206 = vst.msk [vmem:[%s10957_s2 + $0x48] sm:$0xff] %vm1036_vm3, %v5142_v9  ;;  %v4940_v4 = vsub.f32 1.0, %v4939_v40  ;;  %v4776_v31 = vrot.slane %v4775_v52, 1 }
 0x535   :  { %5207 = vst.msk [vmem:[%s10957_s2 + $0x50] sm:$0xff] %vm1036_vm3, %v5143_v20 }
 0x536   :  { %5208 = vst.msk [vmem:[%s10957_s2 + $0x58] sm:$0xff] %vm1036_vm3, %v5144_v44  ;;  %v4941_v48 = vmul.f32 %v5478_v18, %v4940_v4  ;;  %v4777_v47 = vadd.f32 %v4776_v31, %v4775_v52  ;;  %v4241_v31 = vmul.f32 %v9989_v49, %v9989_v49 }
 0x538   :  { %v4942_v13 = vadd.f32 %v5478_v18, %v4941_v48  ;;  %v4881_v41 = vadd.f32 1e-12, %v4777_v47 }
 0x53a   :  { %v4946_v2 = vsel %vm4945_vm2, %v5478_v18, %v4942_v13  ;;  %5479 = vrcp.f32 %v4881_v41  ;;  %v4964_v19 = vand.u32 2147483648, %v4881_v41  ;;  %v4962_v62 = vand.u32 2147483647, %v4881_v41 }
 0x53b   :  { %v4951_v1 = vsel %vm4948_vm4, %v4950_v0, %v4946_v2  ;;  %vm4958_vm0 = vweird.f32 %v4881_v41  ;;  %v4330_v0 = vadd.f32 %v4242_v24, %v4241_v31  ;;  %v4243_v2 = vmul.f32 %v10033_v53, %v10033_v53 }
 0x53c   :  { %v5145_v17 = vmul.f32 %v5781_v5, %v4951_v1  ;;  %v5146_v21 = vmul.f32 %v5782_v28, %v4951_v1  ;;  %v5147_v12 = vmul.f32 %v5783_v11, %v4951_v1  ;;  %v5148_v33 = vmul.f32 %v5784_v39, %v4951_v1 }
 0x53d   :  { %v4965_v56 = vor.u32 1.1754944e-38, %v4964_v19  ;;  %vm4963_vm7 = vcmp.eq.f32.partialorder %v4962_v62, 8.507059e+37  ;;  %v4331_v1 = vadd.f32 %v4330_v0, %v4243_v2  ;;  %v4246_v39 = vmul.f32 %v10077_v29, %v10077_v29 }
 0x53e   :  { %5209 = vst.msk [vmem:[%s10957_s2 + $0x60] sm:$0xff] %vm1036_vm3, %v5145_v17  ;;  %v4245_v19 = vmul.f32 %v10042_v16, %v10042_v16 }
 0x53f   :  { %5210 = vst.msk [vmem:[%s10957_s2 + $0x68] sm:$0xff] %vm1036_vm3, %v5146_v21  ;;  %v4254_v21 = vmul.f32 %v10096_v30, %v10096_v30 }
 0x540   :  { %5211 = vst.msk [vmem:[%s10957_s2 + $0x70] sm:$0xff] %vm1036_vm3, %v5147_v12  ;;  %v5480_v10 = vpop.eup %5479  ;;  %v4249_v12 = vmul.f32 %v10069_v37, %v10069_v37 }
 0x541   :  { %5212 = vst.msk [vmem:[%s10957_s2 + $0x78] sm:$0xff] %vm1036_vm3, %v5148_v33  ;;  %v10164_v26 = vpop.xlane.xlu1 %4174  ;;  %v4954_v59 = vmul.f32 %v5480_v10, %v4881_v41  ;;  %vm4959_vm5 = vweird.f32 %v5480_v10  ;;  %v4253_v33 = vmul.f32 %v10107_v6, %v10107_v6 }
 0x542   :  { %11016 = vst [vmem:[#allocation3_spill] sm:$0xff] %v10164_v26  ;;  %v10166_v32 = vpop.xlane.xlu0 %4165  ;;  %vm4960_vm6 = vmor %vm4958_vm0, %vm4959_vm5 }
 0x543   :  { %v10168_v25 = vpop.xlane.xlu2 %4162  ;;  %v4955_v35 = vsub.f32 1.0, %v4954_v59  ;;  %v4250_v59 = vmul.f32 %v10089_v51, %v10089_v51 }
 0x545   :  { %v4956_v23 = vmul.f32 %v5480_v10, %v4955_v35 }
 0x547   :  { %v4957_v42 = vadd.f32 %v5480_v10, %v4956_v23  ;;  %v4357_v23 = vadd.f32 %v4254_v21, %v4253_v33  ;;  %v4266_v21 = vmul.f32 %v10166_v32, %v10166_v32 }
 0x549   :  { %v10170_v63 = vpop.xlane.xlu1 %4189  ;;  %v4961_v50 = vsel %vm4960_vm6, %v5480_v10, %v4957_v42 }
 0x54a   :  { %11017 = vst [vmem:[#allocation4_spill] sm:$0xff] %v10170_v63  ;;  %v10172_v46 = vpop.xlane.xlu0 %4186  ;;  %v4966_v14 = vsel %vm4963_vm7, %v4965_v56, %v4961_v50  ;;  %v4348_v56 = vadd.f32 %v4250_v59, %v4249_v12 }
 0x54b   :  { %v10174_v54 = vpop.xlane.xlu2 %4177  ;;  %v5149_v58 = vmul.f32 %v5785_v8, %v4966_v14  ;;  %v5150_v18 = vmul.f32 %v5786_v61, %v4966_v14  ;;  %v5151_v38 = vmul.f32 %v5787_v22, %v4966_v14  ;;  %v5152_v9 = vmul.f32 %v5788_v7, %v4966_v14 }
 0x54c   :  { %11018 = vst [vmem:[#allocation12_spill] sm:$0xff] %v10174_v54  ;;  %v4339_v14 = vadd.f32 %v4246_v39, %v4245_v19  ;;  %v4258_v22 = vmul.f32 %v10134_v3, %v10134_v3 }
 0x54d   :  { %5213 = vst.msk [vmem:[%s10957_s2 + $0x80] sm:$0xff] %vm1036_vm3, %v5149_v58 }
 0x54e   :  { %5214 = vst.msk [vmem:[%s10957_s2 + $0x88] sm:$0xff] %vm1036_vm3, %v5150_v18 }
 0x54f   :  { %5215 = vst.msk [vmem:[%s10957_s2 + $0x90] sm:$0xff] %vm1036_vm3, %v5151_v38  ;;  %v4261_v38 = vmul.f32 %v10132_v43, %v10132_v43 }
 0x550   :  { %5216 = vst.msk [vmem:[%s10957_s2 + $0x98] sm:$0xff] %vm1036_vm3, %v5152_v9 }
 0x551   :  { %v10188_v15 = vpop.xlane.xlu1 %4210 }
 0x552   :  { %v10194_v20 = vpop.xlane.xlu0 %4201 }
 0x553   :  { %v10200_v57 = vpop.xlane.xlu2 %4198 }
 0x559   :  { %v10210_v44 = vpop.xlane.xlu1 %4120 }
 0x55a   :  { %v10212_v40 = vpop.xlane.xlu0 %4108  ;;  %v4251_v35 = vmul.f32 %v10210_v44, %v10210_v44 }
 0x55b   :  { %v10214_v34 = vpop.xlane.xlu2 %4213  ;;  %v4247_v62 = vmul.f32 %v10212_v40, %v10212_v40 }
 0x55c   :  { %v4349_v7 = vadd.f32 %v4348_v56, %v4251_v35 }
 0x55d   :  { %v4340_v31 = vadd.f32 %v4339_v14, %v4247_v62 }
 0x561   :  { %v10216_v4 = vpop.xlane.xlu1 %4156 }
 0x562   :  { %v10218_v60 = vpop.xlane.xlu0 %4144  ;;  %v4263_v59 = vmul.f32 %v10216_v4, %v10216_v4 }
 0x563   :  { %11019 = vst [vmem:[#allocation8_spill] sm:$0xff] %v10218_v60  ;;  %v10220_v45 = vpop.xlane.xlu2 %4132 }
 0x564   :  { %v4255_v41 = vmul.f32 %v10220_v45, %v10220_v45 }
 0x566   :  { %v4358_v8 = vadd.f32 %v4357_v23, %v4255_v41  ;;  %v4259_v23 = vmul.f32 %v10218_v60, %v10218_v60 }
 0x56a   :  { %v10222_v48 = vpop.xlane.xlu1 %4192  ;;  %v10226_v52 = vpop.xlane.xlu0 %4180 }
 0x56b   :  { %11020 = vst [vmem:[#allocation7_spill] sm:$0xff] %v10222_v48  ;;  %v10228_v13 = vpop.xlane.xlu2 %4168 }
 0x56c   :  { %11021 = vst [vmem:[#allocation6_spill] sm:$0xff] %v10226_v52  ;;  %v4267_v35 = vmul.f32 %v10228_v13, %v10228_v13 }
 0x572   :  { %v10234_v47 = vpop.xlane.xlu1 %4099  ;;  %v10238_v17 = vpop.xlane.xlu0 %4216 }
 0x573   :  { %v4244_v5 = vmul.f32 %v10234_v47, %v10234_v47  ;;  %11022 = vst [vmem:[#allocation10_spill] sm:$0xff] %v10238_v17  ;;  %v10240_v28 = vpop.xlane.xlu2 %4204 }
 0x575   :  { %v4332_v11 = vadd.f32 %v4331_v1, %v4244_v5  ;;  %v4262_v5 = vmul.f32 %v10130_v27, %v10130_v27 }
 0x577   :  { %v4333_v10 = vrot.slane %v4332_v11, 4 }
 0x579   :  { %v4334_v42 = vadd.f32 %v4333_v10, %v4332_v11  ;;  %v4265_v11 = vmul.f32 %v10168_v25, %v10168_v25  ;;  %v4257_v10 = vmul.f32 %v10109_v55, %v10109_v55 }
 0x57a   :  { %v10260_v50 = vpop.xlane.xlu1 %4135  ;;  %v10264_v18 = vpop.xlane.xlu0 %4123 }
 0x57b   :  { %v4335_v58 = vrot.slane %v4334_v42, 2  ;;  %v4256_v61 = vmul.f32 %v10260_v50, %v10260_v50  ;;  %v4252_v9 = vmul.f32 %v10264_v18, %v10264_v18  ;;  %v10272_v24 = vpop.xlane.xlu2 %4111  ;;  %v4366_v14 = vadd.f32 %v4258_v22, %v4257_v10 }
 0x57c   :  { %v4248_v1 = vmul.f32 %v10272_v24, %v10272_v24 }
 0x57d   :  { %v4336_v0 = vadd.f32 %v4335_v58, %v4334_v42  ;;  %v4359_v2 = vadd.f32 %v4358_v8, %v4256_v61  ;;  %v4350_v12 = vadd.f32 %v4349_v7, %v4252_v9  ;;  %v4375_v8 = vadd.f32 %v4262_v5, %v4261_v38 }
 0x57e   :  { %v4341_v41 = vadd.f32 %v4340_v31, %v4248_v1  ;;  %v4384_v58 = vadd.f32 %v4266_v21, %v4265_v11 }
 0x57f   :  { %v4337_v39 = vrot.slane %v4336_v0, 1  ;;  %v4360_v33 = vrot.slane %v4359_v2, 4  ;;  %v4351_v19 = vrot.slane %v4350_v12, 4  ;;  %v4376_v3 = vadd.f32 %v4375_v8, %v4263_v59 }
 0x580   :  { %v4342_v56 = vrot.slane %v4341_v41, 4  ;;  %v4385_v60 = vadd.f32 %v4384_v58, %v4267_v35 }
 0x581   :  { %v4338_v62 = vadd.f32 %v4337_v39, %v4336_v0  ;;  %v4361_v42 = vadd.f32 %v4360_v33, %v4359_v2  ;;  %v4352_v61 = vadd.f32 %v4351_v19, %v4350_v12  ;;  %v4367_v2 = vadd.f32 %v4366_v14, %v4259_v23 }
 0x582   :  { %v10290_v7 = vpop.xlane.xlu1 %4171  ;;  %v4343_v1 = vadd.f32 %v4342_v56, %v4341_v41  ;;  %v10296_v52 = vpop.xlane.xlu0 %4159 }
 0x583   :  { %v10292_v9 = vadd.f32 1e-16, %v4338_v62  ;;  %v4362_v31 = vrot.slane %v4361_v42, 2  ;;  %v4268_v17 = vmul.f32 %v10290_v7, %v10290_v7  ;;  %v4353_v0 = vrot.slane %v4352_v61, 2  ;;  %v10300_v38 = vpop.xlane.xlu2 %4147 }
 0x584   :  { %v4264_v22 = vmul.f32 %v10296_v52, %v10296_v52  ;;  %v4344_v21 = vrot.slane %v4343_v1, 2  ;;  %v4260_v33 = vmul.f32 %v10300_v38, %v10300_v38 }
 0x585   :  { %5481 = vrsqrt.f32 %v10292_v9  ;;  %v4363_v5 = vadd.f32 %v4362_v31, %v4361_v42  ;;  %v4354_v11 = vadd.f32 %v4353_v0, %v4352_v61  ;;  %v4386_v12 = vadd.f32 %v4385_v60, %v4268_v17 }
 0x586   :  { %v4377_v39 = vadd.f32 %v4376_v3, %v4264_v22  ;;  %v4345_v10 = vadd.f32 %v4344_v21, %v4343_v1  ;;  %v4368_v62 = vadd.f32 %v4367_v2, %v4260_v33  ;;  %v4273_v3 = vmul.f32 %v10172_v46, %v10172_v46 }
 0x587   :  { %v4364_v41 = vrot.slane %v4363_v5, 1  ;;  %v4355_v59 = vrot.slane %v4354_v11, 1  ;;  %v4387_v35 = vrot.slane %v4386_v12, 4  ;;  %v4270_v0 = vmul.f32 %v10174_v54, %v10174_v54 }
 0x588   :  { %v4378_v19 = vrot.slane %v4377_v39, 4  ;;  %v4346_v8 = vrot.slane %v4345_v10, 1  ;;  %v4369_v60 = vrot.slane %v4368_v62, 4  ;;  %vm4501_vm9 = vweird.f32 %v10292_v9 }
 0x589   :  { %v4365_v56 = vadd.f32 %v4364_v41, %v4363_v5  ;;  %v4356_v58 = vadd.f32 %v4355_v59, %v4354_v11  ;;  %v4388_v23 = vadd.f32 %v4387_v35, %v4386_v12  ;;  %v4278_v5 = vmul.f32 %v10194_v20, %v10194_v20 }
 0x58a   :  { %v4379_v14 = vadd.f32 %v4378_v19, %v4377_v39  ;;  %v4347_v61 = vadd.f32 %v4346_v8, %v4345_v10  ;;  %v4277_v12 = vmul.f32 %v10200_v57, %v10200_v57  ;;  %v4370_v33 = vadd.f32 %v4369_v60, %v4368_v62 }
 0x58b   :  { %v5482_v55 = vpop.eup %5481  ;;  %v10305_v42 = vadd.f32 1e-16, %v4365_v56  ;;  %v10310_v31 = vadd.f32 1e-16, %v4356_v58  ;;  %v4389_v1 = vrot.slane %v4388_v23, 2  ;;  %v4269_v59 = vmul.f32 %v10164_v26, %v10164_v26 }
 0x58c   :  { %v4496_v17 = vmul.f32 %v5482_v55, %v10292_v9  ;;  %v10315_v22 = vadd.f32 1e-16, %v4347_v61  ;;  %v4380_v2 = vrot.slane %v4379_v14, 2  ;;  %v4274_v35 = vmul.f32 %v10170_v63, %v10170_v63 }
 0x58d   :  { %5483 = vrsqrt.f32 %v10305_v42  ;;  %v4390_v11 = vadd.f32 %v4389_v1, %v4388_v23  ;;  %v4279_v19 = vmul.f32 %v10240_v28, %v10240_v28  ;;  %vm4502_vm8 = vweird.f32 %v5482_v55 }
 0x58e   :  { %v4497_v21 = vmul.f32 %v5482_v55, %v4496_v17  ;;  %5485 = vrsqrt.f32 %v10310_v31  ;;  %v4381_v39 = vadd.f32 %v4380_v2, %v4379_v14  ;;  %v10329_v61 = vadd.f32 %v4274_v35, %v4273_v3  ;;  %vm4503_vm10 = vmor %vm4501_vm9, %vm4502_vm8 }
 0x58f   :  { %5487 = vrsqrt.f32 %v10315_v22  ;;  %v4391_v10 = vrot.slane %v4390_v11, 1  ;;  %v10331_v14 = vadd.f32 %v4270_v0, %v4269_v59  ;;  %v4411_v62 = vadd.f32 %v4278_v5, %v4277_v12 }
 0x590   :  { %v4498_v41 = vmul.f32 0.5, %v4497_v21  ;;  %v4382_v58 = vrot.slane %v4381_v39, 1  ;;  %v4371_v60 = vrot.slane %v4370_v33, 2  ;;  %vm4531_vm11 = vweird.f32 %v10305_v42 }
 0x591   :  { %v4392_v8 = vadd.f32 %v4391_v10, %v4390_v11  ;;  %v10339_v11 = vmul.f32 %v10222_v48, %v10222_v48  ;;  %v10342_v3 = vadd.f32 %v4411_v62, %v4279_v19  ;;  %vm4521_vm1 = vweird.f32 %v10310_v31 }
 0x592   :  { %v4499_v56 = vsub.f32 1.5, %v4498_v41  ;;  %v4383_v41 = vadd.f32 %v4382_v58, %v4381_v39  ;;  %vm4511_vm2 = vweird.f32 %v10315_v22 }
 0x593   :  { %v5484_v23 = vpop.eup %5483  ;;  %v10335_v21 = vadd.f32 1e-16, %v4392_v8 }
 0x594   :  { %v5486_v17 = vpop.eup %5485  ;;  %v4500_v1 = vmul.f32 %v5482_v55, %v4499_v56  ;;  %v4526_v2 = vmul.f32 %v5484_v23, %v10305_v42  ;;  %v4372_v56 = vadd.f32 %v4371_v60, %v4370_v33  ;;  %vm4532_vm12 = vweird.f32 %v5484_v23 }
 0x595   :  { %v5488_v54 = vpop.eup %5487  ;;  %v4516_v0 = vmul.f32 %v5486_v17, %v10310_v31  ;;  %5489 = vrsqrt.f32 %v10335_v21  ;;  %v10354_v48 = vadd.f32 1e-16, %v4383_v41  ;;  %vm4522_vm13 = vweird.f32 %v5486_v17  ;;  %vm4533_vm15 = vmor %vm4531_vm11, %vm4532_vm12 }
 0x596   :  { %v4504_v5 = vsel %vm4503_vm10, %v5482_v55, %v4500_v1  ;;  %v4527_v12 = vmul.f32 %v5484_v23, %v4526_v2  ;;  %v4506_v9 = vmul.f32 %v5488_v54, %v10315_v22  ;;  %v4373_v60 = vrot.slane %v4372_v56, 1  ;;  %vm4523_vm4 = vmor %vm4521_vm1, %vm4522_vm13 }
 0x597   :  { %v4625_v10 = vmul.f32 %v4504_v5, %v9989_v49  ;;  %v4626_v59 = vmul.f32 %v4504_v5, %v10037_v36  ;;  %v4627_v35 = vmul.f32 %v4504_v5, %v10033_v53  ;;  %v4517_v26 = vmul.f32 %v5486_v17, %v4516_v0 }
 0x598   :  { %v4528_v8 = vmul.f32 0.5, %v4527_v12  ;;  %v4507_v19 = vmul.f32 %v5488_v54, %v4506_v9  ;;  %v4628_v62 = vmul.f32 %v4504_v5, %v10234_v47  ;;  %vm4512_vm14 = vweird.f32 %v5488_v54 }
 0x599   :  { %v4689_v55 = vmul.f32 %v4625_v10, %v9989_v49  ;;  %v4690_v1 = vmul.f32 %v4626_v59, %v10037_v36  ;;  %v4518_v58 = vmul.f32 0.5, %v4517_v26  ;;  %v4691_v63 = vmul.f32 %v4627_v35, %v10033_v53  ;;  %vm4513_vm5 = vmor %vm4511_vm2, %vm4512_vm14 }
 0x59a   :  { %v4529_v39 = vsub.f32 1.5, %v4528_v8  ;;  %v4508_v2 = vmul.f32 0.5, %v4507_v19  ;;  %v4692_v5 = vmul.f32 %v4628_v62, %v10234_v47  ;;  %5491 = vrsqrt.f32 %v10354_v48 }
 0x59b   :  { %v4778_v33 = vadd.f32 %v4690_v1, %v4689_v55  ;;  %v4519_v12 = vsub.f32 1.5, %v4518_v58  ;;  %v10363_v36 = vpop.eup %5489  ;;  %v4374_v35 = vadd.f32 %v4373_v60, %v4372_v56  ;;  %vm4561_vm6 = vweird.f32 %v10335_v21 }
 0x59c   :  { %v4530_v0 = vmul.f32 %v5484_v23, %v4529_v39  ;;  %v4509_v9 = vsub.f32 1.5, %v4508_v2  ;;  %v4556_v62 = vmul.f32 %v10363_v36, %v10335_v21  ;;  %vm4562_vm0 = vweird.f32 %v10363_v36 }
 0x59d   :  { %v4779_v49 = vadd.f32 %v4778_v33, %v4691_v63  ;;  %v4520_v26 = vmul.f32 %v5486_v17, %v4519_v12  ;;  %vm4563_vm7 = vmor %vm4561_vm6, %vm4562_vm0  ;;  %vm4551_vm8 = vweird.f32 %v10354_v48 }
 0x59e   :  { %v4534_v53 = vsel %vm4533_vm15, %v5484_v23, %v4530_v0  ;;  %v4510_v41 = vmul.f32 %v5488_v54, %v4509_v9  ;;  %v10387_v0 = vpop.xlane.xlu1 %4207 }
 0x59f   :  { %v4780_v10 = vadd.f32 %v4779_v49, %v4692_v5  ;;  %v4637_v47 = vmul.f32 %v4534_v53, %v10107_v6  ;;  %v4638_v63 = vmul.f32 %v4534_v53, %v10096_v30  ;;  %v4639_v42 = vmul.f32 %v4534_v53, %v10220_v45 }
 0x5a0   :  { %v4640_v31 = vmul.f32 %v4534_v53, %v10260_v50  ;;  %v4524_v22 = vsel %vm4523_vm4, %v5486_v17, %v4520_v26  ;;  %v4514_v59 = vsel %vm4513_vm5, %v5488_v54, %v4510_v41 }
 0x5a1   :  { %v4781_v23 = vrot.slane %v4780_v10, 4  ;;  %v4701_v8 = vmul.f32 %v4637_v47, %v10107_v6  ;;  %v4702_v19 = vmul.f32 %v4638_v63, %v10096_v30  ;;  %v4703_v55 = vmul.f32 %v4639_v42, %v10220_v45  ;;  %v10381_v6 = vpop.eup %5491 }
 0x5a2   :  { %v4633_v1 = vmul.f32 %v4524_v22, %v10069_v37  ;;  %v4634_v39 = vmul.f32 %v4524_v22, %v10089_v51  ;;  %v4635_v58 = vmul.f32 %v4524_v22, %v10210_v44  ;;  %v4704_v54 = vmul.f32 %v4640_v31, %v10260_v50 }
 0x5a3   :  { %v4782_v2 = vadd.f32 %v4781_v23, %v4780_v10  ;;  %v4805_v17 = vadd.f32 %v4702_v19, %v4701_v8  ;;  %v4629_v56 = vmul.f32 %v4514_v59, %v10042_v16  ;;  %v4636_v30 = vmul.f32 %v4524_v22, %v10264_v18 }
 0x5a4   :  { %v4697_v33 = vmul.f32 %v4633_v1, %v10069_v37  ;;  %v4698_v45 = vmul.f32 %v4634_v39, %v10089_v51  ;;  %v4630_v60 = vmul.f32 %v4514_v59, %v10077_v29  ;;  %v4699_v5 = vmul.f32 %v4635_v58, %v10210_v44 }
 0x5a5   :  { %v4783_v12 = vrot.slane %v4782_v2, 2  ;;  %v4806_v9 = vadd.f32 %v4805_v17, %v4703_v55  ;;  %v4631_v50 = vmul.f32 %v4514_v59, %v10212_v40  ;;  %v4632_v53 = vmul.f32 %v4514_v59, %v10272_v24 }
 0x5a6   :  { %v4796_v49 = vadd.f32 %v4698_v45, %v4697_v33  ;;  %v4693_v26 = vmul.f32 %v4629_v56, %v10042_v16  ;;  %v4694_v41 = vmul.f32 %v4630_v60, %v10077_v29  ;;  %v4557_v51 = vmul.f32 %v10363_v36, %v4556_v62 }
 0x5a7   :  { %v4784_v37 = vadd.f32 %v4783_v12, %v4782_v2  ;;  %v4807_v10 = vadd.f32 %v4806_v9, %v4704_v54  ;;  %v4280_v47 = vmul.f32 %v10387_v0, %v10387_v0  ;;  %v4700_v63 = vmul.f32 %v4636_v30, %v10264_v18 }
 0x5a8   :  { %v4797_v42 = vadd.f32 %v4796_v49, %v4699_v5  ;;  %v4695_v44 = vmul.f32 %v4631_v50, %v10212_v40  ;;  %v4787_v31 = vadd.f32 %v4694_v41, %v4693_v26  ;;  %v4558_v59 = vmul.f32 0.5, %v4557_v51 }
 0x5a9   :  { %v4785_v22 = vrot.slane %v4784_v37, 1  ;;  %v4808_v23 = vrot.slane %v4807_v10, 4  ;;  %v4546_v16 = vmul.f32 %v10381_v6, %v10354_v48  ;;  %v4696_v8 = vmul.f32 %v4632_v53, %v10272_v24  ;;  %v10521_v48 = vpop.xlane.xlu0 %4195 }
 0x5aa   :  { %v4798_v29 = vadd.f32 %v4797_v42, %v4700_v63  ;;  %v4788_v19 = vadd.f32 %v4787_v31, %v4695_v44  ;;  %v10402_v62 = vadd.f32 1e-16, %v4374_v35  ;;  %v4559_v39 = vsub.f32 1.5, %v4558_v59 }
 0x5ab   :  { %v4786_v55 = vadd.f32 %v4785_v22, %v4784_v37  ;;  %v4809_v1 = vadd.f32 %v4808_v23, %v4807_v10  ;;  %v4547_v18 = vmul.f32 %v10381_v6, %v4546_v16  ;;  %v10407_v40 = vmul.f32 %v10188_v15, %v10188_v15 }
 0x5ac   :  { %v4799_v58 = vrot.slane %v4798_v29, 4  ;;  %v4789_v2 = vadd.f32 %v4788_v19, %v4696_v8  ;;  %v4560_v24 = vmul.f32 %v10363_v36, %v4559_v39  ;;  %v4413_v35 = vadd.f32 %v10342_v3, %v4280_v47 }
 0x5ad   :  { %v10410_v54 = vadd.f32 1e-12, %v4786_v55  ;;  %v4810_v17 = vrot.slane %v4809_v1, 2  ;;  %5493 = vrsqrt.f32 %v10402_v62  ;;  %v10418_v33 = vmul.f32 %v10214_v34, %v10214_v34 }
 0x5ae   :  { %v4800_v56 = vadd.f32 %v4799_v58, %v4798_v29  ;;  %v4790_v30 = vrot.slane %v4789_v2, 4  ;;  %v10422_v45 = vadd.f32 %v10329_v61, %v10339_v11  ;;  %v4548_v60 = vmul.f32 0.5, %v4547_v18 }
 0x5af   :  { %5495 = vrcp.f32 %v10410_v54  ;;  %v4811_v12 = vadd.f32 %v4810_v17, %v4809_v1  ;;  %v4564_v5 = vsel %vm4563_vm7, %v10363_v36, %v4560_v24  ;;  %v4414_v49 = vrot.slane %v4413_v35, 4 }
 0x5b0   :  { %v4801_v3 = vrot.slane %v4800_v56, 2  ;;  %v4791_v9 = vadd.f32 %v4790_v30, %v4789_v2  ;;  %v4649_v21 = vmul.f32 %v4564_v5, %v10168_v25  ;;  %v4650_v50 = vmul.f32 %v4564_v5, %v10166_v32 }
 0x5b1   :  { %v4812_v53 = vrot.slane %v4811_v12, 1  ;;  %v4651_v11 = vmul.f32 %v4564_v5, %v10228_v13  ;;  %v4652_v41 = vmul.f32 %v4564_v5, %v10290_v7  ;;  %v4549_v51 = vsub.f32 1.5, %v4548_v60 }
 0x5b2   :  { %v4802_v26 = vadd.f32 %v4801_v3, %v4800_v56  ;;  %v4792_v61 = vrot.slane %v4791_v9, 2  ;;  %v4713_v37 = vmul.f32 %v4649_v21, %v10168_v25  ;;  %v4714_v10 = vmul.f32 %v4650_v50, %v10166_v32 }
 0x5b3   :  { %v10433_v36 = vpop.eup %5493  ;;  %v4813_v47 = vadd.f32 %v4812_v53, %v4811_v12  ;;  %vm4552_vm9 = vweird.f32 %v10381_v6  ;;  %v4715_v31 = vmul.f32 %v4651_v11, %v10228_v13  ;;  %v4550_v23 = vmul.f32 %v10381_v6, %v4549_v51 }
 0x5b4   :  { %v4803_v63 = vrot.slane %v4802_v26, 1  ;;  %v4793_v42 = vadd.f32 %v4792_v61, %v4791_v9  ;;  %v4832_v22 = vadd.f32 %v4714_v10, %v4713_v37  ;;  %v10438_v59 = vadd.f32 %v4414_v49, %v4413_v35  ;;  %vm4553_vm10 = vmor %vm4551_vm8, %vm4552_vm9  ;;  %v5789_v10 = vld [vmem:[%s10956_s0 + $0xa0] sm:$0xff] }
 0x5b5   :  { %v5496_v44 = vpop.eup %5495  ;;  %v4977_v32 = vand.u32 2147483647, %v10410_v54  ;;  %v10442_v16 = vadd.f32 1e-12, %v4813_v47  ;;  %v4979_v8 = vand.u32 2147483648, %v10410_v54  ;;  %v4716_v55 = vmul.f32 %v4652_v41, %v10290_v7  ;;  %v5790_v47 = vld [vmem:[%s10956_s0 + $0xa8] sm:$0xff] }
 0x5b6   :  { %v4969_v25 = vmul.f32 %v5496_v44, %v10410_v54  ;;  %v4804_v29 = vadd.f32 %v4803_v63, %v4802_v26  ;;  %v4794_v19 = vrot.slane %v4793_v42, 1  ;;  %v4833_v1 = vadd.f32 %v4832_v22, %v4715_v31 }
 0x5b7   :  { %5497 = vrcp.f32 %v10442_v16  ;;  %v4554_v39 = vsel %vm4553_vm10, %v10381_v6, %v4550_v23  ;;  %v4536_v18 = vmul.f32 %v10433_v36, %v10402_v62  ;;  %v5024_v58 = vand.u32 2147483648, %v10442_v16 }
 0x5b8   :  { %v4970_v13 = vsub.f32 1.0, %v4969_v25  ;;  %v10453_v2 = vadd.f32 1e-12, %v4804_v29  ;;  %v4795_v17 = vadd.f32 %v4794_v19, %v4793_v42  ;;  %v4834_v24 = vadd.f32 %v4833_v1, %v4716_v55  ;;  %v5791_v42 = vld [vmem:[%s10956_s0 + $0xb0] sm:$0xff] }
 0x5b9   :  { %vm4973_vm11 = vweird.f32 %v10410_v54  ;;  %vm4974_vm12 = vweird.f32 %v5496_v44  ;;  %vm10456_vm13 = vcmp.eq.f32.partialorder %v4977_v32, 8.507059e+37  ;;  %v4980_v7 = vor.u32 1.1754944e-38, %v4979_v8 }
 0x5ba   :  { %v4971_v35 = vmul.f32 %v5496_v44, %v4970_v13  ;;  %v5022_v6 = vand.u32 2147483647, %v10442_v16  ;;  %5499 = vrcp.f32 %v10453_v2  ;;  %v4645_v56 = vmul.f32 %v4554_v39, %v10132_v43  ;;  %vm4975_vm14 = vmor %vm4973_vm11, %vm4974_vm12 }
 0x5bb   :  { %v5009_v60 = vand.u32 2147483648, %v10453_v2  ;;  %v10464_v12 = vadd.f32 1e-12, %v4795_v17  ;;  %v4537_v3 = vmul.f32 %v10433_v36, %v4536_v18  ;;  %vm5018_vm15 = vweird.f32 %v10442_v16 }
 0x5bc   :  { %v4972_v30 = vadd.f32 %v5496_v44, %v4971_v35  ;;  %v10468_v54 = vor.u32 1.1754944e-38, %v5024_v58  ;;  %v4835_v9 = vrot.slane %v4834_v24, 4  ;;  %v4646_v5 = vmul.f32 %v4554_v39, %v10130_v27 }
 0x5bd   :  { %v5498_v21 = vpop.eup %5497  ;;  %v5007_v49 = vand.u32 2147483647, %v10453_v2  ;;  %5501 = vrcp.f32 %v10464_v12  ;;  %v4647_v53 = vmul.f32 %v4554_v39, %v10216_v4  ;;  %vm10477_vm1 = vcmp.eq.f32.partialorder %v5022_v6, 8.507059e+37 }
 0x5be   :  { %v4976_v50 = vsel %vm4975_vm14, %v5496_v44, %v4972_v30  ;;  %v5014_v61 = vmul.f32 %v5498_v21, %v10442_v16  ;;  %v4648_v41 = vmul.f32 %v4554_v39, %v10296_v52  ;;  %v4709_v37 = vmul.f32 %v4645_v56, %v10132_v43  ;;  %v5792_v43 = vld [vmem:[%s10956_s0 + $0xb8] sm:$0xff] }
 0x5bf   :  { %v4981_v26 = vsel %vm10456_vm13, %v4980_v7, %v4976_v50  ;;  %vm5003_vm2 = vweird.f32 %v10453_v2  ;;  %v5010_v31 = vor.u32 1.1754944e-38, %v5009_v60  ;;  %vm5019_vm4 = vweird.f32 %v5498_v21 }
 0x5c0   :  { %v5153_v51 = vmul.f32 %v5789_v10, %v4981_v26  ;;  %v5154_v63 = vmul.f32 %v5790_v47, %v4981_v26  ;;  %v5155_v44 = vmul.f32 %v5791_v42, %v4981_v26  ;;  %v5500_v22 = vpop.eup %5499  ;;  %v5156_v23 = vmul.f32 %v5792_v43, %v4981_v26  ;;  %vm5020_vm9 = vmor %vm5018_vm15, %vm5019_vm4 }
 0x5c1   :  { %v5015_v25 = vsub.f32 1.0, %v5014_v61  ;;  %v4836_v32 = vadd.f32 %v4835_v9, %v4834_v24  ;;  %vm4541_vm5 = vweird.f32 %v10402_v62  ;;  %v4999_v29 = vmul.f32 %v5500_v22, %v10453_v2  ;;  %v5797_v62 = vld [vmem:[%s10956_s0 + $0xe0] sm:$0xff] }
 0x5c2   :  { %5217 = vst.msk [vmem:[%s10957_s2 + $0xa0] sm:$0xff] %vm1036_vm3, %v5153_v51  ;;  %vm10502_vm0 = vcmp.eq.f32.partialorder %v5007_v49, 8.507059e+37  ;;  %v4992_v19 = vand.u32 2147483647, %v10464_v12  ;;  %v4994_v55 = vand.u32 2147483648, %v10464_v12  ;;  %v4710_v1 = vmul.f32 %v4646_v5, %v10130_v27  ;;  %v10537_v49 = vpop.xlane.xlu2 %4183  ;;  %v5795_v51 = vld [vmem:[%s10956_s0 + $0x110] sm:$0xff] }
 0x5c3   :  { %5218 = vst.msk [vmem:[%s10957_s2 + $0xa8] sm:$0xff] %vm1036_vm3, %v5154_v63  ;;  %v5016_v13 = vmul.f32 %v5498_v21, %v5015_v25  ;;  %vm5004_vm6 = vweird.f32 %v5500_v22  ;;  %v4837_v39 = vrot.slane %v4836_v32, 2  ;;  %v4711_v18 = vmul.f32 %v4647_v53, %v10216_v4  ;;  %v10514_v58 = vpop.eup %5501 }
 0x5c4   :  { %5219 = vst.msk [vmem:[%s10957_s2 + $0xb0] sm:$0xff] %vm1036_vm3, %v5155_v44  ;;  %v5000_v17 = vsub.f32 1.0, %v4999_v29  ;;  %v4712_v27 = vmul.f32 %v4648_v41, %v10296_v52  ;;  %v4823_v24 = vadd.f32 %v4710_v1, %v4709_v37  ;;  %v4538_v35 = vmul.f32 0.5, %v4537_v3  ;;  %v5793_v41 = vld [vmem:[%s10956_s0 + $0x100] sm:$0xff]  ;;  %v5794_v37 = vld [vmem:[%s10956_s0 + $0x108] sm:$0xff]  ;;  %vm5005_vm10 = vmor %vm5003_vm2, %vm5004_vm6 }
 0x5c5   :  { %5220 = vst.msk [vmem:[%s10957_s2 + $0xb8] sm:$0xff] %vm1036_vm3, %v5156_v23  ;;  %v5017_v4 = vadd.f32 %v5498_v21, %v5016_v13  ;;  %v4984_v7 = vmul.f32 %v10514_v58, %v10464_v12  ;;  %vm4988_vm7 = vweird.f32 %v10464_v12  ;;  %v4838_v6 = vadd.f32 %v4837_v39, %v4836_v32  ;;  %v11031_v39 = vld [vmem:[#allocation2_spill] sm:$0xff] }
 0x5c6   :  { %vm4542_vm8 = vweird.f32 %v10433_v36  ;;  %v5001_v52 = vmul.f32 %v5500_v22, %v5000_v17  ;;  %v4824_v56 = vadd.f32 %v4823_v24, %v4711_v18  ;;  %v4539_v30 = vsub.f32 1.5, %v4538_v35  ;;  %v11032_v24 = vld [vmem:[#allocation5_spill] sm:$0xff] }
 0x5c7   :  { %v4416_v60 = vrot.slane %v10438_v59, 2  ;;  %v5021_v3 = vsel %vm5020_vm9, %v5498_v21, %v5017_v4  ;;  %v4985_v9 = vsub.f32 1.0, %v4984_v7  ;;  %v4839_v5 = vrot.slane %v4838_v6, 1  ;;  %vm4543_vm11 = vmor %vm4541_vm5, %vm4542_vm8 }
 0x5c8   :  { %v4276_v50 = vmul.f32 %v10521_v48, %v10521_v48  ;;  %v5026_v53 = vsel %vm10477_vm1, %v10468_v54, %v5021_v3  ;;  %v5002_v26 = vadd.f32 %v5500_v22, %v5001_v52  ;;  %v4825_v16 = vadd.f32 %v4824_v56, %v4712_v27  ;;  %v5796_v54 = vld [vmem:[%s10956_s0 + $0x118] sm:$0xff] }
 0x5c9   :  { %v4540_v61 = vmul.f32 %v10433_v36, %v4539_v30  ;;  %v5165_v21 = vmul.f32 %v5793_v41, %v5026_v53  ;;  %v5166_v10 = vmul.f32 %v5794_v37, %v5026_v53  ;;  %v5167_v11 = vmul.f32 %v5795_v51, %v5026_v53  ;;  %v11034_v30 = vld [vmem:[#allocation6_spill] sm:$0xff]  ;;  %v5804_v41 = vld [vmem:[%s10956_s0 + $0xd8] sm:$0xff] }
 0x5ca   :  { %v5168_v47 = vmul.f32 %v5796_v54, %v5026_v53  ;;  %v5006_v63 = vsel %vm5005_vm10, %v5500_v22, %v5002_v26  ;;  %v4986_v42 = vmul.f32 %v10514_v58, %v4985_v9  ;;  %v4840_v44 = vadd.f32 %v4839_v5, %v4838_v6  ;;  %v11033_v6 = vld [vmem:[#allocation8_spill] sm:$0xff]  ;;  %v5801_v9 = vld [vmem:[%s10956_s0 + $0xc0] sm:$0xff] }
 0x5cb   :  { %v4826_v43 = vrot.slane %v4825_v16, 4  ;;  %5229 = vst.msk [vmem:[%s10957_s2 + $0x100] sm:$0xff] %vm1036_vm3, %v5165_v21  ;;  %v5011_v23 = vsel %vm10502_vm0, %v5010_v31, %v5006_v63  ;;  %vm4989_vm12 = vweird.f32 %v10514_v58  ;;  %v4544_v2 = vsel %vm4543_vm11, %v10433_v36, %v4540_v61  ;;  %v5798_v31 = vld [vmem:[%s10956_s0 + $0xe8] sm:$0xff]  ;;  %v5799_v36 = vld [vmem:[%s10956_s0 + $0xf0] sm:$0xff]  ;;  %v10643_v61 = vpop.xlane.xlu2 %4219 }
 0x5cc   :  { %v4417_v22 = vadd.f32 %v4416_v60, %v10438_v59  ;;  %5230 = vst.msk [vmem:[%s10957_s2 + $0x108] sm:$0xff] %vm1036_vm3, %v5166_v10  ;;  %v5161_v25 = vmul.f32 %v5797_v62, %v5011_v23  ;;  %v5162_v32 = vmul.f32 %v5798_v31, %v5011_v23  ;;  %v5163_v59 = vmul.f32 %v5799_v36, %v5011_v23  ;;  %vm4990_vm14 = vmor %vm4988_vm7, %vm4989_vm12  ;;  %v5803_v26 = vld [vmem:[%s10956_s0 + $0xd0] sm:$0xff] }
 0x5cd   :  { %vm10585_vm13 = vcmp.eq.f32.partialorder %v4992_v19, 8.507059e+37  ;;  %5231 = vst.msk [vmem:[%s10957_s2 + $0x110] sm:$0xff] %vm1036_vm3, %v5167_v11  ;;  %v4987_v8 = vadd.f32 %v10514_v58, %v4986_v42  ;;  %v10594_v1 = vadd.f32 1e-12, %v4840_v44  ;;  %v4827_v13 = vadd.f32 %v4826_v43, %v4825_v16  ;;  %v5800_v19 = vld [vmem:[%s10956_s0 + $0xf8] sm:$0xff] }
 0x5ce   :  { %v4641_v18 = vmul.f32 %v4544_v2, %v11031_v39  ;;  %5232 = vst.msk [vmem:[%s10957_s2 + $0x118] sm:$0xff] %vm1036_vm3, %v5168_v47  ;;  %v5164_v17 = vmul.f32 %v5800_v19, %v5011_v23  ;;  %v4995_v27 = vor.u32 1.1754944e-38, %v4994_v55  ;;  %v4642_v35 = vmul.f32 %v4544_v2, %v11032_v24 }
 0x5cf   :  { %v4404_v4 = vadd.f32 %v10422_v45, %v4276_v50  ;;  %5225 = vst.msk [vmem:[%s10957_s2 + $0xe0] sm:$0xff] %vm1036_vm3, %v5161_v25  ;;  %v4991_v7 = vsel %vm4990_vm14, %v10514_v58, %v4987_v8  ;;  %5503 = vrcp.f32 %v10594_v1  ;;  %v4643_v52 = vmul.f32 %v4544_v2, %v11033_v6  ;;  %v11035_v58 = vld [vmem:[#allocation10_spill] sm:$0xff]  ;;  %v5802_v50 = vld [vmem:[%s10956_s0 + $0xc8] sm:$0xff] }
 0x5d0   :  { %v4418_v56 = vrot.slane %v4417_v22, 1  ;;  %v4271_v12 = vmul.f32 %v11034_v30, %v11034_v30  ;;  %5226 = vst.msk [vmem:[%s10957_s2 + $0xe8] sm:$0xff] %vm1036_vm3, %v5162_v32  ;;  %v4996_v45 = vsel %vm10585_vm13, %v4995_v27, %v4991_v7  ;;  %v4828_v55 = vrot.slane %v4827_v13, 2 }
 0x5d1   :  { %v4705_v60 = vmul.f32 %v4641_v18, %v11031_v39  ;;  %v4283_v3 = vmul.f32 %v11035_v58, %v11035_v58  ;;  %5227 = vst.msk [vmem:[%s10957_s2 + $0xf0] sm:$0xff] %vm1036_vm3, %v5163_v59  ;;  %v5157_v5 = vmul.f32 %v5801_v9, %v4996_v45  ;;  %v5158_v53 = vmul.f32 %v5802_v50, %v4996_v45 }
 0x5d2   :  { %v5159_v16 = vmul.f32 %v5803_v26, %v4996_v45  ;;  %5228 = vst.msk [vmem:[%s10957_s2 + $0xf8] sm:$0xff] %vm1036_vm3, %v5164_v17  ;;  %v5160_v21 = vmul.f32 %v5804_v41, %v4996_v45  ;;  %v4829_v37 = vadd.f32 %v4828_v55, %v4827_v13  ;;  %v4644_v10 = vmul.f32 %v4544_v2, %v10300_v38 }
 0x5d3   :  { %v4706_v51 = vmul.f32 %v4642_v35, %v11032_v24  ;;  %v4420_v11 = vadd.f32 %v10418_v33, %v10407_v40  ;;  %5221 = vst.msk [vmem:[%s10957_s2 + $0xc0] sm:$0xff] %vm1036_vm3, %v5157_v5  ;;  %v4707_v54 = vmul.f32 %v4643_v52, %v11033_v6  ;;  %v4419_v47 = vadd.f32 %v4418_v56, %v4417_v22 }
 0x5d4   :  { %v4405_v63 = vrot.slane %v4404_v4, 4  ;;  %5222 = vst.msk [vmem:[%s10957_s2 + $0xc8] sm:$0xff] %vm1036_vm3, %v5158_v53  ;;  %v4830_v42 = vrot.slane %v4829_v37, 1  ;;  %v4272_v43 = vmul.f32 %v10537_v49, %v10537_v49  ;;  %v4284_v40 = vmul.f32 %v10643_v61, %v10643_v61 }
 0x5d5   :  { %v4814_v44 = vadd.f32 %v4706_v51, %v4705_v60  ;;  %v5504_v33 = vpop.eup %5503  ;;  %v4394_v23 = vadd.f32 %v10331_v14, %v4271_v12  ;;  %v4421_v2 = vadd.f32 %v4420_v11, %v4283_v3  ;;  %5223 = vst.msk [vmem:[%s10957_s2 + $0xd0] sm:$0xff] %vm1036_vm3, %v5159_v16  ;;  %v10674_v22 = vadd.f32 1e-16, %v4419_v47  ;;  %v5808_v11 = vld [vmem:[%s10956_s0 + $0x178] sm:$0xff] }
 0x5d6   :  { %v4406_v62 = vadd.f32 %v4405_v63, %v4404_v4  ;;  %5224 = vst.msk [vmem:[%s10957_s2 + $0xd8] sm:$0xff] %vm1036_vm3, %v5160_v21  ;;  %v5059_v25 = vmul.f32 %v5504_v33, %v10594_v1  ;;  %v4831_v31 = vadd.f32 %v4830_v42, %v4829_v37  ;;  %v4708_v32 = vmul.f32 %v4644_v10, %v10300_v38  ;;  %v5806_v21 = vld [vmem:[%s10956_s0 + $0x168] sm:$0xff]  ;;  %v5807_v10 = vld [vmem:[%s10956_s0 + $0x170] sm:$0xff] }
 0x5d7   :  { %v4815_v14 = vadd.f32 %v4814_v44, %v4707_v54  ;;  %5505 = vrsqrt.f32 %v10674_v22  ;;  %v4395_v59 = vadd.f32 %v4394_v23, %v4272_v43  ;;  %v4422_v39 = vadd.f32 %v4421_v2, %v4284_v40 }
 0x5d8   :  { %v4407_v36 = vrot.slane %v4406_v62, 2  ;;  %v5060_v29 = vsub.f32 1.0, %v5059_v25  ;;  %v10683_v8 = vadd.f32 1e-12, %v4831_v31  ;;  %v5069_v18 = vand.u32 2147483648, %v10594_v1 }
 0x5d9   :  { %v4816_v13 = vadd.f32 %v4815_v14, %v4708_v32  ;;  %v4396_v17 = vrot.slane %v4395_v59, 4  ;;  %vm5064_vm15 = vweird.f32 %v5504_v33  ;;  %v5067_v24 = vand.u32 2147483647, %v10594_v1 }
 0x5da   :  { %v4408_v19 = vadd.f32 %v4407_v36, %v4406_v62  ;;  %v5061_v27 = vmul.f32 %v5504_v33, %v5060_v29  ;;  %5507 = vrcp.f32 %v10683_v8  ;;  %vm5063_vm1 = vweird.f32 %v10594_v1  ;;  %v5805_v1 = vld [vmem:[%s10956_s0 + $0x160] sm:$0xff] }
 0x5db   :  { %v4817_v38 = vrot.slane %v4816_v13, 4  ;;  %v4397_v4 = vadd.f32 %v4396_v17, %v4395_v59  ;;  %v4423_v6 = vrot.slane %v4422_v39, 4  ;;  %vm5065_vm2 = vmor %vm5063_vm1, %vm5064_vm15  ;;  %v5070_v56 = vor.u32 1.1754944e-38, %v5069_v18 }
 0x5dc   :  { %v4409_v35 = vrot.slane %v4408_v19, 1  ;;  %v5062_v7 = vadd.f32 %v5504_v33, %v5061_v27  ;;  %vm5068_vm4 = vcmp.eq.f32.partialorder %v5067_v24, 8.507059e+37  ;;  %v5052_v2 = vand.u32 2147483647, %v10683_v8 }
 0x5dd   :  { %v5506_v52 = vpop.eup %5505  ;;  %v4818_v12 = vadd.f32 %v4817_v38, %v4816_v13  ;;  %v4398_v55 = vrot.slane %v4397_v4, 2  ;;  %v4424_v9 = vadd.f32 %v4423_v6, %v4422_v39  ;;  %v5054_v62 = vand.u32 2147483648, %v10683_v8  ;;  %v5811_v6 = vld [vmem:[%s10956_s0 + $0x150] sm:$0xff] }
 0x5de   :  { %v4410_v45 = vadd.f32 %v4409_v35, %v4408_v19  ;;  %v5066_v60 = vsel %vm5065_vm2, %v5504_v33, %v5062_v7  ;;  %v4586_v3 = vmul.f32 %v5506_v52, %v10674_v22  ;;  %vm5048_vm0 = vweird.f32 %v10683_v8  ;;  %v5809_v35 = vld [vmem:[%s10956_s0 + $0x140] sm:$0xff] }
 0x5df   :  { %v5071_v5 = vsel %vm5068_vm4, %v5070_v56, %v5066_v60  ;;  %v4819_v50 = vrot.slane %v4818_v12, 2  ;;  %v4399_v26 = vadd.f32 %v4398_v55, %v4397_v4  ;;  %v4425_v43 = vrot.slane %v4424_v9, 2 }
 0x5e0   :  { %v10690_v53 = vadd.f32 1e-16, %v4410_v45  ;;  %v5508_v16 = vpop.eup %5507  ;;  %v5177_v41 = vmul.f32 %v5805_v1, %v5071_v5  ;;  %v5178_v37 = vmul.f32 %v5806_v21, %v5071_v5  ;;  %v5179_v51 = vmul.f32 %v5807_v10, %v5071_v5 }
 0x5e1   :  { %v5180_v54 = vmul.f32 %v5808_v11, %v5071_v5  ;;  %v5044_v47 = vmul.f32 %v5508_v16, %v10683_v8  ;;  %v4820_v63 = vadd.f32 %v4819_v50, %v4818_v12  ;;  %v4587_v42 = vmul.f32 %v5506_v52, %v4586_v3 }
 0x5e2   :  { %5241 = vst.msk [vmem:[%s10957_s2 + $0x160] sm:$0xff] %vm1036_vm3, %v5177_v41  ;;  %5509 = vrsqrt.f32 %v10690_v53  ;;  %v4400_v44 = vrot.slane %v4399_v26, 1  ;;  %v4426_v31 = vadd.f32 %v4425_v43, %v4424_v9  ;;  %vm5049_vm5 = vweird.f32 %v5508_v16 }
 0x5e3   :  { %5242 = vst.msk [vmem:[%s10957_s2 + $0x168] sm:$0xff] %vm1036_vm3, %v5178_v37  ;;  %v5045_v40 = vsub.f32 1.0, %v5044_v47  ;;  %v4821_v33 = vrot.slane %v4820_v63, 1  ;;  %v4588_v23 = vmul.f32 0.5, %v4587_v42  ;;  %vm4592_vm6 = vweird.f32 %v5506_v52  ;;  %vm5050_vm7 = vmor %vm5048_vm0, %vm5049_vm5 }
 0x5e4   :  { %5243 = vst.msk [vmem:[%s10957_s2 + $0x170] sm:$0xff] %vm1036_vm3, %v5179_v51  ;;  %v4401_v25 = vadd.f32 %v4400_v44, %v4399_v26  ;;  %v4427_v18 = vrot.slane %v4426_v31, 1  ;;  %v5055_v17 = vor.u32 1.1754944e-38, %v5054_v62  ;;  %vm4591_vm8 = vweird.f32 %v10674_v22  ;;  %v5810_v22 = vld [vmem:[%s10956_s0 + $0x148] sm:$0xff] }
 0x5e5   :  { %5244 = vst.msk [vmem:[%s10957_s2 + $0x178] sm:$0xff] %vm1036_vm3, %v5180_v54  ;;  %v5046_v32 = vmul.f32 %v5508_v16, %v5045_v40  ;;  %v4822_v14 = vadd.f32 %v4821_v33, %v4820_v63  ;;  %v4589_v36 = vsub.f32 1.5, %v4588_v23  ;;  %vm5053_vm9 = vcmp.eq.f32.partialorder %v5052_v2, 8.507059e+37  ;;  %vm4593_vm10 = vmor %vm4591_vm8, %vm4592_vm6 }
 0x5e6   :  { %v10725_v59 = vadd.f32 1e-16, %v4401_v25  ;;  %v4428_v12 = vadd.f32 %v4427_v18, %v4426_v31  ;;  %vm4581_vm11 = vweird.f32 %v10690_v53 }
 0x5e7   :  { %v5047_v29 = vadd.f32 %v5508_v16, %v5046_v32  ;;  %v10727_v13 = vadd.f32 1e-12, %v4822_v14  ;;  %v4590_v39 = vmul.f32 %v5506_v52, %v4589_v36  ;;  %v11038_v32 = vld [vmem:[#allocation4_spill] sm:$0xff] }
 0x5e8   :  { %v5510_v19 = vpop.eup %5509  ;;  %5511 = vrsqrt.f32 %v10725_v59  ;;  %v10764_v37 = vadd.f32 1e-16, %v4428_v12  ;;  %vm4571_vm13 = vweird.f32 %v10725_v59 }
 0x5e9   :  { %v5051_v27 = vsel %vm5050_vm7, %v5508_v16, %v5047_v29  ;;  %5513 = vrcp.f32 %v10727_v13  ;;  %v4594_v24 = vsel %vm4593_vm10, %v5506_v52, %v4590_v39  ;;  %v4576_v38 = vmul.f32 %v5510_v19, %v10690_v53  ;;  %v5812_v52 = vld [vmem:[%s10956_s0 + $0x158] sm:$0xff]  ;;  %v11039_v29 = vld [vmem:[#allocation7_spill] sm:$0xff] }
 0x5ea   :  { %v5056_v8 = vsel %vm5053_vm9, %v5055_v17, %v5051_v27  ;;  %v4661_v55 = vmul.f32 %v4594_v24, %v10200_v57  ;;  %v4662_v60 = vmul.f32 %v4594_v24, %v10194_v20  ;;  %v4663_v3 = vmul.f32 %v4594_v24, %v10240_v28 }
 0x5eb   :  { %v5173_v4 = vmul.f32 %v5809_v35, %v5056_v8  ;;  %v5174_v7 = vmul.f32 %v5810_v22, %v5056_v8  ;;  %v5175_v56 = vmul.f32 %v5811_v6, %v5056_v8  ;;  %v5176_v45 = vmul.f32 %v5812_v52, %v5056_v8 }
 0x5ec   :  { %v4577_v9 = vmul.f32 %v5510_v19, %v4576_v38  ;;  %v4664_v50 = vmul.f32 %v4594_v24, %v10387_v0  ;;  %v4725_v26 = vmul.f32 %v4661_v55, %v10200_v57  ;;  %v4726_v16 = vmul.f32 %v4662_v60, %v10194_v20  ;;  %v11040_v55 = vld [vmem:[#allocation3_spill] sm:$0xff] }
 0x5ed   :  { %5237 = vst.msk [vmem:[%s10957_s2 + $0x140] sm:$0xff] %vm1036_vm3, %v5173_v4  ;;  %v4727_v20 = vmul.f32 %v4663_v3, %v10240_v28  ;;  %v5037_v51 = vand.u32 2147483647, %v10727_v13  ;;  %vm4582_vm12 = vweird.f32 %v5510_v19  ;;  %v5039_v44 = vand.u32 2147483648, %v10727_v13  ;;  %v5813_v4 = vld [vmem:[%s10956_s0 + $0x120] sm:$0xff]  ;;  %v11041_v3 = vld [vmem:[#allocation12_spill] sm:$0xff] }
 0x5ee   :  { %v5512_v5 = vpop.eup %5511  ;;  %5238 = vst.msk [vmem:[%s10957_s2 + $0x148] sm:$0xff] %vm1036_vm3, %v5174_v7  ;;  %v4578_v41 = vmul.f32 0.5, %v4577_v9  ;;  %v4859_v10 = vadd.f32 %v4726_v16, %v4725_v26  ;;  %v4728_v63 = vmul.f32 %v4664_v50, %v10387_v0  ;;  %5515 = vrsqrt.f32 %v10764_v37  ;;  %vm4583_vm1 = vmor %vm4581_vm11, %vm4582_vm12 }
 0x5ef   :  { %v5514_v1 = vpop.eup %5513  ;;  %5239 = vst.msk [vmem:[%s10957_s2 + $0x150] sm:$0xff] %vm1036_vm3, %v5175_v56  ;;  %v4566_v21 = vmul.f32 %v5512_v5, %v10725_v59  ;;  %vm5033_vm14 = vweird.f32 %v10727_v13  ;;  %vm10781_vm2 = vcmp.eq.f32.partialorder %v5037_v51, 8.507059e+37  ;;  %vm4572_vm4 = vweird.f32 %v5512_v5  ;;  %v5815_v59 = vld [vmem:[%s10956_s0 + $0x130] sm:$0xff]  ;;  %v5816_v56 = vld [vmem:[%s10956_s0 + $0x138] sm:$0xff] }
 0x5f0   :  { %5240 = vst.msk [vmem:[%s10957_s2 + $0x158] sm:$0xff] %vm1036_vm3, %v5176_v45  ;;  %v5029_v57 = vmul.f32 %v5514_v1, %v10727_v13  ;;  %v4579_v11 = vsub.f32 1.5, %v4578_v41  ;;  %v4860_v42 = vadd.f32 %v4859_v10, %v4727_v20  ;;  %vm5034_vm15 = vweird.f32 %v5514_v1  ;;  %vm4573_vm0 = vmor %vm4571_vm13, %vm4572_vm4 }
 0x5f1   :  { %v4567_v54 = vmul.f32 %v5512_v5, %v4566_v21  ;;  %vm5035_vm5 = vmor %vm5033_vm14, %vm5034_vm15  ;;  %v5040_v36 = vor.u32 1.1754944e-38, %v5039_v44  ;;  %vm4601_vm7 = vweird.f32 %v10764_v37 }
 0x5f2   :  { %v5030_v47 = vsub.f32 1.0, %v5029_v57  ;;  %v4580_v43 = vmul.f32 %v5510_v19, %v4579_v11  ;;  %v4861_v33 = vadd.f32 %v4860_v42, %v4728_v63 }
 0x5f3   :  { %v4568_v40 = vmul.f32 0.5, %v4567_v54 }
 0x5f4   :  { %v5031_v28 = vmul.f32 %v5514_v1, %v5030_v47  ;;  %v4584_v0 = vsel %vm4583_vm1, %v5510_v19, %v4580_v43  ;;  %v4862_v25 = vrot.slane %v4861_v33, 4  ;;  %v5516_v8 = vpop.eup %5515 }
 0x5f5   :  { %v4569_v2 = vsub.f32 1.5, %v4568_v40  ;;  %v4657_v31 = vmul.f32 %v4584_v0, %v10172_v46  ;;  %v4658_v14 = vmul.f32 %v4584_v0, %v11038_v32  ;;  %v4659_v13 = vmul.f32 %v4584_v0, %v11039_v29 }
 0x5f6   :  { %v5032_v62 = vadd.f32 %v5514_v1, %v5031_v28  ;;  %v4660_v53 = vmul.f32 %v4584_v0, %v10521_v48  ;;  %v4863_v17 = vadd.f32 %v4862_v25, %v4861_v33  ;;  %v4596_v16 = vmul.f32 %v5516_v8, %v10764_v37 }
 0x5f7   :  { %v4570_v39 = vmul.f32 %v5512_v5, %v4569_v2  ;;  %v4721_v27 = vmul.f32 %v4657_v31, %v10172_v46  ;;  %v4722_v19 = vmul.f32 %v4658_v14, %v11038_v32  ;;  %v4723_v38 = vmul.f32 %v4659_v13, %v11039_v29  ;;  %v5814_v46 = vld [vmem:[%s10956_s0 + $0x128] sm:$0xff] }
 0x5f8   :  { %v5036_v18 = vsel %vm5035_vm5, %v5514_v1, %v5032_v62  ;;  %v4864_v52 = vrot.slane %v4863_v17, 2  ;;  %vm4602_vm6 = vweird.f32 %v5516_v8 }
 0x5f9   :  { %v5041_v24 = vsel %vm10781_vm2, %v5040_v36, %v5036_v18  ;;  %v4574_v35 = vsel %vm4573_vm0, %v5512_v5, %v4570_v39  ;;  %v4850_v45 = vadd.f32 %v4722_v19, %v4721_v27  ;;  %v4724_v5 = vmul.f32 %v4660_v53, %v10521_v48  ;;  %vm4603_vm8 = vmor %vm4601_vm7, %vm4602_vm6 }
 0x5fa   :  { %v5169_v22 = vmul.f32 %v5813_v4, %v5041_v24  ;;  %v5170_v7 = vmul.f32 %v5814_v46, %v5041_v24  ;;  %v5171_v6 = vmul.f32 %v5815_v59, %v5041_v24  ;;  %v5172_v12 = vmul.f32 %v5816_v56, %v5041_v24 }
 0x5fb   :  { %v4653_v60 = vmul.f32 %v4574_v35, %v11040_v55  ;;  %v4654_v9 = vmul.f32 %v4574_v35, %v11041_v3  ;;  %v4655_v50 = vmul.f32 %v4574_v35, %v11034_v30  ;;  %v4656_v26 = vmul.f32 %v4574_v35, %v10537_v49 }
 0x5fc   :  { %5233 = vst.msk [vmem:[%s10957_s2 + $0x120] sm:$0xff] %vm1036_vm3, %v5169_v22  ;;  %v4865_v1 = vadd.f32 %v4864_v52, %v4863_v17  ;;  %v4851_v41 = vadd.f32 %v4850_v45, %v4723_v38  ;;  %v4597_v48 = vmul.f32 %v5516_v8, %v4596_v16 }
 0x5fd   :  { %5234 = vst.msk [vmem:[%s10957_s2 + $0x128] sm:$0xff] %vm1036_vm3, %v5170_v7  ;;  %v4717_v21 = vmul.f32 %v4653_v60, %v11040_v55  ;;  %v4718_v57 = vmul.f32 %v4654_v9, %v11041_v3  ;;  %v4719_v51 = vmul.f32 %v4655_v50, %v11034_v30  ;;  %v4720_v42 = vmul.f32 %v4656_v26, %v10537_v49  ;;  %v5817_v55 = vld [vmem:[%s10956_s0 + $0x1c0] sm:$0xff]  ;;  %v5818_v3 = vld [vmem:[%s10956_s0 + $0x1c8] sm:$0xff]  ;;  %v5820_v26 = vld [vmem:[%s10956_s0 + $0x1d8] sm:$0xff] }
 0x5fe   :  { %5235 = vst.msk [vmem:[%s10957_s2 + $0x130] sm:$0xff] %vm1036_vm3, %v5171_v6  ;;  %v4866_v20 = vrot.slane %v4865_v1, 1  ;;  %v4852_v10 = vadd.f32 %v4851_v41, %v4724_v5  ;;  %v4598_v54 = vmul.f32 0.5, %v4597_v48  ;;  %v5819_v5 = vld [vmem:[%s10956_s0 + $0x1d0] sm:$0xff] }
 0x5ff   :  { %5236 = vst.msk [vmem:[%s10957_s2 + $0x138] sm:$0xff] %vm1036_vm3, %v5172_v12  ;;  %v4841_v11 = vadd.f32 %v4718_v57, %v4717_v21 }
 0x600   :  { %v4867_v47 = vadd.f32 %v4866_v20, %v4865_v1  ;;  %v4853_v63 = vrot.slane %v4852_v10, 4  ;;  %v4599_v43 = vsub.f32 1.5, %v4598_v54 }
 0x601   :  { %v4842_v44 = vadd.f32 %v4841_v11, %v4719_v51 }
 0x602   :  { %v4891_v40 = vadd.f32 1e-12, %v4867_v47  ;;  %v4854_v28 = vadd.f32 %v4853_v63, %v4852_v10  ;;  %v4600_v23 = vmul.f32 %v5516_v8, %v4599_v43 }
 0x603   :  { %v4843_v33 = vadd.f32 %v4842_v44, %v4720_v42 }
 0x604   :  { %5517 = vrcp.f32 %v4891_v40  ;;  %v4855_v0 = vrot.slane %v4854_v28, 2  ;;  %v4604_v30 = vsel %vm4603_vm8, %v5516_v8, %v4600_v23  ;;  %v5114_v22 = vand.u32 2147483648, %v4891_v40 }
 0x605   :  { %v4844_v2 = vrot.slane %v4843_v33, 4  ;;  %v4665_v62 = vmul.f32 %v4604_v30, %v10188_v15  ;;  %v4666_v25 = vmul.f32 %v4604_v30, %v10214_v34  ;;  %v4667_v32 = vmul.f32 %v4604_v30, %v11035_v58 }
 0x606   :  { %v4856_v31 = vadd.f32 %v4855_v0, %v4854_v28  ;;  %v4668_v14 = vmul.f32 %v4604_v30, %v10643_v61  ;;  %vm5108_vm10 = vweird.f32 %v4891_v40 }
 0x607   :  { %v4845_v49 = vadd.f32 %v4844_v2, %v4843_v33  ;;  %v4729_v36 = vmul.f32 %v4665_v62, %v10188_v15  ;;  %v4730_v29 = vmul.f32 %v4666_v25, %v10214_v34  ;;  %v4731_v39 = vmul.f32 %v4667_v32, %v11035_v58  ;;  %v5821_v2 = vld [vmem:[%s10956_s0 + $0x1a0] sm:$0xff]  ;;  %v5822_v62 = vld [vmem:[%s10956_s0 + $0x1a8] sm:$0xff]  ;;  %v5824_v32 = vld [vmem:[%s10956_s0 + $0x1b8] sm:$0xff] }
 0x608   :  { %v4857_v37 = vrot.slane %v4856_v31, 1  ;;  %v4732_v8 = vmul.f32 %v4668_v14, %v10643_v61  ;;  %v5112_v34 = vand.u32 2147483647, %v4891_v40  ;;  %v5115_v58 = vor.u32 1.1754944e-38, %v5114_v22 }
 0x609   :  { %v4846_v13 = vrot.slane %v4845_v49, 2  ;;  %v4868_v18 = vadd.f32 %v4730_v29, %v4729_v36 }
 0x60a   :  { %v5518_v53 = vpop.eup %5517  ;;  %v4858_v27 = vadd.f32 %v4857_v37, %v4856_v31  ;;  %vm5113_vm12 = vcmp.eq.f32.partialorder %v5112_v34, 8.507059e+37  ;;  %v5823_v31 = vld [vmem:[%s10956_s0 + $0x1b0] sm:$0xff] }
 0x60b   :  { %v5104_v17 = vmul.f32 %v5518_v53, %v4891_v40  ;;  %v4847_v19 = vadd.f32 %v4846_v13, %v4845_v49  ;;  %v4869_v24 = vadd.f32 %v4868_v18, %v4731_v39  ;;  %vm5109_vm9 = vweird.f32 %v5518_v53  ;;  %v5826_v18 = vld [vmem:[%s10956_s0 + $0x188] sm:$0xff] }
 0x60c   :  { %v4890_v35 = vadd.f32 1e-12, %v4858_v27  ;;  %vm5110_vm11 = vmor %vm5108_vm10, %vm5109_vm9  ;;  %v5827_v27 = vld [vmem:[%s10956_s0 + $0x190] sm:$0xff] }
 0x60d   :  { %v5105_v38 = vsub.f32 1.0, %v5104_v17  ;;  %v4848_v4 = vrot.slane %v4847_v19, 1  ;;  %v4870_v46 = vadd.f32 %v4869_v24, %v4732_v8  ;;  %v5828_v8 = vld [vmem:[%s10956_s0 + $0x198] sm:$0xff] }
 0x60e   :  { %5519 = vrcp.f32 %v4890_v35  ;;  %v5099_v57 = vand.u32 2147483648, %v4890_v35  ;;  %v5097_v51 = vand.u32 2147483647, %v4890_v35  ;;  %vm5093_vm14 = vweird.f32 %v4890_v35 }
 0x60f   :  { %v5106_v15 = vmul.f32 %v5518_v53, %v5105_v38  ;;  %v4849_v7 = vadd.f32 %v4848_v4, %v4847_v19  ;;  %v4871_v59 = vrot.slane %v4870_v46, 4 }
 0x610   :  { %v5100_v63 = vor.u32 1.1754944e-38, %v5099_v57  ;;  %vm5098_vm1 = vcmp.eq.f32.partialorder %v5097_v51, 8.507059e+37 }
 0x611   :  { %v5107_v6 = vadd.f32 %v5518_v53, %v5106_v15  ;;  %v4889_v56 = vadd.f32 1e-12, %v4849_v7  ;;  %v4872_v61 = vadd.f32 %v4871_v59, %v4870_v46 }
 0x613   :  { %v5111_v12 = vsel %vm5110_vm11, %v5518_v53, %v5107_v6  ;;  %5521 = vrcp.f32 %v4889_v56  ;;  %v4873_v41 = vrot.slane %v4872_v61, 2  ;;  %v5082_v40 = vand.u32 2147483647, %v4889_v56  ;;  %v5825_v53 = vld [vmem:[%s10956_s0 + $0x180] sm:$0xff] }
 0x614   :  { %v5116_v52 = vsel %vm5113_vm12, %v5115_v58, %v5111_v12  ;;  %v5520_v45 = vpop.eup %5519  ;;  %v5084_v28 = vand.u32 2147483648, %v4889_v56  ;;  %vm5078_vm4 = vweird.f32 %v4889_v56  ;;  %v5829_v58 = vld [vmem:[%s10956_s0 + $0x1e0] sm:$0xff]  ;;  %v5830_v12 = vld [vmem:[%s10956_s0 + $0x1e8] sm:$0xff] }
 0x615   :  { %v5189_v60 = vmul.f32 %v5817_v55, %v5116_v52  ;;  %v5190_v9 = vmul.f32 %v5818_v3, %v5116_v52  ;;  %v5191_v50 = vmul.f32 %v5819_v5, %v5116_v52  ;;  %v5192_v16 = vmul.f32 %v5820_v26, %v5116_v52  ;;  %v5831_v52 = vld [vmem:[%s10956_s0 + $0x1f0] sm:$0xff]  ;;  %v5832_v55 = vld [vmem:[%s10956_s0 + $0x1f8] sm:$0xff] }
 0x616   :  { %v5089_v1 = vmul.f32 %v5520_v45, %v4890_v35  ;;  %v4874_v48 = vadd.f32 %v4873_v41, %v4872_v61  ;;  %vm5094_vm13 = vweird.f32 %v5520_v45  ;;  %v5085_v29 = vor.u32 1.1754944e-38, %v5084_v28 }
 0x617   :  { %5253 = vst.msk [vmem:[%s10957_s2 + $0x1c0] sm:$0xff] %vm1036_vm3, %v5189_v60  ;;  %vm5095_vm15 = vmor %vm5093_vm14, %vm5094_vm13  ;;  %vm5083_vm0 = vcmp.eq.f32.partialorder %v5082_v40, 8.507059e+37 }
 0x618   :  { %5254 = vst.msk [vmem:[%s10957_s2 + $0x1c8] sm:$0xff] %vm1036_vm3, %v5190_v9  ;;  %v5090_v21 = vsub.f32 1.0, %v5089_v1  ;;  %v4875_v54 = vrot.slane %v4874_v48, 1 }
 0x619   :  { %5255 = vst.msk [vmem:[%s10957_s2 + $0x1d0] sm:$0xff] %vm1036_vm3, %v5191_v50  ;;  %v5522_v20 = vpop.eup %5521 }
 0x61a   :  { %5256 = vst.msk [vmem:[%s10957_s2 + $0x1d8] sm:$0xff] %vm1036_vm3, %v5192_v16  ;;  %v5091_v10 = vmul.f32 %v5520_v45, %v5090_v21  ;;  %v5074_v11 = vmul.f32 %v5522_v20, %v4889_v56  ;;  %v4876_v44 = vadd.f32 %v4875_v54, %v4874_v48  ;;  %vm5079_vm2 = vweird.f32 %v5522_v20 }
 0x61b   :  { %vm5080_vm5 = vmor %vm5078_vm4, %vm5079_vm2 }
 0x61c   :  { %v5092_v47 = vadd.f32 %v5520_v45, %v5091_v10  ;;  %v5075_v42 = vsub.f32 1.0, %v5074_v11  ;;  %v4892_v0 = vadd.f32 1e-12, %v4876_v44 }
 0x61e   :  { %v5096_v43 = vsel %vm5095_vm15, %v5520_v45, %v5092_v47  ;;  %v5076_v23 = vmul.f32 %v5522_v20, %v5075_v42  ;;  %5523 = vrcp.f32 %v4892_v0  ;;  %v5129_v22 = vand.u32 2147483648, %v4892_v0 }
 0x61f   :  { %v5101_v33 = vsel %vm5098_vm1, %v5100_v63, %v5096_v43  ;;  %v5127_v15 = vand.u32 2147483647, %v4892_v0  ;;  %vm5123_vm7 = vweird.f32 %v4892_v0 }
 0x620   :  { %v5185_v30 = vmul.f32 %v5821_v2, %v5101_v33  ;;  %v5186_v25 = vmul.f32 %v5822_v62, %v5101_v33  ;;  %v5187_v49 = vmul.f32 %v5823_v31, %v5101_v33  ;;  %v5188_v14 = vmul.f32 %v5824_v32, %v5101_v33 }
 0x621   :  { %v5077_v36 = vadd.f32 %v5522_v20, %v5076_v23  ;;  %v5130_v7 = vor.u32 1.1754944e-38, %v5129_v22  ;;  %vm5128_vm9 = vcmp.eq.f32.partialorder %v5127_v15, 8.507059e+37 }
 0x622   :  { %5249 = vst.msk [vmem:[%s10957_s2 + $0x1a0] sm:$0xff] %vm1036_vm3, %v5185_v30 }
 0x623   :  { %5250 = vst.msk [vmem:[%s10957_s2 + $0x1a8] sm:$0xff] %vm1036_vm3, %v5186_v25  ;;  %v5081_v37 = vsel %vm5080_vm5, %v5522_v20, %v5077_v36 }
 0x624   :  { %5251 = vst.msk [vmem:[%s10957_s2 + $0x1b0] sm:$0xff] %vm1036_vm3, %v5187_v49  ;;  %v5086_v13 = vsel %vm5083_vm0, %v5085_v29, %v5081_v37  ;;  %v5524_v38 = vpop.eup %5523 }
 0x625   :  { %5252 = vst.msk [vmem:[%s10957_s2 + $0x1b8] sm:$0xff] %vm1036_vm3, %v5188_v14  ;;  %v5181_v39 = vmul.f32 %v5825_v53, %v5086_v13  ;;  %v5182_v17 = vmul.f32 %v5826_v18, %v5086_v13  ;;  %v5183_v19 = vmul.f32 %v5827_v27, %v5086_v13  ;;  %v5184_v24 = vmul.f32 %v5828_v8, %v5086_v13 }
 0x626   :  { %v5119_v35 = vmul.f32 %v5524_v38, %v4892_v0  ;;  %vm5124_vm6 = vweird.f32 %v5524_v38 }
 0x627   :  { %5245 = vst.msk [vmem:[%s10957_s2 + $0x180] sm:$0xff] %vm1036_vm3, %v5181_v39  ;;  %vm5125_vm8 = vmor %vm5123_vm7, %vm5124_vm6 }
 0x628   :  { %5246 = vst.msk [vmem:[%s10957_s2 + $0x188] sm:$0xff] %vm1036_vm3, %v5182_v17  ;;  %v5120_v4 = vsub.f32 1.0, %v5119_v35 }
 0x629   :  { %5247 = vst.msk [vmem:[%s10957_s2 + $0x190] sm:$0xff] %vm1036_vm3, %v5183_v19 }
 0x62a   :  { %5248 = vst.msk [vmem:[%s10957_s2 + $0x198] sm:$0xff] %vm1036_vm3, %v5184_v24  ;;  %v5121_v46 = vmul.f32 %v5524_v38, %v5120_v4 }
 0x62c   :  { %v5122_v34 = vadd.f32 %v5524_v38, %v5121_v46 }
 0x62e   :  { %v5126_v59 = vsel %vm5125_vm8, %v5524_v38, %v5122_v34 }
 0x62f   :  { %v5131_v6 = vsel %vm5128_vm9, %v5130_v7, %v5126_v59 }
 0x630   :  { %v5193_v56 = vmul.f32 %v5829_v58, %v5131_v6  ;;  %v5194_v61 = vmul.f32 %v5830_v12, %v5131_v6  ;;  %v5195_v45 = vmul.f32 %v5831_v52, %v5131_v6  ;;  %v5196_v60 = vmul.f32 %v5832_v55, %v5131_v6 }
 0x632   :  { %5257 = vst.msk [vmem:[%s10957_s2 + $0x1e0] sm:$0xff] %vm1036_vm3, %v5193_v56 }
 0x633   :  { %5258 = vst.msk [vmem:[%s10957_s2 + $0x1e8] sm:$0xff] %vm1036_vm3, %v5194_v61 }
 0x634   :  { %5259 = vst.msk [vmem:[%s10957_s2 + $0x1f0] sm:$0xff] %vm1036_vm3, %v5195_v45 }
 0x635   :  { %5260 = vst.msk [vmem:[%s10957_s2 + $0x1f8] sm:$0xff] %vm1036_vm3, %v5196_v60 }

</bundles_post_ra>
